<compile_context>
chip_gen: v5e
topology: v5e:2x2
jax: 0.10.0
libtpu: 0.0.40
codegen_flags: <defaults>
</compile_context>

<pallas_src>
import jax
import jax.numpy as jnp
from jax.experimental import pallas as pl
from jax.experimental.pallas import tpu as pltpu


C = 64  # DRRN hidden width; also the lane-padding target for in/out channels


# ----------------------------- Pallas kernel ------------------------------ #

def _drrn_fused_kernel(xbn_ref, res_ref, w_ref, o_ref, xpad_ref, act_ref):
    # xbn_ref : (1, H, W, 64)  bn(x), channels zero-padded to 64
    # res_ref : (1, H, W, 64)  residual (original x), channels zero-padded to 64
    # w_ref   : (4, 576, 64)   [input, conv1, conv2, output] weights, im2col order
    # o_ref   : (1, H, W, 64)  output (channels >= nChannels are zero)
    # xpad_ref: (H+2, W+2, 64) VMEM scratch; zero border = conv zero padding
    # act_ref : (H, W, 64)     VMEM scratch holding the running activation
    _unused, H, W, _unused2 = o_ref.shape
    HW = H * W

    # Zero once per grid step; only the interior is (re)written afterwards, so
    # the 1-pixel border stays zero and provides the conv padding for free.
    xpad_ref[...] = jnp.zeros_like(xpad_ref)

    def conv3x3(act, w):
        """conv3x3(relu(act), w, pad=1) as ONE (H*W, 576) @ (576, 64) MXU matmul."""
        xpad_ref[pl.ds(1, H), pl.ds(1, W), :] = jnp.maximum(act, 0.0)  # ReLU once
        patch = jnp.concatenate(
            [xpad_ref[pl.ds(dy, H), pl.ds(dx, W), :].reshape(HW, C)
             for dy in range(3) for dx in range(3)],
            axis=-1)                                         # (H*W, 9*C) im2col
        out = jnp.dot(patch, w, preferred_element_type=jnp.float32)
        return out.reshape(H, W, C)

    # inputs = self.input(relu(bn(x)))
    inputs = conv3x3(xbn_ref[0], w_ref[0])
    act_ref[...] = inputs

    # 9 recursive residual units, entirely in VMEM.
    @pl.loop(0, 9)
    def _body(_i):
        mid = conv3x3(act_ref[...], w_ref[1])              # conv1(relu(out))
        act_ref[...] = conv3x3(mid, w_ref[2]) + inputs     # conv2(relu(mid)) + inputs

    # out = self.output(relu(out)) + residual
    out = conv3x3(act_ref[...], w_ref[3]) + res_ref[0]
    o_ref[0] = out.astype(o_ref.dtype)


def drrn_pallas(x_bn, residual, w_stack):
    """x_bn, residual: (N, H, W, 64) f32; w_stack: (4, 9*64, 64) f32."""
    N, H, W, _ = x_bn.shape
    flops = 20 * 2 * N * H * W * (9 * C) * C
    bytes_accessed = 4 * (3 * N * H * W * C + 4 * 9 * C * C)
    return pl.pallas_call(
        _drrn_fused_kernel,
        out_shape=jax.ShapeDtypeStruct((N, H, W, C), jnp.float32),
        grid=(N,),
        in_specs=[
            pl.BlockSpec((1, H, W, C), lambda n: (n, 0, 0, 0)),
            pl.BlockSpec((1, H, W, C), lambda n: (n, 0, 0, 0)),
            pl.BlockSpec((4, 9 * C, C), lambda n: (0, 0, 0)),   # weights stay resident
        ],
        out_specs=pl.BlockSpec((1, H, W, C), lambda n: (n, 0, 0, 0)),
        scratch_shapes=[
            pltpu.VMEM((H + 2, W + 2, C), jnp.float32),   # padded activation tile
            pltpu.VMEM((H, W, C), jnp.float32),           # running activation
        ],
        compiler_params=pltpu.CompilerParams(
            dimension_semantics=("parallel",)),   # one image per TensorCore on v7x
        cost_estimate=pl.CostEstimate(
            flops=flops, transcendentals=0, bytes_accessed=bytes_accessed),
    )(x_bn, residual, w_stack)


# --------------------------- Parameters / model --------------------------- #

def init_drrn_params(key, n_channels):
    """Deterministic init matching DRRN.__init__: N(0, sqrt(2 / (k*k*Cout)))."""
    def conv_init(k, cin, cout):
        n = 3 * 3 * cout
        return jax.random.normal(k, (3, 3, cin, cout), jnp.float32) * jnp.sqrt(2.0 / n)

    k1, k2, k3, k4 = jax.random.split(key, 4)
    return {
        "input":  conv_init(k1, n_channels, C),
        "conv1":  conv_init(k2, C, C),
        "conv2":  conv_init(k3, C, C),
        "output": conv_init(k4, C, n_channels),
        "bn_gamma": jnp.ones((n_channels,), jnp.float32),
        "bn_beta":  jnp.zeros((n_channels,), jnp.float32),
    }


def drrn_forward(params, x_nchw, eps=1e-5):
    x = jnp.transpose(x_nchw, (0, 2, 3, 1)).astype(jnp.float32)   # NCHW -> NHWC
    N, H, W, cin = x.shape

    # BatchNorm2d of a freshly-constructed module runs in training mode:
    # batch statistics (biased variance), identity affine at init.
    mean = jnp.mean(x, axis=(0, 1, 2))
    var = jnp.mean((x - mean) ** 2, axis=(0, 1, 2))
    x_bn = (x - mean) / jnp.sqrt(var + eps) * params["bn_gamma"] + params["bn_beta"]

    # Zero-pad the channel axis to the uniform 64-lane width used in-kernel.
    cpad = ((0, 0), (0, 0), (0, 0), (0, C - cin))
    xbn_p = jnp.pad(x_bn, cpad)
    res_p = jnp.pad(x, cpad)

    # Stack the 4 conv weights into one (4, 9*64, 64) im2col-ordered tensor.
    w_in = jnp.pad(params["input"], ((0, 0), (0, 0), (0, C - cin), (0, 0)))
    w_out = jnp.pad(params["output"], ((0, 0), (0, 0), (0, 0), (0, C - cin)))
    w_stack = jnp.stack([w.reshape(9 * C, C)
                         for w in (w_in, params["conv1"], params["conv2"], w_out)])

    out = drrn_pallas(xbn_p, res_p, w_stack)
    out = out[..., :cin]                                   # drop padded channels
    return jnp.transpose(out, (0, 3, 1, 2))                # NHWC -> NCHW


# ------------------------------ Pure-JAX ref ------------------------------ #

def _ref_conv(x, w):
    return jax.lax.conv_general_dilated(
        x, w, window_strides=(1, 1), padding="SAME",
        dimension_numbers=("NHWC", "HWIO", "NHWC"))


def drrn_forward_ref(params, x_nchw, eps=1e-5):
    x = jnp.transpose(x_nchw, (0, 2, 3, 1)).astype(jnp.float32)
    residual = x
    mean = jnp.mean(x, axis=(0, 1, 2))
    var = jnp.mean((x - mean) ** 2, axis=(0, 1, 2))
    x_bn = (x - mean) / jnp.sqrt(var + eps) * params["bn_gamma"] + params["bn_beta"]
    relu = lambda a: jnp.maximum(a, 0.0)
    inputs = _ref_conv(relu(x_bn), params["input"])
    out = inputs
    for _ in range(9):
        out = _ref_conv(relu(_ref_conv(relu(out), params["conv1"])), params["conv2"]) + inputs
    out = _ref_conv(relu(out), params["output"]) + residual
    return jnp.transpose(out, (0, 3, 1, 2))


# ---------------------------------- main ----------------------------------- #

if __name__ == "__main__":
    key = jax.random.PRNGKey(0)
    k_params, k_x = jax.random.split(key)

    n_channels = 4
    x = jax.random.normal(k_x, (2, n_channels, 16, 16), jnp.float32)  # NCHW, like PyTorch
    params = init_drrn_params(k_params, n_channels)

    out = jax.block_until_ready(jax.jit(drrn_forward)(params, x))
    ref = jax.block_until_ready(drrn_forward_ref(params, x))

    assert out.shape == x.shape
    assert jnp.allclose(out, ref, atol=1e-3, rtol=1e-3), "Pallas DRRN mismatch vs JAX reference"
    print("KERNEL_OK")
</pallas_src>

<mosaic_0001>
module attributes {stable_mosaic.version = 11 : i64} {
  func.func @_drrn_fused_kernel(%arg0: i32, %arg1: memref<1x16x16x64xf32, #tpu.memory_space<vmem>>, %arg2: memref<1x16x16x64xf32, #tpu.memory_space<vmem>>, %arg3: memref<4x576x64xf32, #tpu.memory_space<vmem>>, %arg4: memref<1x16x16x64xf32, #tpu.memory_space<vmem>>, %arg5: memref<18x18x64xf32, #tpu.memory_space<vmem>>, %arg6: memref<16x16x64xf32, #tpu.memory_space<vmem>>) attributes {dimension_semantics = [#tpu.dimension_semantics<parallel>], iteration_bounds = array<i64: 2>, scalar_prefetch = 0 : i64, scratch_operands = 2 : i64, tpu.core_type = #tpu.core_type<tc>, window_params = [{transform_indices = @transform_0, window_bounds = array<i64: 1, 16, 16, 64>}, {transform_indices = @transform_1, window_bounds = array<i64: 1, 16, 16, 64>}, {pipeline_mode = #tpu.pipeline_mode<synchronous>, transform_indices = @transform_2, window_bounds = array<i64: 4, 576, 64>}, {transform_indices = @transform_3, window_bounds = array<i64: 1, 16, 16, 64>}]} {
    %cst = arith.constant 0.000000e+00 : f32
    %0 = vector.broadcast %cst : f32 to vector<18x18x64xf32>
    %c0 = arith.constant 0 : index
    %c0_0 = arith.constant 0 : index
    %c0_1 = arith.constant 0 : index
    %1 = vector.load %arg5[%c0, %c0_0, %c0_1] : memref<18x18x64xf32, #tpu.memory_space<vmem>>, vector<18x18x64xf32>
    tpu.vector_store %arg5[%c0, %c0_0, %c0_1], %0 {strides = array<i32>} : memref<18x18x64xf32, #tpu.memory_space<vmem>>, vector<18x18x64xf32>,
    %c0_2 = arith.constant 0 : index
    %c0_3 = arith.constant 0 : index
    %c0_4 = arith.constant 0 : index
    %c0_5 = arith.constant 0 : index
    %2 = vector.load %arg1[%c0_2, %c0_3, %c0_4, %c0_5] : memref<1x16x16x64xf32, #tpu.memory_space<vmem>>, vector<1x16x16x64xf32>
    %3 = vector.shape_cast %2 : vector<1x16x16x64xf32> to vector<16x16x64xf32>
    %c0_6 = arith.constant 0 : index
    %c0_7 = arith.constant 0 : index
    %c0_8 = arith.constant 0 : index
    %4 = vector.load %arg3[%c0_6, %c0_7, %c0_8] : memref<4x576x64xf32, #tpu.memory_space<vmem>>, vector<1x576x64xf32>
    %5 = vector.shape_cast %4 : vector<1x576x64xf32> to vector<576x64xf32>
    %cst_9 = arith.constant 0.000000e+00 : f32
    %6 = vector.broadcast %cst_9 : f32 to vector<16x16x64xf32>
    %7 = arith.maximumf %3, %6 : vector<16x16x64xf32>
    %c1 = arith.constant 1 : index
    %c1_10 = arith.constant 1 : index
    %c0_11 = arith.constant 0 : index
    %8 = vector.load %arg5[%c1, %c1_10, %c0_11] : memref<18x18x64xf32, #tpu.memory_space<vmem>>, vector<16x16x64xf32>
    tpu.vector_store %arg5[%c1, %c1_10, %c0_11], %7 {strides = array<i32>} : memref<18x18x64xf32, #tpu.memory_space<vmem>>, vector<16x16x64xf32>,
    %c0_12 = arith.constant 0 : index
    %c0_13 = arith.constant 0 : index
    %c0_14 = arith.constant 0 : index
    %9 = vector.load %arg5[%c0_12, %c0_13, %c0_14] : memref<18x18x64xf32, #tpu.memory_space<vmem>>, vector<16x16x64xf32>
    %10 = vector.shape_cast %9 : vector<16x16x64xf32> to vector<256x64xf32>
    %c0_15 = arith.constant 0 : index
    %c1_16 = arith.constant 1 : index
    %c0_17 = arith.constant 0 : index
    %11 = vector.load %arg5[%c0_15, %c1_16, %c0_17] : memref<18x18x64xf32, #tpu.memory_space<vmem>>, vector<16x16x64xf32>
    %12 = vector.shape_cast %11 : vector<16x16x64xf32> to vector<256x64xf32>
    %c0_18 = arith.constant 0 : index
    %c2 = arith.constant 2 : index
    %c0_19 = arith.constant 0 : index
    %13 = vector.load %arg5[%c0_18, %c2, %c0_19] : memref<18x18x64xf32, #tpu.memory_space<vmem>>, vector<16x16x64xf32>
    %14 = vector.shape_cast %13 : vector<16x16x64xf32> to vector<256x64xf32>
    %c1_20 = arith.constant 1 : index
    %c0_21 = arith.constant 0 : index
    %c0_22 = arith.constant 0 : index
    %15 = vector.load %arg5[%c1_20, %c0_21, %c0_22] : memref<18x18x64xf32, #tpu.memory_space<vmem>>, vector<16x16x64xf32>
    %16 = vector.shape_cast %15 : vector<16x16x64xf32> to vector<256x64xf32>
    %c1_23 = arith.constant 1 : index
    %c1_24 = arith.constant 1 : index
    %c0_25 = arith.constant 0 : index
    %17 = vector.load %arg5[%c1_23, %c1_24, %c0_25] : memref<18x18x64xf32, #tpu.memory_space<vmem>>, vector<16x16x64xf32>
    %18 = vector.shape_cast %17 : vector<16x16x64xf32> to vector<256x64xf32>
    %c1_26 = arith.constant 1 : index
    %c2_27 = arith.constant 2 : index
    %c0_28 = arith.constant 0 : index
    %19 = vector.load %arg5[%c1_26, %c2_27, %c0_28] : memref<18x18x64xf32, #tpu.memory_space<vmem>>, vector<16x16x64xf32>
    %20 = vector.shape_cast %19 : vector<16x16x64xf32> to vector<256x64xf32>
    %c2_29 = arith.constant 2 : index
    %c0_30 = arith.constant 0 : index
    %c0_31 = arith.constant 0 : index
    %21 = vector.load %arg5[%c2_29, %c0_30, %c0_31] : memref<18x18x64xf32, #tpu.memory_space<vmem>>, vector<16x16x64xf32>
    %22 = vector.shape_cast %21 : vector<16x16x64xf32> to vector<256x64xf32>
    %c2_32 = arith.constant 2 : index
    %c1_33 = arith.constant 1 : index
    %c0_34 = arith.constant 0 : index
    %23 = vector.load %arg5[%c2_32, %c1_33, %c0_34] : memref<18x18x64xf32, #tpu.memory_space<vmem>>, vector<16x16x64xf32>
    %24 = vector.shape_cast %23 : vector<16x16x64xf32> to vector<256x64xf32>
    %c2_35 = arith.constant 2 : index
    %c2_36 = arith.constant 2 : index
    %c0_37 = arith.constant 0 : index
    %25 = vector.load %arg5[%c2_35, %c2_36, %c0_37] : memref<18x18x64xf32, #tpu.memory_space<vmem>>, vector<16x16x64xf32>
    %26 = vector.shape_cast %25 : vector<16x16x64xf32> to vector<256x64xf32>
    %27 = tpu.concatenate %10, %12, %14, %16, %18, %20, %22, %24, %26 in 1 : vector<256x64xf32>, vector<256x64xf32>, vector<256x64xf32>, vector<256x64xf32>, vector<256x64xf32>, vector<256x64xf32>, vector<256x64xf32>, vector<256x64xf32>, vector<256x64xf32> -> vector<256x576xf32>
    %cst_38 = arith.constant dense<0.000000e+00> : vector<256x64xf32>
    %28 = tpu.matmul %27, %5, %cst_38 {dimension_numbers = #tpu.dot_dimension_numbers<[1], [0], [0], [1], [0, 0, 1, 1], [], []>} : vector<256x576xf32>, vector<576x64xf32>, vector<256x64xf32> -> vector<256x64xf32>
    %29 = vector.shape_cast %28 : vector<256x64xf32> to vector<16x16x64xf32>
    %c0_39 = arith.constant 0 : index
    %c0_40 = arith.constant 0 : index
    %c0_41 = arith.constant 0 : index
    %30 = vector.load %arg6[%c0_39, %c0_40, %c0_41] : memref<16x16x64xf32, #tpu.memory_space<vmem>>, vector<16x16x64xf32>
    tpu.vector_store %arg6[%c0_39, %c0_40, %c0_41], %29 {strides = array<i32>} : memref<16x16x64xf32, #tpu.memory_space<vmem>>, vector<16x16x64xf32>,
    %c0_i32 = arith.constant 0 : i32
    %c9_i32 = arith.constant 9 : i32
    %31 = arith.addi %c0_i32, %c9_i32 : i32
    %c1_i32 = arith.constant 1 : i32
    scf.for %arg7 = %c0_i32 to %31 step %c1_i32  : i32 {
      %c0_87 = arith.constant 0 : index
      %c0_88 = arith.constant 0 : index
      %c0_89 = arith.constant 0 : index
      %65 = vector.load %arg6[%c0_87, %c0_88, %c0_89] : memref<16x16x64xf32, #tpu.memory_space<vmem>>, vector<16x16x64xf32>
      %c1_90 = arith.constant 1 : index
      %c0_91 = arith.constant 0 : index
      %c0_92 = arith.constant 0 : index
      %66 = vector.load %arg3[%c1_90, %c0_91, %c0_92] : memref<4x576x64xf32, #tpu.memory_space<vmem>>, vector<1x576x64xf32>
      %67 = vector.shape_cast %66 : vector<1x576x64xf32> to vector<576x64xf32>
      %cst_93 = arith.constant 0.000000e+00 : f32
      %68 = vector.broadcast %cst_93 : f32 to vector<16x16x64xf32>
      %69 = arith.maximumf %65, %68 : vector<16x16x64xf32>
      %c1_94 = arith.constant 1 : index
      %c1_95 = arith.constant 1 : index
      %c0_96 = arith.constant 0 : index
      %70 = vector.load %arg5[%c1_94, %c1_95, %c0_96] : memref<18x18x64xf32, #tpu.memory_space<vmem>>, vector<16x16x64xf32>
      tpu.vector_store %arg5[%c1_94, %c1_95, %c0_96], %69 {strides = array<i32>} : memref<18x18x64xf32, #tpu.memory_space<vmem>>, vector<16x16x64xf32>,
      %c0_97 = arith.constant 0 : index
      %c0_98 = arith.constant 0 : index
      %c0_99 = arith.constant 0 : index
      %71 = vector.load %arg5[%c0_97, %c0_98, %c0_99] : memref<18x18x64xf32, #tpu.memory_space<vmem>>, vector<16x16x64xf32>
      %72 = vector.shape_cast %71 : vector<16x16x64xf32> to vector<256x64xf32>
      %c0_100 = arith.constant 0 : index
      %c1_101 = arith.constant 1 : index
      %c0_102 = arith.constant 0 : index
      %73 = vector.load %arg5[%c0_100, %c1_101, %c0_102] : memref<18x18x64xf32, #tpu.memory_space<vmem>>, vector<16x16x64xf32>
      %74 = vector.shape_cast %73 : vector<16x16x64xf32> to vector<256x64xf32>
      %c0_103 = arith.constant 0 : index
      %c2_104 = arith.constant 2 : index
      %c0_105 = arith.constant 0 : index
      %75 = vector.load %arg5[%c0_103, %c2_104, %c0_105] : memref<18x18x64xf32, #tpu.memory_space<vmem>>, vector<16x16x64xf32>
      %76 = vector.shape_cast %75 : vector<16x16x64xf32> to vector<256x64xf32>
      %c1_106 = arith.constant 1 : index
      %c0_107 = arith.constant 0 : index
      %c0_108 = arith.constant 0 : index
      %77 = vector.load %arg5[%c1_106, %c0_107, %c0_108] : memref<18x18x64xf32, #tpu.memory_space<vmem>>, vector<16x16x64xf32>
      %78 = vector.shape_cast %77 : vector<16x16x64xf32> to vector<256x64xf32>
      %c1_109 = arith.constant 1 : index
      %c1_110 = arith.constant 1 : index
      %c0_111 = arith.constant 0 : index
      %79 = vector.load %arg5[%c1_109, %c1_110, %c0_111] : memref<18x18x64xf32, #tpu.memory_space<vmem>>, vector<16x16x64xf32>
      %80 = vector.shape_cast %79 : vector<16x16x64xf32> to vector<256x64xf32>
      %c1_112 = arith.constant 1 : index
      %c2_113 = arith.constant 2 : index
      %c0_114 = arith.constant 0 : index
      %81 = vector.load %arg5[%c1_112, %c2_113, %c0_114] : memref<18x18x64xf32, #tpu.memory_space<vmem>>, vector<16x16x64xf32>
      %82 = vector.shape_cast %81 : vector<16x16x64xf32> to vector<256x64xf32>
      %c2_115 = arith.constant 2 : index
      %c0_116 = arith.constant 0 : index
      %c0_117 = arith.constant 0 : index
      %83 = vector.load %arg5[%c2_115, %c0_116, %c0_117] : memref<18x18x64xf32, #tpu.memory_space<vmem>>, vector<16x16x64xf32>
      %84 = vector.shape_cast %83 : vector<16x16x64xf32> to vector<256x64xf32>
      %c2_118 = arith.constant 2 : index
      %c1_119 = arith.constant 1 : index
      %c0_120 = arith.constant 0 : index
      %85 = vector.load %arg5[%c2_118, %c1_119, %c0_120] : memref<18x18x64xf32, #tpu.memory_space<vmem>>, vector<16x16x64xf32>
      %86 = vector.shape_cast %85 : vector<16x16x64xf32> to vector<256x64xf32>
      %c2_121 = arith.constant 2 : index
      %c2_122 = arith.constant 2 : index
      %c0_123 = arith.constant 0 : index
      %87 = vector.load %arg5[%c2_121, %c2_122, %c0_123] : memref<18x18x64xf32, #tpu.memory_space<vmem>>, vector<16x16x64xf32>
      %88 = vector.shape_cast %87 : vector<16x16x64xf32> to vector<256x64xf32>
      %89 = tpu.concatenate %72, %74, %76, %78, %80, %82, %84, %86, %88 in 1 : vector<256x64xf32>, vector<256x64xf32>, vector<256x64xf32>, vector<256x64xf32>, vector<256x64xf32>, vector<256x64xf32>, vector<256x64xf32>, vector<256x64xf32>, vector<256x64xf32> -> vector<256x576xf32>
      %cst_124 = arith.constant dense<0.000000e+00> : vector<256x64xf32>
      %90 = tpu.matmul %89, %67, %cst_124 {dimension_numbers = #tpu.dot_dimension_numbers<[1], [0], [0], [1], [0, 0, 1, 1], [], []>} : vector<256x576xf32>, vector<576x64xf32>, vector<256x64xf32> -> vector<256x64xf32>
      %91 = vector.shape_cast %90 : vector<256x64xf32> to vector<16x16x64xf32>
      %c2_125 = arith.constant 2 : index
      %c0_126 = arith.constant 0 : index
      %c0_127 = arith.constant 0 : index
      %92 = vector.load %arg3[%c2_125, %c0_126, %c0_127] : memref<4x576x64xf32, #tpu.memory_space<vmem>>, vector<1x576x64xf32>
      %93 = vector.shape_cast %92 : vector<1x576x64xf32> to vector<576x64xf32>
      %cst_128 = arith.constant 0.000000e+00 : f32
      %94 = vector.broadcast %cst_128 : f32 to vector<16x16x64xf32>
      %95 = arith.maximumf %91, %94 : vector<16x16x64xf32>
      %c1_129 = arith.constant 1 : index
      %c1_130 = arith.constant 1 : index
      %c0_131 = arith.constant 0 : index
      %96 = vector.load %arg5[%c1_129, %c1_130, %c0_131] : memref<18x18x64xf32, #tpu.memory_space<vmem>>, vector<16x16x64xf32>
      tpu.vector_store %arg5[%c1_129, %c1_130, %c0_131], %95 {strides = array<i32>} : memref<18x18x64xf32, #tpu.memory_space<vmem>>, vector<16x16x64xf32>,
      %c0_132 = arith.constant 0 : index
      %c0_133 = arith.constant 0 : index
      %c0_134 = arith.constant 0 : index
      %97 = vector.load %arg5[%c0_132, %c0_133, %c0_134] : memref<18x18x64xf32, #tpu.memory_space<vmem>>, vector<16x16x64xf32>
      %98 = vector.shape_cast %97 : vector<16x16x64xf32> to vector<256x64xf32>
      %c0_135 = arith.constant 0 : index
      %c1_136 = arith.constant 1 : index
      %c0_137 = arith.constant 0 : index
      %99 = vector.load %arg5[%c0_135, %c1_136, %c0_137] : memref<18x18x64xf32, #tpu.memory_space<vmem>>, vector<16x16x64xf32>
      %100 = vector.shape_cast %99 : vector<16x16x64xf32> to vector<256x64xf32>
      %c0_138 = arith.constant 0 : index
      %c2_139 = arith.constant 2 : index
      %c0_140 = arith.constant 0 : index
      %101 = vector.load %arg5[%c0_138, %c2_139, %c0_140] : memref<18x18x64xf32, #tpu.memory_space<vmem>>, vector<16x16x64xf32>
      %102 = vector.shape_cast %101 : vector<16x16x64xf32> to vector<256x64xf32>
      %c1_141 = arith.constant 1 : index
      %c0_142 = arith.constant 0 : index
      %c0_143 = arith.constant 0 : index
      %103 = vector.load %arg5[%c1_141, %c0_142, %c0_143] : memref<18x18x64xf32, #tpu.memory_space<vmem>>, vector<16x16x64xf32>
      %104 = vector.shape_cast %103 : vector<16x16x64xf32> to vector<256x64xf32>
      %c1_144 = arith.constant 1 : index
      %c1_145 = arith.constant 1 : index
      %c0_146 = arith.constant 0 : index
      %105 = vector.load %arg5[%c1_144, %c1_145, %c0_146] : memref<18x18x64xf32, #tpu.memory_space<vmem>>, vector<16x16x64xf32>
      %106 = vector.shape_cast %105 : vector<16x16x64xf32> to vector<256x64xf32>
      %c1_147 = arith.constant 1 : index
      %c2_148 = arith.constant 2 : index
      %c0_149 = arith.constant 0 : index
      %107 = vector.load %arg5[%c1_147, %c2_148, %c0_149] : memref<18x18x64xf32, #tpu.memory_space<vmem>>, vector<16x16x64xf32>
      %108 = vector.shape_cast %107 : vector<16x16x64xf32> to vector<256x64xf32>
      %c2_150 = arith.constant 2 : index
      %c0_151 = arith.constant 0 : index
      %c0_152 = arith.constant 0 : index
      %109 = vector.load %arg5[%c2_150, %c0_151, %c0_152] : memref<18x18x64xf32, #tpu.memory_space<vmem>>, vector<16x16x64xf32>
      %110 = vector.shape_cast %109 : vector<16x16x64xf32> to vector<256x64xf32>
      %c2_153 = arith.constant 2 : index
      %c1_154 = arith.constant 1 : index
      %c0_155 = arith.constant 0 : index
      %111 = vector.load %arg5[%c2_153, %c1_154, %c0_155] : memref<18x18x64xf32, #tpu.memory_space<vmem>>, vector<16x16x64xf32>
      %112 = vector.shape_cast %111 : vector<16x16x64xf32> to vector<256x64xf32>
      %c2_156 = arith.constant 2 : index
      %c2_157 = arith.constant 2 : index
      %c0_158 = arith.constant 0 : index
      %113 = vector.load %arg5[%c2_156, %c2_157, %c0_158] : memref<18x18x64xf32, #tpu.memory_space<vmem>>, vector<16x16x64xf32>
      %114 = vector.shape_cast %113 : vector<16x16x64xf32> to vector<256x64xf32>
      %115 = tpu.concatenate %98, %100, %102, %104, %106, %108, %110, %112, %114 in 1 : vector<256x64xf32>, vector<256x64xf32>, vector<256x64xf32>, vector<256x64xf32>, vector<256x64xf32>, vector<256x64xf32>, vector<256x64xf32>, vector<256x64xf32>, vector<256x64xf32> -> vector<256x576xf32>
      %cst_159 = arith.constant dense<0.000000e+00> : vector<256x64xf32>
      %116 = tpu.matmul %115, %93, %cst_159 {dimension_numbers = #tpu.dot_dimension_numbers<[1], [0], [0], [1], [0, 0, 1, 1], [], []>} : vector<256x576xf32>, vector<576x64xf32>, vector<256x64xf32> -> vector<256x64xf32>
      %117 = vector.shape_cast %116 : vector<256x64xf32> to vector<16x16x64xf32>
      %118 = arith.addf %117, %29 : vector<16x16x64xf32>
      %c0_160 = arith.constant 0 : index
      %c0_161 = arith.constant 0 : index
      %c0_162 = arith.constant 0 : index
      %119 = vector.load %arg6[%c0_160, %c0_161, %c0_162] : memref<16x16x64xf32, #tpu.memory_space<vmem>>, vector<16x16x64xf32>
      tpu.vector_store %arg6[%c0_160, %c0_161, %c0_162], %118 {strides = array<i32>} : memref<16x16x64xf32, #tpu.memory_space<vmem>>, vector<16x16x64xf32>,
    }
    %c0_42 = arith.constant 0 : index
    %c0_43 = arith.constant 0 : index
    %c0_44 = arith.constant 0 : index
    %32 = vector.load %arg6[%c0_42, %c0_43, %c0_44] : memref<16x16x64xf32, #tpu.memory_space<vmem>>, vector<16x16x64xf32>
    %c3 = arith.constant 3 : index
    %c0_45 = arith.constant 0 : index
    %c0_46 = arith.constant 0 : index
    %33 = vector.load %arg3[%c3, %c0_45, %c0_46] : memref<4x576x64xf32, #tpu.memory_space<vmem>>, vector<1x576x64xf32>
    %34 = vector.shape_cast %33 : vector<1x576x64xf32> to vector<576x64xf32>
    %cst_47 = arith.constant 0.000000e+00 : f32
    %35 = vector.broadcast %cst_47 : f32 to vector<16x16x64xf32>
    %36 = arith.maximumf %32, %35 : vector<16x16x64xf32>
    %c1_48 = arith.constant 1 : index
    %c1_49 = arith.constant 1 : index
    %c0_50 = arith.constant 0 : index
    %37 = vector.load %arg5[%c1_48, %c1_49, %c0_50] : memref<18x18x64xf32, #tpu.memory_space<vmem>>, vector<16x16x64xf32>
    tpu.vector_store %arg5[%c1_48, %c1_49, %c0_50], %36 {strides = array<i32>} : memref<18x18x64xf32, #tpu.memory_space<vmem>>, vector<16x16x64xf32>,
    %c0_51 = arith.constant 0 : index
    %c0_52 = arith.constant 0 : index
    %c0_53 = arith.constant 0 : index
    %38 = vector.load %arg5[%c0_51, %c0_52, %c0_53] : memref<18x18x64xf32, #tpu.memory_space<vmem>>, vector<16x16x64xf32>
    %39 = vector.shape_cast %38 : vector<16x16x64xf32> to vector<256x64xf32>
    %c0_54 = arith.constant 0 : index
    %c1_55 = arith.constant 1 : index
    %c0_56 = arith.constant 0 : index
    %40 = vector.load %arg5[%c0_54, %c1_55, %c0_56] : memref<18x18x64xf32, #tpu.memory_space<vmem>>, vector<16x16x64xf32>
    %41 = vector.shape_cast %40 : vector<16x16x64xf32> to vector<256x64xf32>
    %c0_57 = arith.constant 0 : index
    %c2_58 = arith.constant 2 : index
    %c0_59 = arith.constant 0 : index
    %42 = vector.load %arg5[%c0_57, %c2_58, %c0_59] : memref<18x18x64xf32, #tpu.memory_space<vmem>>, vector<16x16x64xf32>
    %43 = vector.shape_cast %42 : vector<16x16x64xf32> to vector<256x64xf32>
    %c1_60 = arith.constant 1 : index
    %c0_61 = arith.constant 0 : index
    %c0_62 = arith.constant 0 : index
    %44 = vector.load %arg5[%c1_60, %c0_61, %c0_62] : memref<18x18x64xf32, #tpu.memory_space<vmem>>, vector<16x16x64xf32>
    %45 = vector.shape_cast %44 : vector<16x16x64xf32> to vector<256x64xf32>
    %c1_63 = arith.constant 1 : index
    %c1_64 = arith.constant 1 : index
    %c0_65 = arith.constant 0 : index
    %46 = vector.load %arg5[%c1_63, %c1_64, %c0_65] : memref<18x18x64xf32, #tpu.memory_space<vmem>>, vector<16x16x64xf32>
    %47 = vector.shape_cast %46 : vector<16x16x64xf32> to vector<256x64xf32>
    %c1_66 = arith.constant 1 : index
    %c2_67 = arith.constant 2 : index
    %c0_68 = arith.constant 0 : index
    %48 = vector.load %arg5[%c1_66, %c2_67, %c0_68] : memref<18x18x64xf32, #tpu.memory_space<vmem>>, vector<16x16x64xf32>
    %49 = vector.shape_cast %48 : vector<16x16x64xf32> to vector<256x64xf32>
    %c2_69 = arith.constant 2 : index
    %c0_70 = arith.constant 0 : index
    %c0_71 = arith.constant 0 : index
    %50 = vector.load %arg5[%c2_69, %c0_70, %c0_71] : memref<18x18x64xf32, #tpu.memory_space<vmem>>, vector<16x16x64xf32>
    %51 = vector.shape_cast %50 : vector<16x16x64xf32> to vector<256x64xf32>
    %c2_72 = arith.constant 2 : index
    %c1_73 = arith.constant 1 : index
    %c0_74 = arith.constant 0 : index
    %52 = vector.load %arg5[%c2_72, %c1_73, %c0_74] : memref<18x18x64xf32, #tpu.memory_space<vmem>>, vector<16x16x64xf32>
    %53 = vector.shape_cast %52 : vector<16x16x64xf32> to vector<256x64xf32>
    %c2_75 = arith.constant 2 : index
    %c2_76 = arith.constant 2 : index
    %c0_77 = arith.constant 0 : index
    %54 = vector.load %arg5[%c2_75, %c2_76, %c0_77] : memref<18x18x64xf32, #tpu.memory_space<vmem>>, vector<16x16x64xf32>
    %55 = vector.shape_cast %54 : vector<16x16x64xf32> to vector<256x64xf32>
    %56 = tpu.concatenate %39, %41, %43, %45, %47, %49, %51, %53, %55 in 1 : vector<256x64xf32>, vector<256x64xf32>, vector<256x64xf32>, vector<256x64xf32>, vector<256x64xf32>, vector<256x64xf32>, vector<256x64xf32>, vector<256x64xf32>, vector<256x64xf32> -> vector<256x576xf32>
    %cst_78 = arith.constant dense<0.000000e+00> : vector<256x64xf32>
    %57 = tpu.matmul %56, %34, %cst_78 {dimension_numbers = #tpu.dot_dimension_numbers<[1], [0], [0], [1], [0, 0, 1, 1], [], []>} : vector<256x576xf32>, vector<576x64xf32>, vector<256x64xf32> -> vector<256x64xf32>
    %58 = vector.shape_cast %57 : vector<256x64xf32> to vector<16x16x64xf32>
    %c0_79 = arith.constant 0 : index
    %c0_80 = arith.constant 0 : index
    %c0_81 = arith.constant 0 : index
    %c0_82 = arith.constant 0 : index
    %59 = vector.load %arg2[%c0_79, %c0_80, %c0_81, %c0_82] : memref<1x16x16x64xf32, #tpu.memory_space<vmem>>, vector<1x16x16x64xf32>
    %60 = vector.shape_cast %59 : vector<1x16x16x64xf32> to vector<16x16x64xf32>
    %61 = arith.addf %58, %60 : vector<16x16x64xf32>
    %c0_83 = arith.constant 0 : index
    %c0_84 = arith.constant 0 : index
    %c0_85 = arith.constant 0 : index
    %c0_86 = arith.constant 0 : index
    %62 = vector.load %arg4[%c0_83, %c0_84, %c0_85, %c0_86] : memref<1x16x16x64xf32, #tpu.memory_space<vmem>>, vector<1x16x16x64xf32>
    %63 = vector.shape_cast %62 : vector<1x16x16x64xf32> to vector<16x16x64xf32>
    %64 = vector.shape_cast %61 : vector<16x16x64xf32> to vector<1x16x16x64xf32>
    tpu.vector_store %arg4[%c0_83, %c0_84, %c0_85, %c0_86], %64 {strides = array<i32>} : memref<1x16x16x64xf32, #tpu.memory_space<vmem>>, vector<1x16x16x64xf32>,
    return
  }
  func.func @transform_0(%arg0: i32) -> (i32, i32, i32, i32) {
    %c0_i32 = arith.constant 0 : i32
    %c0_i32_0 = arith.constant 0 : i32
    %c0_i32_1 = arith.constant 0 : i32
    %c0_i32_2 = arith.constant 0 : i32
    return %arg0, %c0_i32, %c0_i32_0, %c0_i32_1 : i32, i32, i32, i32
  }
  func.func @transform_1(%arg0: i32) -> (i32, i32, i32, i32) {
    %c0_i32 = arith.constant 0 : i32
    %c0_i32_0 = arith.constant 0 : i32
    %c0_i32_1 = arith.constant 0 : i32
    %c0_i32_2 = arith.constant 0 : i32
    return %arg0, %c0_i32, %c0_i32_0, %c0_i32_1 : i32, i32, i32, i32
  }
  func.func @transform_2(%arg0: i32) -> (i32, i32, i32) {
    %c0_i32 = arith.constant 0 : i32
    %c0_i32_0 = arith.constant 0 : i32
    %c0_i32_1 = arith.constant 0 : i32
    %c0_i32_2 = arith.constant 0 : i32
    return %c0_i32, %c0_i32_0, %c0_i32_1 : i32, i32, i32
  }
  func.func @transform_3(%arg0: i32) -> (i32, i32, i32, i32) {
    %c0_i32 = arith.constant 0 : i32
    %c0_i32_0 = arith.constant 0 : i32
    %c0_i32_1 = arith.constant 0 : i32
    %c0_i32_2 = arith.constant 0 : i32
    return %arg0, %c0_i32, %c0_i32_0, %c0_i32_1 : i32, i32, i32, i32
  }
}

</mosaic_0001>

<bundles_post_ra>
// kernel: drrn_forward.1
= control target key start
LH: loop header
LB: loop body
LE: loop exit
PB: predicated region body
PF: predicated region fallthrough
CT: control target
= control target key end

     0   :  { %s9310_s12 = smov 0   ;;  %s13720_s0 = inlined_call_operand.vmem [shape: f32[2,16,16,64], index: 0, kind: input, shape index: {}]   ;;  %s13721_s1 = inlined_call_operand.vmem [shape: f32[2,16,16,64], index: 1, kind: input, shape index: {}]   ;;  %s13722_s2 = inlined_call_operand.vmem [shape: f32[4,576,64], index: 2, kind: input, shape index: {}]   ;;  %s13723_s3 = inlined_call_operand.vmem [shape: f32[2,16,16,64], index: 3, kind: output, shape index: {}]  }
   0x1 LB: > { %s7518_s13 = sadd.s32 4294967295, %s9281_s12   ;;  %p7522_p0 = scmp.ge.s32.totalorder %s9281_s12, 1  ;;  %s9281_s12 = sphi %s9310_s12, %s13_s12  }
   0x2   : > { %p147_p1 = scmp.lt.s32.totalorder %s9281_s12, 3 }
   0x4   : > { %p148_p2 = pnand %p7522_p0, %p147_p1 }
   0x6   : > { %151 = sbr.rel (%p148_p2) target bundleno = 2470 (0x9a6), region = 32 }
   0xb   : > { %p176_p3 = scmp.lt.s32.totalorder %s7518_s13, 1  ;;  %vm191_vm0 = vcmask 523264   ;;  %v9287_v0 = vmov 0.0   ;;  %s9288_s24 = smov 64   ;;  %vm194_vm1 = vcmask 517120  }
   0xc   : > { %217 = vst.msk [vmem:[#allocation2 + $0xc0] sm:$0xff] %vm191_vm0, %v9287_v0 }
   0xd   : > { %s13930_s13 = smov (!%p176_p3, %s7518_s13), 1  ;;  %218 = vst.msk [vmem:[#allocation2 + $0xc8] sm:$0xff] %vm191_vm0, %v9287_v0 }
   0xe   : > { %229 = vst.msk [vmem:[#allocation2 + $0x120] sm:$0xff] %vm191_vm0, %v9287_v0  ;;  %s7875_s14 = sshll.u32 %s13930_s13, 8 }
   0xf   : > { %230 = vst.msk [vmem:[#allocation2 + $0x128] sm:$0xff] %vm191_vm0, %v9287_v0  ;;  %s9329_s17 = scalar_lea.vmem %s13720_s0, %s7875_s14  ;;  %s9334_s20 = scalar_lea.vmem %s13721_s1, %s7875_s14 }
  0x10   : > { %192 = vst.msk [vmem:[#allocation2] sm:$0xff] %vm191_vm0, %v9287_v0  ;;  %s9341_s23 = scalar_lea.vmem %s13723_s3, %s7875_s14  ;;  %v261_v1 = vld [vmem:[%s9329_s17 + $0x70] sm:$0xff]  ;;  %v270_v8 = vld [vmem:[%s9329_s17 + $0xb8] sm:$0xff]  ;;  %v263_v17 = vld [vmem:[%s9329_s17 + $0x80] sm:$0xff] }
  0x11   : > { %v269_v2 = vld [vmem:[%s9329_s17 + $0xb0] sm:$0xff]  ;;  %193 = vst.msk [vmem:[#allocation2 + $0x8] sm:$0xff] %vm191_vm0, %v9287_v0  ;;  %v365_v3 = vmax.f32 %v261_v1, 0.0  ;;  %v374_v9 = vmax.f32 %v270_v8, 0.0  ;;  %v262_v14 = vld [vmem:[%s9329_s17 + $0x78] sm:$0xff]  ;;  %v247_v19 = vld [vmem:[%s9329_s17] sm:$0xff] }
  0x12   : > { %v373_v4 = vmax.f32 %v269_v2, 0.0  ;;  %196 = vst.msk [vmem:[#allocation2 + $0x18] sm:$0xff] %vm191_vm0, %v9287_v0  ;;  %v253_v13 = vld [vmem:[%s9329_s17 + $0x30] sm:$0xff]  ;;  %v254_v15 = vld [vmem:[%s9329_s17 + $0x38] sm:$0xff]  ;;  %v366_v18 = vmax.f32 %v262_v14, 0.0  ;;  %v272_v21 = vld [vmem:[%s9329_s17 + $0xc8] sm:$0xff] }
  0x13   : > { %197 = vst.msk [vmem:[#allocation2 + $0x20] sm:$0xff] %vm191_vm0, %v9287_v0  ;;  %v357_v16 = vmax.f32 %v253_v13, 0.0  ;;  %v358_v20 = vmax.f32 %v254_v15, 0.0  ;;  %v367_v22 = vmax.f32 %v263_v17, 0.0  ;;  %v256_v23 = vld [vmem:[%s9329_s17 + $0x48] sm:$0xff]  ;;  %v351_v24 = vmax.f32 %v247_v19, 0.0 }
  0x14   : > { %398 = vst.msk [vmem:[#allocation2 + $0xc1] sm:$0xff] %vm191_vm0, %v365_v3  ;;  %v265_v25 = vld [vmem:[%s9329_s17 + $0x90] sm:$0xff]  ;;  %v376_v26 = vmax.f32 %v272_v21, 0.0  ;;  %v271_v27 = vld [vmem:[%s9329_s17 + $0xc0] sm:$0xff]  ;;  %v360_v28 = vmax.f32 %v256_v23, 0.0  ;;  %v266_v31 = vld [vmem:[%s9329_s17 + $0x98] sm:$0xff] }
  0x15   : > { %406 = vst.msk [vmem:[#allocation2 + $0x121] sm:$0xff] %vm191_vm0, %v373_v4  ;;  %v257_v29 = vld [vmem:[%s9329_s17 + $0x50] sm:$0xff]  ;;  %v369_v30 = vmax.f32 %v265_v25, 0.0  ;;  %v375_v32 = vmax.f32 %v271_v27, 0.0  ;;  %v274_v35 = vld [vmem:[%s9329_s17 + $0xd8] sm:$0xff]  ;;  %v370_v36 = vmax.f32 %v266_v31, 0.0 }
  0x16   : > { %199 = vst.msk [vmem:[#allocation2 + $0x30] sm:$0xff] %vm191_vm0, %v9287_v0  ;;  %v249_v33 = vld [vmem:[%s9329_s17 + $0x10] sm:$0xff]  ;;  %v361_v34 = vmax.f32 %v257_v29, 0.0  ;;  %v255_v37 = vld [vmem:[%s9329_s17 + $0x40] sm:$0xff]  ;;  %v264_v40 = vld [vmem:[%s9329_s17 + $0x88] sm:$0xff]  ;;  %v378_v42 = vmax.f32 %v274_v35, 0.0 }
  0x17   : > { %200 = vst.msk [vmem:[#allocation2 + $0x38] sm:$0xff] %vm191_vm0, %v9287_v0  ;;  %v353_v39 = vmax.f32 %v249_v33, 0.0  ;;  %v250_v43 = vld [vmem:[%s9329_s17 + $0x18] sm:$0xff]  ;;  %v359_v46 = vmax.f32 %v255_v37, 0.0  ;;  %v275_v47 = vld [vmem:[%s9329_s17 + $0xe0] sm:$0xff]  ;;  %v368_v49 = vmax.f32 %v264_v40, 0.0 }
  0x18   : > { %202 = vst.msk [vmem:[#allocation2 + $0x48] sm:$0xff] %vm191_vm0, %v9287_v0  ;;  %v448_v10 = vld [vmem:[#allocation2 + $0x1] sm:$0xff]  ;;  %v354_v52 = vmax.f32 %v250_v43, 0.0  ;;  %v379_v56 = vmax.f32 %v275_v47, 0.0  ;;  %v273_v60 = vld [vmem:[%s9329_s17 + $0xd0] sm:$0xff]  ;;  %v258_v8 = vld [vmem:[%s9329_s17 + $0x58] sm:$0xff] }
  0x19   : > { %203 = vst.msk [vmem:[#allocation2 + $0x50] sm:$0xff] %vm191_vm0, %v9287_v0  ;;  %v259_v50 = vld [vmem:[%s9329_s17 + $0x60] sm:$0xff]  ;;  %v268_v53 = vld [vmem:[%s9329_s17 + $0xa8] sm:$0xff]  ;;  %v362_v13 = vmax.f32 %v258_v8, 0.0  ;;  %v293_v27 = vld [vmem:[%s13722_s2 + $0x70] sm:$0xff] }
  0x1a   : > { %205 = vst.msk [vmem:[#allocation2 + $0x60] sm:$0xff] %vm191_vm0, %v9287_v0  ;;  %v248_v57 = vld [vmem:[%s9329_s17 + $0x8] sm:$0xff]  ;;  %v363_v59 = vmax.f32 %v259_v50, 0.0  ;;  %v372_v63 = vmax.f32 %v268_v53, 0.0  ;;  %v251_v14 = vld [vmem:[%s9329_s17 + $0x20] sm:$0xff] }
  0x1b   : > { %v9363_v5 = vld [vmem:[#allocation2 + $0xc1] sm:$0xff]  ;;  %206 = vst.msk [vmem:[#allocation2 + $0x68] sm:$0xff] %vm191_vm0, %v9287_v0  ;;  %v352_v3 = vmax.f32 %v248_v57, 0.0 }
  0x1c   : > { %v472_v6 = vld [vmem:[#allocation2 + $0x121] sm:$0xff]  ;;  %208 = vst.msk [vmem:[#allocation2 + $0x78] sm:$0xff] %vm191_vm0, %v9287_v0 }
  0x1d   : > { %v8025_v7 = vpack.i.bf16 %v472_v6, %v9363_v5  ;;  %209 = vst.msk [vmem:[#allocation2 + $0x80] sm:$0xff] %vm191_vm0, %v9287_v0  ;;  %v252_v4 = vld [vmem:[%s9329_s17 + $0x28] sm:$0xff]  ;;  %v291_v33 = vld [vmem:[%s13722_s2 + $0x60] sm:$0xff] }
  0x1e   : > { %211 = vst.msk [vmem:[#allocation2 + $0x90] sm:$0xff] %vm191_vm0, %v9287_v0  ;;  %v276_v21 = vld [vmem:[%s9329_s17 + $0xe8] sm:$0xff]  ;;  %v287_v47 = vld [vmem:[%s13722_s2 + $0x40] sm:$0xff] }
  0x1f   : > { %8026 = vrot.lane.b32.xlu0 %v8025_v7, %s9288_s24  ;;  %212 = vst.msk [vmem:[#allocation2 + $0x98] sm:$0xff] %vm191_vm0, %v9287_v0  ;;  %v377_v7 = vmax.f32 %v273_v60, 0.0  ;;  %v292_v29 = vld [vmem:[%s13722_s2 + $0x68] sm:$0xff]  ;;  %v283_v60 = vld [vmem:[%s13722_s2 + $0x20] sm:$0xff] }
  0x20   : > { %214 = vst.msk [vmem:[#allocation2 + $0xa8] sm:$0xff] %vm191_vm0, %v9287_v0  ;;  %v280_v8 = vld [vmem:[%s13722_s2 + $0x8] sm:$0xff] }
  0x21   : > { %215 = vst.msk [vmem:[#allocation2 + $0xb0] sm:$0xff] %vm191_vm0, %v9287_v0 }
  0x22   : > { %220 = vst.msk [vmem:[#allocation2 + $0xd8] sm:$0xff] %vm191_vm0, %v9287_v0 }
  0x23   : > { %221 = vst.msk [vmem:[#allocation2 + $0xe0] sm:$0xff] %vm191_vm0, %v9287_v0 }
  0x24   : > { %223 = vst.msk [vmem:[#allocation2 + $0xf0] sm:$0xff] %vm191_vm0, %v9287_v0 }
  0x25   : > { %224 = vst.msk [vmem:[#allocation2 + $0xf8] sm:$0xff] %vm191_vm0, %v9287_v0 }
  0x26   : > { %226 = vst.msk [vmem:[#allocation2 + $0x108] sm:$0xff] %vm191_vm0, %v9287_v0 }
  0x27   : > { %227 = vst.msk [vmem:[#allocation2 + $0x110] sm:$0xff] %vm191_vm0, %v9287_v0 }
  0x28   : > { %232 = vst.msk [vmem:[#allocation2 + $0x138] sm:$0xff] %vm191_vm0, %v9287_v0 }
  0x29   : > { %233 = vst.msk [vmem:[#allocation2 + $0x140] sm:$0xff] %vm191_vm0, %v9287_v0 }
  0x2a   : > { %235 = vst.msk [vmem:[#allocation2 + $0x150] sm:$0xff] %vm191_vm0, %v9287_v0 }
  0x2b   : > { %236 = vst.msk [vmem:[#allocation2 + $0x158] sm:$0xff] %vm191_vm0, %v9287_v0 }
  0x2c   : > { %238 = vst.msk [vmem:[#allocation2 + $0x168] sm:$0xff] %vm191_vm0, %v9287_v0 }
  0x2d   : > { %239 = vst.msk [vmem:[#allocation2 + $0x170] sm:$0xff] %vm191_vm0, %v9287_v0 }
  0x2e   : > { %241 = vst.msk [vmem:[#allocation2 + $0x180] sm:$0xff] %vm191_vm0, %v9287_v0 }
  0x2f   : > { %242 = vst.msk [vmem:[#allocation2 + $0x188] sm:$0xff] %vm191_vm0, %v9287_v0 }
  0x30   : > { %244 = vst.msk [vmem:[#allocation2 + $0x198] sm:$0xff] %vm191_vm0, %v9287_v0 }
  0x31   : > { %245 = vst.msk [vmem:[#allocation2 + $0x1a0] sm:$0xff] %vm191_vm0, %v9287_v0 }
  0x32   : > { %231 = vst.msk [vmem:[#allocation2 + $0x130] sm:$0x3] %vm194_vm1, %v9287_v0 }
  0x33   : > { %407 = vst.msk [vmem:[#allocation2 + $0x129] sm:$0xff] %vm191_vm0, %v374_v9 }
  0x34   : > { %195 = vst.msk [vmem:[#allocation2 + $0x10] sm:$0x3] %vm194_vm1, %v9287_v0 }
  0x35   : > { %198 = vst.msk [vmem:[#allocation2 + $0x28] sm:$0x3] %vm194_vm1, %v9287_v0 }
  0x36   : > { %201 = vst.msk [vmem:[#allocation2 + $0x40] sm:$0x3] %vm194_vm1, %v9287_v0 }
  0x37   : > { %204 = vst.msk [vmem:[#allocation2 + $0x58] sm:$0x3] %vm194_vm1, %v9287_v0 }
  0x38   : > { %207 = vst.msk [vmem:[#allocation2 + $0x70] sm:$0x3] %vm194_vm1, %v9287_v0 }
  0x39   : > { %210 = vst.msk [vmem:[#allocation2 + $0x88] sm:$0x3] %vm194_vm1, %v9287_v0 }
  0x3a   : > { %v473_v11 = vld [vmem:[#allocation2 + $0x129] sm:$0xff]  ;;  %213 = vst.msk [vmem:[#allocation2 + $0xa0] sm:$0x3] %vm194_vm1, %v9287_v0 }
  0x3b   : > { %v8035_v12 = vpack.i.bf16 %v473_v11, %v448_v10  ;;  %216 = vst.msk [vmem:[#allocation2 + $0xb8] sm:$0x3] %vm194_vm1, %v9287_v0  ;;  %v449_v58 = vld [vmem:[#allocation2 + $0x9] sm:$0xff]  ;;  %v267_v11 = vld [vmem:[%s9329_s17 + $0xa0] sm:$0xff] }
  0x3c   : > { %219 = vst.msk [vmem:[#allocation2 + $0xd0] sm:$0x3] %vm194_vm1, %v9287_v0 }
  0x3d   : > { %8036 = vrot.lane.b32.xlu1 %v8035_v12, %s9288_s24  ;;  %222 = vst.msk [vmem:[#allocation2 + $0xe8] sm:$0x3] %vm194_vm1, %v9287_v0  ;;  %v356_v12 = vmax.f32 %v252_v4, 0.0  ;;  %v281_v4 = vld [vmem:[%s13722_s2 + $0x10] sm:$0xff] }
  0x3e   : > { %225 = vst.msk [vmem:[#allocation2 + $0x100] sm:$0x3] %vm194_vm1, %v9287_v0 }
  0x3f   : > { %228 = vst.msk [vmem:[#allocation2 + $0x118] sm:$0x3] %vm194_vm1, %v9287_v0 }
  0x40   : > { %234 = vst.msk [vmem:[#allocation2 + $0x148] sm:$0x3] %vm194_vm1, %v9287_v0 }
  0x41   : > { %237 = vst.msk [vmem:[#allocation2 + $0x160] sm:$0x3] %vm194_vm1, %v9287_v0 }
  0x42   : > { %240 = vst.msk [vmem:[#allocation2 + $0x178] sm:$0x3] %vm194_vm1, %v9287_v0 }
  0x43   : > { %243 = vst.msk [vmem:[#allocation2 + $0x190] sm:$0x3] %vm194_vm1, %v9287_v0 }
  0x44   : > { %246 = vst.msk [vmem:[#allocation2 + $0x1a8] sm:$0x3] %vm194_vm1, %v9287_v0  ;;  %v260_v0 = vld [vmem:[%s9329_s17 + $0x68] sm:$0xff] }
  0x45   : > { %390 = vst.msk [vmem:[#allocation2 + $0x61] sm:$0xff] %vm191_vm0, %v357_v16  ;;  %v364_v10 = vmax.f32 %v260_v0, 0.0  ;;  %v282_v0 = vld [vmem:[%s13722_s2 + $0x18] sm:$0xff] }
  0x46   : > { %399 = vst.msk [vmem:[#allocation2 + $0xc9] sm:$0xff] %vm191_vm0, %v366_v18  ;;  %v371_v18 = vmax.f32 %v267_v11, 0.0 }
  0x47   : > { %391 = vst.msk [vmem:[#allocation2 + $0x69] sm:$0xff] %vm191_vm0, %v358_v20  ;;  %v355_v20 = vmax.f32 %v251_v14, 0.0 }
  0x48   : > { %400 = vst.msk [vmem:[#allocation2 + $0xd9] sm:$0xff] %vm191_vm0, %v367_v22  ;;  %v294_v22 = vld [vmem:[%s13722_s2 + $0x78] sm:$0xff] }
  0x49   : > { %384 = vst.msk [vmem:[#allocation2 + $0x19] sm:$0xff] %vm191_vm0, %v351_v24  ;;  %7879 = vmatpush.msra.mxu2 %v294_v22  ;;  %7880 = vmatpush.msra.mxu3 %v294_v22 }
  0x4a   : > { %409 = vst.msk [vmem:[#allocation2 + $0x141] sm:$0xff] %vm191_vm0, %v376_v26  ;;  %v380_v26 = vmax.f32 %v276_v21, 0.0  ;;  %1441 = vmatpush.msra.mxu0 %v294_v22  ;;  %7878 = vmatpush.msra.mxu1 %v294_v22 }
  0x4b   : > { %393 = vst.msk [vmem:[#allocation2 + $0x81] sm:$0xff] %vm191_vm0, %v360_v28  ;;  %7882 = vmatpush.msra.mxu2 %v293_v27  ;;  %7883 = vmatpush.msra.mxu3 %v293_v27 }
  0x4c   : > { %v9473_v38 = vld [vmem:[#allocation2 + $0x61] sm:$0xff]  ;;  %402 = vst.msk [vmem:[#allocation2 + $0xf1] sm:$0xff] %vm191_vm0, %v369_v30  ;;  %1442 = vmatpush.msra.mxu0 %v293_v27  ;;  %7881 = vmatpush.msra.mxu1 %v293_v27 }
  0x4d   : > { %v9477_v41 = vld [vmem:[#allocation2 + $0xc9] sm:$0xff]  ;;  %408 = vst.msk [vmem:[#allocation2 + $0x139] sm:$0xff] %vm191_vm0, %v375_v32  ;;  %7885 = vmatpush.msra.mxu2 %v292_v29  ;;  %7886 = vmatpush.msra.mxu3 %v292_v29 }
  0x4e   : > { %v8030_v44 = vpack.i.bf16 %v9477_v41, %v9473_v38  ;;  %v9483_v45 = vld [vmem:[#allocation2 + $0x69] sm:$0xff]  ;;  %394 = vst.msk [vmem:[#allocation2 + $0x91] sm:$0xff] %vm191_vm0, %v361_v34  ;;  %v290_v34 = vld [vmem:[%s13722_s2 + $0x58] sm:$0xff]  ;;  %1443 = vmatpush.msra.mxu0 %v292_v29  ;;  %7884 = vmatpush.msra.mxu1 %v292_v29  ;;  %v440_v29 = vld [vmem:[#allocation2 + $0x120] sm:$0xff] }
  0x4f   : > { %v9487_v48 = vld [vmem:[#allocation2 + $0xd9] sm:$0xff]  ;;  %403 = vst.msk [vmem:[#allocation2 + $0xf9] sm:$0xff] %vm191_vm0, %v370_v36  ;;  %7888 = vmatpush.msra.mxu2 %v291_v33  ;;  %7889 = vmatpush.msra.mxu3 %v291_v33 }
  0x50   : > { %8031 = vrot.lane.b32.xlu0 %v8030_v44, %s9288_s24  ;;  %v8040_v51 = vpack.i.bf16 %v9487_v48, %v9483_v45  ;;  %386 = vst.msk [vmem:[#allocation2 + $0x31] sm:$0xff] %vm191_vm0, %v353_v39  ;;  %v450_v54 = vld [vmem:[#allocation2 + $0x19] sm:$0xff]  ;;  %v288_v44 = vld [vmem:[%s13722_s2 + $0x48] sm:$0xff]  ;;  %1444 = vmatpush.msra.mxu0 %v291_v33 }
  0x51   : > { %v475_v55 = vld [vmem:[#allocation2 + $0x141] sm:$0xff]  ;;  %411 = vst.msk [vmem:[#allocation2 + $0x159] sm:$0xff] %vm191_vm0, %v378_v42  ;;  %7891 = vmatpush.msra.mxu2 %v290_v34  ;;  %v289_v42 = vld [vmem:[%s13722_s2 + $0x50] sm:$0xff]  ;;  %7892 = vmatpush.msra.mxu3 %v290_v34 }
  0x52   : > { %8041 = vrot.lane.b32.xlu1 %v8040_v51, %s9288_s24  ;;  %392 = vst.msk [vmem:[#allocation2 + $0x79] sm:$0xff] %vm191_vm0, %v359_v46  ;;  %v9501_v61 = vld [vmem:[#allocation2 + $0x81] sm:$0xff]  ;;  %v8055_v1 = vpack.i.bf16 %v475_v55, %v450_v54  ;;  %7887 = vmatpush.msra.mxu1 %v291_v33  ;;  %v286_v51 = vld [vmem:[%s13722_s2 + $0x38] sm:$0xff]  ;;  %v285_v54 = vld [vmem:[%s13722_s2 + $0x30] sm:$0xff] }
  0x53   : > { %v468_v62 = vld [vmem:[#allocation2 + $0xf1] sm:$0xff]  ;;  %401 = vst.msk [vmem:[#allocation2 + $0xe1] sm:$0xff] %vm191_vm0, %v368_v49  ;;  %7894 = vmatpush.msra.mxu2 %v289_v42  ;;  %7895 = vmatpush.msra.mxu3 %v289_v42 }
  0x54   : > { %v474_v2 = vld [vmem:[#allocation2 + $0x139] sm:$0xff]  ;;  %387 = vst.msk [vmem:[#allocation2 + $0x39] sm:$0xff] %vm191_vm0, %v354_v52  ;;  %v8060_v9 = vpack.i.bf16 %v468_v62, %v9501_v61  ;;  %1445 = vmatpush.msra.mxu0 %v290_v34  ;;  %7890 = vmatpush.msra.mxu1 %v290_v34 }
  0x55   : > { %v8045_v6 = vpack.i.bf16 %v474_v2, %v449_v58  ;;  %412 = vst.msk [vmem:[#allocation2 + $0x169] sm:$0xff] %vm191_vm0, %v379_v56  ;;  %v9517_v15 = vld [vmem:[#allocation2 + $0x91] sm:$0xff]  ;;  %7897 = vmatpush.msra.mxu2 %v288_v44  ;;  %7898 = vmatpush.msra.mxu3 %v288_v44  ;;  %v284_v58 = vld [vmem:[%s13722_s2 + $0x28] sm:$0xff] }
  0x56   : > { %396 = vst.msk [vmem:[#allocation2 + $0xa9] sm:$0xff] %vm191_vm0, %v363_v59  ;;  %v469_v16 = vld [vmem:[#allocation2 + $0xf9] sm:$0xff]  ;;  %1446 = vmatpush.msra.mxu0 %v289_v42  ;;  %7893 = vmatpush.msra.mxu1 %v289_v42 }
  0x57   : > { %8046 = vrot.lane.b32.xlu2 %v8045_v6, %s9288_s24  ;;  %405 = vst.msk [vmem:[#allocation2 + $0x111] sm:$0xff] %vm191_vm0, %v372_v63  ;;  %v9530_v23 = vld [vmem:[#allocation2 + $0x31] sm:$0xff]  ;;  %v8070_v28 = vpack.i.bf16 %v469_v16, %v9517_v15  ;;  %7900 = vmatpush.msra.mxu2 %v287_v47 }
  0x58   : > { %8056 = vrot.lane.b32.xlu0 %v8055_v1, %s9288_s24  ;;  %385 = vst.msk [vmem:[#allocation2 + $0x21] sm:$0xff] %vm191_vm0, %v352_v3  ;;  %v477_v24 = vld [vmem:[#allocation2 + $0x159] sm:$0xff]  ;;  %7901 = vmatpush.msra.mxu3 %v287_v47  ;;  %v9653_v21 = vld [vmem:[#allocation2 + $0x30] sm:$0xff] }
  0x59   : > { %v9519_v17 = vld [vmem:[#allocation2 + $0x79] sm:$0xff]  ;;  %410 = vst.msk [vmem:[#allocation2 + $0x151] sm:$0xff] %vm191_vm0, %v377_v7  ;;  %v8075_v30 = vpack.i.bf16 %v477_v24, %v9530_v23  ;;  %7903 = vmatpush.msra.mxu2 %v286_v51  ;;  %1447 = vmatpush.msra.mxu0 %v288_v44  ;;  %v9660_v24 = vld [vmem:[#allocation2 + $0x62] sm:$0xff] }
  0x5a   : > { %8061 = vrot.lane.b32.xlu1 %v8060_v9, %s9288_s24  ;;  %v9523_v19 = vld [vmem:[#allocation2 + $0xe1] sm:$0xff]  ;;  %397 = vst.msk [vmem:[#allocation2 + $0xb1] sm:$0xff] %vm191_vm0, %v364_v10  ;;  %7904 = vmatpush.msra.mxu3 %v286_v51  ;;  %v9630_v9 = vld [vmem:[#allocation2 + $0x18] sm:$0xff] }
  0x5b   : > { %v8050_v25 = vpack.i.bf16 %v9523_v19, %v9519_v17  ;;  %389 = vst.msk [vmem:[#allocation2 + $0x51] sm:$0xff] %vm191_vm0, %v356_v12  ;;  %v9557_v35 = vld [vmem:[#allocation2 + $0x39] sm:$0xff]  ;;  %7906 = vmatpush.msra.mxu2 %v285_v54  ;;  %7896 = vmatpush.msra.mxu1 %v288_v44 }
  0x5c   : > { %395 = vst.msk [vmem:[#allocation2 + $0x99] sm:$0xff] %vm191_vm0, %v362_v13  ;;  %v478_v36 = vld [vmem:[#allocation2 + $0x169] sm:$0xff]  ;;  %7907 = vmatpush.msra.mxu3 %v285_v54  ;;  %1448 = vmatpush.msra.mxu0 %v287_v47  ;;  %v9615_v2 = vld [vmem:[#allocation2 + $0x32] sm:$0xff]  ;;  %v279_v12 = vld [vmem:[%s13722_s2] sm:$0xff] }
  0x5d   : > { %404 = vst.msk [vmem:[#allocation2 + $0x109] sm:$0xff] %vm191_vm0, %v371_v18  ;;  %v9560_v37 = vld [vmem:[#allocation2 + $0xa9] sm:$0xff]  ;;  %v8085_v43 = vpack.i.bf16 %v478_v36, %v9557_v35  ;;  %7909 = vmatpush.msra.mxu2 %v284_v58  ;;  %7899 = vmatpush.msra.mxu1 %v287_v47  ;;  %v9634_v11 = vld [vmem:[#allocation2 + $0x38] sm:$0xff] }
  0x5e   : > { %388 = vst.msk [vmem:[#allocation2 + $0x49] sm:$0xff] %vm191_vm0, %v355_v20  ;;  %v471_v39 = vld [vmem:[#allocation2 + $0x111] sm:$0xff]  ;;  %7910 = vmatpush.msra.mxu3 %v284_v58  ;;  %1449 = vmatpush.msra.mxu0 %v286_v51  ;;  %v9655_v22 = vld [vmem:[#allocation2 + $0x3a] sm:$0xff] }
  0x5f   : > { %8051 = vrot.lane.b32.xlu2 %v8050_v25, %s9288_s24  ;;  %v9547_v31 = vld [vmem:[#allocation2 + $0x21] sm:$0xff]  ;;  %413 = vst.msk [vmem:[#allocation2 + $0x171] sm:$0xff] %vm191_vm0, %v380_v26  ;;  %v8090_v46 = vpack.i.bf16 %v471_v39, %v9560_v37  ;;  %7912 = vmatpush.msra.mxu2 %v283_v60  ;;  %v326_v16 = vld [vmem:[%s13722_s2 + $0x178] sm:$0xff]  ;;  %v8150_v26 = vpack.i.bf16 %v9519_v17, %v9660_v24  ;;  %v309_v47 = vld [vmem:[%s13722_s2 + $0xf0] sm:$0xff] }
  0x60   : > { %8071 = vrot.lane.b32.xlu0 %v8070_v28, %s9288_s24  ;;  %v476_v32 = vld [vmem:[#allocation2 + $0x151] sm:$0xff]  ;;  %v9585_v53 = vld [vmem:[#allocation2 + $0x1a] sm:$0xff]  ;;  %7913 = vmatpush.msra.mxu3 %v283_v60  ;;  %v9632_v10 = vld [vmem:[#allocation2 + $0x22] sm:$0xff] }
  0x61   : > { %v8065_v40 = vpack.i.bf16 %v476_v32, %v9547_v31  ;;  %v9583_v52 = vld [vmem:[#allocation2 + $0xb1] sm:$0xff]  ;;  %v9607_v63 = vld [vmem:[#allocation2 + $0x20] sm:$0xff]  ;;  %7902 = vmatpush.msra.mxu1 %v286_v51  ;;  %7915 = vmatpush.msra.mxu2 %v282_v0  ;;  %v8110_v14 = vpack.i.bf16 %v9632_v10, %v9630_v9  ;;  %v9676_v17 = vld [vmem:[#allocation2 + $0x68] sm:$0xff] }
  0x62   : > { %8076 = vrot.lane.b32.xlu1 %v8075_v30, %s9288_s24  ;;  %v9591_v55 = vld [vmem:[#allocation2 + $0x51] sm:$0xff]  ;;  %v8100_v57 = vpack.i.bf16 %v9585_v53, %v9583_v52  ;;  %v8115_v6 = vpack.i.bf16 %v9607_v63, %v9557_v35  ;;  %7916 = vmatpush.msra.mxu3 %v282_v0  ;;  %v9671_v28 = vld [vmem:[#allocation2 + $0xc0] sm:$0xff]  ;;  %v8160_v34 = vpack.i.bf16 %v9676_v17, %v9501_v61  ;;  %v324_v51 = vld [vmem:[%s13722_s2 + $0x168] sm:$0xff] }
  0x63   : > { %v9576_v49 = vld [vmem:[#allocation2 + $0x99] sm:$0xff]  ;;  %v8105_v59 = vpack.i.bf16 %v9530_v23, %v9591_v55  ;;  %1450 = vmatpush.msra.mxu0 %v285_v54  ;;  %7905 = vmatpush.msra.mxu1 %v285_v54  ;;  %v8130_v18 = vpack.i.bf16 %v9634_v11, %v9591_v55  ;;  %v325_v61 = vld [vmem:[%s13722_s2 + $0x170] sm:$0xff]  ;;  %v340_v54 = vld [vmem:[%s13722_s2 + $0x1e8] sm:$0xff] }
  0x64   : > { %v9578_v50 = vld [vmem:[#allocation2 + $0x109] sm:$0xff]  ;;  %7918 = vmatpush.msra.mxu2 %v281_v4  ;;  %7919 = vmatpush.msra.mxu3 %v281_v4  ;;  %v342_v35 = vld [vmem:[%s13722_s2 + $0x1f8] sm:$0xff]  ;;  %v416_v55 = vld [vmem:[#allocation2] sm:$0xff] }
  0x65   : > { %v8080_v56 = vpack.i.bf16 %v9578_v50, %v9576_v49  ;;  %v9613_v1 = vld [vmem:[#allocation2 + $0x49] sm:$0xff]  ;;  %1451 = vmatpush.msra.mxu0 %v284_v58  ;;  %7908 = vmatpush.msra.mxu1 %v284_v58  ;;  %v9684_v36 = vld [vmem:[#allocation2 + $0x7a] sm:$0xff] }
  0x66   : > { %v479_v62 = vld [vmem:[#allocation2 + $0x171] sm:$0xff]  ;;  %v8120_v7 = vpack.i.bf16 %v9613_v1, %v9615_v2  ;;  %7921 = vmatpush.msra.mxu2 %v280_v8  ;;  %7922 = vmatpush.msra.mxu3 %v280_v8  ;;  %v9686_v39 = vld [vmem:[#allocation2 + $0x48] sm:$0xff]  ;;  %v8165_v44 = vpack.i.bf16 %v9517_v15, %v9684_v36  ;;  %v323_v58 = vld [vmem:[%s13722_s2 + $0x160] sm:$0xff] }
  0x67   : > { %8066 = vrot.lane.b32.xlu2 %v8065_v40, %s9288_s24  ;;  %v8095_v3 = vpack.i.bf16 %v479_v62, %v9613_v1  ;;  %v9640_v13 = vld [vmem:[#allocation2 + $0x4a] sm:$0xff]  ;;  %1452 = vmatpush.msra.mxu0 %v283_v60  ;;  %v9688_v40 = vld [vmem:[#allocation2 + $0x52] sm:$0xff]  ;;  %v307_v62 = vld [vmem:[%s13722_s2 + $0xe0] sm:$0xff] }
  0x68   : > { %8086 = vrot.lane.b32.xlu0 %v8085_v43, %s9288_s24  ;;  %7911 = vmatpush.msra.mxu1 %v283_v60  ;;  %v8135_v20 = vpack.i.bf16 %v9473_v38, %v9640_v13  ;;  %v9657_v23 = vld [vmem:[#allocation2 + $0x50] sm:$0xff]  ;;  %v8125_v38 = vpack.i.bf16 %v9655_v22, %v9653_v21  ;;  %v310_v42 = vld [vmem:[%s13722_s2 + $0xf8] sm:$0xff] }
  0x69   : > { %7924 = vmatpush.msra.mxu2 %v279_v12  ;;  %7925 = vmatpush.msra.mxu3 %v279_v12  ;;  %v8145_v25 = vpack.i.bf16 %v9657_v23, %v9483_v45  ;;  %v341_v43 = vld [vmem:[%s13722_s2 + $0x1f0] sm:$0xff]  ;;  %v350_v15 = vld [vmem:[%s13722_s2 + $0x238] sm:$0xff] }
  0x6a   : > { %8091 = vrot.lane.b32.xlu1 %v8090_v46, %s9288_s24  ;;  %1453 = vmatpush.msra.mxu0 %v282_v0  ;;  %v8140_v46 = vpack.i.bf16 %v9688_v40, %v9686_v39 }
  0x6b   : > { %7914 = vmatpush.msra.mxu1 %v282_v0  ;;  %1667 = vmatpush.msrb.mxu2 %v326_v16  ;;  %v322_v0 = vld [vmem:[%s13722_s2 + $0x158] sm:$0xff] }
  0x6c   : > { %1454 = vmatpush.msra.mxu0 %v281_v4  ;;  %1780 = vmatpush.msrb.mxu3 %v342_v35  ;;  %v305_v35 = vld [vmem:[%s13722_s2 + $0xd0] sm:$0xff] }
  0x6d   : > { %7917 = vmatpush.msra.mxu1 %v281_v4  ;;  %1668 = vmatpush.msrb.mxu2 %v325_v61 }
  0x6e   : > { %1455 = vmatpush.msra.mxu0 %v280_v8  ;;  %1781 = vmatpush.msrb.mxu3 %v341_v43 }
  0x6f   : > { %8081 = vrot.lane.b32.xlu2 %v8080_v56, %s9288_s24  ;;  %7920 = vmatpush.msra.mxu1 %v280_v8  ;;  %v9717_v56 = vld [vmem:[#allocation2 + $0x128] sm:$0xff]  ;;  %v9740_v8 = vld [vmem:[#allocation2 + $0x80] sm:$0xff] }
  0x70   : > { %8101 = vrot.lane.b32.xlu0 %v8100_v57, %s9288_s24  ;;  %1456 = vmatpush.msra.mxu0 %v279_v12  ;;  %v308_v57 = vld [vmem:[%s13722_s2 + $0xe8] sm:$0xff] }
  0x71   : > { %7923 = vmatpush.msra.mxu1 %v279_v12  ;;  %1669 = vmatpush.msrb.mxu2 %v324_v51  ;;  %v335_v51 = vld [vmem:[%s13722_s2 + $0x1c0] sm:$0xff] }
  0x72   : > { %8106 = vrot.lane.b32.xlu1 %v8105_v59, %s9288_s24  ;;  %1782 = vmatpush.msrb.mxu3 %v340_v54  ;;  %v339_v59 = vld [vmem:[%s13722_s2 + $0x1e0] sm:$0xff] }
  0x73   : > { %1554 = vmatpush.msrb.mxu1 %v310_v42  ;;  %1901 = vmatpush.msrb.mxu0 %v350_v15  ;;  %v320_v42 = vld [vmem:[%s13722_s2 + $0x148] sm:$0xff]  ;;  %v303_v54 = vld [vmem:[%s13722_s2 + $0xc0] sm:$0xff]  ;;  %v318_v15 = vld [vmem:[%s13722_s2 + $0x138] sm:$0xff] }
  0x74   : > { %1670 = vmatpush.msrb.mxu2 %v323_v58  ;;  %1783 = vmatpush.msrb.mxu3 %v339_v59  ;;  %v9804_v58 = vld [vmem:[#allocation2 + $0x98] sm:$0xff] }
  0x75   : > { %1555 = vmatpush.msrb.mxu1 %v309_v47  ;;  %v319_v47 = vld [vmem:[%s13722_s2 + $0x140] sm:$0xff]  ;;  %v8190_v59 = vpack.i.bf16 %v9804_v58, %v9583_v52 }
  0x76   : > { %1671 = vmatpush.msrb.mxu2 %v322_v0 }
  0x77   : > { %8096 = vrot.lane.b32.xlu2 %v8095_v3, %s9288_s24  ;;  %1556 = vmatpush.msrb.mxu1 %v308_v57  ;;  %v338_v3 = vld [vmem:[%s13722_s2 + $0x1d8] sm:$0xff]  ;;  %v347_v57 = vld [vmem:[%s13722_s2 + $0x220] sm:$0xff] }
  0x78   : > { %8116 = vrot.lane.b32.xlu0 %v8115_v6, %s9288_s24  ;;  %1784 = vmatpush.msrb.mxu3 %v338_v3  ;;  %v9814_v3 = vld [vmem:[#allocation2 + $0xc8] sm:$0xff] }
  0x79   : > { %1557 = vmatpush.msrb.mxu1 %v307_v62  ;;  %v317_v62 = vld [vmem:[%s13722_s2 + $0x130] sm:$0xff] }
  0x7a   : > { %8121 = vrot.lane.b32.xlu1 %v8120_v7, %s9288_s24  ;;  %v349_v7 = vld [vmem:[%s13722_s2 + $0x230] sm:$0xff] }
  0x7b   : > { %1902 = vmatpush.msrb.mxu0 %v349_v7 }
  0x7f   : > { %8111 = vrot.lane.b32.xlu2 %v8110_v14, %s9288_s24  ;;  %v8175_v14 = vpack.i.bf16 %v9740_v8, %v9576_v49  ;;  %v9752_v49 = vld [vmem:[#allocation2 + $0x6a] sm:$0xff] }
  0x80   : > { %8131 = vrot.lane.b32.xlu0 %v8130_v18, %s9288_s24 }
  0x82   : > { %8136 = vrot.lane.b32.xlu1 %v8135_v20, %s9288_s24  ;;  %v9747_v20 = vld [vmem:[#allocation2 + $0x60] sm:$0xff] }
  0x87   : > { %8126 = vrot.lane.b32.xlu2 %v8125_v38, %s9288_s24 }
  0x88   : > { %8146 = vrot.lane.b32.xlu0 %v8145_v25, %s9288_s24 }
  0x8a   : > { %8151 = vrot.lane.b32.xlu1 %v8150_v26, %s9288_s24  ;;  %v417_v26 = vld [vmem:[#allocation2 + $0x8] sm:$0xff] }
  0x8f   : > { %8141 = vrot.lane.b32.xlu2 %v8140_v46, %s9288_s24  ;;  %v304_v46 = vld [vmem:[%s13722_s2 + $0xc8] sm:$0xff] }
  0x90   : > { %8161 = vrot.lane.b32.xlu0 %v8160_v34, %s9288_s24  ;;  %v8155_v34 = vpack.i.bf16 %v9752_v49, %v9747_v20 }
  0x91   : > { %v8027_v27 = vpop.permute.xlu0 %8026 }
  0x92   : > { %v8029_v30 = vunpack.i.h.bf16 %v8027_v27  ;;  %v8028_v32 = vunpack.i.l.bf16 %v8027_v27  ;;  %8166 = vrot.lane.b32.xlu1 %v8165_v44, %s9288_s24  ;;  %v442_v27 = vld [vmem:[#allocation2 + $0x138] sm:$0xff]  ;;  %v348_v44 = vld [vmem:[%s13722_s2 + $0x228] sm:$0xff] }
  0x93   : > { %1903 = vmatpush.msrb.mxu0 %v348_v44 }
  0x94   : > { %v1233_v33 = vsel %vm191_vm0, %v9671_v28, %v8028_v32  ;;  %v1241_v45 = vsel %vm191_vm0, %v440_v29, %v8029_v30  ;;  %v9750_v29 = vld [vmem:[#allocation2 + $0x92] sm:$0xff] }
  0x95   : > { %1505 = vmatmul.f32.vlgmr.msra.gmra.mxu2 %v1233_v33  ;;  %1529 = vmatmul.f32.vlgmr.msra.gmra.mxu3 %v1241_v45  ;;  %v306_v30 = vld [vmem:[%s13722_s2 + $0xd8] sm:$0xff]  ;;  %v321_v32 = vld [vmem:[%s13722_s2 + $0x150] sm:$0xff]  ;;  %v8180_v45 = vpack.i.bf16 %v9560_v37, %v9750_v29  ;;  %v336_v37 = vld [vmem:[%s13722_s2 + $0x1c8] sm:$0xff] }
  0x96   : > { %v337_v33 = vld [vmem:[%s13722_s2 + $0x1d0] sm:$0xff]  ;;  %1558 = vmatpush.msrb.mxu1 %v306_v30  ;;  %1672 = vmatpush.msrb.mxu2 %v321_v32  ;;  %v316_v32 = vld [vmem:[%s13722_s2 + $0x128] sm:$0xff] }
  0x97   : > { %1785 = vmatpush.msrb.mxu3 %v337_v33  ;;  %8156 = vrot.lane.b32.xlu2 %v8155_v34, %s9288_s24  ;;  %v301_v30 = vld [vmem:[%s13722_s2 + $0xb0] sm:$0xff]  ;;  %v332_v34 = vld [vmem:[%s13722_s2 + $0x1a8] sm:$0xff] }
  0x98   : > { %8176 = vrot.lane.b32.xlu0 %v8175_v14, %s9288_s24  ;;  %1559 = vmatpush.msrb.mxu1 %v305_v35  ;;  %v9848_v35 = vld [vmem:[#allocation2 + $0xd8] sm:$0xff] }
  0x99   : > { %1673 = vmatpush.msrb.mxu2 %v320_v42  ;;  %1786 = vmatpush.msrb.mxu3 %v336_v37  ;;  %v300_v42 = vld [vmem:[%s13722_s2 + $0xa8] sm:$0xff]  ;;  %v9858_v37 = vld [vmem:[#allocation2 + $0x140] sm:$0xff] }
  0x9a   : > { %8181 = vrot.lane.b32.xlu1 %v8180_v45, %s9288_s24  ;;  %1560 = vmatpush.msrb.mxu1 %v304_v46 }
  0x9b   : > { %1674 = vmatpush.msrb.mxu2 %v319_v47  ;;  %1787 = vmatpush.msrb.mxu3 %v335_v51 }
  0x9c   : > { %1561 = vmatpush.msrb.mxu1 %v303_v54  ;;  %1904 = vmatpush.msrb.mxu0 %v347_v57 }
  0x9d   : > { %1675 = vmatpush.msrb.mxu2 %v318_v15 }
  0x9f   : > { %1676 = vmatpush.msrb.mxu2 %v317_v62  ;;  %v314_v62 = vld [vmem:[%s13722_s2 + $0x118] sm:$0xff] }
  0xa0   : > { %8191 = vrot.lane.b32.xlu0 %v8190_v59, %s9288_s24  ;;  %v331_v59 = vld [vmem:[%s13722_s2 + $0x1a0] sm:$0xff] }
  0xa1   : > { %1677 = vmatpush.msrb.mxu2 %v316_v32 }
  0xaf   : > { %v8037_v60 = vpop.permute.xlu1 %8036 }
  0xb0   : > { %v8039_v4 = vunpack.i.h.bf16 %v8037_v60  ;;  %v8038_v6 = vunpack.i.l.bf16 %v8037_v60  ;;  %v302_v60 = vld [vmem:[%s13722_s2 + $0xb8] sm:$0xff] }
  0xb1   : > { %v8047_v12 = vpop.permute.xlu2 %8046  ;;  %1562 = vmatpush.msrb.mxu1 %v302_v60  ;;  %v299_v60 = vld [vmem:[%s13722_s2 + $0xa0] sm:$0xff] }
  0xb2   : > { %v1217_v16 = vsel %vm191_vm0, %v416_v55, %v8038_v6  ;;  %v1242_v18 = vsel %vm191_vm0, %v9717_v56, %v8039_v4  ;;  %v8049_v38 = vunpack.i.h.bf16 %v8047_v12  ;;  %v8048_v25 = vunpack.i.l.bf16 %v8047_v12  ;;  %v334_v55 = vld [vmem:[%s13722_s2 + $0x1b8] sm:$0xff] }
  0xb3   : > { %1457 = vmatmul.f32.vlgmr.msra.gmra.mxu0 %v1217_v16  ;;  %1532 = vmatmul.f32.gmra.mxu3 %v1242_v18  ;;  %v9823_v16 = vld [vmem:[#allocation2 + $0x78] sm:$0xff]  ;;  %v9825_v18 = vld [vmem:[#allocation2 + $0xaa] sm:$0xff] }
  0xb4   : > { %v1218_v61 = vsel %vm191_vm0, %v417_v26, %v8048_v25  ;;  %v1243_v43 = vsel %vm191_vm0, %v442_v27, %v8049_v38  ;;  %1788 = vmatpush.msrb.mxu3 %v334_v55  ;;  %v9827_v38 = vld [vmem:[#allocation2 + $0x82] sm:$0xff]  ;;  %v333_v25 = vld [vmem:[%s13722_s2 + $0x1b0] sm:$0xff]  ;;  %v8195_v26 = vpack.i.bf16 %v9363_v5, %v9825_v18  ;;  %1563 = vmatpush.msrb.mxu1 %v301_v30  ;;  %v346_v5 = vld [vmem:[%s13722_s2 + $0x218] sm:$0xff] }
  0xb5   : > { %v8170_v27 = vpack.i.bf16 %v9827_v38, %v9823_v16  ;;  %1905 = vmatpush.msrb.mxu0 %v346_v5 }
  0xb6   : > { %1789 = vmatpush.msrb.mxu3 %v333_v25  ;;  %8196 = vrot.lane.b32.xlu1 %v8195_v26, %s9288_s24  ;;  %v9889_v25 = vld [vmem:[#allocation2 + $0xb0] sm:$0xff] }
  0xb7   : > { %8171 = vrot.lane.b32.xlu2 %v8170_v27, %s9288_s24  ;;  %1564 = vmatpush.msrb.mxu1 %v300_v42  ;;  %v313_v26 = vld [vmem:[%s13722_s2 + $0x110] sm:$0xff]  ;;  %v8205_v30 = vpack.i.bf16 %v9889_v25, %v9477_v41 }
  0xb8   : > { %1790 = vmatpush.msrb.mxu3 %v332_v34  ;;  %v9897_v27 = vld [vmem:[#allocation2 + $0x150] sm:$0xff] }
  0xb9   : > { %v9821_v14 = vpop.permute.xlu2 %8051  ;;  %1565 = vmatpush.msrb.mxu1 %v299_v60  ;;  %8206 = vrot.lane.b32.xlu0 %v8205_v30, %s9288_s24  ;;  %v9910_v41 = vld [vmem:[#allocation2 + $0x90] sm:$0xff]  ;;  %v327_v30 = vld [vmem:[%s13722_s2 + $0x180] sm:$0xff] }
  0xba   : > { %1791 = vmatpush.msrb.mxu3 %v331_v59 }
  0xbb   : > { %1460 = vmatmul.f32.gmra.mxu0 %v1218_v61  ;;  %1535 = vmatmul.f32.gmra.mxu3 %v1243_v43  ;;  %v315_v61 = vld [vmem:[%s13722_s2 + $0x120] sm:$0xff] }
  0xbc   : > { %1678 = vmatpush.msrb.mxu2 %v315_v61  ;;  %v9912_v61 = vld [vmem:[#allocation2 + $0xc2] sm:$0xff] }
  0xbe   : > { %1679 = vmatpush.msrb.mxu2 %v314_v62  ;;  %v296_v62 = vld [vmem:[%s13722_s2 + $0x88] sm:$0xff] }
  0xc0   : > { %1680 = vmatpush.msrb.mxu2 %v313_v26 }
  0xc1   : > { %v8067_v57 = vpop.permute.xlu2 %8066 }
  0xc2   : > { %v8032_v0 = vpop.permute.xlu0 %8031 }
  0xc3   : > { %v8034_v4 = vunpack.i.h.bf16 %v8032_v0  ;;  %v8033_v6 = vunpack.i.l.bf16 %v8032_v0  ;;  %v8054_v0 = vunpack.i.h.bf16 %v9821_v14 }
  0xc4   : > { %v8042_v7 = vpop.permute.xlu1 %8041 }
  0xc5   : > { %v1225_v52 = vsel %vm191_vm0, %v9747_v20, %v8033_v6  ;;  %v1234_v12 = vsel %vm191_vm0, %v9814_v3, %v8034_v4  ;;  %v8044_v33 = vunpack.i.h.bf16 %v8042_v7  ;;  %v8043_v45 = vunpack.i.l.bf16 %v8042_v7  ;;  %v330_v6 = vld [vmem:[%s13722_s2 + $0x198] sm:$0xff]  ;;  %v345_v7 = vld [vmem:[%s13722_s2 + $0x210] sm:$0xff] }
  0xc6   : > { %1481 = vmatmul.f32.vlgmr.msra.gmra.mxu1 %v1225_v52  ;;  %1508 = vmatmul.f32.gmra.mxu2 %v1234_v12  ;;  %v8053_v4 = vunpack.i.l.bf16 %v9821_v14  ;;  %v8069_v52 = vunpack.i.h.bf16 %v8067_v57  ;;  %v8068_v12 = vunpack.i.l.bf16 %v8067_v57  ;;  %v298_v14 = vld [vmem:[%s13722_s2 + $0x98] sm:$0xff]  ;;  %v9934_v57 = vld [vmem:[#allocation2 + $0xf0] sm:$0xff] }
  0xc7   : > { %v1226_v44 = vsel %vm191_vm0, %v9676_v17, %v8043_v45  ;;  %v1235_v46 = vsel %vm191_vm0, %v9848_v35, %v8044_v33  ;;  %1906 = vmatpush.msrb.mxu0 %v345_v7  ;;  %1792 = vmatpush.msrb.mxu3 %v330_v6 }
  0xc8   : > { %1566 = vmatpush.msrb.mxu1 %v298_v14  ;;  %v1227_v32 = vsel %vm191_vm0, %v9823_v16, %v8053_v4  ;;  %v1245_v45 = vsel %vm191_vm0, %v9897_v27, %v8069_v52  ;;  %v1220_v34 = vsel %vm191_vm0, %v9607_v63, %v8068_v12  ;;  %v311_v4 = vld [vmem:[%s13722_s2 + $0x100] sm:$0xff] }
  0xc9   : > { %v8082_v14 = vpop.permute.xlu2 %8081 }
  0xca   : > { %v8057_v43 = vpop.permute.xlu0 %8056 }
  0xcb   : > { %v8059_v47 = vunpack.i.h.bf16 %v8057_v43  ;;  %v8058_v51 = vunpack.i.l.bf16 %v8057_v43  ;;  %v9914_v43 = vld [vmem:[#allocation2 + $0x9a] sm:$0xff] }
  0xcc   : > { %v9864_v54 = vpop.permute.xlu1 %8061  ;;  %v8185_v63 = vpack.i.bf16 %v9914_v43, %v9910_v41 }
  0xcd   : > { %v1244_v15 = vsel %vm191_vm0, %v9858_v37, %v8059_v47  ;;  %v1219_v55 = vsel %vm191_vm0, %v9630_v9, %v8058_v51  ;;  %v9881_v9 = vld [vmem:[#allocation2 + $0xe0] sm:$0xff]  ;;  %v297_v47 = vld [vmem:[%s13722_s2 + $0x90] sm:$0xff]  ;;  %v8064_v51 = vunpack.i.h.bf16 %v9864_v54 }
  0xce   : > { %1484 = vmatmul.f32.gmra.mxu1 %v1226_v44  ;;  %1511 = vmatmul.f32.gmra.mxu2 %v1235_v46  ;;  %v1236_v33 = vsel %vm191_vm0, %v9881_v9, %v8054_v0  ;;  %v329_v44 = vld [vmem:[%s13722_s2 + $0x190] sm:$0xff]  ;;  %v8210_v46 = vpack.i.bf16 %v9487_v48, %v9912_v61  ;;  %v328_v48 = vld [vmem:[%s13722_s2 + $0x188] sm:$0xff]  ;;  %v9943_v0 = vld [vmem:[#allocation2 + $0x158] sm:$0xff] }
  0xcf   : > { %1538 = vmatmul.f32.gmra.mxu3 %v1244_v15  ;;  %1463 = vmatmul.f32.gmra.mxu0 %v1219_v55  ;;  %v8063_v15 = vunpack.i.l.bf16 %v9864_v54  ;;  %v312_v55 = vld [vmem:[%s13722_s2 + $0x108] sm:$0xff]  ;;  %v1237_v7 = vsel %vm191_vm0, %v9934_v57, %v8064_v51 }
  0xd0   : > { %1793 = vmatpush.msrb.mxu3 %v329_v44  ;;  %8211 = vrot.lane.b32.xlu1 %v8210_v46, %s9288_s24  ;;  %v344_v54 = vld [vmem:[%s13722_s2 + $0x208] sm:$0xff]  ;;  %v9968_v44 = vld [vmem:[#allocation2 + $0xf8] sm:$0xff] }
  0xd1   : > { %8186 = vrot.lane.b32.xlu2 %v8185_v63, %s9288_s24  ;;  %1567 = vmatpush.msrb.mxu1 %v297_v47  ;;  %v1228_v6 = vsel %vm191_vm0, %v9740_v8, %v8063_v15  ;;  %v9970_v47 = vld [vmem:[#allocation2 + $0x168] sm:$0xff] }
  0xd2   : > { %v8072_v5 = vpop.permute.xlu0 %8071  ;;  %1681 = vmatpush.msrb.mxu2 %v312_v55  ;;  %1794 = vmatpush.msrb.mxu3 %v328_v48  ;;  %v9981_v15 = vld [vmem:[#allocation2 + $0xa8] sm:$0xff]  ;;  %v8097_v48 = vpop.permute.xlu2 %8096 }
  0xd3   : > { %1907 = vmatpush.msrb.mxu0 %v344_v54  ;;  %1568 = vmatpush.msrb.mxu1 %v296_v62  ;;  %v9987_v54 = vld [vmem:[#allocation2 + $0xb2] sm:$0xff] }
  0xd4   : > { %v8077_v42 = vpop.permute.xlu1 %8076  ;;  %1682 = vmatpush.msrb.mxu2 %v311_v4  ;;  %1795 = vmatpush.msrb.mxu3 %v327_v30  ;;  %v8200_v4 = vpack.i.bf16 %v9987_v54, %v9981_v15  ;;  %v9997_v30 = vld [vmem:[#allocation2 + $0x170] sm:$0xff] }
  0xd5   : > { %v8079_v59 = vunpack.i.h.bf16 %v8077_v42  ;;  %v8078_v60 = vunpack.i.l.bf16 %v8077_v42  ;;  %v8073_v42 = vunpack.i.l.bf16 %v8072_v5 }
  0xd6   : > { %1487 = vmatmul.f32.gmra.mxu1 %v1227_v32  ;;  %1514 = vmatmul.f32.gmra.mxu2 %v1236_v33  ;;  %v295_v32 = vld [vmem:[%s13722_s2 + $0x80] sm:$0xff] }
  0xd7   : > { %1541 = vmatmul.f32.gmra.mxu3 %v1245_v45  ;;  %1466 = vmatmul.f32.gmra.mxu0 %v1220_v34  ;;  %v1246_v52 = vsel %vm191_vm0, %v9943_v0, %v8079_v59  ;;  %v1221_v12 = vsel %vm191_vm0, %v9653_v21, %v8078_v60  ;;  %v343_v33 = vld [vmem:[%s13722_s2 + $0x200] sm:$0xff]  ;;  %v8220_v45 = vpack.i.bf16 %v9814_v3, %v9523_v19  ;;  %v8074_v34 = vunpack.i.h.bf16 %v8072_v5  ;;  %v9985_v60 = vld [vmem:[#allocation2 + $0xf1] sm:$0xff] }
  0xd8   : > { %1569 = vmatpush.msrb.mxu1 %v295_v32  ;;  %1908 = vmatpush.msrb.mxu0 %v343_v33  ;;  %v1229_v51 = vsel %vm191_vm0, %v9910_v41, %v8073_v42  ;;  %v9983_v59 = vld [vmem:[#allocation2 + $0xda] sm:$0xff] }
  0xd9   : > { %8221 = vrot.lane.b32.xlu0 %v8220_v45, %s9288_s24  ;;  %v1238_v19 = vsel %vm191_vm0, %v9968_v44, %v8074_v34  ;;  %v8225_v62 = vpack.i.bf16 %v9985_v60, %v9983_v59  ;;  %8201 = vrot.lane.b32.xlu2 %v8200_v4, %s9288_s24 }
  0xda   : > { %v8087_v26 = vpop.permute.xlu0 %8086 }
  0xdb   : > { %v8089_v46 = vunpack.i.h.bf16 %v8087_v26  ;;  %v8088_v63 = vunpack.i.l.bf16 %v8087_v26  ;;  %v8098_v26 = vunpack.i.l.bf16 %v8097_v48  ;;  %8226 = vrot.lane.b32.xlu1 %v8225_v62, %s9288_s24 }
  0xdc   : > { %v8092_v55 = vpop.permute.xlu1 %8091 }
  0xdd   : > { %v1247_v3 = vsel %vm191_vm0, %v9970_v47, %v8089_v46  ;;  %v1222_v5 = vsel %vm191_vm0, %v9634_v11, %v8088_v63  ;;  %v1223_v45 = vsel %vm191_vm0, %v9686_v39, %v8098_v26  ;;  %v10007_v46 = vld [vmem:[#allocation2 + $0xf9] sm:$0xff]  ;;  %v8094_v63 = vunpack.i.h.bf16 %v8092_v55  ;;  %v10024_v26 = vld [vmem:[#allocation2 + $0xca] sm:$0xff] }
  0xde   : > { %1490 = vmatmul.f32.gmra.mxu1 %v1228_v6  ;;  %1517 = vmatmul.f32.gmra.mxu2 %v1237_v7  ;;  %v8084_v6 = vunpack.i.h.bf16 %v8082_v14  ;;  %v8083_v7 = vunpack.i.l.bf16 %v8082_v14 }
  0xdf   : > { %1544 = vmatmul.f32.gmra.mxu3 %v1246_v52  ;;  %1469 = vmatmul.f32.gmra.mxu0 %v1221_v12  ;;  %v9993_v52 = vld [vmem:[#allocation2 + $0x108] sm:$0xff]  ;;  %v8099_v12 = vunpack.i.h.bf16 %v8097_v48  ;;  %v8235_v48 = vpack.i.bf16 %v9881_v9, %v10007_v46 }
  0xe0   : > { %v1230_v32 = vsel %vm191_vm0, %v9804_v58, %v8083_v7  ;;  %v1239_v33 = vsel %vm191_vm0, %v9993_v52, %v8084_v6 }
  0xe1   : > { %v1248_v14 = vsel %vm191_vm0, %v9997_v30, %v8099_v12  ;;  %8236 = vrot.lane.b32.xlu0 %v8235_v48, %s9288_s24  ;;  %v10022_v12 = vld [vmem:[#allocation2 + $0xf2] sm:$0xff] }
  0xe2   : > { %v8102_v34 = vpop.permute.xlu0 %8101  ;;  %v8240_v9 = vpack.i.bf16 %v9578_v50, %v10022_v12 }
  0xe4   : > { %v8107_v42 = vpop.permute.xlu1 %8106  ;;  %8241 = vrot.lane.b32.xlu1 %v8240_v9, %s9288_s24 }
  0xe6   : > { %1493 = vmatmul.f32.gmra.mxu1 %v1229_v51  ;;  %1520 = vmatmul.f32.gmra.mxu2 %v1238_v19  ;;  %v8093_v51 = vunpack.i.l.bf16 %v8092_v55  ;;  %v10009_v19 = vld [vmem:[#allocation2 + $0x110] sm:$0xff] }
  0xe7   : > { %1547 = vmatmul.f32.gmra.mxu3 %v1247_v3  ;;  %1472 = vmatmul.f32.gmra.mxu0 %v1222_v5  ;;  %v8109_v3 = vunpack.i.h.bf16 %v8107_v42  ;;  %v8108_v5 = vunpack.i.l.bf16 %v8107_v42  ;;  %v1240_v4 = vsel %vm191_vm0, %v10009_v19, %v8094_v63 }
  0xe8   : > { %v1231_v62 = vsel %vm191_vm0, %v9981_v15, %v8093_v51  ;;  %v8112_v51 = vpop.permute.xlu2 %8111 }
  0xe9   : > { %v1313_v55 = vsel %vm191_vm0, %v9653_v21, %v8109_v3  ;;  %v1224_v6 = vsel %vm191_vm0, %v9657_v23, %v8108_v5  ;;  %v544_v21 = vld [vmem:[#allocation2 + $0x19] sm:$0xff]  ;;  %v8113_v3 = vunpack.i.l.bf16 %v8112_v51 }
  0xea   : > { %v8117_v7 = vpop.permute.xlu0 %8116 }
  0xec   : > { %v8122_v5 = vpop.permute.xlu1 %8121 }
  0xee   : > { %1496 = vmatmul.f32.gmra.mxu1 %v1230_v32  ;;  %1523 = vmatmul.f32.gmra.mxu2 %v1239_v33  ;;  %v8215_v32 = vpack.i.bf16 %v10024_v26, %v9671_v28  ;;  %v8104_v33 = vunpack.i.h.bf16 %v8102_v34  ;;  %v10037_v28 = vld [vmem:[#allocation2 + $0x111] sm:$0xff] }
  0xef   : > { %1550 = vmatmul.f32.gmra.mxu3 %v1248_v14  ;;  %1475 = vmatmul.f32.gmra.mxu0 %v1223_v45  ;;  %v8103_v14 = vunpack.i.l.bf16 %v8102_v34  ;;  %v8118_v45 = vunpack.i.l.bf16 %v8117_v7  ;;  %v8114_v34 = vunpack.i.h.bf16 %v8112_v51  ;;  %v8250_v48 = vpack.i.bf16 %v9968_v44, %v10037_v28 }
  0xf0   : > { %8216 = vrot.lane.b32.xlu2 %v8215_v32, %s9288_s24  ;;  %v1281_v63 = vsel %vm191_vm0, %v544_v21, %v8104_v33  ;;  %v10049_v32 = vld [vmem:[#allocation2 + $0x10a] sm:$0xff]  ;;  %v10051_v33 = vld [vmem:[#allocation2 + $0x121] sm:$0xff]  ;;  %v8127_v51 = vpop.permute.xlu2 %8126 }
  0xf1   : > { %v1232_v42 = vsel %vm191_vm0, %v9889_v25, %v8103_v14  ;;  %v1314_v50 = vsel %vm191_vm0, %v9634_v11, %v8118_v45  ;;  %8251 = vrot.lane.b32.xlu0 %v8250_v48, %s9288_s24  ;;  %v8255_v44 = vpack.i.bf16 %v10051_v33, %v10049_v32  ;;  %v8123_v14 = vunpack.i.l.bf16 %v8122_v5 }
  0xf2   : > { %v8132_v9 = vpop.permute.xlu0 %8131  ;;  %v8119_v45 = vunpack.i.h.bf16 %v8117_v7 }
  0xf3   : > { %v8133_v21 = vunpack.i.l.bf16 %v8132_v9  ;;  %8256 = vrot.lane.b32.xlu1 %v8255_v44, %s9288_s24  ;;  %v10079_v44 = vld [vmem:[#allocation2 + $0x122] sm:$0xff] }
  0xf4   : > { %v8137_v48 = vpop.permute.xlu1 %8136 }
  0xf6   : > { %1499 = vmatmul.f32.gmra.mxu1 %v1231_v62  ;;  %1526 = vmatmul.f32.gmra.mxu2 %v1240_v4  ;;  %v480_v62 = vld [vmem:[#allocation2 + $0x2] sm:$0xff]  ;;  %v8124_v4 = vunpack.i.h.bf16 %v8122_v5  ;;  %v8128_v5 = vunpack.i.l.bf16 %v8127_v51 }
  0xf7   : > { %1796 = vmatmul.f32.vlgmr.msrb.gmra.mxu3 %v1313_v55  ;;  %1478 = vmatmul.f32.gmra.mxu0 %v1224_v6  ;;  %v1249_v11 = vsel %vm191_vm0, %v480_v62, %v8113_v3  ;;  %v1282_v55 = vsel %vm191_vm0, %v9547_v31, %v8114_v34  ;;  %v10067_v3 = vld [vmem:[#allocation2 + $0x129] sm:$0xff]  ;;  %v547_v62 = vld [vmem:[#allocation2 + $0x39] sm:$0xff] }
  0xf8   : > { %v1315_v6 = vsel %vm191_vm0, %v9686_v39, %v8124_v4  ;;  %v546_v39 = vld [vmem:[#allocation2 + $0x31] sm:$0xff]  ;;  %v8265_v7 = vpack.i.bf16 %v10009_v19, %v10067_v3  ;;  %v8139_v4 = vunpack.i.h.bf16 %v8137_v48 }
  0xfa   : > { %8266 = vrot.lane.b32.xlu0 %v8265_v7, %s9288_s24 }
  0xfe   : > { %1502 = vmatmul.f32.gmra.mxu1 %v1232_v42  ;;  %1683 = vmatmul.f32.vlgmr.msrb.gmra.mxu2 %v1281_v63  ;;  %v481_v42 = vld [vmem:[#allocation2 + $0xa] sm:$0xff]  ;;  %v1283_v63 = vsel %vm191_vm0, %v546_v39, %v8123_v14  ;;  %v10081_v14 = vld [vmem:[#allocation2 + $0x139] sm:$0xff]  ;;  %v8134_v39 = vunpack.i.h.bf16 %v8132_v9 }
  0xff   : > { %1799 = vmatmul.f32.gmra.mxu3 %v1314_v50  ;;  %7529 = vmatmul.msk.f32.vlgmr.msrb.gmra.mxu0 %vm191_vm0, %v9615_v2  ;;  %v10053_v2 = vld [vmem:[#allocation2 + $0xe2] sm:$0xff]  ;;  %v1316_v50 = vsel %vm191_vm0, %v9657_v23, %v8133_v21  ;;  %v1250_v34 = vsel %vm191_vm0, %v481_v42, %v8119_v45  ;;  %v1251_v23 = vsel %vm191_vm0, %v9585_v53, %v8128_v5  ;;  %v8142_v45 = vpop.permute.xlu2 %8141  ;;  %v484_v9 = vld [vmem:[#allocation2 + $0x32] sm:$0xff] }
 0x100   : > { %v8230_v31 = vpack.i.bf16 %v10053_v2, %v9848_v35  ;;  %v8129_v35 = vunpack.i.h.bf16 %v8127_v51  ;;  %v8270_v19 = vpack.i.bf16 %v10081_v14, %v10079_v44  ;;  %v8144_v51 = vunpack.i.h.bf16 %v8142_v45 }
 0x102   : > { %8231 = vrot.lane.b32.xlu2 %v8230_v31, %s9288_s24  ;;  %v8138_v31 = vunpack.i.l.bf16 %v8137_v48  ;;  %8271 = vrot.lane.b32.xlu1 %v8270_v19, %s9288_s24 }
 0x104   : > { %v1285_v21 = vsel %vm191_vm0, %v9613_v1, %v8138_v31  ;;  %v10101_v1 = vld [vmem:[#allocation2 + $0x141] sm:$0xff] }
 0x106   : > { %1570 = vmatmul.f32.vlgmr.msrb.gmra.mxu1 %v1249_v11  ;;  %1686 = vmatmul.f32.gmra.mxu2 %v1282_v55  ;;  %v1284_v11 = vsel %vm191_vm0, %v547_v62, %v8129_v35  ;;  %v1317_v55 = vsel %vm191_vm0, %v9747_v20, %v8139_v4  ;;  %v10110_v62 = vld [vmem:[#allocation2 + $0x13a] sm:$0xff]  ;;  %v10114_v4 = vld [vmem:[#allocation2 + $0x112] sm:$0xff] }
 0x107   : > { %1802 = vmatmul.f32.gmra.mxu3 %v1315_v6  ;;  %7530 = vmatmul.msk.f32.gmra.mxu0 %vm191_vm0, %v9655_v22  ;;  %v8147_v6 = vpop.permute.xlu0 %8146 }
 0x108   : > { %v8148_v20 = vunpack.i.l.bf16 %v8147_v6  ;;  %v8149_v19 = vunpack.i.h.bf16 %v8147_v6  ;;  %v551_v6 = vld [vmem:[#allocation2 + $0x69] sm:$0xff] }
 0x10a   : > { %v1318_v42 = vsel %vm191_vm0, %v9676_v17, %v8148_v20  ;;  %v8280_v17 = vpack.i.bf16 %v9717_v56, %v10101_v1 }
 0x10c   : > { %8281 = vrot.lane.b32.xlu0 %v8280_v17, %s9288_s24  ;;  %v10146_v17 = vld [vmem:[#allocation2 + $0x120] sm:$0xff] }
 0x10e   : > { %1573 = vmatmul.f32.gmra.mxu1 %v1250_v34  ;;  %1689 = vmatmul.f32.gmra.mxu2 %v1283_v63  ;;  %v1252_v63 = vsel %vm191_vm0, %v9632_v10, %v8134_v39  ;;  %v549_v34 = vld [vmem:[#allocation2 + $0x51] sm:$0xff] }
 0x10f   : > { %1805 = vmatmul.f32.gmra.mxu3 %v1316_v50  ;;  %7531 = vmatmul.msk.f32.gmra.mxu0 %vm191_vm0, %v9640_v13  ;;  %v10083_v13 = vld [vmem:[#allocation2 + $0xfa] sm:$0xff]  ;;  %v8152_v50 = vpop.permute.xlu1 %8151  ;;  %v1286_v10 = vsel %vm191_vm0, %v549_v34, %v8144_v51  ;;  %v8162_v7 = vpop.permute.xlu0 %8161  ;;  %v10142_v34 = vld [vmem:[#allocation2 + $0x152] sm:$0xff] }
 0x110   : > { %v8245_v53 = vpack.i.bf16 %v10083_v13, %v9934_v57  ;;  %v8143_v57 = vunpack.i.l.bf16 %v8142_v45  ;;  %v8154_v35 = vunpack.i.h.bf16 %v8152_v50  ;;  %v10131_v51 = vld [vmem:[#allocation2 + $0x159] sm:$0xff] }
 0x112   : > { %8246 = vrot.lane.b32.xlu2 %v8245_v53, %s9288_s24  ;;  %v1253_v5 = vsel %vm191_vm0, %v484_v9, %v8143_v57  ;;  %v1319_v48 = vsel %vm191_vm0, %v9823_v16, %v8154_v35  ;;  %v550_v16 = vld [vmem:[#allocation2 + $0x61] sm:$0xff]  ;;  %v8157_v53 = vpop.permute.xlu2 %8156  ;;  %v10144_v35 = vld [vmem:[#allocation2 + $0x169] sm:$0xff] }
 0x113   : > { %v8159_v39 = vunpack.i.h.bf16 %v8157_v53 }
 0x116   : > { %1576 = vmatmul.f32.gmra.mxu1 %v1251_v23  ;;  %1692 = vmatmul.f32.gmra.mxu2 %v1284_v11  ;;  %v8260_v23 = vpack.i.bf16 %v10114_v4, %v9993_v52  ;;  %v8153_v11 = vunpack.i.l.bf16 %v8152_v50  ;;  %v1254_v52 = vsel %vm191_vm0, %v9655_v22, %v8149_v19  ;;  %v1288_v22 = vsel %vm191_vm0, %v551_v6, %v8159_v39  ;;  %v277_v19 = vld [vmem:[%s9329_s17 + $0xf0] sm:$0xff]  ;;  %v553_v6 = vld [vmem:[#allocation2 + $0x81] sm:$0xff] }
 0x117   : > { %1808 = vmatmul.f32.gmra.mxu3 %v1317_v55  ;;  %7532 = vmatmul.msk.f32.gmra.mxu0 %vm191_vm0, %v9688_v40  ;;  %v8163_v55 = vunpack.i.l.bf16 %v8162_v7  ;;  %v8167_v45 = vpop.permute.xlu1 %8166  ;;  %v10140_v9 = vpop.permute.xlu0 %8176 }
 0x118   : > { %v1287_v31 = vsel %vm191_vm0, %v550_v16, %v8153_v11  ;;  %v8164_v11 = vunpack.i.h.bf16 %v8162_v7  ;;  %v10170_v7 = vpop.f32.mrf.mxu2 }
 0x119   : > { %v1320_v20 = vsel %vm191_vm0, %v9740_v8, %v8163_v55  ;;  %v8295_v8 = vpack.i.bf16 %v9858_v37, %v10131_v51  ;;  %v10148_v37 = vpop.f32.mrf.mxu3  ;;  %13764 = vst [vmem:[#allocation5_spill] sm:$0xff] %v10170_v7 }
 0x11a   : > { %8261 = vrot.lane.b32.xlu2 %v8260_v23, %s9288_s24  ;;  %13763 = vst [vmem:[#allocation4_spill] sm:$0xff] %v10148_v37  ;;  %v8178_v23 = vunpack.i.l.bf16 %v10140_v9 }
 0x11b   : > { %8296 = vrot.lane.b32.xlu0 %v8295_v8, %s9288_s24  ;;  %v10176_v8 = vld [vmem:[#allocation2 + $0x171] sm:$0xff] }
 0x11c   : > { %13766 = vst [vmem:[#allocation7_spill] sm:$0xff] %v10176_v8 }
 0x11e   : > { %1579 = vmatmul.f32.gmra.mxu1 %v1252_v63  ;;  %1695 = vmatmul.f32.gmra.mxu2 %v1285_v21  ;;  %v8158_v21 = vunpack.i.l.bf16 %v8157_v53  ;;  %v8169_v63 = vunpack.i.h.bf16 %v8167_v45  ;;  %v1322_v53 = vsel %vm191_vm0, %v9804_v58, %v8178_v23 }
 0x11f   : > { %1811 = vmatmul.f32.gmra.mxu3 %v1318_v42  ;;  %7533 = vmatmul.msk.f32.gmra.mxu0 %vm191_vm0, %v9660_v24  ;;  %v10112_v24 = vld [vmem:[#allocation2 + $0x151] sm:$0xff] }
 0x120   : > { %v8285_v56 = vpack.i.bf16 %v10112_v24, %v10110_v62  ;;  %v486_v42 = vld [vmem:[#allocation2 + $0x4a] sm:$0xff]  ;;  %v1321_v50 = vsel %vm191_vm0, %v9910_v41, %v8169_v63  ;;  %v8300_v41 = vpack.i.bf16 %v10144_v35, %v10142_v34 }
 0x121   : > { %v1255_v57 = vsel %vm191_vm0, %v486_v42, %v8158_v21  ;;  %v488_v42 = vld [vmem:[#allocation2 + $0x62] sm:$0xff] }
 0x122   : > { %8286 = vrot.lane.b32.xlu1 %v8285_v56, %s9288_s24  ;;  %v552_v56 = vld [vmem:[#allocation2 + $0x79] sm:$0xff] }
 0x126   : > { %1582 = vmatmul.f32.gmra.mxu1 %v1253_v5  ;;  %1698 = vmatmul.f32.gmra.mxu2 %v1286_v10  ;;  %v10150_v5 = vld [vmem:[#allocation2 + $0x12a] sm:$0xff]  ;;  %v8168_v10 = vunpack.i.l.bf16 %v8167_v45  ;;  %v8182_v45 = vpop.permute.xlu1 %8181 }
 0x127   : > { %1814 = vmatmul.f32.gmra.mxu3 %v1319_v48  ;;  %7534 = vmatmul.msk.f32.gmra.mxu0 %vm191_vm0, %v9752_v49  ;;  %v8275_v48 = vpack.i.bf16 %v10150_v5, %v10146_v17  ;;  %v8184_v63 = vunpack.i.h.bf16 %v8182_v45 }
 0x128   : > { %v1289_v55 = vsel %vm191_vm0, %v552_v56, %v8168_v10  ;;  %v10191_v56 = vld [vmem:[#allocation2 + $0x16a] sm:$0xff] }
 0x129   : > { %8276 = vrot.lane.b32.xlu2 %v8275_v48, %s9288_s24  ;;  %v10189_v48 = vpop.permute.xlu0 %8191 }
 0x12a   : > { %8301 = vrot.lane.b32.xlu1 %v8300_v41, %s9288_s24  ;;  %v1323_v41 = vsel %vm191_vm0, %v9981_v15, %v8184_v63 }
 0x12e   : > { %1585 = vmatmul.f32.gmra.mxu1 %v1254_v52  ;;  %1701 = vmatmul.f32.gmra.mxu2 %v1287_v31  ;;  %v8172_v31 = vpop.permute.xlu2 %8171  ;;  %v1256_v52 = vsel %vm191_vm0, %v9688_v40, %v8164_v11  ;;  %v8310_v40 = vpack.i.bf16 %v9943_v0, %v10176_v8  ;;  %v10195_v0 = vld [vmem:[#allocation2 + $0x138] sm:$0xff] }
 0x12f   : > { %1817 = vmatmul.f32.gmra.mxu3 %v1320_v20  ;;  %7535 = vmatmul.msk.f32.gmra.mxu0 %vm191_vm0, %v9684_v36  ;;  %v381_v20 = vmax.f32 %v277_v19, 0.0  ;;  %v8174_v39 = vunpack.i.h.bf16 %v8172_v31  ;;  %v8173_v21 = vunpack.i.l.bf16 %v8172_v31  ;;  %v8183_v19 = vunpack.i.l.bf16 %v8182_v45  ;;  %v278_v31 = vld [vmem:[%s9329_s17 + $0xf8] sm:$0xff]  ;;  %s10635_s17 = smov 0  }
 0x130   : > { %v10161_v16 = vpop.f32.mrf.mxu0  ;;  %8311 = vrot.lane.b32.xlu0 %v8310_v40, %s9288_s24 }
 0x131   : > { %414 = vst.msk [vmem:[#allocation2 + $0x181] sm:$0xff] %vm191_vm0, %v381_v20  ;;  %v8193_v20 = vunpack.i.l.bf16 %v10189_v48 }
 0x136   : > { %1588 = vmatmul.f32.gmra.mxu1 %v1255_v57  ;;  %1704 = vmatmul.f32.gmra.mxu2 %v1288_v22  ;;  %v10174_v58 = vpop.f32.mrf.mxu3  ;;  %v1257_v22 = vsel %vm191_vm0, %v488_v42, %v8173_v21  ;;  %v8187_v63 = vpop.permute.xlu2 %8186 }
 0x137   : > { %1820 = vmatmul.f32.gmra.mxu3 %v1321_v50  ;;  %7536 = vmatmul.msk.f32.gmra.mxu0 %vm191_vm0, %v9827_v38  ;;  %13765 = vst [vmem:[#allocation6_spill] sm:$0xff] %v10174_v58  ;;  %v1290_v50 = vsel %vm191_vm0, %v553_v6, %v8174_v39  ;;  %v8179_v39 = vunpack.i.h.bf16 %v10140_v9  ;;  %v10247_v58 = vld [vmem:[#allocation2 + $0x15a] sm:$0xff] }
 0x138   : > { %v10184_v10 = vpop.f32.mrf.mxu0  ;;  %v10193_v23 = vld [vmem:[#allocation2 + $0x181] sm:$0xff] }
 0x139   : > { %13767 = vst [vmem:[#allocation8_spill] sm:$0xff] %v10193_v23  ;;  %v8315_v11 = vpack.i.bf16 %v10193_v23, %v10191_v56  ;;  %v1258_v9 = vsel %vm191_vm0, %v9752_v49, %v8179_v39 }
 0x13b   : > { %8316 = vrot.lane.b32.xlu1 %v8315_v11, %s9288_s24  ;;  %v8197_v11 = vpop.permute.xlu1 %8196 }
 0x13e   : > { %1591 = vmatmul.f32.gmra.mxu1 %v1256_v52  ;;  %1707 = vmatmul.f32.gmra.mxu2 %v1289_v55  ;;  %v10199_v55 = vld [vmem:[#allocation2 + $0x142] sm:$0xff]  ;;  %v382_v52 = vmax.f32 %v278_v31, 0.0  ;;  %v10212_v45 = vpop.f32.mrf.mxu3 }
 0x13f   : > { %1823 = vmatmul.f32.gmra.mxu3 %v1322_v53  ;;  %7537 = vmatmul.msk.f32.gmra.mxu0 %vm191_vm0, %v9750_v29  ;;  %v8290_v15 = vpack.i.bf16 %v10199_v55, %v10195_v0  ;;  %v554_v53 = vld [vmem:[#allocation2 + $0x91] sm:$0xff]  ;;  %13769 = vst [vmem:[#allocation10_spill] sm:$0xff] %v10212_v45 }
 0x140   : > { %415 = vst.msk [vmem:[#allocation2 + $0x189] sm:$0xff] %vm191_vm0, %v382_v52  ;;  %v1291_v6 = vsel %vm191_vm0, %v554_v53, %v8183_v19  ;;  %v8199_v19 = vunpack.i.h.bf16 %v8197_v11  ;;  %v621_v53 = vld [vmem:[#allocation2 + $0xc0] sm:$0xff] }
 0x141   : > { %8291 = vrot.lane.b32.xlu2 %v8290_v15, %s9288_s24  ;;  %v555_v15 = vld [vmem:[#allocation2 + $0x99] sm:$0xff] }
 0x143   : > { %v10180_v57 = vpop.f32.mrf.mxu1  ;;  %v8212_v37 = vpop.permute.xlu1 %8211 }
 0x146   : > { %1594 = vmatmul.f32.gmra.mxu1 %v1257_v22  ;;  %1710 = vmatmul.f32.gmra.mxu2 %v1290_v50  ;;  %v1324_v22 = vsel %vm191_vm0, %v9889_v25, %v8193_v20  ;;  %v8189_v50 = vunpack.i.h.bf16 %v8187_v63 }
 0x147   : > { %1826 = vmatmul.f32.gmra.mxu3 %v1323_v41  ;;  %7538 = vmatmul.msk.f32.gmra.mxu0 %vm191_vm0, %v9914_v43  ;;  %v8188_v41 = vunpack.i.l.bf16 %v8187_v63  ;;  %v10228_v52 = vld [vmem:[#allocation2 + $0x189] sm:$0xff] }
 0x148   : > { %13771 = vst [vmem:[#allocation12_spill] sm:$0xff] %v10228_v52  ;;  %v8325_v49 = vpack.i.bf16 %v9997_v30, %v10228_v52  ;;  %v10245_v45 = vld [vmem:[#allocation2 + $0x182] sm:$0xff] }
 0x149   : > { %v10209_v21 = vpop.f32.mrf.mxu2  ;;  %v1259_v39 = vsel %vm191_vm0, %v9684_v36, %v8188_v41  ;;  %v8305_v36 = vpack.i.bf16 %v10247_v58, %v9897_v27  ;;  %v556_v41 = vld [vmem:[#allocation2 + $0xa9] sm:$0xff] }
 0x14a   : > { %13768 = vst [vmem:[#allocation9_spill] sm:$0xff] %v10209_v21  ;;  %8326 = vrot.lane.b32.xlu0 %v8325_v49, %s9288_s24  ;;  %v10287_v21 = vld [vmem:[#allocation2 + $0x172] sm:$0xff] }
 0x14b   : > { %v10215_v42 = vpop.f32.mrf.mxu1  ;;  %8306 = vrot.lane.b32.xlu2 %v8305_v36, %s9288_s24 }
 0x14c   : > { %v10218_v40 = vpop.f32.mrf.mxu0 }
 0x14e   : > { %1597 = vmatmul.f32.gmra.mxu1 %v1258_v9  ;;  %1713 = vmatmul.f32.gmra.mxu2 %v1291_v6  ;;  %v1292_v6 = vsel %vm191_vm0, %v555_v15, %v8189_v50  ;;  %v10243_v9 = vpop.permute.xlu0 %8206  ;;  %v8198_v50 = vunpack.i.l.bf16 %v8197_v11 }
 0x14f   : > { %1829 = vmatmul.f32.gmra.mxu3 %v1324_v22  ;;  %7539 = vmatmul.msk.f32.gmra.mxu0 %vm191_vm0, %v9825_v18  ;;  %v1325_v22 = vsel %vm191_vm0, %v621_v53, %v8199_v19  ;;  %v8208_v15 = vunpack.i.l.bf16 %v10243_v9  ;;  %v8194_v19 = vunpack.i.h.bf16 %v10189_v48 }
 0x150   : > { %v1293_v11 = vsel %vm191_vm0, %v556_v41, %v8198_v50  ;;  %v623_v41 = vld [vmem:[#allocation2 + $0xd8] sm:$0xff] }
 0x151   : > { %v10226_v31 = vpop.f32.mrf.mxu2 }
 0x152   : > { %13770 = vst [vmem:[#allocation11_spill] sm:$0xff] %v10226_v31  ;;  %v10230_v25 = vpop.f32.mrf.mxu3 }
 0x153   : > { %13772 = vst [vmem:[#allocation13_spill] sm:$0xff] %v10230_v25  ;;  %v10234_v20 = vpop.f32.mrf.mxu1  ;;  %v671_v25 = vld [vmem:[#allocation2 + $0x199] sm:$0xff] }
 0x154   : > { %v10239_v63 = vpop.f32.mrf.mxu0  ;;  %v8330_v30 = vpack.i.bf16 %v671_v25, %v10245_v45  ;;  %v622_v25 = vld [vmem:[#allocation2 + $0xc8] sm:$0xff] }
 0x156   : > { %1600 = vmatmul.f32.gmra.mxu1 %v1259_v39  ;;  %1716 = vmatmul.f32.gmra.mxu2 %v1292_v6  ;;  %v8202_v39 = vpop.permute.xlu2 %8201 }
 0x157   : > { %1832 = vmatmul.f32.gmra.mxu3 %v1325_v22  ;;  %7540 = vmatmul.msk.f32.gmra.mxu0 %vm191_vm0, %v9987_v54  ;;  %v1326_v22 = vsel %vm191_vm0, %v622_v25, %v8208_v15  ;;  %v8204_v48 = vunpack.i.h.bf16 %v8202_v39  ;;  %v8203_v36 = vunpack.i.l.bf16 %v8202_v39  ;;  %v10281_v25 = vld [vmem:[#allocation2 + $0x188] sm:$0xff] }
 0x158   : > { %8331 = vrot.lane.b32.xlu1 %v8330_v30, %s9288_s24  ;;  %v1260_v30 = vsel %vm191_vm0, %v9827_v38, %v8194_v19 }
 0x159   : > { %v10258_v53 = vpop.f32.mrf.mxu2  ;;  %v1261_v38 = vsel %vm191_vm0, %v9750_v29, %v8203_v36  ;;  %v8213_v29 = vunpack.i.l.bf16 %v8212_v37 }
 0x15a   : > { %13773 = vst [vmem:[#allocation14_spill] sm:$0xff] %v10258_v53  ;;  %v10260_v49 = vpop.f32.mrf.mxu3  ;;  %v8214_v53 = vunpack.i.h.bf16 %v8212_v37 }
 0x15b   : > { %13774 = vst [vmem:[#allocation15_spill] sm:$0xff] %v10260_v49  ;;  %v10262_v27 = vpop.f32.mrf.mxu1  ;;  %v557_v49 = vld [vmem:[#allocation2 + $0xb1] sm:$0xff] }
 0x15c   : > { %v10265_v6 = vpop.f32.mrf.mxu0  ;;  %v1294_v19 = vsel %vm191_vm0, %v557_v49, %v8204_v48  ;;  %v558_v49 = vld [vmem:[#allocation2 + $0xc1] sm:$0xff] }
 0x15e   : > { %1603 = vmatmul.f32.gmra.mxu1 %v1260_v30  ;;  %1719 = vmatmul.f32.gmra.mxu2 %v1293_v11  ;;  %v672_v11 = vld [vmem:[#allocation2 + $0x1a1] sm:$0xff]  ;;  %v8217_v37 = vpop.permute.xlu2 %8216 }
 0x15f   : > { %1835 = vmatmul.f32.gmra.mxu3 %v1326_v22  ;;  %7541 = vmatmul.msk.f32.gmra.mxu0 %vm191_vm0, %v9912_v61  ;;  %v1327_v22 = vsel %vm191_vm0, %v623_v41, %v8214_v53  ;;  %v8340_v30 = vpack.i.bf16 %v10281_v25, %v672_v11  ;;  %v8209_v53 = vunpack.i.h.bf16 %v10243_v9  ;;  %v624_v41 = vld [vmem:[#allocation2 + $0xe0] sm:$0xff]  ;;  %v8218_v9 = vunpack.i.l.bf16 %v8217_v37 }
 0x161   : > { %v10272_v50 = vpop.f32.mrf.mxu2  ;;  %8341 = vrot.lane.b32.xlu0 %v8340_v30, %s9288_s24  ;;  %v1262_v30 = vsel %vm191_vm0, %v9914_v43, %v8209_v53  ;;  %v1263_v43 = vsel %vm191_vm0, %v9825_v18, %v8218_v9  ;;  %v560_v18 = vld [vmem:[#allocation2 + $0xd9] sm:$0xff] }
 0x162   : > { %13775 = vst [vmem:[#allocation16_spill] sm:$0xff] %v10272_v50  ;;  %v10274_v31 = vpop.f32.mrf.mxu3  ;;  %v8222_v50 = vpop.permute.xlu0 %8221  ;;  %v626_v9 = vld [vmem:[#allocation2 + $0xf8] sm:$0xff] }
 0x163   : > { %13776 = vst [vmem:[#allocation17_spill] sm:$0xff] %v10274_v31  ;;  %v10276_v15 = vpop.f32.mrf.mxu1  ;;  %v8320_v31 = vpack.i.bf16 %v10287_v21, %v9970_v47  ;;  %v8223_v48 = vunpack.i.l.bf16 %v8222_v50  ;;  %v1295_v47 = vsel %vm191_vm0, %v558_v49, %v8213_v29  ;;  %v625_v49 = vld [vmem:[#allocation2 + $0xf0] sm:$0xff] }
 0x164   : > { %13777 = vst [vmem:[#allocation18_spill] sm:$0xff] %v10276_v15  ;;  %v10283_v39 = vpop.f32.mrf.mxu0 }
 0x165   : > { %8321 = vrot.lane.b32.xlu2 %v8320_v31, %s9288_s24  ;;  %v8219_v31 = vunpack.i.h.bf16 %v8217_v37 }
 0x166   : > { %1606 = vmatmul.f32.gmra.mxu1 %v1261_v38  ;;  %1722 = vmatmul.f32.gmra.mxu2 %v1294_v19 }
 0x167   : > { %1838 = vmatmul.f32.gmra.mxu3 %v1327_v22  ;;  %7542 = vmatmul.msk.f32.gmra.mxu0 %vm191_vm0, %v10024_v26  ;;  %v1328_v22 = vsel %vm191_vm0, %v624_v41, %v8223_v48 }
 0x169   : > { %v10296_v36 = vpop.f32.mrf.mxu2 }
 0x16a   : > { %13778 = vst [vmem:[#allocation19_spill] sm:$0xff] %v10296_v36  ;;  %v10298_v38 = vpop.f32.mrf.mxu3  ;;  %v8227_v36 = vpop.permute.xlu1 %8226 }
 0x16b   : > { %13779 = vst [vmem:[#allocation20_spill] sm:$0xff] %v10298_v38  ;;  %v10300_v19 = vpop.f32.mrf.mxu1  ;;  %v559_v38 = vld [vmem:[#allocation2 + $0xc9] sm:$0xff]  ;;  %v8229_v7 = vunpack.i.h.bf16 %v8227_v36  ;;  %v10322_v37 = vpop.permute.xlu0 %8236 }
 0x16c   : > { %13780 = vst [vmem:[#allocation21_spill] sm:$0xff] %v10300_v19  ;;  %v10303_v11 = vpop.f32.mrf.mxu0  ;;  %v1296_v53 = vsel %vm191_vm0, %v559_v38, %v8219_v31  ;;  %v8238_v38 = vunpack.i.l.bf16 %v10322_v37 }
 0x16e   : > { %1609 = vmatmul.f32.gmra.mxu1 %v1262_v30  ;;  %1725 = vmatmul.f32.gmra.mxu2 %v1295_v47  ;;  %v1329_v47 = vsel %vm191_vm0, %v625_v49, %v8229_v7  ;;  %v10326_v30 = vld [vmem:[#allocation2 + $0x18a] sm:$0xff]  ;;  %v8224_v7 = vunpack.i.h.bf16 %v8222_v50 }
 0x16f   : > { %1841 = vmatmul.f32.gmra.mxu3 %v1328_v22  ;;  %7543 = vmatmul.msk.f32.gmra.mxu0 %vm191_vm0, %v9983_v59  ;;  %v10324_v22 = vld [vmem:[#allocation2 + $0x180] sm:$0xff]  ;;  %13784 = vst [vmem:[#allocation25_spill] sm:$0xff] %v10326_v30 }
 0x170   : > { %v1264_v19 = vsel %vm191_vm0, %v9987_v54, %v8224_v7 }
 0x171   : > { %v10310_v29 = vpop.f32.mrf.mxu2 }
 0x172   : > { %13781 = vst [vmem:[#allocation22_spill] sm:$0xff] %v10310_v29  ;;  %v10312_v52 = vpop.f32.mrf.mxu3  ;;  %v8228_v29 = vunpack.i.l.bf16 %v8227_v36  ;;  %v8242_v50 = vpop.permute.xlu1 %8241 }
 0x173   : > { %13782 = vst [vmem:[#allocation23_spill] sm:$0xff] %v10312_v52  ;;  %v10314_v48 = vpop.f32.mrf.mxu1  ;;  %v8335_v52 = vpack.i.bf16 %v10326_v30, %v10324_v22 }
 0x174   : > { %13783 = vst [vmem:[#allocation24_spill] sm:$0xff] %v10314_v48  ;;  %v10319_v41 = vpop.f32.mrf.mxu0  ;;  %v8232_v48 = vpop.permute.xlu2 %8231 }
 0x175   : > { %8336 = vrot.lane.b32.xlu2 %v8335_v52, %s9288_s24  ;;  %v8234_v23 = vunpack.i.h.bf16 %v8232_v48  ;;  %v8233_v52 = vunpack.i.l.bf16 %v8232_v48 }
 0x176   : > { %1612 = vmatmul.f32.gmra.mxu1 %v1263_v43  ;;  %1728 = vmatmul.f32.gmra.mxu2 %v1296_v53  ;;  %v1297_v53 = vsel %vm191_vm0, %v560_v18, %v8228_v29  ;;  %v627_v29 = vld [vmem:[#allocation2 + $0x108] sm:$0xff] }
 0x177   : > { %1844 = vmatmul.f32.gmra.mxu3 %v1329_v47  ;;  %7544 = vmatmul.msk.f32.gmra.mxu0 %vm191_vm0, %v10053_v2  ;;  %v1330_v47 = vsel %vm191_vm0, %v626_v9, %v8238_v38  ;;  %v1265_v38 = vsel %vm191_vm0, %v9912_v61, %v8233_v52  ;;  %v10349_v9 = vpop.permute.xlu0 %8251 }
 0x178   : > { %v8253_v61 = vunpack.i.l.bf16 %v10349_v9 }
 0x179   : > { %v10334_v31 = vpop.f32.mrf.mxu2 }
 0x17a   : > { %13785 = vst [vmem:[#allocation26_spill] sm:$0xff] %v10334_v31  ;;  %v1797_v49 = vpop.f32.mrf.mxu3  ;;  %v561_v31 = vld [vmem:[#allocation2 + $0xe1] sm:$0xff] }
 0x17b   : > { %v10336_v43 = vpop.f32.mrf.mxu1  ;;  %v1298_v54 = vsel %vm191_vm0, %v561_v31, %v8234_v23  ;;  %v8239_v23 = vunpack.i.h.bf16 %v10322_v37 }
 0x17c   : > { %13786 = vst [vmem:[#allocation27_spill] sm:$0xff] %v10336_v43  ;;  %v1910_v36 = vpop.f32.mrf.mxu0  ;;  %v8244_v43 = vunpack.i.h.bf16 %v8242_v50 }
 0x17d   : > { %v1266_v37 = vsel %vm191_vm0, %v10024_v26, %v8239_v23 }
 0x17e   : > { %1615 = vmatmul.f32.gmra.mxu1 %v1264_v19  ;;  %1731 = vmatmul.f32.gmra.mxu2 %v1297_v53  ;;  %v1331_v48 = vsel %vm191_vm0, %v627_v29, %v8244_v43  ;;  %v8247_v29 = vpop.permute.xlu2 %8246 }
 0x17f   : > { %1847 = vmatmul.f32.gmra.mxu3 %v1330_v47  ;;  %7545 = vmatmul.msk.f32.gmra.mxu0 %vm191_vm0, %v10022_v12  ;;  %v8243_v47 = vunpack.i.l.bf16 %v8242_v50 }
 0x181   : > { %v1684_v30 = vpop.f32.mrf.mxu2 }
 0x182   : > { %v1800_v18 = vpop.f32.mrf.mxu3 }
 0x183   : > { %v1571_v15 = vpop.f32.mrf.mxu1 }
 0x184   : > { %v1572_v19 = vadd.f32 %v1571_v15, %v10161_v16  ;;  %v1913_v7 = vpop.f32.mrf.mxu0  ;;  %v628_v16 = vld [vmem:[#allocation2 + $0x110] sm:$0xff] }
 0x186   : > { %v1685_v53 = vadd.f32 %v1684_v30, %v1572_v19  ;;  %1618 = vmatmul.f32.gmra.mxu1 %v1265_v38  ;;  %1734 = vmatmul.f32.gmra.mxu2 %v1298_v54  ;;  %v1299_v30 = vsel %vm191_vm0, %v9985_v60, %v8243_v47  ;;  %v1332_v38 = vsel %vm191_vm0, %v628_v16, %v8253_v61  ;;  %v8257_v19 = vpop.permute.xlu1 %8256 }
 0x187   : > { %1850 = vmatmul.f32.gmra.mxu3 %v1331_v48  ;;  %7546 = vmatmul.msk.f32.gmra.mxu0 %vm191_vm0, %v10083_v13  ;;  %v8259_v48 = vunpack.i.h.bf16 %v8257_v19 }
 0x188   : > { %v1798_v8 = vadd.f32 %v1797_v49, %v1685_v53 }
 0x189   : > { %v1687_v31 = vpop.f32.mrf.mxu2 }
 0x18a   : > { %v10355_v15 = vadd.f32 %v1910_v36, %v1798_v8  ;;  %v1803_v43 = vpop.f32.mrf.mxu3  ;;  %v8249_v8 = vunpack.i.h.bf16 %v8247_v29  ;;  %v8248_v36 = vunpack.i.l.bf16 %v8247_v29 }
 0x18b   : > { %v1574_v52 = vpop.f32.mrf.mxu1 }
 0x18c   : > { %2006 = vst.msk [vmem:[#allocation3] sm:$0xff] %vm191_vm0, %v10355_v15  ;;  %v1575_v50 = vadd.f32 %v1574_v52, %v10184_v10  ;;  %v1916_v49 = vpop.f32.mrf.mxu0  ;;  %v1267_v26 = vsel %vm191_vm0, %v9983_v59, %v8248_v36  ;;  %v1300_v23 = vsel %vm191_vm0, %v10007_v46, %v8249_v8  ;;  %v10378_v52 = vpop.permute.xlu0 %8266  ;;  %v564_v46 = vld [vmem:[#allocation2 + $0x109] sm:$0xff] }
 0x18e   : > { %v1688_v54 = vadd.f32 %v1687_v31, %v1575_v50  ;;  %1621 = vmatmul.f32.gmra.mxu1 %v1266_v37  ;;  %1737 = vmatmul.f32.gmra.mxu2 %v1299_v30  ;;  %v8258_v30 = vunpack.i.l.bf16 %v8257_v19  ;;  %v8268_v50 = vunpack.i.l.bf16 %v10378_v52  ;;  %v8262_v19 = vpop.permute.xlu2 %8261 }
 0x18f   : > { %1853 = vmatmul.f32.gmra.mxu3 %v1332_v38  ;;  %7547 = vmatmul.msk.f32.gmra.mxu0 %vm191_vm0, %v10049_v32  ;;  %v630_v38 = vld [vmem:[#allocation2 + $0x128] sm:$0xff] }
 0x190   : > { %v1801_v60 = vadd.f32 %v1800_v18, %v1688_v54  ;;  %v1333_v18 = vsel %vm191_vm0, %v10146_v17, %v8259_v48  ;;  %v1301_v8 = vsel %vm191_vm0, %v564_v46, %v8258_v30 }
 0x191   : > { %v1690_v10 = vpop.f32.mrf.mxu2 }
 0x192   : > { %v10367_v53 = vadd.f32 %v1913_v7, %v1801_v60  ;;  %v1806_v47 = vpop.f32.mrf.mxu3  ;;  %v1334_v60 = vsel %vm191_vm0, %v630_v38, %v8268_v50  ;;  %v632_v38 = vld [vmem:[#allocation2 + $0x140] sm:$0xff] }
 0x193   : > { %v1577_v61 = vpop.f32.mrf.mxu1 }
 0x194   : > { %13787 = vst [vmem:[#allocation28_spill] sm:$0xff] %v10367_v53  ;;  %v1578_v31 = vadd.f32 %v1577_v61, %v10218_v40  ;;  %v1919_v16 = vpop.f32.mrf.mxu0  ;;  %v8254_v40 = vunpack.i.h.bf16 %v10349_v9  ;;  %v8272_v61 = vpop.permute.xlu1 %8271 }
 0x195   : > { %2007 = vst.msk [vmem:[#allocation3 + $0x8] sm:$0xff] %vm191_vm0, %v10367_v53  ;;  %v10406_v50 = vpop.permute.xlu0 %8281 }
 0x196   : > { %v1691_v7 = vadd.f32 %v1690_v10, %v1578_v31  ;;  %1624 = vmatmul.f32.gmra.mxu1 %v1267_v26  ;;  %1740 = vmatmul.f32.gmra.mxu2 %v1300_v23  ;;  %v1268_v9 = vsel %vm191_vm0, %v10053_v2, %v8254_v40  ;;  %v8263_v10 = vunpack.i.l.bf16 %v8262_v19  ;;  %v8274_v23 = vunpack.i.h.bf16 %v8272_v61 }
 0x197   : > { %1856 = vmatmul.f32.gmra.mxu3 %v1333_v18  ;;  %7548 = vmatmul.msk.f32.gmra.mxu0 %vm191_vm0, %v10114_v4  ;;  %v8273_v40 = vunpack.i.l.bf16 %v8272_v61 }
 0x198   : > { %v1804_v59 = vadd.f32 %v1803_v43, %v1691_v7  ;;  %v1269_v2 = vsel %vm191_vm0, %v10022_v12, %v8263_v10 }
 0x199   : > { %v1693_v29 = vpop.f32.mrf.mxu2 }
 0x19a   : > { %v10384_v37 = vadd.f32 %v1916_v49, %v1804_v59  ;;  %v1809_v17 = vpop.f32.mrf.mxu3  ;;  %v8264_v49 = vunpack.i.h.bf16 %v8262_v19 }
 0x19b   : > { %v1580_v54 = vpop.f32.mrf.mxu1 }
 0x19c   : > { %13788 = vst [vmem:[#allocation29_spill] sm:$0xff] %v10384_v37  ;;  %v1581_v36 = vadd.f32 %v1580_v54, %v10239_v63  ;;  %v1922_v43 = vpop.f32.mrf.mxu0  ;;  %v1302_v30 = vsel %vm191_vm0, %v10037_v28, %v8264_v49  ;;  %v8283_v28 = vunpack.i.l.bf16 %v10406_v50  ;;  %v8287_v10 = vpop.permute.xlu1 %8286 }
 0x19d   : > { %2008 = vst.msk [vmem:[#allocation3 + $0x10] sm:$0xff] %vm191_vm0, %v10384_v37  ;;  %v8289_v61 = vunpack.i.h.bf16 %v8287_v10 }
 0x19e   : > { %v1694_v48 = vadd.f32 %v1693_v29, %v1581_v36  ;;  %1627 = vmatmul.f32.gmra.mxu1 %v1268_v9  ;;  %1743 = vmatmul.f32.gmra.mxu2 %v1301_v8  ;;  %v8269_v29 = vunpack.i.h.bf16 %v10378_v52  ;;  %v1303_v36 = vsel %vm191_vm0, %v10051_v33, %v8273_v40  ;;  %v1336_v9 = vsel %vm191_vm0, %v632_v38, %v8283_v28 }
 0x19f   : > { %1859 = vmatmul.f32.gmra.mxu3 %v1334_v60  ;;  %7549 = vmatmul.msk.f32.gmra.mxu0 %vm191_vm0, %v10079_v44  ;;  %v8277_v60 = vpop.permute.xlu2 %8276  ;;  %v8284_v40 = vunpack.i.h.bf16 %v10406_v50 }
 0x1a0   : > { %v1807_v26 = vadd.f32 %v1806_v47, %v1694_v48  ;;  %v1335_v47 = vsel %vm191_vm0, %v10195_v0, %v8274_v23  ;;  %v1270_v52 = vsel %vm191_vm0, %v10083_v13, %v8269_v29  ;;  %v8278_v49 = vunpack.i.l.bf16 %v8277_v60 }
 0x1a1   : > { %v1696_v63 = vpop.f32.mrf.mxu2  ;;  %v1272_v50 = vsel %vm191_vm0, %v10114_v4, %v8284_v40 }
 0x1a2   : > { %v10395_v31 = vadd.f32 %v1919_v16, %v1807_v26  ;;  %v1812_v18 = vpop.f32.mrf.mxu3  ;;  %v633_v26 = vld [vmem:[#allocation2 + $0x150] sm:$0xff]  ;;  %v1271_v13 = vsel %vm191_vm0, %v10049_v32, %v8278_v49 }
 0x1a3   : > { %v1583_v7 = vpop.f32.mrf.mxu1 }
 0x1a4   : > { %13789 = vst [vmem:[#allocation30_spill] sm:$0xff] %v10395_v31  ;;  %v1584_v59 = vadd.f32 %v1583_v7, %v10265_v6  ;;  %v1925_v46 = vpop.f32.mrf.mxu0 }
 0x1a5   : > { %2009 = vst.msk [vmem:[#allocation3 + $0x18] sm:$0xff] %vm191_vm0, %v10395_v31 }
 0x1a6   : > { %v1697_v16 = vadd.f32 %v1696_v63, %v1584_v59  ;;  %1630 = vmatmul.f32.gmra.mxu1 %v1269_v2  ;;  %1746 = vmatmul.f32.gmra.mxu2 %v1302_v30 }
 0x1a7   : > { %1862 = vmatmul.f32.gmra.mxu3 %v1335_v47  ;;  %7550 = vmatmul.msk.f32.gmra.mxu0 %vm191_vm0, %v10150_v5  ;;  %v10434_v47 = vpop.permute.xlu0 %8296 }
 0x1a8   : > { %v1810_v12 = vadd.f32 %v1809_v17, %v1697_v16  ;;  %v8288_v16 = vunpack.i.l.bf16 %v8287_v10 }
 0x1a9   : > { %v1699_v6 = vpop.f32.mrf.mxu2 }
 0x1aa   : > { %v10412_v54 = vadd.f32 %v1922_v43, %v1810_v12  ;;  %v1815_v0 = vpop.f32.mrf.mxu3  ;;  %v8279_v43 = vunpack.i.h.bf16 %v8277_v60  ;;  %v1305_v38 = vsel %vm191_vm0, %v10081_v14, %v8288_v16 }
 0x1ab   : > { %v1586_v8 = vpop.f32.mrf.mxu1 }
 0x1ac   : > { %13790 = vst [vmem:[#allocation31_spill] sm:$0xff] %v10412_v54  ;;  %v1587_v19 = vadd.f32 %v1586_v8, %v10283_v39  ;;  %v1928_v17 = vpop.f32.mrf.mxu0  ;;  %v1304_v2 = vsel %vm191_vm0, %v10067_v3, %v8279_v43  ;;  %v8298_v3 = vunpack.i.l.bf16 %v10434_v47  ;;  %v635_v43 = vld [vmem:[#allocation2 + $0x168] sm:$0xff] }
 0x1ad   : > { %2010 = vst.msk [vmem:[#allocation3 + $0x20] sm:$0xff] %vm191_vm0, %v10412_v54 }
 0x1ae   : > { %v1700_v48 = vadd.f32 %v1699_v6, %v1587_v19  ;;  %1633 = vmatmul.f32.gmra.mxu1 %v1270_v52  ;;  %1749 = vmatmul.f32.gmra.mxu2 %v1303_v36  ;;  %v8292_v36 = vpop.permute.xlu2 %8291  ;;  %v8302_v52 = vpop.permute.xlu1 %8301 }
 0x1af   : > { %1865 = vmatmul.f32.gmra.mxu3 %v1336_v9  ;;  %7551 = vmatmul.msk.f32.gmra.mxu0 %vm191_vm0, %v10110_v62  ;;  %v8293_v9 = vunpack.i.l.bf16 %v8292_v36 }
 0x1b0   : > { %v1813_v33 = vadd.f32 %v1812_v18, %v1700_v48  ;;  %v1337_v18 = vsel %vm191_vm0, %v633_v26, %v8289_v61  ;;  %v8304_v48 = vunpack.i.h.bf16 %v8302_v52 }
 0x1b1   : > { %v1702_v39 = vpop.f32.mrf.mxu2  ;;  %v1273_v4 = vsel %vm191_vm0, %v10079_v44, %v8293_v9 }
 0x1b2   : > { %v10424_v23 = vadd.f32 %v1925_v46, %v1813_v33  ;;  %v1818_v63 = vpop.f32.mrf.mxu3 }
 0x1b3   : > { %v1589_v7 = vpop.f32.mrf.mxu1 }
 0x1b4   : > { %13791 = vst [vmem:[#allocation32_spill] sm:$0xff] %v10424_v23  ;;  %v1590_v30 = vadd.f32 %v1589_v7, %v10303_v11  ;;  %v1931_v59 = vpop.f32.mrf.mxu0  ;;  %v634_v11 = vld [vmem:[#allocation2 + $0x158] sm:$0xff]  ;;  %v10462_v7 = vpop.permute.xlu0 %8311 }
 0x1b5   : > { %2011 = vst.msk [vmem:[#allocation3 + $0x28] sm:$0xff] %vm191_vm0, %v10424_v23  ;;  %v1338_v19 = vsel %vm191_vm0, %v634_v11, %v8298_v3 }
 0x1b6   : > { %v1703_v46 = vadd.f32 %v1702_v39, %v1590_v30  ;;  %1636 = vmatmul.f32.gmra.mxu1 %v1271_v13  ;;  %1752 = vmatmul.f32.gmra.mxu2 %v1304_v2  ;;  %v8303_v2 = vunpack.i.l.bf16 %v8302_v52  ;;  %v8299_v30 = vunpack.i.h.bf16 %v10434_v47  ;;  %v8307_v40 = vpop.permute.xlu2 %8306 }
 0x1b7   : > { %1868 = vmatmul.f32.gmra.mxu3 %v1337_v18  ;;  %7552 = vmatmul.msk.f32.gmra.mxu0 %vm191_vm0, %v10199_v55 }
 0x1b8   : > { %v1816_v32 = vadd.f32 %v1815_v0, %v1703_v46  ;;  %v1274_v47 = vsel %vm191_vm0, %v10150_v5, %v8299_v30 }
 0x1b9   : > { %v1705_v12 = vpop.f32.mrf.mxu2 }
 0x1ba   : > { %v10440_v28 = vadd.f32 %v1928_v17, %v1816_v32  ;;  %v1821_v29 = vpop.f32.mrf.mxu3  ;;  %v8294_v17 = vunpack.i.h.bf16 %v8292_v36  ;;  %v1307_v32 = vsel %vm191_vm0, %v10112_v24, %v8303_v2 }
 0x1bb   : > { %v1592_v6 = vpop.f32.mrf.mxu1 }
 0x1bc   : > { %13792 = vst [vmem:[#allocation33_spill] sm:$0xff] %v10440_v28  ;;  %v1593_v8 = vadd.f32 %v1592_v6, %v10319_v41  ;;  %v1934_v0 = vpop.f32.mrf.mxu0  ;;  %v1306_v61 = vsel %vm191_vm0, %v10101_v1, %v8294_v17  ;;  %v8313_v1 = vunpack.i.l.bf16 %v10462_v7  ;;  %v8309_v6 = vunpack.i.h.bf16 %v8307_v40 }
 0x1bd   : > { %2012 = vst.msk [vmem:[#allocation3 + $0x30] sm:$0xff] %vm191_vm0, %v10440_v28 }
 0x1be   : > { %v1706_v60 = vadd.f32 %v1705_v12, %v1593_v8  ;;  %1639 = vmatmul.f32.gmra.mxu1 %v1272_v50  ;;  %1755 = vmatmul.f32.gmra.mxu2 %v1305_v38  ;;  %v8308_v38 = vunpack.i.l.bf16 %v8307_v40  ;;  %v8317_v8 = vpop.permute.xlu1 %8316 }
 0x1bf   : > { %1871 = vmatmul.f32.gmra.mxu3 %v1338_v19  ;;  %7553 = vmatmul.msk.f32.gmra.mxu0 %vm191_vm0, %v10142_v34  ;;  %v8319_v36 = vunpack.i.h.bf16 %v8317_v8 }
 0x1c0   : > { %v1819_v14 = vadd.f32 %v1818_v63, %v1706_v60  ;;  %v1339_v63 = vsel %vm191_vm0, %v635_v43, %v8304_v48  ;;  %v1275_v5 = vsel %vm191_vm0, %v10110_v62, %v8308_v38  ;;  %v1308_v60 = vsel %vm191_vm0, %v10131_v51, %v8309_v6  ;;  %v13800_v6 = vld [vmem:[#allocation25_spill] sm:$0xff] }
 0x1c1   : > { %v1708_v41 = vpop.f32.mrf.mxu2  ;;  %v1341_v52 = vsel %vm191_vm0, %v10324_v22, %v8319_v36  ;;  %v8314_v43 = vunpack.i.h.bf16 %v10462_v7  ;;  %v640_v36 = vld [vmem:[#allocation2 + $0x1a0] sm:$0xff] }
 0x1c2   : > { %v10452_v49 = vadd.f32 %v1931_v59, %v1819_v14  ;;  %v1824_v10 = vpop.f32.mrf.mxu3  ;;  %v10491_v14 = vpop.permute.xlu0 %8326 }
 0x1c3   : > { %v1595_v33 = vpop.f32.mrf.mxu1  ;;  %v8328_v51 = vunpack.i.l.bf16 %v10491_v14  ;;  %v1276_v7 = vsel %vm191_vm0, %v10199_v55, %v8314_v43 }
 0x1c4   : > { %13793 = vst [vmem:[#allocation34_spill] sm:$0xff] %v10452_v49  ;;  %v1596_v39 = vadd.f32 %v1595_v33, %v10180_v57  ;;  %v1937_v26 = vpop.f32.mrf.mxu0  ;;  %v636_v57 = vld [vmem:[#allocation2 + $0x170] sm:$0xff] }
 0x1c5   : > { %2013 = vst.msk [vmem:[#allocation3 + $0x38] sm:$0xff] %vm191_vm0, %v10452_v49  ;;  %v1340_v11 = vsel %vm191_vm0, %v636_v57, %v8313_v1 }
 0x1c6   : > { %v1709_v13 = vadd.f32 %v1708_v41, %v1596_v39  ;;  %1642 = vmatmul.f32.gmra.mxu1 %v1273_v4  ;;  %1758 = vmatmul.f32.gmra.mxu2 %v1306_v61  ;;  %v8318_v41 = vunpack.i.l.bf16 %v8317_v8  ;;  %v8322_v39 = vpop.permute.xlu2 %8321  ;;  %v8329_v8 = vunpack.i.h.bf16 %v10491_v14 }
 0x1c7   : > { %1874 = vmatmul.f32.gmra.mxu3 %v1339_v63  ;;  %7554 = vmatmul.msk.f32.gmra.mxu0 %vm191_vm0, %v10247_v58  ;;  %v1342_v63 = vsel %vm191_vm0, %v10281_v25, %v8328_v51  ;;  %v8324_v2 = vunpack.i.h.bf16 %v8322_v39 }
 0x1c8   : > { %v1822_v44 = vadd.f32 %v1821_v29, %v1709_v13  ;;  %v1309_v4 = vsel %vm191_vm0, %v10144_v35, %v8318_v41  ;;  %v1278_v14 = vsel %vm191_vm0, %v10247_v58, %v8329_v8 }
 0x1c9   : > { %v1711_v59 = vpop.f32.mrf.mxu2 }
 0x1ca   : > { %v10468_v18 = vadd.f32 %v1934_v0, %v1822_v44  ;;  %v1827_v46 = vpop.f32.mrf.mxu3  ;;  %v8323_v44 = vunpack.i.l.bf16 %v8322_v39  ;;  %v8332_v1 = vpop.permute.xlu1 %8331 }
 0x1cb   : > { %v1598_v16 = vpop.f32.mrf.mxu1 }
 0x1cc   : > { %13794 = vst [vmem:[#allocation35_spill] sm:$0xff] %v10468_v18  ;;  %v1599_v3 = vadd.f32 %v1598_v16, %v10215_v42  ;;  %v1940_v12 = vpop.f32.mrf.mxu0  ;;  %v1277_v55 = vsel %vm191_vm0, %v10142_v34, %v8323_v44  ;;  %v13798_v16 = vld [vmem:[#allocation7_spill] sm:$0xff] }
 0x1cd   : > { %2014 = vst.msk [vmem:[#allocation3 + $0x40] sm:$0xff] %vm191_vm0, %v10468_v18  ;;  %v704_v44 = vld [vmem:[#allocation2 + $0x1a2] sm:$0xff] }
 0x1ce   : > { %v1712_v29 = vadd.f32 %v1711_v59, %v1599_v3  ;;  %1645 = vmatmul.f32.gmra.mxu1 %v1274_v47  ;;  %1761 = vmatmul.f32.gmra.mxu2 %v1307_v32  ;;  %v639_v59 = vld [vmem:[#allocation2 + $0x198] sm:$0xff]  ;;  %v1310_v32 = vsel %vm191_vm0, %v13798_v16, %v8324_v2  ;;  %v13799_v3 = vld [vmem:[#allocation18_spill] sm:$0xff] }
 0x1cf   : > { %1877 = vmatmul.f32.gmra.mxu3 %v1340_v11  ;;  %7555 = vmatmul.msk.f32.gmra.mxu0 %vm191_vm0, %v10191_v56 }
 0x1d0   : > { %v1825_v24 = vadd.f32 %v1824_v10, %v1712_v29  ;;  %v8333_v29 = vunpack.i.l.bf16 %v8332_v1 }
 0x1d1   : > { %v1714_v42 = vpop.f32.mrf.mxu2 }
 0x1d2   : > { %v10480_v0 = vadd.f32 %v1937_v26, %v1825_v24  ;;  %v1830_v19 = vpop.f32.mrf.mxu3 }
 0x1d3   : > { %v1601_v50 = vpop.f32.mrf.mxu1  ;;  %v8342_v11 = vpop.permute.xlu0 %8341 }
 0x1d4   : > { %13795 = vst [vmem:[#allocation36_spill] sm:$0xff] %v10480_v0  ;;  %v1602_v17 = vadd.f32 %v1601_v50, %v10234_v20  ;;  %v1943_v9 = vpop.f32.mrf.mxu0  ;;  %v8343_v38 = vunpack.i.l.bf16 %v8342_v11 }
 0x1d5   : > { %2015 = vst.msk [vmem:[#allocation3 + $0x48] sm:$0xff] %vm191_vm0, %v10480_v0 }
 0x1d6   : > { %v1715_v48 = vadd.f32 %v1714_v42, %v1602_v17  ;;  %1648 = vmatmul.f32.gmra.mxu1 %v1275_v5  ;;  %1764 = vmatmul.f32.gmra.mxu2 %v1308_v60  ;;  %v13802_v5 = vld [vmem:[#allocation8_spill] sm:$0xff]  ;;  %v13803_v17 = vld [vmem:[#allocation21_spill] sm:$0xff]  ;;  %v1344_v41 = vsel %vm191_vm0, %v640_v36, %v8343_v38 }
 0x1d7   : > { %1880 = vmatmul.f32.gmra.mxu3 %v1341_v52  ;;  %7556 = vmatmul.msk.f32.gmra.mxu0 %vm191_vm0, %v10287_v21  ;;  %v1311_v60 = vsel %vm191_vm0, %v13802_v5, %v8333_v29  ;;  %v8337_v52 = vpop.permute.xlu2 %8336  ;;  %v13810_v29 = vld [vmem:[#allocation5_spill] sm:$0xff] }
 0x1d8   : > { %v1828_v62 = vadd.f32 %v1827_v46, %v1715_v48  ;;  %v8339_v43 = vunpack.i.h.bf16 %v8337_v52 }
 0x1d9   : > { %v1717_v20 = vpop.f32.mrf.mxu2 }
 0x1da   : > { %v10497_v10 = vadd.f32 %v1940_v12, %v1828_v62  ;;  %v1833_v33 = vpop.f32.mrf.mxu3  ;;  %v703_v62 = vld [vmem:[#allocation2 + $0x19a] sm:$0xff] }
 0x1db   : > { %v1604_v22 = vpop.f32.mrf.mxu1 }
 0x1dc   : > { %13796 = vst [vmem:[#allocation37_spill] sm:$0xff] %v10497_v10  ;;  %v1605_v61 = vadd.f32 %v1604_v22, %v10262_v27  ;;  %v1946_v26 = vpop.f32.mrf.mxu0  ;;  %v8334_v27 = vunpack.i.h.bf16 %v8332_v1 }
 0x1dd   : > { %2016 = vst.msk [vmem:[#allocation3 + $0x50] sm:$0xff] %vm191_vm0, %v10497_v10 }
 0x1de   : > { %v1718_v13 = vadd.f32 %v1717_v20, %v1605_v61  ;;  %1651 = vmatmul.f32.gmra.mxu1 %v1276_v7  ;;  %1767 = vmatmul.f32.gmra.mxu2 %v1309_v4  ;;  %v1343_v12 = vsel %vm191_vm0, %v639_v59, %v8334_v27  ;;  %v8338_v20 = vunpack.i.l.bf16 %v8337_v52  ;;  %v13806_v7 = vld [vmem:[#allocation24_spill] sm:$0xff]  ;;  %v8344_v27 = vunpack.i.h.bf16 %v8342_v11 }
 0x1df   : > { %1883 = vmatmul.f32.gmra.mxu3 %v1342_v63  ;;  %7557 = vmatmul.msk.f32.gmra.mxu0 %vm191_vm0, %v10245_v45  ;;  %v13805_v63 = vld [vmem:[#allocation12_spill] sm:$0xff] }
 0x1e0   : > { %v1831_v35 = vadd.f32 %v1830_v19, %v1718_v13  ;;  %v1312_v58 = vsel %vm191_vm0, %v13805_v63, %v8339_v43  ;;  %v13816_v63 = vld [vmem:[#allocation14_spill] sm:$0xff] }
 0x1e1   : > { %v1720_v30 = vpop.f32.mrf.mxu2 }
 0x1e2   : > { %v10510_v57 = vadd.f32 %v1943_v9, %v1831_v35  ;;  %v1836_v25 = vpop.f32.mrf.mxu3 }
 0x1e3   : > { %v1607_v46 = vpop.f32.mrf.mxu1 }
 0x1e4   : > { %13797 = vst [vmem:[#allocation38_spill] sm:$0xff] %v10510_v57  ;;  %v1608_v40 = vadd.f32 %v1607_v46, %v13799_v3  ;;  %v1949_v45 = vpop.f32.mrf.mxu0  ;;  %v13808_v46 = vld [vmem:[#allocation27_spill] sm:$0xff] }
 0x1e5   : > { %2017 = vst.msk [vmem:[#allocation3 + $0x58] sm:$0xff] %vm191_vm0, %v10510_v57 }
 0x1e6   : > { %v1721_v47 = vadd.f32 %v1720_v30, %v1608_v40  ;;  %1654 = vmatmul.f32.gmra.mxu1 %v1277_v55  ;;  %1770 = vmatmul.f32.gmra.mxu2 %v1310_v32  ;;  %v1280_v32 = vsel %vm191_vm0, %v10287_v21, %v8344_v27 }
 0x1e7   : > { %1886 = vmatmul.f32.gmra.mxu3 %v1343_v12  ;;  %7558 = vmatmul.msk.f32.gmra.mxu0 %vm191_vm0, %v13800_v6 }
 0x1e8   : > { %v1834_v34 = vadd.f32 %v1833_v33, %v1721_v47 }
 0x1e9   : > { %v1723_v24 = vpop.f32.mrf.mxu2 }
 0x1ea   : > { %v10523_v42 = vadd.f32 %v1946_v26, %v1834_v34  ;;  %v1839_v19 = vpop.f32.mrf.mxu3  ;;  %v1279_v26 = vsel %vm191_vm0, %v10191_v56, %v8338_v20 }
 0x1eb   : > { %v1610_v50 = vpop.f32.mrf.mxu1 }
 0x1ec   : > { %13801 = vst [vmem:[#allocation7_spill] sm:$0xff] %v10523_v42  ;;  %v1611_v9 = vadd.f32 %v1610_v50, %v13803_v17  ;;  %v1952_v48 = vpop.f32.mrf.mxu0  ;;  %v13812_v50 = vld [vmem:[#allocation9_spill] sm:$0xff] }
 0x1ed   : > { %2018 = vst.msk [vmem:[#allocation3 + $0x60] sm:$0xff] %vm191_vm0, %v10523_v42 }
 0x1ee   : > { %v1724_v51 = vadd.f32 %v1723_v24, %v1611_v9  ;;  %1657 = vmatmul.f32.gmra.mxu1 %v1278_v14  ;;  %1773 = vmatmul.f32.gmra.mxu2 %v1311_v60  ;;  %v13814_v14 = vld [vmem:[#allocation11_spill] sm:$0xff] }
 0x1ef   : > { %1889 = vmatmul.f32.gmra.mxu3 %v1344_v41  ;;  %7559 = vmatmul.msk.f32.gmra.mxu0 %vm191_vm0, %v703_v62 }
 0x1f0   : > { %v1837_v33 = vadd.f32 %v1836_v25, %v1724_v51 }
 0x1f1   : > { %v1726_v22 = vpop.f32.mrf.mxu2 }
 0x1f2   : > { %v10534_v4 = vadd.f32 %v1949_v45, %v1837_v33  ;;  %v1842_v61 = vpop.f32.mrf.mxu3 }
 0x1f3   : > { %v1613_v39 = vpop.f32.mrf.mxu1 }
 0x1f4   : > { %13804 = vst [vmem:[#allocation18_spill] sm:$0xff] %v10534_v4  ;;  %v1614_v13 = vadd.f32 %v1613_v39, %v13806_v7  ;;  %v1955_v2 = vpop.f32.mrf.mxu0 }
 0x1f5   : > { %2019 = vst.msk [vmem:[#allocation3 + $0x68] sm:$0xff] %vm191_vm0, %v10534_v4 }
 0x1f6   : > { %v1727_v1 = vadd.f32 %v1726_v22, %v1614_v13  ;;  %1660 = vmatmul.f32.gmra.mxu1 %v1279_v26  ;;  %1776 = vmatmul.f32.gmra.mxu2 %v1312_v58 }
 0x1f7   : > { %7560 = vmatmul.msk.f32.gmra.mxu0 %vm191_vm0, %v704_v44 }
 0x1f8   : > { %v1840_v35 = vadd.f32 %v1839_v19, %v1727_v1 }
 0x1f9   : > { %v1729_v30 = vpop.f32.mrf.mxu2 }
 0x1fa   : > { %v10544_v59 = vadd.f32 %v1952_v48, %v1840_v35  ;;  %v1845_v56 = vpop.f32.mrf.mxu3 }
 0x1fb   : > { %v1616_v25 = vpop.f32.mrf.mxu1 }
 0x1fc   : > { %13807 = vst [vmem:[#allocation25_spill] sm:$0xff] %v10544_v59  ;;  %v1617_v55 = vadd.f32 %v1616_v25, %v13808_v46  ;;  %v1958_v16 = vpop.f32.mrf.mxu0 }
 0x1fd   : > { %2020 = vst.msk [vmem:[#allocation3 + $0x70] sm:$0xff] %vm191_vm0, %v10544_v59 }
 0x1fe   : > { %v1730_v3 = vadd.f32 %v1729_v30, %v1617_v55  ;;  %1663 = vmatmul.f32.gmra.mxu1 %v1280_v32  ;;  %v13818_v30 = vld [vmem:[#allocation16_spill] sm:$0xff] }
 0x200   : > { %v1843_v40 = vadd.f32 %v1842_v61, %v1730_v3 }
 0x201   : > { %v1732_v45 = vpop.f32.mrf.mxu2 }
 0x202   : > { %v10551_v12 = vadd.f32 %v1955_v2, %v1843_v40  ;;  %v1848_v11 = vpop.f32.mrf.mxu3 }
 0x203   : > { %v1619_v47 = vpop.f32.mrf.mxu1 }
 0x204   : > { %13809 = vst [vmem:[#allocation8_spill] sm:$0xff] %v10551_v12  ;;  %v1620_v6 = vadd.f32 %v1619_v47, %v13810_v29  ;;  %v1961_v34 = vpop.f32.mrf.mxu0 }
 0x205   : > { %2021 = vst.msk [vmem:[#allocation3 + $0x78] sm:$0xff] %vm191_vm0, %v10551_v12 }
 0x206   : > { %v1733_v38 = vadd.f32 %v1732_v45, %v1620_v6  ;;  %v13820_v45 = vld [vmem:[#allocation19_spill] sm:$0xff] }
 0x208   : > { %v1846_v8 = vadd.f32 %v1845_v56, %v1733_v38 }
 0x209   : > { %v1735_v24 = vpop.f32.mrf.mxu2 }
 0x20a   : > { %v10556_v36 = vadd.f32 %v1958_v16, %v1846_v8  ;;  %v1851_v21 = vpop.f32.mrf.mxu3 }
 0x20b   : > { %v1622_v19 = vpop.f32.mrf.mxu1 }
 0x20c   : > { %13811 = vst [vmem:[#allocation21_spill] sm:$0xff] %v10556_v36  ;;  %v1623_v5 = vadd.f32 %v1622_v19, %v13812_v50  ;;  %v1964_v60 = vpop.f32.mrf.mxu0 }
 0x20d   : > { %2022 = vst.msk [vmem:[#allocation3 + $0x80] sm:$0xff] %vm191_vm0, %v10556_v36 }
 0x20e   : > { %v1736_v17 = vadd.f32 %v1735_v24, %v1623_v5 }
 0x210   : > { %v1849_v9 = vadd.f32 %v1848_v11, %v1736_v17 }
 0x211   : > { %v1738_v52 = vpop.f32.mrf.mxu2 }
 0x212   : > { %v10561_v48 = vadd.f32 %v1961_v34, %v1849_v9  ;;  %v1854_v41 = vpop.f32.mrf.mxu3 }
 0x213   : > { %v1625_v62 = vpop.f32.mrf.mxu1 }
 0x214   : > { %13813 = vst [vmem:[#allocation12_spill] sm:$0xff] %v10561_v48  ;;  %v1626_v51 = vadd.f32 %v1625_v62, %v13814_v14  ;;  %v1967_v43 = vpop.f32.mrf.mxu0  ;;  %v13824_v62 = vld [vmem:[#allocation26_spill] sm:$0xff] }
 0x215   : > { %2023 = vst.msk [vmem:[#allocation3 + $0x88] sm:$0xff] %vm191_vm0, %v10561_v48 }
 0x216   : > { %v1739_v20 = vadd.f32 %v1738_v52, %v1626_v51 }
 0x218   : > { %v1852_v33 = vadd.f32 %v1851_v21, %v1739_v20  ;;  %v13822_v21 = vld [vmem:[#allocation22_spill] sm:$0xff] }
 0x219   : > { %v1741_v22 = vpop.f32.mrf.mxu2 }
 0x21a   : > { %v10566_v61 = vadd.f32 %v1964_v60, %v1852_v33  ;;  %v1857_v39 = vpop.f32.mrf.mxu3 }
 0x21b   : > { %v1628_v26 = vpop.f32.mrf.mxu1 }
 0x21c   : > { %13815 = vst [vmem:[#allocation24_spill] sm:$0xff] %v10566_v61  ;;  %v1629_v58 = vadd.f32 %v1628_v26, %v13816_v63  ;;  %v1970_v7 = vpop.f32.mrf.mxu0  ;;  %v13826_v63 = vld [vmem:[#allocation4_spill] sm:$0xff] }
 0x21d   : > { %2024 = vst.msk [vmem:[#allocation3 + $0x90] sm:$0xff] %vm191_vm0, %v10566_v61 }
 0x21e   : > { %v1742_v13 = vadd.f32 %v1741_v22, %v1629_v58 }
 0x220   : > { %v1855_v2 = vadd.f32 %v1854_v41, %v1742_v13 }
 0x221   : > { %v1744_v44 = vpop.f32.mrf.mxu2 }
 0x222   : > { %v10571_v1 = vadd.f32 %v1967_v43, %v1855_v2  ;;  %v1860_v35 = vpop.f32.mrf.mxu3 }
 0x223   : > { %v1631_v27 = vpop.f32.mrf.mxu1 }
 0x224   : > { %13817 = vst [vmem:[#allocation27_spill] sm:$0xff] %v10571_v1  ;;  %v1632_v56 = vadd.f32 %v1631_v27, %v13818_v30  ;;  %v1973_v25 = vpop.f32.mrf.mxu0  ;;  %v13828_v30 = vld [vmem:[#allocation6_spill] sm:$0xff] }
 0x225   : > { %2025 = vst.msk [vmem:[#allocation3 + $0x98] sm:$0xff] %vm191_vm0, %v10571_v1 }
 0x226   : > { %v1745_v46 = vadd.f32 %v1744_v44, %v1632_v56 }
 0x228   : > { %v1858_v55 = vadd.f32 %v1857_v39, %v1745_v46 }
 0x229   : > { %v1747_v16 = vpop.f32.mrf.mxu2 }
 0x22a   : > { %v10576_v32 = vadd.f32 %v1970_v7, %v1858_v55  ;;  %v1863_v3 = vpop.f32.mrf.mxu3 }
 0x22b   : > { %v1634_v40 = vpop.f32.mrf.mxu1 }
 0x22c   : > { %13819 = vst [vmem:[#allocation5_spill] sm:$0xff] %v10576_v32  ;;  %v1635_v11 = vadd.f32 %v1634_v40, %v13820_v45  ;;  %v1976_v47 = vpop.f32.mrf.mxu0 }
 0x22d   : > { %2026 = vst.msk [vmem:[#allocation3 + $0xa0] sm:$0xff] %vm191_vm0, %v10576_v32 }
 0x22e   : > { %v1748_v29 = vadd.f32 %v1747_v16, %v1635_v11  ;;  %v13830_v11 = vld [vmem:[#allocation10_spill] sm:$0xff] }
 0x230   : > { %v1861_v6 = vadd.f32 %v1860_v35, %v1748_v29 }
 0x231   : > { %v1750_v34 = vpop.f32.mrf.mxu2 }
 0x232   : > { %v10581_v38 = vadd.f32 %v1973_v25, %v1861_v6  ;;  %v1866_v8 = vpop.f32.mrf.mxu3 }
 0x233   : > { %v1637_v24 = vpop.f32.mrf.mxu1 }
 0x234   : > { %13821 = vst [vmem:[#allocation9_spill] sm:$0xff] %v10581_v38  ;;  %v1638_v19 = vadd.f32 %v1637_v24, %v13822_v21  ;;  %v1979_v50 = vpop.f32.mrf.mxu0 }
 0x235   : > { %2027 = vst.msk [vmem:[#allocation3 + $0xa8] sm:$0xff] %vm191_vm0, %v10581_v38 }
 0x236   : > { %v1751_v5 = vadd.f32 %v1750_v34, %v1638_v19 }
 0x238   : > { %v1864_v60 = vadd.f32 %v1863_v3, %v1751_v5 }
 0x239   : > { %v1753_v17 = vpop.f32.mrf.mxu2 }
 0x23a   : > { %v10586_v9 = vadd.f32 %v1976_v47, %v1864_v60  ;;  %v1869_v52 = vpop.f32.mrf.mxu3 }
 0x23b   : > { %v1640_v41 = vpop.f32.mrf.mxu1 }
 0x23c   : > { %13823 = vst [vmem:[#allocation11_spill] sm:$0xff] %v10586_v9  ;;  %v1641_v14 = vadd.f32 %v1640_v41, %v13824_v62  ;;  %v1982_v51 = vpop.f32.mrf.mxu0 }
 0x23d   : > { %2028 = vst.msk [vmem:[#allocation3 + $0xb0] sm:$0xff] %vm191_vm0, %v10586_v9 }
 0x23e   : > { %v1754_v43 = vadd.f32 %v1753_v17, %v1641_v14 }
 0x240   : > { %v1867_v20 = vadd.f32 %v1866_v8, %v1754_v43  ;;  %v13834_v43 = vld [vmem:[#allocation15_spill] sm:$0xff] }
 0x241   : > { %v1756_v33 = vpop.f32.mrf.mxu2 }
 0x242   : > { %v10591_v22 = vadd.f32 %v1979_v50, %v1867_v20  ;;  %v1872_v39 = vpop.f32.mrf.mxu3  ;;  %v13832_v50 = vld [vmem:[#allocation13_spill] sm:$0xff] }
 0x243   : > { %v1643_v26 = vpop.f32.mrf.mxu1 }
 0x244   : > { %13825 = vst [vmem:[#allocation14_spill] sm:$0xff] %v10591_v22  ;;  %v1644_v58 = vadd.f32 %v1643_v26, %v13826_v63  ;;  %v1985_v7 = vpop.f32.mrf.mxu0 }
 0x245   : > { %2029 = vst.msk [vmem:[#allocation3 + $0xb8] sm:$0xff] %vm191_vm0, %v10591_v22 }
 0x246   : > { %v1757_v13 = vadd.f32 %v1756_v33, %v1644_v58 }
 0x248   : > { %v1870_v2 = vadd.f32 %v1869_v52, %v1757_v13 }
 0x249   : > { %v1759_v44 = vpop.f32.mrf.mxu2 }
 0x24a   : > { %v10596_v35 = vadd.f32 %v1982_v51, %v1870_v2  ;;  %v1875_v25 = vpop.f32.mrf.mxu3  ;;  %v13836_v2 = vld [vmem:[#allocation17_spill] sm:$0xff] }
 0x24b   : > { %v1646_v27 = vpop.f32.mrf.mxu1 }
 0x24c   : > { %13827 = vst [vmem:[#allocation16_spill] sm:$0xff] %v10596_v35  ;;  %v1647_v56 = vadd.f32 %v1646_v27, %v13828_v30  ;;  %v1988_v46 = vpop.f32.mrf.mxu0 }
 0x24d   : > { %2030 = vst.msk [vmem:[#allocation3 + $0xc0] sm:$0xff] %vm191_vm0, %v10596_v35 }
 0x24e   : > { %v1760_v55 = vadd.f32 %v1759_v44, %v1647_v56 }
 0x250   : > { %v1873_v16 = vadd.f32 %v1872_v39, %v1760_v55  ;;  %v13838_v55 = vld [vmem:[#allocation20_spill] sm:$0xff] }
 0x251   : > { %v1762_v3 = vpop.f32.mrf.mxu2 }
 0x252   : > { %v10601_v40 = vadd.f32 %v1985_v7, %v1873_v16  ;;  %v1878_v6 = vpop.f32.mrf.mxu3 }
 0x253   : > { %v1649_v45 = vpop.f32.mrf.mxu1 }
 0x254   : > { %13829 = vst [vmem:[#allocation19_spill] sm:$0xff] %v10601_v40  ;;  %v1650_v47 = vadd.f32 %v1649_v45, %v13830_v11  ;;  %v1991_v34 = vpop.f32.mrf.mxu0 }
 0x255   : > { %2031 = vst.msk [vmem:[#allocation3 + $0xc8] sm:$0xff] %vm191_vm0, %v10601_v40 }
 0x256   : > { %v1763_v29 = vadd.f32 %v1762_v3, %v1650_v47 }
 0x258   : > { %v1876_v8 = vadd.f32 %v1875_v25, %v1763_v29 }
 0x259   : > { %v1765_v24 = vpop.f32.mrf.mxu2 }
 0x25a   : > { %v10606_v21 = vadd.f32 %v1988_v46, %v1876_v8  ;;  %v1881_v52 = vpop.f32.mrf.mxu3 }
 0x25b   : > { %v1652_v19 = vpop.f32.mrf.mxu1 }
 0x25c   : > { %13831 = vst [vmem:[#allocation22_spill] sm:$0xff] %v10606_v21  ;;  %v1653_v5 = vadd.f32 %v1652_v19, %v13832_v50  ;;  %v1994_v62 = vpop.f32.mrf.mxu0 }
 0x25d   : > { %2032 = vst.msk [vmem:[#allocation3 + $0xd0] sm:$0xff] %vm191_vm0, %v10606_v21 }
 0x25e   : > { %v1766_v60 = vadd.f32 %v1765_v24, %v1653_v5 }
 0x260   : > { %v1879_v17 = vadd.f32 %v1878_v6, %v1766_v60 }
 0x261   : > { %v1768_v41 = vpop.f32.mrf.mxu2 }
 0x262   : > { %v10611_v14 = vadd.f32 %v1991_v34, %v1879_v17  ;;  %v1884_v58 = vpop.f32.mrf.mxu3  ;;  %v13840_v34 = vld [vmem:[#allocation23_spill] sm:$0xff] }
 0x263   : > { %v1655_v51 = vpop.f32.mrf.mxu1 }
 0x264   : > { %13833 = vst [vmem:[#allocation26_spill] sm:$0xff] %v10611_v14  ;;  %v1656_v20 = vadd.f32 %v1655_v51, %v13834_v43  ;;  %v1997_v13 = vpop.f32.mrf.mxu0 }
 0x265   : > { %2033 = vst.msk [vmem:[#allocation3 + $0xd8] sm:$0xff] %vm191_vm0, %v10611_v14 }
 0x266   : > { %v1769_v33 = vadd.f32 %v1768_v41, %v1656_v20 }
 0x268   : > { %v1882_v39 = vadd.f32 %v1881_v52, %v1769_v33 }
 0x269   : > { %v1771_v26 = vpop.f32.mrf.mxu2 }
 0x26a   : > { %v10616_v63 = vadd.f32 %v1994_v62, %v1882_v39  ;;  %v1887_v3 = vpop.f32.mrf.mxu3 }
 0x26b   : > { %v1658_v7 = vpop.f32.mrf.mxu1 }
 0x26c   : > { %13835 = vst [vmem:[#allocation4_spill] sm:$0xff] %v10616_v63  ;;  %v1659_v44 = vadd.f32 %v1658_v7, %v13836_v2  ;;  %v2000_v45 = vpop.f32.mrf.mxu0 }
 0x26d   : > { %2034 = vst.msk [vmem:[#allocation3 + $0xe0] sm:$0xff] %vm191_vm0, %v10616_v63 }
 0x26e   : > { %v1772_v27 = vadd.f32 %v1771_v26, %v1659_v44 }
 0x270   : > { %v1885_v30 = vadd.f32 %v1884_v58, %v1772_v27 }
 0x271   : > { %v1774_v25 = vpop.f32.mrf.mxu2 }
 0x272   : > { %v10621_v56 = vadd.f32 %v1997_v13, %v1885_v30  ;;  %v1890_v19 = vpop.f32.mrf.mxu3 }
 0x273   : > { %v1661_v46 = vpop.f32.mrf.mxu1 }
 0x274   : > { %13837 = vst [vmem:[#allocation6_spill] sm:$0xff] %v10621_v56  ;;  %v1662_v16 = vadd.f32 %v1661_v46, %v13838_v55  ;;  %v2003_v5 = vpop.f32.mrf.mxu0 }
 0x275   : > { %2035 = vst.msk [vmem:[#allocation3 + $0xe8] sm:$0xff] %vm191_vm0, %v10621_v56 }
 0x276   : > { %v1775_v11 = vadd.f32 %v1774_v25, %v1662_v16 }
 0x278   : > { %v1888_v47 = vadd.f32 %v1887_v3, %v1775_v11 }
 0x279   : > { %v1777_v24 = vpop.f32.mrf.mxu2 }
 0x27a   : > { %v10626_v29 = vadd.f32 %v2000_v45, %v1888_v47 }
 0x27b   : > { %v1664_v6 = vpop.f32.mrf.mxu1 }
 0x27c   : > { %13839 = vst [vmem:[#allocation10_spill] sm:$0xff] %v10626_v29  ;;  %v1665_v8 = vadd.f32 %v1664_v6, %v13840_v34 }
 0x27d   : > { %2036 = vst.msk [vmem:[#allocation3 + $0xf0] sm:$0xff] %vm191_vm0, %v10626_v29 }
 0x27e   : > { %v1778_v50 = vadd.f32 %v1777_v24, %v1665_v8 }
 0x280   : > { %v1891_v60 = vadd.f32 %v1890_v19, %v1778_v50 }
 0x282   : > { %v10631_v17 = vadd.f32 %v2003_v5, %v1891_v60 }
 0x284   : > { %13841 = vst [vmem:[#allocation13_spill] sm:$0xff] %v10631_v17 }
 0x285   : > { %2037 = vst.msk [vmem:[#allocation3 + $0xf8] sm:$0xff] %vm191_vm0, %v10631_v17 }
 0x286 LB: >> { %v2060_v52 = vld [vmem:[#allocation3 + $0x80] sm:$0xff]  ;;  %v2061_v41 = vld [vmem:[#allocation3 + $0x88] sm:$0xff]  ;;  %v2058_v62 = vld [vmem:[#allocation3 + $0x70] sm:$0xff]  ;;  %s9289_s10 = smov 64   ;;  %s2043_s17 = sadd.s32 1, %s9285_s17   ;;  %s9285_s17 = sphi %s10635_s17, %s2043_s17  }
 0x287   : >> { %v2165_v51 = vmax.f32 %v2060_v52, 0.0  ;;  %v2166_v43 = vmax.f32 %v2061_v41, 0.0  ;;  %v2163_v20 = vmax.f32 %v2058_v62, 0.0  ;;  %v2062_v33 = vld [vmem:[#allocation3 + $0x90] sm:$0xff]  ;;  %v2059_v39 = vld [vmem:[#allocation3 + $0x78] sm:$0xff]  ;;  %v2048_v2 = vld [vmem:[#allocation3 + $0x20] sm:$0xff] }
 0x288   : >> { %v2167_v26 = vmax.f32 %v2062_v33, 0.0  ;;  %v2046_v58 = vld [vmem:[#allocation3 + $0x10] sm:$0xff]  ;;  %v2063_v7 = vld [vmem:[#allocation3 + $0x98] sm:$0xff]  ;;  %v2164_v13 = vmax.f32 %v2059_v39, 0.0  ;;  %v2065_v27 = vld [vmem:[#allocation3 + $0xa8] sm:$0xff]  ;;  %v2153_v46 = vmax.f32 %v2048_v2, 0.0 }
 0x289   : >> { %2197 = vst.msk [vmem:[#allocation2 + $0xd9] sm:$0xff] %vm191_vm0, %v2165_v51  ;;  %v2151_v44 = vmax.f32 %v2046_v58, 0.0  ;;  %v2168_v30 = vmax.f32 %v2063_v7, 0.0  ;;  %v2050_v25 = vld [vmem:[#allocation3 + $0x30] sm:$0xff]  ;;  %v2067_v55 = vld [vmem:[#allocation3 + $0xb8] sm:$0xff]  ;;  %v2170_v16 = vmax.f32 %v2065_v27, 0.0 }
 0x28a   : >> { %2198 = vst.msk [vmem:[#allocation2 + $0xe1] sm:$0xff] %vm191_vm0, %v2166_v43  ;;  %v2045_v3 = vld [vmem:[#allocation3 + $0x8] sm:$0xff]  ;;  %v2155_v45 = vmax.f32 %v2050_v25, 0.0  ;;  %v2064_v11 = vld [vmem:[#allocation3 + $0xa0] sm:$0xff]  ;;  %v2172_v47 = vmax.f32 %v2067_v55, 0.0  ;;  %v2071_v2 = vld [vmem:[#allocation3 + $0xd8] sm:$0xff] }
 0x28b   : >> { %2195 = vst.msk [vmem:[#allocation2 + $0xc1] sm:$0xff] %vm191_vm0, %v2163_v20  ;;  %v2044_v6 = vld [vmem:[#allocation3] sm:$0xff]  ;;  %v2150_v24 = vmax.f32 %v2045_v3, 0.0  ;;  %v2169_v5 = vmax.f32 %v2064_v11, 0.0  ;;  %v2069_v60 = vld [vmem:[#allocation3 + $0xc8] sm:$0xff]  ;;  %v2047_v25 = vld [vmem:[#allocation3 + $0x18] sm:$0xff] }
 0x28c   : >> { %2199 = vst.msk [vmem:[#allocation2 + $0xf1] sm:$0xff] %vm191_vm0, %v2167_v26  ;;  %v2052_v19 = vld [vmem:[#allocation3 + $0x40] sm:$0xff]  ;;  %v2149_v62 = vmax.f32 %v2044_v6, 0.0  ;;  %v2174_v20 = vmax.f32 %v2069_v60, 0.0  ;;  %v2245_v26 = vld [vmem:[#allocation2 + $0x1] sm:$0xff]  ;;  %v2152_v55 = vmax.f32 %v2047_v25, 0.0 }
 0x28d   : >> { %2196 = vst.msk [vmem:[#allocation2 + $0xc9] sm:$0xff] %vm191_vm0, %v2164_v13  ;;  %v2157_v43 = vmax.f32 %v2052_v19, 0.0  ;;  %v2246_v33 = vld [vmem:[#allocation2 + $0x9] sm:$0xff]  ;;  %v2054_v13 = vld [vmem:[#allocation3 + $0x50] sm:$0xff]  ;;  %v2073_v60 = vld [vmem:[#allocation3 + $0xe8] sm:$0xff]  ;;  %p2040_p4 = scmp.ge.s32.totalorder %s2043_s17, 9  }
 0x28e   : >> { %2183 = vst.msk [vmem:[#allocation2 + $0x31] sm:$0xff] %vm191_vm0, %v2151_v44  ;;  %v2159_v27 = vmax.f32 %v2054_v13, 0.0  ;;  %v7587_v29 = vld [vmem:[%s13722_s2 + $0x310] sm:$0xff]  ;;  %v10804_v63 = vld [vmem:[%s13722_s2 + $0x300] sm:$0xff]  ;;  %v7584_v21 = vld [vmem:[%s13722_s2 + $0x2f8] sm:$0xff] }
 0x28f   : >> { %2200 = vst.msk [vmem:[#allocation2 + $0xf9] sm:$0xff] %vm191_vm0, %v2168_v30  ;;  %v2176_v30 = vmax.f32 %v2071_v2, 0.0  ;;  %v2049_v2 = vld [vmem:[#allocation3 + $0x28] sm:$0xff]  ;;  %v7567_v35 = vld [vmem:[%s13722_s2 + $0x270] sm:$0xff] }
 0x290   : >> { %v2263_v34 = vld [vmem:[#allocation2 + $0xd9] sm:$0xff]  ;;  %2185 = vst.msk [vmem:[#allocation2 + $0x49] sm:$0xff] %vm191_vm0, %v2153_v46 }
 0x291   : >> { %v10647_v8 = vld [vmem:[#allocation2 + $0xd8] sm:$0xff]  ;;  %v10650_v50 = vld [vmem:[#allocation2 + $0xe0] sm:$0xff]  ;;  %2202 = vst.msk [vmem:[#allocation2 + $0x111] sm:$0xff] %vm191_vm0, %v2170_v16 }
 0x292   : >> { %v8355_v52 = vpack.i.bf16 %v2263_v34, %v10650_v50  ;;  %v2261_v41 = vld [vmem:[#allocation2 + $0xc1] sm:$0xff]  ;;  %2187 = vst.msk [vmem:[#allocation2 + $0x61] sm:$0xff] %vm191_vm0, %v2155_v45  ;;  %v7580_v9 = vld [vmem:[%s13722_s2 + $0x2d8] sm:$0xff] }
 0x293   : >> { %v8345_v51 = vpack.i.bf16 %v10647_v8, %v2261_v41  ;;  %2204 = vst.msk [vmem:[#allocation2 + $0x129] sm:$0xff] %vm191_vm0, %v2172_v47  ;;  %v10660_v39 = vld [vmem:[#allocation2 + $0xf0] sm:$0xff]  ;;  %v2066_v46 = vld [vmem:[#allocation3 + $0xb0] sm:$0xff] }
 0x294   : >> { %8356 = vrot.lane.b32.xlu1 %v8355_v52, %s9289_s10  ;;  %2182 = vst.msk [vmem:[#allocation2 + $0x21] sm:$0xff] %vm191_vm0, %v2150_v24  ;;  %v2262_v58 = vld [vmem:[#allocation2 + $0xc9] sm:$0xff]  ;;  %v8360_v7 = vpack.i.bf16 %v10660_v39, %v2246_v33  ;;  %v2171_v16 = vmax.f32 %v2066_v46, 0.0  ;;  %v2264_v3 = vld [vmem:[#allocation2 + $0xe1] sm:$0xff]  ;;  %v2265_v41 = vld [vmem:[#allocation2 + $0xf1] sm:$0xff]  ;;  %v2154_v46 = vmax.f32 %v2049_v2, 0.0 }
 0x295   : >> { %8346 = vrot.lane.b32.xlu0 %v8345_v51, %s9289_s10  ;;  %2201 = vst.msk [vmem:[#allocation2 + $0x109] sm:$0xff] %vm191_vm0, %v2169_v5  ;;  %v8350_v44 = vpack.i.bf16 %v2245_v26, %v2262_v58  ;;  %v10671_v45 = vld [vmem:[#allocation2 + $0x31] sm:$0xff]  ;;  %v10979_v59 = vld [vmem:[#allocation2 + $0xc0] sm:$0xff] }
 0x296   : >> { %2181 = vst.msk [vmem:[#allocation2 + $0x19] sm:$0xff] %vm191_vm0, %v2149_v62  ;;  %v2266_v11 = vld [vmem:[#allocation2 + $0xf9] sm:$0xff]  ;;  %v2056_v5 = vld [vmem:[#allocation3 + $0x60] sm:$0xff]  ;;  %v10981_v4 = vld [vmem:[#allocation2 + $0xc2] sm:$0xff] }
 0x297   : >> { %2189 = vst.msk [vmem:[#allocation2 + $0x79] sm:$0xff] %vm191_vm0, %v2157_v43  ;;  %v8380_v19 = vpack.i.bf16 %v10671_v45, %v2266_v11  ;;  %v10680_v62 = vld [vmem:[#allocation2 + $0xf8] sm:$0xff]  ;;  %v2161_v51 = vmax.f32 %v2056_v5, 0.0  ;;  %v2178_v43 = vmax.f32 %v2073_v60, 0.0  ;;  %v10686_v33 = vld [vmem:[#allocation2 + $0x49] sm:$0xff] }
 0x298   : >> { %2206 = vst.msk [vmem:[#allocation2 + $0x141] sm:$0xff] %vm191_vm0, %v2174_v20  ;;  %v8370_v20 = vpack.i.bf16 %v2265_v41, %v10680_v62  ;;  %v2268_v26 = vld [vmem:[#allocation2 + $0x111] sm:$0xff]  ;;  %v11029_v31 = vld [vmem:[#allocation2 + $0xda] sm:$0xff] }
 0x299   : >> { %2191 = vst.msk [vmem:[#allocation2 + $0x91] sm:$0xff] %vm191_vm0, %v2159_v27  ;;  %v8395_v13 = vpack.i.bf16 %v10686_v33, %v2268_v26  ;;  %v10861_v1 = vld [vmem:[#allocation2 + $0x30] sm:$0xff] }
 0x29a   : >> { %2208 = vst.msk [vmem:[#allocation2 + $0x159] sm:$0xff] %vm191_vm0, %v2176_v30  ;;  %v2270_v11 = vld [vmem:[#allocation2 + $0x129] sm:$0xff] }
 0x29b   : >> { %2184 = vst.msk [vmem:[#allocation2 + $0x39] sm:$0xff] %vm191_vm0, %v2152_v55  ;;  %v2248_v6 = vld [vmem:[#allocation2 + $0x21] sm:$0xff] }
 0x29c   : >> { %8361 = vrot.lane.b32.xlu1 %v8360_v7, %s9289_s10  ;;  %v10674_v34 = vld [vmem:[#allocation2 + $0x108] sm:$0xff]  ;;  %2203 = vst.msk [vmem:[#allocation2 + $0x121] sm:$0xff] %vm191_vm0, %v2171_v16  ;;  %v10697_v25 = vld [vmem:[#allocation2 + $0x110] sm:$0xff] }
 0x29d   : >> { %8351 = vrot.lane.b32.xlu0 %v8350_v44, %s9289_s10  ;;  %v2247_v47 = vld [vmem:[#allocation2 + $0x19] sm:$0xff]  ;;  %v8375_v52 = vpack.i.bf16 %v10674_v34, %v2248_v6  ;;  %2193 = vst.msk [vmem:[#allocation2 + $0xa9] sm:$0xff] %vm191_vm0, %v2161_v51  ;;  %v2068_v44 = vld [vmem:[#allocation3 + $0xc0] sm:$0xff]  ;;  %v10824_v22 = vld [vmem:[#allocation2 + $0x22] sm:$0xff] }
 0x29e   : >> { %v8365_v24 = vpack.i.bf16 %v2247_v47, %v2264_v3  ;;  %2210 = vst.msk [vmem:[#allocation2 + $0x171] sm:$0xff] %vm191_vm0, %v2178_v43  ;;  %v2267_v30 = vld [vmem:[#allocation2 + $0x109] sm:$0xff]  ;;  %v2173_v55 = vmax.f32 %v2068_v44, 0.0  ;;  %v10703_v3 = vld [vmem:[#allocation2 + $0x61] sm:$0xff] }
 0x29f   : >> { %2186 = vst.msk [vmem:[#allocation2 + $0x51] sm:$0xff] %vm191_vm0, %v2154_v46  ;;  %v8385_v16 = vpack.i.bf16 %v2267_v30, %v10697_v25  ;;  %v8410_v47 = vpack.i.bf16 %v10703_v3, %v2270_v11  ;;  %v2070_v6 = vld [vmem:[#allocation3 + $0xd0] sm:$0xff]  ;;  %v2051_v43 = vld [vmem:[#allocation3 + $0x38] sm:$0xff]  ;;  %v2072_v44 = vld [vmem:[#allocation3 + $0xe0] sm:$0xff] }
 0x2a0   : >> { %8366 = vrot.lane.b32.xlu2 %v8365_v24, %s9289_s10  ;;  %2205 = vst.msk [vmem:[#allocation2 + $0x139] sm:$0xff] %vm191_vm0, %v2173_v55  ;;  %v2175_v5 = vmax.f32 %v2070_v6, 0.0  ;;  %v2272_v26 = vld [vmem:[#allocation2 + $0x141] sm:$0xff]  ;;  %v2177_v46 = vmax.f32 %v2072_v44, 0.0  ;;  %v10727_v55 = vld [vmem:[#allocation2 + $0x91] sm:$0xff] }
 0x2a1   : >> { %v7592_v6 = vld [vmem:[%s13722_s2 + $0x338] sm:$0xff]  ;;  %v7574_v44 = vld [vmem:[%s13722_s2 + $0x2a8] sm:$0xff] }
 0x2a2   : >> { %v10689_v58 = vld [vmem:[#allocation2 + $0x39] sm:$0xff]  ;;  %2207 = vst.msk [vmem:[#allocation2 + $0x151] sm:$0xff] %vm191_vm0, %v2175_v5  ;;  %7942 = vmatpush.msra.mxu3 %v7592_v6  ;;  %3350 = vmatpush.msra.mxu1 %v7592_v6 }
 0x2a3   : >> { %v10691_v7 = vld [vmem:[#allocation2 + $0x120] sm:$0xff]  ;;  %2209 = vst.msk [vmem:[#allocation2 + $0x169] sm:$0xff] %vm191_vm0, %v2177_v46  ;;  %v7590_v46 = vld [vmem:[%s13722_s2 + $0x328] sm:$0xff]  ;;  %v2053_v6 = vld [vmem:[#allocation3 + $0x48] sm:$0xff] }
 0x2a4   : >> { %8381 = vrot.lane.b32.xlu1 %v8380_v19, %s9289_s10  ;;  %v8390_v27 = vpack.i.bf16 %v10691_v7, %v10689_v58  ;;  %v2269_v24 = vld [vmem:[#allocation2 + $0x121] sm:$0xff]  ;;  %v2274_v5 = vld [vmem:[#allocation2 + $0x159] sm:$0xff]  ;;  %v2158_v17 = vmax.f32 %v2053_v6, 0.0  ;;  %v10781_v6 = vld [vmem:[#allocation2 + $0xa9] sm:$0xff] }
 0x2a5   : >> { %8376 = vrot.lane.b32.xlu0 %v8375_v52, %s9289_s10  ;;  %v10708_v19 = vld [vmem:[#allocation2 + $0x128] sm:$0xff] }
 0x2a6   : >> { %v10710_v60 = vld [vmem:[#allocation2 + $0x51] sm:$0xff]  ;;  %v8400_v41 = vpack.i.bf16 %v2269_v24, %v10708_v19  ;;  %v2074_v24 = vld [vmem:[#allocation3 + $0xf0] sm:$0xff]  ;;  %2190 = vst.msk [vmem:[#allocation2 + $0x81] sm:$0xff] %vm191_vm0, %v2158_v17  ;;  %v7570_v17 = vld [vmem:[%s13722_s2 + $0x288] sm:$0xff] }
 0x2a7   : >> { %v10712_v52 = vld [vmem:[#allocation2 + $0x138] sm:$0xff]  ;;  %v10725_v30 = vld [vmem:[#allocation2 + $0x140] sm:$0xff] }
 0x2a8   : >> { %8371 = vrot.lane.b32.xlu2 %v8370_v20, %s9289_s10  ;;  %v8405_v51 = vpack.i.bf16 %v10712_v52, %v10710_v60  ;;  %v10719_v20 = vld [vmem:[#allocation2 + $0x79] sm:$0xff] }
 0x2a9   : >> { %v8425_v2 = vpack.i.bf16 %v10719_v20, %v2272_v26 }
 0x2aa   : >> { %v2275_v56 = vld [vmem:[#allocation2 + $0x169] sm:$0xff] }
 0x2ac   : >> { %8396 = vrot.lane.b32.xlu1 %v8395_v13, %s9289_s10  ;;  %v2156_v13 = vmax.f32 %v2051_v43, 0.0  ;;  %v7575_v43 = vld [vmem:[%s13722_s2 + $0x2b0] sm:$0xff] }
 0x2ad   : >> { %8391 = vrot.lane.b32.xlu0 %v8390_v27, %s9289_s10  ;;  %v2271_v27 = vld [vmem:[#allocation2 + $0x139] sm:$0xff] }
 0x2ae   : >> { %2188 = vst.msk [vmem:[#allocation2 + $0x69] sm:$0xff] %vm191_vm0, %v2156_v13  ;;  %v8415_v11 = vpack.i.bf16 %v2271_v27, %v10725_v30 }
 0x2b0   : >> { %8386 = vrot.lane.b32.xlu2 %v8385_v16, %s9289_s10  ;;  %v10729_v16 = vld [vmem:[#allocation2 + $0x150] sm:$0xff] }
 0x2b4   : >> { %8411 = vrot.lane.b32.xlu1 %v8410_v47, %s9289_s10  ;;  %v7576_v47 = vld [vmem:[%s13722_s2 + $0x2b8] sm:$0xff] }
 0x2b5   : >> { %8406 = vrot.lane.b32.xlu0 %v8405_v51, %s9289_s10  ;;  %7926 = vmatpush.msra.mxu2 %v7576_v47  ;;  %v2179_v51 = vmax.f32 %v2074_v24, 0.0  ;;  %v10743_v26 = vld [vmem:[#allocation2 + $0x69] sm:$0xff]  ;;  %v8440_v24 = vpack.i.bf16 %v10727_v55, %v2274_v5  ;;  %v7589_v5 = vld [vmem:[%s13722_s2 + $0x320] sm:$0xff] }
 0x2b6   : >> { %3237 = vmatpush.msra.mxu0 %v7576_v47  ;;  %v8420_v27 = vpack.i.bf16 %v10729_v16, %v10743_v26  ;;  %v7573_v47 = vld [vmem:[%s13722_s2 + $0x2a0] sm:$0xff] }
 0x2b7   : >> { %2211 = vst.msk [vmem:[#allocation2 + $0x181] sm:$0xff] %vm191_vm0, %v2179_v51  ;;  %7927 = vmatpush.msra.mxu2 %v7575_v43  ;;  %v10763_v51 = vld [vmem:[#allocation2 + $0x158] sm:$0xff] }
 0x2b8   : >> { %8401 = vrot.lane.b32.xlu2 %v8400_v41, %s9289_s10  ;;  %v2075_v41 = vld [vmem:[#allocation3 + $0xf8] sm:$0xff]  ;;  %3238 = vmatpush.msra.mxu0 %v7575_v43  ;;  %v7588_v43 = vld [vmem:[%s13722_s2 + $0x318] sm:$0xff] }
 0x2b9   : >> { %v2180_v13 = vmax.f32 %v2075_v41, 0.0  ;;  %v2273_v41 = vld [vmem:[#allocation2 + $0x151] sm:$0xff]  ;;  %7928 = vmatpush.msra.mxu2 %v7574_v44 }
 0x2ba   : >> { %3239 = vmatpush.msra.mxu0 %v7574_v44  ;;  %v2276_v44 = vld [vmem:[#allocation2 + $0x171] sm:$0xff] }
 0x2bb   : >> { %2212 = vst.msk [vmem:[#allocation2 + $0x189] sm:$0xff] %vm191_vm0, %v2180_v13  ;;  %7929 = vmatpush.msra.mxu2 %v7573_v47  ;;  %v8430_v13 = vpack.i.bf16 %v2273_v41, %v10763_v51  ;;  %v10796_v41 = vld [vmem:[#allocation2 + $0x168] sm:$0xff] }
 0x2bc   : >> { %8426 = vrot.lane.b32.xlu1 %v8425_v2, %s9289_s10  ;;  %v7591_v2 = vld [vmem:[%s13722_s2 + $0x330] sm:$0xff]  ;;  %3240 = vmatpush.msra.mxu0 %v7573_v47  ;;  %v7569_v47 = vld [vmem:[%s13722_s2 + $0x280] sm:$0xff] }
 0x2bd   : >> { %7943 = vmatpush.msra.mxu3 %v7591_v2  ;;  %8421 = vrot.lane.b32.xlu0 %v8420_v27, %s9289_s10  ;;  %v7571_v27 = vld [vmem:[%s13722_s2 + $0x290] sm:$0xff] }
 0x2be   : >> { %3351 = vmatpush.msra.mxu1 %v7591_v2  ;;  %v10792_v2 = vld [vmem:[%s13722_s2 + $0x308] sm:$0xff] }
 0x2bf   : >> { %7944 = vmatpush.msra.mxu3 %v7590_v46 }
 0x2c0   : >> { %8416 = vrot.lane.b32.xlu2 %v8415_v11, %s9289_s10  ;;  %v7572_v11 = vld [vmem:[%s13722_s2 + $0x298] sm:$0xff]  ;;  %3352 = vmatpush.msra.mxu1 %v7590_v46  ;;  %v2338_v46 = vld [vmem:[#allocation2 + $0x170] sm:$0xff] }
 0x2c1   : >> { %7945 = vmatpush.msra.mxu3 %v7589_v5  ;;  %7930 = vmatpush.msra.mxu2 %v7572_v11  ;;  %v8445_v40 = vpack.i.bf16 %v2275_v56, %v2338_v46  ;;  %v7566_v56 = vld [vmem:[%s13722_s2 + $0x268] sm:$0xff]  ;;  %v7565_v46 = vld [vmem:[%s13722_s2 + $0x260] sm:$0xff] }
 0x2c2   : >> { %3241 = vmatpush.msra.mxu0 %v7572_v11  ;;  %v10806_v11 = vld [vmem:[#allocation2 + $0x81] sm:$0xff]  ;;  %3353 = vmatpush.msra.mxu1 %v7589_v5  ;;  %v10822_v5 = vld [vmem:[#allocation2 + $0x18] sm:$0xff] }
 0x2c3   : >> { %7946 = vmatpush.msra.mxu3 %v7588_v43  ;;  %7931 = vmatpush.msra.mxu2 %v7571_v27  ;;  %v8435_v14 = vpack.i.bf16 %v10796_v41, %v10806_v11 }
 0x2c4   : >> { %8441 = vrot.lane.b32.xlu1 %v8440_v24, %s9289_s10  ;;  %v8455_v24 = vpack.i.bf16 %v10781_v6, %v2276_v44  ;;  %3242 = vmatpush.msra.mxu0 %v7571_v27  ;;  %v2055_v44 = vld [vmem:[#allocation3 + $0x58] sm:$0xff] }
 0x2c5   : >> { %7947 = vmatpush.msra.mxu3 %v7587_v29  ;;  %7932 = vmatpush.msra.mxu2 %v7570_v17  ;;  %v2160_v27 = vmax.f32 %v2055_v44, 0.0  ;;  %v2340_v44 = vld [vmem:[#allocation2 + $0x188] sm:$0xff] }
 0x2c6   : >> { %3243 = vmatpush.msra.mxu0 %v7570_v17  ;;  %8436 = vrot.lane.b32.xlu0 %v8435_v14, %s9289_s10  ;;  %v7583_v17 = vld [vmem:[%s13722_s2 + $0x2f0] sm:$0xff]  ;;  %v8470_v14 = vpack.i.bf16 %v10824_v22, %v10822_v5 }
 0x2c7   : >> { %7948 = vmatpush.msra.mxu3 %v10792_v2  ;;  %7933 = vmatpush.msra.mxu2 %v7569_v47  ;;  %2192 = vst.msk [vmem:[#allocation2 + $0x99] sm:$0xff] %vm191_vm0, %v2160_v27  ;;  %v10843_v27 = vld [vmem:[#allocation2 + $0x1a] sm:$0xff] }
 0x2c8   : >> { %8431 = vrot.lane.b32.xlu2 %v8430_v13, %s9289_s10  ;;  %v7568_v13 = vld [vmem:[%s13722_s2 + $0x278] sm:$0xff]  ;;  %3244 = vmatpush.msra.mxu0 %v7569_v47  ;;  %v7581_v47 = vld [vmem:[%s13722_s2 + $0x2e0] sm:$0xff]  ;;  %v8460_v38 = vpack.i.bf16 %v10843_v27, %v2340_v44 }
 0x2c9   : >> { %7949 = vmatpush.msra.mxu3 %v10804_v63  ;;  %7934 = vmatpush.msra.mxu2 %v7568_v13  ;;  %v10874_v44 = vld [vmem:[#allocation2 + $0x20] sm:$0xff] }
 0x2ca   : >> { %3354 = vmatpush.msra.mxu1 %v7588_v43  ;;  %3245 = vmatpush.msra.mxu0 %v7568_v13  ;;  %v7564_v43 = vld [vmem:[%s13722_s2 + $0x258] sm:$0xff]  ;;  %v7563_v13 = vld [vmem:[%s13722_s2 + $0x250] sm:$0xff] }
 0x2cb   : >> { %7950 = vmatpush.msra.mxu3 %v7584_v21  ;;  %7935 = vmatpush.msra.mxu2 %v7567_v35 }
 0x2cc   : >> { %8456 = vrot.lane.b32.xlu1 %v8455_v24, %s9289_s10  ;;  %v7582_v24 = vld [vmem:[%s13722_s2 + $0x2e8] sm:$0xff]  ;;  %3355 = vmatpush.msra.mxu1 %v7587_v29  ;;  %v10863_v29 = vld [vmem:[#allocation2 + $0x3a] sm:$0xff] }
 0x2cd   : >> { %7951 = vmatpush.msra.mxu3 %v7583_v17  ;;  %7936 = vmatpush.msra.mxu2 %v7566_v56 }
 0x2ce   : >> { %3246 = vmatpush.msra.mxu0 %v7567_v35  ;;  %v10856_v32 = vld [vmem:[#allocation2 + $0x99] sm:$0xff]  ;;  %v7579_v35 = vld [vmem:[%s13722_s2 + $0x2d0] sm:$0xff]  ;;  %3356 = vmatpush.msra.mxu1 %v10792_v2  ;;  %v8475_v2 = vpack.i.bf16 %v10874_v44, %v10689_v58 }
 0x2cf   : >> { %7952 = vmatpush.msra.mxu3 %v7582_v24  ;;  %7937 = vmatpush.msra.mxu2 %v7565_v46  ;;  %v10892_v58 = vld [vmem:[#allocation2 + $0x60] sm:$0xff] }
 0x2d0   : >> { %8446 = vrot.lane.b32.xlu2 %v8445_v40, %s9289_s10  ;;  %v2339_v40 = vld [vmem:[#allocation2 + $0x180] sm:$0xff]  ;;  %3247 = vmatpush.msra.mxu0 %v7566_v56  ;;  %v10882_v56 = vld [vmem:[#allocation2 + $0x52] sm:$0xff] }
 0x2d1   : >> { %7953 = vmatpush.msra.mxu3 %v7581_v47  ;;  %7938 = vmatpush.msra.mxu2 %v7564_v43  ;;  %v8450_v61 = vpack.i.bf16 %v2339_v40, %v10856_v32 }
 0x2d2   : >> { %3248 = vmatpush.msra.mxu0 %v7565_v46  ;;  %3357 = vmatpush.msra.mxu1 %v10804_v63  ;;  %v10887_v63 = vld [vmem:[#allocation2 + $0x38] sm:$0xff]  ;;  %v10894_v46 = vld [vmem:[#allocation2 + $0x6a] sm:$0xff] }
 0x2d3   : >> { %7954 = vmatpush.msra.mxu3 %v7580_v9  ;;  %8451 = vrot.lane.b32.xlu0 %v8450_v61, %s9289_s10  ;;  %v10880_v61 = vld [vmem:[#allocation2 + $0x48] sm:$0xff] }
 0x2d4   : >> { %8471 = vrot.lane.b32.xlu1 %v8470_v14, %s9289_s10  ;;  %7939 = vmatpush.msra.mxu2 %v7563_v13  ;;  %v8485_v14 = vpack.i.bf16 %v10863_v29, %v10861_v1 }
 0x2d5   : >> { %7955 = vmatpush.msra.mxu3 %v7579_v35  ;;  %3249 = vmatpush.msra.mxu0 %v7564_v43  ;;  %v2057_v43 = vld [vmem:[#allocation3 + $0x68] sm:$0xff] }
 0x2d6   : >> { %3358 = vmatpush.msra.mxu1 %v7584_v21  ;;  %v8490_v21 = vpack.i.bf16 %v10887_v63, %v10710_v60  ;;  %v7561_v60 = vld [vmem:[%s13722_s2 + $0x240] sm:$0xff]  ;;  %v2162_v40 = vmax.f32 %v2057_v43, 0.0 }
 0x2d7   : >> { %3250 = vmatpush.msra.mxu0 %v7563_v13  ;;  %v7608_v13 = vld [vmem:[%s13722_s2 + $0x3b8] sm:$0xff] }
 0x2d8   : >> { %8461 = vrot.lane.b32.xlu2 %v8460_v38, %s9289_s10  ;;  %3359 = vmatpush.msra.mxu1 %v7583_v17  ;;  %v8500_v38 = vpack.i.bf16 %v10882_v56, %v10880_v61  ;;  %v7562_v17 = vld [vmem:[%s13722_s2 + $0x248] sm:$0xff]  ;;  %2194 = vst.msk [vmem:[#allocation2 + $0xb1] sm:$0xff] %vm191_vm0, %v2162_v40 }
 0x2d9   : >> { %7940 = vmatpush.msra.mxu2 %v7562_v17  ;;  %3251 = vmatpush.msra.mxu0 %v7562_v17  ;;  %v7623_v17 = vld [vmem:[%s13722_s2 + $0x430] sm:$0xff] }
 0x2da   : >> { %3360 = vmatpush.msra.mxu1 %v7582_v24  ;;  %v7578_v24 = vld [vmem:[%s13722_s2 + $0x2c8] sm:$0xff] }
 0x2db   : >> { %7956 = vmatpush.msra.mxu3 %v7578_v24  ;;  %7941 = vmatpush.msra.mxu2 %v7561_v60 }
 0x2dc   : >> { %8486 = vrot.lane.b32.xlu1 %v8485_v14, %s9289_s10  ;;  %3361 = vmatpush.msra.mxu1 %v7581_v47  ;;  %v7577_v47 = vld [vmem:[%s13722_s2 + $0x2c0] sm:$0xff] }
 0x2dd   : >> { %7957 = vmatpush.msra.mxu3 %v7577_v47  ;;  %3252 = vmatpush.msra.mxu0 %v7561_v60 }
 0x2de   : >> { %3362 = vmatpush.msra.mxu1 %v7580_v9  ;;  %v8515_v9 = vpack.i.bf16 %v10894_v46, %v10892_v58  ;;  %3463 = vmatpush.msrb.mxu2 %v7608_v13  ;;  %v7622_v13 = vld [vmem:[%s13722_s2 + $0x428] sm:$0xff] }
 0x2df   : >> { %v10919_v14 = vld [vmem:[#allocation2 + $0xb1] sm:$0xff] }
 0x2e0   : >> { %8476 = vrot.lane.b32.xlu2 %v8475_v2, %s9289_s10  ;;  %3363 = vmatpush.msra.mxu1 %v7579_v35  ;;  %v7624_v35 = vld [vmem:[%s13722_s2 + $0x438] sm:$0xff] }
 0x2e1   : >> { %3576 = vmatpush.msrb.mxu3 %v7624_v35  ;;  %v10921_v2 = vld [vmem:[#allocation2 + $0x78] sm:$0xff] }
 0x2e2   : >> { %3364 = vmatpush.msra.mxu1 %v7578_v24  ;;  %v7632_v24 = vld [vmem:[%s13722_s2 + $0x478] sm:$0xff] }
 0x2e3   : >> { %3577 = vmatpush.msrb.mxu3 %v7623_v17  ;;  %3697 = vmatpush.msrb.mxu0 %v7632_v24  ;;  %v10959_v17 = vld [vmem:[#allocation2 + $0x9a] sm:$0xff]  ;;  %v11010_v49 = vld [vmem:[#allocation2 + $0xb2] sm:$0xff] }
 0x2e4   : >> { %8501 = vrot.lane.b32.xlu1 %v8500_v38, %s9289_s10  ;;  %3365 = vmatpush.msra.mxu1 %v7577_v47  ;;  %v10923_v38 = vld [vmem:[#allocation2 + $0x82] sm:$0xff]  ;;  %v10938_v47 = vld [vmem:[#allocation2 + $0x50] sm:$0xff] }
 0x2e5   : >> { %v8530_v60 = vpack.i.bf16 %v10923_v38, %v10921_v2  ;;  %v8505_v43 = vpack.i.bf16 %v10938_v47, %v10743_v26  ;;  %3578 = vmatpush.msrb.mxu3 %v7622_v13  ;;  %v10957_v26 = vld [vmem:[#allocation2 + $0x90] sm:$0xff]  ;;  %v7605_v24 = vld [vmem:[%s13722_s2 + $0x3a0] sm:$0xff]  ;;  %v10974_v13 = vld [vmem:[#allocation2 + $0x68] sm:$0xff] }
 0x2e6   : >> { %v8520_v36 = vpack.i.bf16 %v10974_v13, %v10806_v11 }
 0x2e8   : >> { %8491 = vrot.lane.b32.xlu2 %v8490_v21, %s9289_s10  ;;  %v7607_v21 = vld [vmem:[%s13722_s2 + $0x3b0] sm:$0xff] }
 0x2e9   : >> { %3464 = vmatpush.msrb.mxu2 %v7607_v21  ;;  %v10955_v21 = vld [vmem:[#allocation2 + $0x32] sm:$0xff] }
 0x2ec   : >> { %8516 = vrot.lane.b32.xlu1 %v8515_v9, %s9289_s10  ;;  %v8465_v9 = vpack.i.bf16 %v10671_v45, %v10919_v14  ;;  %v7606_v45 = vld [vmem:[%s13722_s2 + $0x3a8] sm:$0xff] }
 0x2ed   : >> { %3465 = vmatpush.msrb.mxu2 %v7606_v45  ;;  %v8545_v45 = vpack.i.bf16 %v10959_v17, %v10957_v26 }
 0x2ee   : >> { %8466 = vrot.lane.b32.xlu0 %v8465_v9, %s9289_s10  ;;  %v7621_v9 = vld [vmem:[%s13722_s2 + $0x420] sm:$0xff] }
 0x2ef   : >> { %3466 = vmatpush.msrb.mxu2 %v7605_v24  ;;  %3579 = vmatpush.msrb.mxu3 %v7621_v9 }
 0x2f0   : >> { %8506 = vrot.lane.b32.xlu2 %v8505_v43, %s9289_s10  ;;  %v8480_v43 = vpack.i.bf16 %v10686_v33, %v10955_v21 }
 0x2f4   : >> { %8531 = vrot.lane.b32.xlu1 %v8530_v60, %s9289_s10  ;;  %v7631_v60 = vld [vmem:[%s13722_s2 + $0x470] sm:$0xff] }
 0x2f5   : >> { %3698 = vmatpush.msrb.mxu0 %v7631_v60  ;;  %v7604_v60 = vld [vmem:[%s13722_s2 + $0x398] sm:$0xff] }
 0x2f6   : >> { %8481 = vrot.lane.b32.xlu0 %v8480_v43, %s9289_s10  ;;  %3467 = vmatpush.msrb.mxu2 %v7604_v60  ;;  %v11006_v60 = vld [vmem:[#allocation2 + $0x4a] sm:$0xff] }
 0x2f8   : >> { %8521 = vrot.lane.b32.xlu2 %v8520_v36, %s9289_s10 }
 0x2fa   : >> { %v10945_v40 = vpop.permute.xlu2 %8366 }
 0x2fc   : >> { %8546 = vrot.lane.b32.xlu1 %v8545_v45, %s9289_s10 }
 0x302   : >> { %v10953_v35 = vpop.permute.xlu2 %8371 }
 0x306   : >> { %v8357_v48 = vpop.permute.xlu1 %8356 }
 0x307   : >> { %v8347_v12 = vpop.permute.xlu0 %8346  ;;  %v8358_v43 = vunpack.i.l.bf16 %v8357_v48  ;;  %v8359_v23 = vunpack.i.h.bf16 %v8357_v48 }
 0x308   : >> { %v8349_v33 = vunpack.i.h.bf16 %v8347_v12  ;;  %v8348_v42 = vunpack.i.l.bf16 %v8347_v12  ;;  %v7620_v12 = vld [vmem:[%s13722_s2 + $0x418] sm:$0xff] }
 0x309   : >> { %3580 = vmatpush.msrb.mxu3 %v7620_v12  ;;  %v11008_v12 = vld [vmem:[#allocation2 + $0xa8] sm:$0xff] }
 0x30a   : >> { %v3029_v24 = vsel %vm191_vm0, %v10979_v59, %v8348_v42  ;;  %v3061_v9 = vsel %vm191_vm0, %v10981_v4, %v8349_v33  ;;  %v10989_v11 = vpop.permute.xlu2 %8386  ;;  %v10997_v42 = vld [vmem:[#allocation2 + $0xca] sm:$0xff]  ;;  %v2213_v33 = vld [vmem:[#allocation2] sm:$0xff] }
 0x30b   : >> { %3301 = vmatmul.f32.vlgmr.msra.gmra.mxu2 %v3029_v24  ;;  %3414 = vmatmul.f32.vlgmr.msra.gmra.mxu3 %v3061_v9  ;;  %v10999_v24 = vld [vmem:[#allocation2 + $0xc8] sm:$0xff]  ;;  %v3062_v10 = vsel %vm191_vm0, %v10997_v42, %v8358_v43  ;;  %v7619_v43 = vld [vmem:[%s13722_s2 + $0x410] sm:$0xff] }
 0x30c   : >> { %3581 = vmatpush.msrb.mxu3 %v7619_v43  ;;  %v7602_v43 = vld [vmem:[%s13722_s2 + $0x388] sm:$0xff] }
 0x30e   : >> { %v8362_v36 = vpop.permute.xlu1 %8361 }
 0x30f   : >> { %v8352_v45 = vpop.permute.xlu0 %8351  ;;  %v8363_v28 = vunpack.i.l.bf16 %v8362_v36 }
 0x310   : >> { %v8354_v9 = vunpack.i.h.bf16 %v8352_v45  ;;  %v8353_v57 = vunpack.i.l.bf16 %v8352_v45  ;;  %v7603_v45 = vld [vmem:[%s13722_s2 + $0x390] sm:$0xff] }
 0x311   : >> { %3468 = vmatpush.msrb.mxu2 %v7603_v45  ;;  %v3031_v45 = vsel %vm191_vm0, %v10647_v8, %v8359_v23  ;;  %v11054_v8 = vld [vmem:[#allocation2 + $0xe2] sm:$0xff] }
 0x312   : >> { %v3013_v0 = vsel %vm191_vm0, %v2213_v33, %v8354_v9  ;;  %v3030_v18 = vsel %vm191_vm0, %v10999_v24, %v8353_v57  ;;  %v8560_v57 = vpack.i.bf16 %v11010_v49, %v11008_v12  ;;  %v8364_v33 = vunpack.i.h.bf16 %v8362_v36  ;;  %v11025_v9 = vld [vmem:[#allocation2 + $0x80] sm:$0xff]  ;;  %v11031_v37 = vpop.permute.xlu2 %8401 }
 0x313   : >> { %3253 = vmatmul.f32.vlgmr.msra.gmra.mxu0 %v3013_v0  ;;  %3304 = vmatmul.f32.gmra.mxu2 %v3030_v18  ;;  %v7630_v18 = vld [vmem:[%s13722_s2 + $0x468] sm:$0xff]  ;;  %v8495_v0 = vpack.i.bf16 %v10703_v3, %v11006_v60  ;;  %v8535_v3 = vpack.i.bf16 %v11025_v9, %v10856_v32 }
 0x314   : >> { %3417 = vmatmul.f32.gmra.mxu3 %v3062_v10  ;;  %v2214_v10 = vld [vmem:[#allocation2 + $0x8] sm:$0xff]  ;;  %3699 = vmatpush.msrb.mxu0 %v7630_v18  ;;  %v3063_v48 = vsel %vm191_vm0, %v11029_v31, %v8364_v33  ;;  %v8369_v18 = vunpack.i.h.bf16 %v10945_v40 }
 0x315   : >> { %8496 = vrot.lane.b32.xlu0 %v8495_v0, %s9289_s10  ;;  %8561 = vrot.lane.b32.xlu1 %v8560_v57, %s9289_s10  ;;  %v3014_v36 = vsel %vm191_vm0, %v2214_v10, %v8363_v28  ;;  %v7618_v32 = vld [vmem:[%s13722_s2 + $0x408] sm:$0xff]  ;;  %v8373_v28 = vunpack.i.l.bf16 %v10953_v35  ;;  %v8368_v0 = vunpack.i.l.bf16 %v10945_v40  ;;  %v11066_v40 = vld [vmem:[#allocation2 + $0x98] sm:$0xff] }
 0x316   : >> { %v11027_v54 = vpop.permute.xlu1 %8381  ;;  %8536 = vrot.lane.b32.xlu2 %v8535_v3, %s9289_s10  ;;  %3469 = vmatpush.msrb.mxu2 %v7602_v43  ;;  %v3015_v3 = vsel %vm191_vm0, %v10822_v5, %v8369_v18  ;;  %v7601_v43 = vld [vmem:[%s13722_s2 + $0x380] sm:$0xff]  ;;  %v8550_v18 = vpack.i.bf16 %v11066_v40, %v10919_v14 }
 0x317   : >> { %3582 = vmatpush.msrb.mxu3 %v7618_v32  ;;  %v3064_v33 = vsel %vm191_vm0, %v11054_v8, %v8373_v28  ;;  %v8377_v10 = vpop.permute.xlu0 %8376  ;;  %v7617_v32 = vld [vmem:[%s13722_s2 + $0x400] sm:$0xff]  ;;  %v8575_v28 = vpack.i.bf16 %v10997_v42, %v10979_v59  ;;  %v8384_v42 = vunpack.i.h.bf16 %v11027_v54 }
 0x318   : >> { %3470 = vmatpush.msrb.mxu2 %v7601_v43  ;;  %v7600_v43 = vld [vmem:[%s13722_s2 + $0x378] sm:$0xff] }
 0x319   : >> { %3583 = vmatpush.msrb.mxu3 %v7617_v32  ;;  %v11110_v32 = vld [vmem:[#allocation2 + $0xfa] sm:$0xff] }
 0x31a   : >> { %v11056_v57 = vpop.permute.xlu2 %8416  ;;  %3471 = vmatpush.msrb.mxu2 %v7600_v43 }
 0x31b   : >> { %3256 = vmatmul.f32.gmra.mxu0 %v3014_v36  ;;  %3307 = vmatmul.f32.gmra.mxu2 %v3031_v45  ;;  %v3032_v36 = vsel %vm191_vm0, %v10650_v50, %v8368_v0  ;;  %v8378_v45 = vunpack.i.l.bf16 %v8377_v10  ;;  %v7629_v50 = vld [vmem:[%s13722_s2 + $0x460] sm:$0xff]  ;;  %v8379_v0 = vunpack.i.h.bf16 %v8377_v10  ;;  %v8383_v10 = vunpack.i.l.bf16 %v11027_v54 }
 0x31c   : >> { %3420 = vmatmul.f32.gmra.mxu3 %v3063_v48  ;;  %v11064_v48 = vld [vmem:[#allocation2 + $0x62] sm:$0xff]  ;;  %3700 = vmatpush.msrb.mxu0 %v7629_v50  ;;  %v3017_v54 = vsel %vm191_vm0, %v10861_v1, %v8384_v42  ;;  %v7599_v1 = vld [vmem:[%s13722_s2 + $0x370] sm:$0xff] }
 0x31d   : >> { %v8510_v5 = vpack.i.bf16 %v10719_v20, %v11064_v48  ;;  %8576 = vrot.lane.b32.xlu1 %v8575_v28, %s9289_s10  ;;  %v3016_v59 = vsel %vm191_vm0, %v10874_v44, %v8378_v45  ;;  %v7616_v44 = vld [vmem:[%s13722_s2 + $0x3f8] sm:$0xff]  ;;  %v8388_v45 = vunpack.i.l.bf16 %v10989_v11  ;;  %v3034_v50 = vsel %vm191_vm0, %v10680_v62, %v8383_v10  ;;  %v7615_v62 = vld [vmem:[%s13722_s2 + $0x3f0] sm:$0xff]  ;;  %3472 = vmatpush.msrb.mxu2 %v7599_v1  ;;  %v7598_v1 = vld [vmem:[%s13722_s2 + $0x368] sm:$0xff] }
 0x31e   : >> { %v11052_v23 = vpop.permute.xlu1 %8396  ;;  %8551 = vrot.lane.b32.xlu2 %v8550_v18, %s9289_s10  ;;  %3584 = vmatpush.msrb.mxu3 %v7616_v44  ;;  %v11118_v18 = vld [vmem:[#allocation2 + $0x7a] sm:$0xff]  ;;  %v8389_v44 = vunpack.i.h.bf16 %v10989_v11 }
 0x31f   : >> { %8511 = vrot.lane.b32.xlu0 %v8510_v5, %s9289_s10  ;;  %v3066_v5 = vsel %vm191_vm0, %v11110_v32, %v8388_v45  ;;  %v8392_v28 = vpop.permute.xlu0 %8391  ;;  %v8525_v42 = vpack.i.bf16 %v10727_v55, %v11118_v18  ;;  %v8399_v11 = vunpack.i.h.bf16 %v11052_v23  ;;  %3473 = vmatpush.msrb.mxu2 %v7598_v1  ;;  %v7597_v1 = vld [vmem:[%s13722_s2 + $0x360] sm:$0xff] }
 0x320   : >> { %v8394_v43 = vunpack.i.h.bf16 %v8392_v28  ;;  %3585 = vmatpush.msrb.mxu3 %v7615_v62  ;;  %v8403_v62 = vunpack.i.l.bf16 %v11031_v37 }
 0x321   : >> { %3474 = vmatpush.msrb.mxu2 %v7597_v1 }
 0x323   : >> { %3259 = vmatmul.f32.gmra.mxu0 %v3015_v3  ;;  %3310 = vmatmul.f32.gmra.mxu2 %v3032_v36  ;;  %v11086_v36 = vld [vmem:[#allocation2 + $0xf2] sm:$0xff] }
 0x324   : >> { %3423 = vmatmul.f32.gmra.mxu3 %v3064_v33  ;;  %v8374_v33 = vunpack.i.h.bf16 %v10953_v35  ;;  %v3065_v20 = vsel %vm191_vm0, %v11086_v36, %v8379_v0  ;;  %v11097_v35 = vpop.permute.xlu2 %8431  ;;  %v11120_v0 = vld [vmem:[#allocation2 + $0xb0] sm:$0xff] }
 0x326   : >> { %v11084_v3 = vpop.permute.xlu1 %8411  ;;  %v3033_v14 = vsel %vm191_vm0, %v10660_v39, %v8374_v33  ;;  %v11122_v33 = vld [vmem:[#allocation2 + $0xc9] sm:$0xff] }
 0x327   : >> { %v8565_v10 = vpack.i.bf16 %v11120_v0, %v11122_v33  ;;  %8526 = vrot.lane.b32.xlu0 %v8525_v42, %s9289_s10 }
 0x329   : >> { %8566 = vrot.lane.b32.xlu2 %v8565_v10, %s9289_s10 }
 0x32b   : >> { %3262 = vmatmul.f32.gmra.mxu0 %v3016_v59  ;;  %3313 = vmatmul.f32.gmra.mxu2 %v3033_v14  ;;  %v8393_v59 = vunpack.i.l.bf16 %v8392_v28  ;;  %v7628_v14 = vld [vmem:[%s13722_s2 + $0x458] sm:$0xff]  ;;  %v8398_v28 = vunpack.i.l.bf16 %v11052_v23  ;;  %v3019_v23 = vsel %vm191_vm0, %v10880_v61, %v8399_v11  ;;  %v7627_v61 = vld [vmem:[%s13722_s2 + $0x450] sm:$0xff] }
 0x32c   : >> { %3426 = vmatmul.f32.gmra.mxu3 %v3065_v20  ;;  %v11124_v20 = vpop.permute.xlu2 %8446  ;;  %3701 = vmatpush.msrb.mxu0 %v7628_v14  ;;  %v11163_v14 = vld [vmem:[#allocation2 + $0x112] sm:$0xff] }
 0x32d   : >> { %v3018_v55 = vsel %vm191_vm0, %v10887_v63, %v8393_v59  ;;  %v7614_v59 = vld [vmem:[%s13722_s2 + $0x3e8] sm:$0xff]  ;;  %v3036_v10 = vsel %vm191_vm0, %v10697_v25, %v8398_v28  ;;  %v7613_v25 = vld [vmem:[%s13722_s2 + $0x3e0] sm:$0xff] }
 0x32e   : >> { %v11108_v39 = vpop.permute.xlu1 %8426  ;;  %3586 = vmatpush.msrb.mxu3 %v7614_v59  ;;  %3702 = vmatpush.msrb.mxu0 %v7627_v61  ;;  %v8414_v61 = vunpack.i.h.bf16 %v11084_v3 }
 0x330   : >> { %3587 = vmatpush.msrb.mxu3 %v7613_v25 }
 0x333   : >> { %3265 = vmatmul.f32.gmra.mxu0 %v3017_v54  ;;  %3316 = vmatmul.f32.gmra.mxu2 %v3034_v50  ;;  %v11142_v54 = vld [vmem:[#allocation2 + $0x10a] sm:$0xff] }
 0x334   : >> { %3429 = vmatmul.f32.gmra.mxu3 %v3066_v5  ;;  %v3067_v50 = vsel %vm191_vm0, %v11142_v54, %v8394_v43  ;;  %v3035_v5 = vsel %vm191_vm0, %v10674_v34, %v8389_v44  ;;  %v11165_v42 = vpop.permute.xlu2 %8461  ;;  %v3068_v43 = vsel %vm191_vm0, %v11163_v14, %v8403_v62  ;;  %v8407_v44 = vpop.permute.xlu0 %8406  ;;  %v8404_v62 = vunpack.i.h.bf16 %v11031_v37 }
 0x335   : >> { %v8409_v59 = vunpack.i.h.bf16 %v8407_v44 }
 0x336   : >> { %v11140_v45 = vpop.permute.xlu1 %8441  ;;  %v3037_v1 = vsel %vm191_vm0, %v10691_v7, %v8404_v62  ;;  %v8418_v7 = vunpack.i.l.bf16 %v11056_v57 }
 0x33b   : >> { %3268 = vmatmul.f32.gmra.mxu0 %v3018_v55  ;;  %3319 = vmatmul.f32.gmra.mxu2 %v3035_v5  ;;  %v11173_v55 = vld [vmem:[#allocation2 + $0x92] sm:$0xff]  ;;  %v8408_v5 = vunpack.i.l.bf16 %v8407_v44 }
 0x33c   : >> { %3432 = vmatmul.f32.gmra.mxu3 %v3067_v50  ;;  %v11175_v50 = vld [vmem:[#allocation2 + $0xe1] sm:$0xff]  ;;  %v8540_v11 = vpack.i.bf16 %v10781_v6, %v11173_v55 }
 0x33d   : >> { %v8580_v28 = vpack.i.bf16 %v10999_v24, %v11175_v50  ;;  %v3020_v6 = vsel %vm191_vm0, %v10938_v47, %v8408_v5  ;;  %v11200_v24 = vpop.permute.xlu2 %8476  ;;  %v2278_v5 = vld [vmem:[#allocation2 + $0xa] sm:$0xff] }
 0x33e   : >> { %v11161_v34 = vpop.permute.xlu1 %8456  ;;  %8541 = vrot.lane.b32.xlu0 %v8540_v11, %s9289_s10  ;;  %v8479_v25 = vunpack.i.h.bf16 %v11200_v24  ;;  %v8413_v11 = vunpack.i.l.bf16 %v11084_v3  ;;  %v3021_v3 = vsel %vm191_vm0, %v10892_v58, %v8414_v61  ;;  %v7611_v61 = vld [vmem:[%s13722_s2 + $0x3d0] sm:$0xff] }
 0x33f   : >> { %8581 = vrot.lane.b32.xlu2 %v8580_v28, %s9289_s10  ;;  %v7612_v28 = vld [vmem:[%s13722_s2 + $0x3d8] sm:$0xff] }
 0x340   : >> { %3588 = vmatpush.msrb.mxu3 %v7612_v28  ;;  %v3046_v62 = vsel %vm191_vm0, %v2278_v5, %v8479_v25  ;;  %v11231_v25 = vld [vmem:[#allocation2 + $0xc1] sm:$0xff] }
 0x342   : >> { %3589 = vmatpush.msrb.mxu3 %v7611_v61  ;;  %v8429_v61 = vunpack.i.h.bf16 %v11108_v39 }
 0x343   : >> { %3271 = vmatmul.f32.gmra.mxu0 %v3019_v23  ;;  %3322 = vmatmul.f32.gmra.mxu2 %v3036_v10  ;;  %v2277_v10 = vld [vmem:[#allocation2 + $0x2] sm:$0xff] }
 0x344   : >> { %3435 = vmatmul.f32.gmra.mxu3 %v3068_v43  ;;  %v11193_v43 = vld [vmem:[#allocation2 + $0x122] sm:$0xff] }
 0x345   : >> { %v3069_v37 = vsel %vm191_vm0, %v11193_v43, %v8409_v59  ;;  %v11217_v59 = vld [vmem:[#allocation2 + $0x12a] sm:$0xff] }
 0x346   : >> { %v11191_v23 = vpop.permute.xlu1 %8471 }
 0x347   : >> { %v8473_v53 = vunpack.i.l.bf16 %v11191_v23 }
 0x349   : >> { %v3045_v44 = vsel %vm191_vm0, %v2277_v10, %v8473_v53  ;;  %v7596_v53 = vld [vmem:[%s13722_s2 + $0x358] sm:$0xff]  ;;  %v3038_v10 = vsel %vm191_vm0, %v10708_v19, %v8413_v11  ;;  %v7595_v19 = vld [vmem:[%s13722_s2 + $0x350] sm:$0xff]  ;;  %v7626_v11 = vld [vmem:[%s13722_s2 + $0x448] sm:$0xff] }
 0x34a   : >> { %3366 = vmatmul.f32.vlgmr.msra.gmra.mxu1 %v3045_v44  ;;  %3475 = vmatpush.msrb.mxu2 %v7596_v53  ;;  %v3070_v44 = vsel %vm191_vm0, %v11217_v59, %v8418_v7  ;;  %v11229_v53 = vld [vmem:[#allocation2 + $0xaa] sm:$0xff]  ;;  %v8419_v7 = vunpack.i.h.bf16 %v11056_v57 }
 0x34b   : >> { %3274 = vmatmul.f32.gmra.mxu0 %v3020_v6  ;;  %3325 = vmatmul.f32.gmra.mxu2 %v3037_v1  ;;  %v8555_v5 = vpack.i.bf16 %v11231_v25, %v11229_v53 }
 0x34c   : >> { %3438 = vmatmul.f32.gmra.mxu3 %v3069_v37  ;;  %v8422_v37 = vpop.permute.xlu0 %8421  ;;  %3476 = vmatpush.msrb.mxu2 %v7595_v19  ;;  %v3039_v19 = vsel %vm191_vm0, %v10712_v52, %v8419_v7  ;;  %v8433_v52 = vunpack.i.l.bf16 %v11097_v35 }
 0x34d   : >> { %v8423_v58 = vunpack.i.l.bf16 %v8422_v37  ;;  %v8424_v28 = vunpack.i.h.bf16 %v8422_v37  ;;  %3703 = vmatpush.msrb.mxu0 %v7626_v11  ;;  %8556 = vrot.lane.b32.xlu0 %v8555_v5, %s9289_s10  ;;  %v2304_v11 = vld [vmem:[#allocation2 + $0x142] sm:$0xff] }
 0x34e   : >> { %v11224_v6 = vpop.permute.xlu1 %8486 }
 0x34f   : >> { %v8488_v1 = vunpack.i.l.bf16 %v11224_v6 }
 0x352   : >> { %3369 = vmatmul.f32.gmra.mxu1 %v3046_v62  ;;  %v11245_v62 = vld [vmem:[#allocation2 + $0x13a] sm:$0xff] }
 0x353   : >> { %3277 = vmatmul.f32.gmra.mxu0 %v3021_v3  ;;  %3328 = vmatmul.f32.gmra.mxu2 %v3038_v10  ;;  %v3047_v3 = vsel %vm191_vm0, %v10843_v27, %v8488_v1  ;;  %v3022_v10 = vsel %vm191_vm0, %v10974_v13, %v8423_v58  ;;  %v3071_v37 = vsel %vm191_vm0, %v11245_v62, %v8424_v28  ;;  %v8428_v27 = vunpack.i.l.bf16 %v11108_v39  ;;  %v7594_v1 = vld [vmem:[%s13722_s2 + $0x348] sm:$0xff] }
 0x354   : >> { %3441 = vmatmul.f32.gmra.mxu3 %v3070_v44  ;;  %v11252_v44 = vpop.permute.xlu2 %8491  ;;  %v7610_v58 = vld [vmem:[%s13722_s2 + $0x3c8] sm:$0xff]  ;;  %3477 = vmatpush.msrb.mxu2 %v7594_v1  ;;  %v3023_v39 = vsel %vm191_vm0, %v10921_v2, %v8429_v61  ;;  %v7593_v2 = vld [vmem:[%s13722_s2 + $0x340] sm:$0xff]  ;;  %v8434_v1 = vunpack.i.h.bf16 %v11097_v35 }
 0x355   : >> { %v8494_v57 = vunpack.i.h.bf16 %v11252_v44  ;;  %3590 = vmatpush.msrb.mxu3 %v7610_v58  ;;  %v3040_v28 = vsel %vm191_vm0, %v10725_v30, %v8428_v27  ;;  %v7609_v30 = vld [vmem:[%s13722_s2 + $0x3c0] sm:$0xff]  ;;  %v11292_v58 = vld [vmem:[#allocation2 + $0x152] sm:$0xff] }
 0x356   : >> { %v11274_v7 = vpop.permute.xlu1 %8501  ;;  %3478 = vmatpush.msrb.mxu2 %v7593_v2 }
 0x357   : >> { %v3048_v5 = vsel %vm191_vm0, %v10824_v22, %v8494_v57  ;;  %v7625_v57 = vld [vmem:[%s13722_s2 + $0x440] sm:$0xff]  ;;  %3591 = vmatpush.msrb.mxu3 %v7609_v30 }
 0x358   : >> { %3704 = vmatpush.msrb.mxu0 %v7625_v57 }
 0x35a   : >> { %3372 = vmatmul.f32.gmra.mxu1 %v3047_v3  ;;  %v3072_v3 = vsel %vm191_vm0, %v2304_v11, %v8433_v52 }
 0x35b   : >> { %3280 = vmatmul.f32.gmra.mxu0 %v3022_v10  ;;  %3331 = vmatmul.f32.gmra.mxu2 %v3039_v19  ;;  %v8437_v10 = vpop.permute.xlu0 %8436  ;;  %v11278_v19 = vld [vmem:[#allocation2 + $0xd9] sm:$0xff] }
 0x35c   : >> { %3444 = vmatmul.f32.gmra.mxu3 %v3071_v37  ;;  %v8503_v37 = vunpack.i.l.bf16 %v11274_v7  ;;  %v8438_v22 = vunpack.i.l.bf16 %v8437_v10  ;;  %v8570_v61 = vpack.i.bf16 %v11278_v19, %v10981_v4  ;;  %v8439_v27 = vunpack.i.h.bf16 %v8437_v10 }
 0x35d   : >> { %v8448_v10 = vunpack.i.l.bf16 %v11124_v20 }
 0x35e   : >> { %8571 = vrot.lane.b32.xlu0 %v8570_v61, %s9289_s10  ;;  %v3049_v52 = vsel %vm191_vm0, %v10955_v21, %v8503_v37  ;;  %v3024_v11 = vsel %vm191_vm0, %v11025_v9, %v8438_v22  ;;  %v3073_v4 = vsel %vm191_vm0, %v11292_v58, %v8439_v27  ;;  %v2306_v37 = vld [vmem:[#allocation2 + $0x15a] sm:$0xff]  ;;  %v11315_v30 = vpop.permute.xlu1 %8516  ;;  %v11319_v27 = vld [vmem:[#allocation2 + $0xf1] sm:$0xff] }
 0x35f   : >> { %v3074_v57 = vsel %vm191_vm0, %v2306_v37, %v8448_v10  ;;  %v8458_v10 = vunpack.i.l.bf16 %v11161_v34 }
 0x362   : >> { %3375 = vmatmul.f32.gmra.mxu1 %v3048_v5  ;;  %v11299_v5 = vpop.permute.xlu2 %8506 }
 0x363   : >> { %3283 = vmatmul.f32.gmra.mxu0 %v3023_v39  ;;  %3334 = vmatmul.f32.gmra.mxu2 %v3040_v28  ;;  %v3041_v39 = vsel %vm191_vm0, %v10729_v16, %v8434_v1  ;;  %v8509_v35 = vunpack.i.h.bf16 %v11299_v5  ;;  %v8444_v28 = vunpack.i.h.bf16 %v11140_v45  ;;  %v8452_v61 = vpop.permute.xlu0 %8451 }
 0x364   : >> { %3447 = vmatmul.f32.gmra.mxu3 %v3072_v3  ;;  %v8443_v3 = vunpack.i.l.bf16 %v11140_v45  ;;  %v8518_v45 = vunpack.i.l.bf16 %v11315_v30  ;;  %v8454_v1 = vunpack.i.h.bf16 %v8452_v61 }
 0x365   : >> { %v3050_v22 = vsel %vm191_vm0, %v10863_v29, %v8509_v35  ;;  %v3025_v2 = vsel %vm191_vm0, %v10957_v26, %v8444_v28  ;;  %v8453_v29 = vunpack.i.l.bf16 %v8452_v61  ;;  %v8585_v26 = vpack.i.bf16 %v11319_v27, %v11029_v31 }
 0x366   : >> { %v3042_v16 = vsel %vm191_vm0, %v10763_v51, %v8443_v3  ;;  %v8449_v51 = vunpack.i.h.bf16 %v11124_v20  ;;  %v11335_v20 = vld [vmem:[#allocation2 + $0xf9] sm:$0xff]  ;;  %v8459_v3 = vunpack.i.h.bf16 %v11161_v34 }
 0x367   : >> { %8586 = vrot.lane.b32.xlu0 %v8585_v26, %s9289_s10  ;;  %v8590_v37 = vpack.i.bf16 %v11335_v20, %v11054_v8 }
 0x368   : >> { %v3043_v28 = vsel %vm191_vm0, %v10796_v41, %v8449_v51  ;;  %v2405_v51 = vld [vmem:[#allocation2 + $0x30] sm:$0xff] }
 0x369   : >> { %8591 = vrot.lane.b32.xlu1 %v8590_v37, %s9289_s10  ;;  %v8478_v37 = vunpack.i.l.bf16 %v11200_v24 }
 0x36a   : >> { %3378 = vmatmul.f32.gmra.mxu1 %v3049_v52  ;;  %v2307_v52 = vld [vmem:[#allocation2 + $0x16a] sm:$0xff] }
 0x36b   : >> { %3286 = vmatmul.f32.gmra.mxu0 %v3024_v11  ;;  %3337 = vmatmul.f32.gmra.mxu2 %v3041_v39  ;;  %v3051_v11 = vsel %vm191_vm0, %v11006_v60, %v8518_v45  ;;  %v11329_v39 = vpop.permute.xlu2 %8521  ;;  %v3075_v35 = vsel %vm191_vm0, %v2307_v52, %v8454_v1  ;;  %v11348_v45 = vpop.permute.xlu1 %8531 }
 0x36c   : >> { %3450 = vmatmul.f32.gmra.mxu3 %v3073_v4  ;;  %v3026_v4 = vsel %vm191_vm0, %v11066_v40, %v8453_v29  ;;  %v8524_v31 = vunpack.i.h.bf16 %v11329_v39  ;;  %v8467_v8 = vpop.permute.xlu0 %8466  ;;  %v8533_v29 = vunpack.i.l.bf16 %v11348_v45 }
 0x36d   : >> { %v8468_v26 = vunpack.i.l.bf16 %v8467_v8  ;;  %v8469_v1 = vunpack.i.h.bf16 %v8467_v8 }
 0x36e   : >> { %v3052_v41 = vsel %vm191_vm0, %v10882_v56, %v8524_v31  ;;  %v8464_v56 = vunpack.i.h.bf16 %v11165_v42  ;;  %v3053_v52 = vsel %vm191_vm0, %v11064_v48, %v8533_v29 }
 0x372   : >> { %3381 = vmatmul.f32.gmra.mxu1 %v3050_v22  ;;  %v8463_v22 = vunpack.i.l.bf16 %v11165_v42  ;;  %v11362_v42 = vld [vmem:[#allocation2 + $0x111] sm:$0xff] }
 0x373   : >> { %3289 = vmatmul.f32.gmra.mxu0 %v3025_v2  ;;  %3340 = vmatmul.f32.gmra.mxu2 %v3042_v16  ;;  %v2244_v2 = vld [vmem:[#allocation2 + $0x170] sm:$0xff]  ;;  %v11375_v8 = vpop.permute.xlu1 %8546 }
 0x374   : >> { %3453 = vmatmul.f32.gmra.mxu3 %v3074_v57  ;;  %v2308_v16 = vld [vmem:[#allocation2 + $0x172] sm:$0xff]  ;;  %v3027_v57 = vsel %vm191_vm0, %v11008_v12, %v8459_v3  ;;  %v3044_v61 = vsel %vm191_vm0, %v2244_v2, %v8458_v10  ;;  %v8600_v10 = vpack.i.bf16 %v11362_v42, %v11110_v32  ;;  %v3110_v32 = vsel %vm191_vm0, %v10887_v63, %v8478_v37  ;;  %v8482_v24 = vpop.permute.xlu0 %8481 }
 0x375   : >> { %v3076_v34 = vsel %vm191_vm0, %v2308_v16, %v8463_v22  ;;  %v8474_v22 = vunpack.i.h.bf16 %v11191_v23  ;;  %v8548_v29 = vunpack.i.l.bf16 %v11375_v8 }
 0x376   : >> { %8601 = vrot.lane.b32.xlu0 %v8600_v10, %s9289_s10 }
 0x37a   : >> { %3384 = vmatmul.f32.gmra.mxu1 %v3051_v11  ;;  %v2341_v11 = vld [vmem:[#allocation2 + $0x19] sm:$0xff] }
 0x37b   : >> { %3292 = vmatmul.f32.gmra.mxu0 %v3026_v4  ;;  %3343 = vmatmul.f32.gmra.mxu2 %v3043_v28  ;;  %v3028_v4 = vsel %vm191_vm0, %v11120_v0, %v8468_v26  ;;  %v3109_v28 = vsel %vm191_vm0, %v2405_v51, %v8469_v1  ;;  %v3077_v31 = vsel %vm191_vm0, %v2341_v11, %v8464_v56  ;;  %v11383_v26 = vld [vmem:[#allocation2 + $0x121] sm:$0xff]  ;;  %v8484_v56 = vunpack.i.h.bf16 %v8482_v24  ;;  %v2343_v51 = vld [vmem:[#allocation2 + $0x31] sm:$0xff] }
 0x37c   : >> { %3456 = vmatmul.f32.gmra.mxu3 %v3075_v35  ;;  %v11357_v35 = vpop.permute.xlu2 %8536  ;;  %v8605_v1 = vpack.i.bf16 %v11383_v26, %v11142_v54 }
 0x37d   : >> { %v8539_v3 = vunpack.i.h.bf16 %v11357_v35 }
 0x37e   : >> { %8606 = vrot.lane.b32.xlu1 %v8605_v1, %s9289_s10 }
 0x382   : >> { %3387 = vmatmul.f32.gmra.mxu1 %v3052_v41 }
 0x383   : >> { %3295 = vmatmul.f32.gmra.mxu0 %v3027_v57  ;;  %3346 = vmatmul.f32.gmra.mxu2 %v3044_v61  ;;  %v3054_v57 = vsel %vm191_vm0, %v10894_v46, %v8539_v3  ;;  %v2342_v61 = vld [vmem:[#allocation2 + $0x21] sm:$0xff]  ;;  %v8483_v46 = vunpack.i.l.bf16 %v8482_v24 }
 0x384   : >> { %3459 = vmatmul.f32.gmra.mxu3 %v3076_v34  ;;  %v3078_v23 = vsel %vm191_vm0, %v2342_v61, %v8474_v22  ;;  %v2470_v3 = vld [vmem:[#allocation2 + $0x3a] sm:$0xff]  ;;  %v11395_v10 = vpop.permute.xlu2 %8551  ;;  %v11400_v22 = vld [vmem:[#allocation2 + $0x109] sm:$0xff] }
 0x385   : >> { %v8554_v37 = vunpack.i.h.bf16 %v11395_v10 }
 0x387   : >> { %v3056_v24 = vsel %vm191_vm0, %v10923_v38, %v8554_v37  ;;  %v11413_v1 = vpop.permute.xlu1 %8561 }
 0x388   : >> { %v8563_v38 = vunpack.i.l.bf16 %v11413_v1 }
 0x38a   : >> { %3390 = vmatmul.f32.gmra.mxu1 %v3053_v52  ;;  %v2407_v52 = vld [vmem:[#allocation2 + $0x48] sm:$0xff] }
 0x38b   : >> { %3479 = vmatmul.f32.vlgmr.msrb.gmra.mxu2 %v3077_v31  ;;  %3298 = vmatmul.f32.gmra.mxu0 %v3028_v4  ;;  %v3055_v4 = vsel %vm191_vm0, %v11118_v18, %v8548_v29  ;;  %v3079_v31 = vsel %vm191_vm0, %v2343_v51, %v8483_v46  ;;  %v3111_v54 = vsel %vm191_vm0, %v2407_v52, %v8484_v56  ;;  %v3971_v56 = vld [vmem:[#allocation2 + $0x1] sm:$0xff] }
 0x38c   : >> { %3592 = vmatmul.f32.vlgmr.msrb.gmra.mxu3 %v3109_v28 }
 0x38e   : >> { %v3302_v2 = vpop.f32.mrf.mxu2  ;;  %v3415_v16 = vpop.f32.mrf.mxu3 }
 0x38f   : >> { %v11369_v41 = vadd.f32 %v3415_v16, %v3302_v2  ;;  %v8595_v2 = vpack.i.bf16 %v11400_v22, %v11086_v36  ;;  %v8493_v16 = vunpack.i.l.bf16 %v11252_v44  ;;  %v8497_v44 = vpop.permute.xlu0 %8496 }
 0x390   : >> { %v11373_v34 = vpop.f32.mrf.mxu0  ;;  %v8498_v51 = vunpack.i.l.bf16 %v8497_v44  ;;  %v8499_v52 = vunpack.i.h.bf16 %v8497_v44 }
 0x391   : >> { %8596 = vrot.lane.b32.xlu2 %v8595_v2, %s9289_s10  ;;  %v3112_v36 = vsel %vm191_vm0, %v10938_v47, %v8493_v16 }
 0x392   : >> { %3393 = vmatmul.f32.gmra.mxu1 %v3054_v57  ;;  %v8489_v57 = vunpack.i.h.bf16 %v11224_v6 }
 0x393   : >> { %3482 = vmatmul.f32.gmra.mxu2 %v3078_v23  ;;  %7633 = vmatmul.msk.f32.vlgmr.msrb.gmra.mxu0 %vm191_vm0, %v10955_v21  ;;  %v2344_v23 = vld [vmem:[#allocation2 + $0x39] sm:$0xff] }
 0x394   : >> { %3595 = vmatmul.f32.gmra.mxu3 %v3110_v32  ;;  %v3080_v6 = vsel %vm191_vm0, %v2344_v23, %v8489_v57  ;;  %v8508_v23 = vunpack.i.l.bf16 %v11299_v5 }
 0x396   : >> { %v3305_v63 = vpop.f32.mrf.mxu2 }
 0x397   : >> { %v3418_v11 = vpop.f32.mrf.mxu3 }
 0x398   : >> { %v11390_v21 = vadd.f32 %v3418_v11, %v3305_v63  ;;  %v11392_v28 = vpop.f32.mrf.mxu0  ;;  %v8615_v63 = vpack.i.bf16 %v11193_v43, %v3971_v56  ;;  %v2345_v11 = vld [vmem:[#allocation2 + $0x49] sm:$0xff]  ;;  %v2472_v43 = vld [vmem:[#allocation2 + $0x52] sm:$0xff] }
 0x399   : >> { %v3081_v57 = vsel %vm191_vm0, %v2345_v11, %v8498_v51  ;;  %v2346_v56 = vld [vmem:[#allocation2 + $0x51] sm:$0xff]  ;;  %v3114_v11 = vsel %vm191_vm0, %v10974_v13, %v8508_v23 }
 0x39a   : >> { %3396 = vmatmul.f32.gmra.mxu1 %v3055_v4  ;;  %v2459_v4 = vld [vmem:[#allocation2 + $0x139] sm:$0xff]  ;;  %8616 = vrot.lane.b32.xlu0 %v8615_v63, %s9289_s10 }
 0x39b   : >> { %3485 = vmatmul.f32.gmra.mxu2 %v3079_v31  ;;  %7634 = vmatmul.msk.f32.gmra.mxu0 %vm191_vm0, %v2470_v3  ;;  %v3972_v31 = vld [vmem:[#allocation2 + $0x9] sm:$0xff]  ;;  %v2409_v3 = vld [vmem:[#allocation2 + $0x60] sm:$0xff] }
 0x39c   : >> { %3598 = vmatmul.f32.gmra.mxu3 %v3111_v54  ;;  %v8620_v54 = vpack.i.bf16 %v3972_v31, %v2459_v4  ;;  %v8512_v4 = vpop.permute.xlu0 %8511 }
 0x39d   : >> { %v8513_v31 = vunpack.i.l.bf16 %v8512_v4 }
 0x39e   : >> { %v3308_v61 = vpop.f32.mrf.mxu2  ;;  %8621 = vrot.lane.b32.xlu1 %v8620_v54, %s9289_s10  ;;  %v2347_v54 = vld [vmem:[#allocation2 + $0x61] sm:$0xff] }
 0x39f   : >> { %v3421_v32 = vpop.f32.mrf.mxu3 }
 0x3a0   : >> { %v11409_v29 = vadd.f32 %v3421_v32, %v3308_v61  ;;  %v11411_v46 = vpop.f32.mrf.mxu0  ;;  %v11430_v61 = vpop.permute.xlu2 %8566  ;;  %v3113_v32 = vsel %vm191_vm0, %v2409_v3, %v8499_v52  ;;  %v8514_v3 = vunpack.i.h.bf16 %v8512_v4 }
 0x3a1   : >> { %v11444_v52 = vpop.permute.xlu1 %8576 }
 0x3a2   : >> { %3399 = vmatmul.f32.gmra.mxu1 %v3056_v24  ;;  %v8569_v24 = vunpack.i.h.bf16 %v11430_v61 }
 0x3a3   : >> { %3488 = vmatmul.f32.gmra.mxu2 %v3080_v6  ;;  %7635 = vmatmul.msk.f32.gmra.mxu0 %vm191_vm0, %v11006_v60  ;;  %v3057_v60 = vsel %vm191_vm0, %v11173_v55, %v8563_v38 }
 0x3a4   : >> { %3601 = vmatmul.f32.gmra.mxu3 %v3112_v36  ;;  %v8504_v36 = vunpack.i.h.bf16 %v11274_v7  ;;  %v3058_v38 = vsel %vm191_vm0, %v10959_v17, %v8569_v24  ;;  %v8578_v17 = vunpack.i.l.bf16 %v11444_v52  ;;  %v11452_v7 = vld [vmem:[#allocation2 + $0x129] sm:$0xff] }
 0x3a5   : >> { %v2474_v24 = vld [vmem:[#allocation2 + $0x6a] sm:$0xff] }
 0x3a6   : >> { %v3311_v47 = vpop.f32.mrf.mxu2  ;;  %v3082_v5 = vsel %vm191_vm0, %v2346_v56, %v8504_v36 }
 0x3a7   : >> { %v3424_v37 = vpop.f32.mrf.mxu3 }
 0x3a8   : >> { %v11425_v2 = vadd.f32 %v3424_v37, %v3311_v47  ;;  %v11427_v16 = vpop.f32.mrf.mxu0  ;;  %v8610_v47 = vpack.i.bf16 %v11452_v7, %v11163_v14  ;;  %v2411_v37 = vld [vmem:[#allocation2 + $0x78] sm:$0xff]  ;;  %v11464_v23 = vpop.permute.xlu2 %8581 }
 0x3a9   : >> { %v3115_v14 = vsel %vm191_vm0, %v2411_v37, %v8514_v3  ;;  %v8584_v36 = vunpack.i.h.bf16 %v11464_v23  ;;  %v8527_v3 = vpop.permute.xlu0 %8526 }
 0x3aa   : >> { %3402 = vmatmul.f32.gmra.mxu1 %v3057_v60  ;;  %8611 = vrot.lane.b32.xlu2 %v8610_v47, %s9289_s10 }
 0x3ab   : >> { %3491 = vmatmul.f32.gmra.mxu2 %v3081_v57  ;;  %7636 = vmatmul.msk.f32.gmra.mxu0 %vm191_vm0, %v2472_v43  ;;  %v3059_v57 = vsel %vm191_vm0, %v11229_v53, %v8578_v17  ;;  %v3060_v4 = vsel %vm191_vm0, %v11010_v49, %v8584_v36  ;;  %v8538_v36 = vunpack.i.l.bf16 %v11357_v35 }
 0x3ac   : >> { %3604 = vmatmul.f32.gmra.mxu3 %v3113_v32  ;;  %v3083_v32 = vsel %vm191_vm0, %v2347_v54, %v8513_v31  ;;  %v8529_v54 = vunpack.i.h.bf16 %v8527_v3 }
 0x3ae   : >> { %v3314_v44 = vpop.f32.mrf.mxu2 }
 0x3af   : >> { %v3427_v6 = vpop.f32.mrf.mxu3 }
 0x3b0   : >> { %v11440_v51 = vadd.f32 %v3427_v6, %v3314_v44  ;;  %v11442_v63 = vpop.f32.mrf.mxu0  ;;  %v8519_v44 = vunpack.i.h.bf16 %v11315_v30  ;;  %v8523_v6 = vunpack.i.l.bf16 %v11329_v39  ;;  %v11482_v30 = vld [vmem:[#allocation2 + $0x141] sm:$0xff]  ;;  %v8528_v39 = vunpack.i.l.bf16 %v8527_v3  ;;  %v2351_v3 = vld [vmem:[#allocation2 + $0x91] sm:$0xff] }
 0x3b1   : >> { %v8625_v49 = vpack.i.bf16 %v11482_v30, %v11217_v59  ;;  %v8534_v59 = vunpack.i.h.bf16 %v11348_v45 }
 0x3b2   : >> { %3405 = vmatmul.f32.gmra.mxu1 %v3058_v38  ;;  %v2348_v38 = vld [vmem:[#allocation2 + $0x69] sm:$0xff]  ;;  %v3116_v47 = vsel %vm191_vm0, %v11025_v9, %v8523_v6 }
 0x3b3   : >> { %3494 = vmatmul.f32.gmra.mxu2 %v3082_v5  ;;  %7637 = vmatmul.msk.f32.gmra.mxu0 %vm191_vm0, %v11064_v48  ;;  %v3084_v31 = vsel %vm191_vm0, %v2348_v38, %v8519_v44  ;;  %v2350_v44 = vld [vmem:[#allocation2 + $0x81] sm:$0xff] }
 0x3b4   : >> { %3607 = vmatmul.f32.gmra.mxu3 %v3114_v11  ;;  %8626 = vrot.lane.b32.xlu2 %v8625_v49, %s9289_s10 }
 0x3b6   : >> { %v3317_v13 = vpop.f32.mrf.mxu2 }
 0x3b7   : >> { %v3430_v60 = vpop.f32.mrf.mxu3 }
 0x3b8   : >> { %v11459_v48 = vadd.f32 %v3430_v60, %v3317_v13  ;;  %v11461_v43 = vpop.f32.mrf.mxu0  ;;  %v2349_v13 = vld [vmem:[#allocation2 + $0x79] sm:$0xff]  ;;  %v2413_v60 = vld [vmem:[#allocation2 + $0x90] sm:$0xff] }
 0x3ba   : >> { %3408 = vmatmul.f32.gmra.mxu1 %v3059_v57 }
 0x3bb   : >> { %3497 = vmatmul.f32.gmra.mxu2 %v3083_v32  ;;  %7638 = vmatmul.msk.f32.gmra.mxu0 %vm191_vm0, %v2474_v24  ;;  %v2476_v24 = vld [vmem:[#allocation2 + $0x82] sm:$0xff] }
 0x3bc   : >> { %3610 = vmatmul.f32.gmra.mxu3 %v3115_v14  ;;  %v3117_v14 = vsel %vm191_vm0, %v2413_v60, %v8529_v54  ;;  %v2478_v60 = vld [vmem:[#allocation2 + $0x9a] sm:$0xff] }
 0x3be   : >> { %v3320_v56 = vpop.f32.mrf.mxu2 }
 0x3bf   : >> { %v3433_v11 = vpop.f32.mrf.mxu3 }
 0x3c0   : >> { %v11473_v5 = vadd.f32 %v3433_v11, %v3320_v56  ;;  %v11475_v17 = vpop.f32.mrf.mxu0 }
 0x3c2   : >> { %3411 = vmatmul.f32.gmra.mxu1 %v3060_v4  ;;  %v3086_v4 = vsel %vm191_vm0, %v2350_v44, %v8534_v59 }
 0x3c3   : >> { %3500 = vmatmul.f32.gmra.mxu2 %v3084_v31  ;;  %7639 = vmatmul.msk.f32.gmra.mxu0 %vm191_vm0, %v11118_v18  ;;  %v3085_v18 = vsel %vm191_vm0, %v2349_v13, %v8528_v39  ;;  %v3118_v31 = vsel %vm191_vm0, %v11066_v40, %v8538_v36 }
 0x3c4   : >> { %3613 = vmatmul.f32.gmra.mxu3 %v3116_v47  ;;  %v8542_v47 = vpop.permute.xlu0 %8541 }
 0x3c5   : >> { %v8543_v45 = vunpack.i.l.bf16 %v8542_v47  ;;  %v8544_v35 = vunpack.i.h.bf16 %v8542_v47 }
 0x3c6   : >> { %v3323_v37 = vpop.f32.mrf.mxu2 }
 0x3c7   : >> { %v3436_v9 = vpop.f32.mrf.mxu3  ;;  %v3119_v40 = vsel %vm191_vm0, %v11008_v12, %v8544_v35 }
 0x3c8   : >> { %v11487_v57 = vadd.f32 %v3436_v9, %v3323_v37  ;;  %v11489_v32 = vpop.f32.mrf.mxu0  ;;  %v3087_v37 = vsel %vm191_vm0, %v2351_v3, %v8543_v45  ;;  %v8553_v9 = vunpack.i.l.bf16 %v11395_v10 }
 0x3ca   : >> { %v3120_v12 = vsel %vm191_vm0, %v11120_v0, %v8553_v9 }
 0x3cb   : >> { %3503 = vmatmul.f32.gmra.mxu2 %v3085_v18  ;;  %7640 = vmatmul.msk.f32.gmra.mxu0 %vm191_vm0, %v2476_v24  ;;  %v2352_v18 = vld [vmem:[#allocation2 + $0x99] sm:$0xff] }
 0x3cc   : >> { %3616 = vmatmul.f32.gmra.mxu3 %v3117_v14 }
 0x3ce   : >> { %v3326_v6 = vpop.f32.mrf.mxu2 }
 0x3cf   : >> { %v3439_v38 = vpop.f32.mrf.mxu3 }
 0x3d0   : >> { %v11496_v56 = vadd.f32 %v3439_v38, %v3326_v6  ;;  %v11498_v11 = vpop.f32.mrf.mxu0  ;;  %v8557_v6 = vpop.permute.xlu0 %8556  ;;  %v2353_v38 = vld [vmem:[#allocation2 + $0xa9] sm:$0xff] }
 0x3d1   : >> { %v8559_v10 = vunpack.i.h.bf16 %v8557_v6 }
 0x3d3   : >> { %3506 = vmatmul.f32.gmra.mxu2 %v3086_v4  ;;  %7641 = vmatmul.msk.f32.gmra.mxu0 %vm191_vm0, %v11173_v55  ;;  %v8549_v55 = vunpack.i.h.bf16 %v11375_v8  ;;  %v8558_v8 = vunpack.i.l.bf16 %v8557_v6 }
 0x3d4   : >> { %3619 = vmatmul.f32.gmra.mxu3 %v3118_v31  ;;  %v2417_v31 = vld [vmem:[#allocation2 + $0xc0] sm:$0xff] }
 0x3d5   : >> { %v3088_v44 = vsel %vm191_vm0, %v2352_v18, %v8549_v55  ;;  %v3089_v3 = vsel %vm191_vm0, %v2353_v38, %v8558_v8  ;;  %v3121_v0 = vsel %vm191_vm0, %v2417_v31, %v8559_v10  ;;  %v2418_v55 = vld [vmem:[#allocation2 + $0xc8] sm:$0xff]  ;;  %v2419_v38 = vld [vmem:[#allocation2 + $0xd8] sm:$0xff] }
 0x3d6   : >> { %v3329_v39 = vpop.f32.mrf.mxu2 }
 0x3d7   : >> { %v3442_v49 = vpop.f32.mrf.mxu3 }
 0x3d8   : >> { %v11505_v54 = vadd.f32 %v3442_v49, %v3329_v39  ;;  %v11507_v13 = vpop.f32.mrf.mxu0  ;;  %v2480_v39 = vld [vmem:[#allocation2 + $0xb2] sm:$0xff]  ;;  %v3367_v49 = vpop.f32.mrf.mxu1 }
 0x3d9   : >> { %v8572_v6 = vpop.permute.xlu0 %8571 }
 0x3db   : >> { %3509 = vmatmul.f32.gmra.mxu2 %v3087_v37  ;;  %7642 = vmatmul.msk.f32.gmra.mxu0 %vm191_vm0, %v2478_v60  ;;  %v8568_v37 = vunpack.i.l.bf16 %v11430_v61  ;;  %v2354_v60 = vld [vmem:[#allocation2 + $0xb1] sm:$0xff]  ;;  %v8574_v61 = vunpack.i.h.bf16 %v8572_v6 }
 0x3dc   : >> { %3622 = vmatmul.f32.gmra.mxu3 %v3119_v40 }
 0x3de   : >> { %v3332_v24 = vpop.f32.mrf.mxu2 }
 0x3df   : >> { %v3445_v14 = vpop.f32.mrf.mxu3 }
 0x3e0   : >> { %v11515_v59 = vadd.f32 %v3445_v14, %v3332_v24  ;;  %v11517_v36 = vpop.f32.mrf.mxu0  ;;  %v3370_v8 = vpop.f32.mrf.mxu1 }
 0x3e3   : >> { %3512 = vmatmul.f32.gmra.mxu2 %v3088_v44  ;;  %7643 = vmatmul.msk.f32.gmra.mxu0 %vm191_vm0, %v11229_v53  ;;  %v8564_v53 = vunpack.i.h.bf16 %v11413_v1  ;;  %v2481_v44 = vld [vmem:[#allocation2 + $0xc2] sm:$0xff]  ;;  %v8573_v1 = vunpack.i.l.bf16 %v8572_v6 }
 0x3e4   : >> { %3625 = vmatmul.f32.gmra.mxu3 %v3120_v12  ;;  %v3122_v12 = vsel %vm191_vm0, %v2418_v55, %v8568_v37  ;;  %v8583_v37 = vunpack.i.l.bf16 %v11464_v23 }
 0x3e5   : >> { %v3090_v14 = vsel %vm191_vm0, %v2354_v60, %v8564_v53  ;;  %v8579_v53 = vunpack.i.h.bf16 %v11444_v52 }
 0x3e6   : >> { %v3335_v4 = vpop.f32.mrf.mxu2 }
 0x3e7   : >> { %v3448_v47 = vpop.f32.mrf.mxu3 }
 0x3e8   : >> { %v11524_v45 = vadd.f32 %v3448_v47, %v3335_v4  ;;  %v11526_v35 = vpop.f32.mrf.mxu0 }
 0x3eb   : >> { %3515 = vmatmul.f32.gmra.mxu2 %v3089_v3  ;;  %7644 = vmatmul.msk.f32.gmra.mxu0 %vm191_vm0, %v2480_v39  ;;  %v3091_v3 = vsel %vm191_vm0, %v11231_v25, %v8573_v1  ;;  %v2482_v39 = vld [vmem:[#allocation2 + $0xca] sm:$0xff]  ;;  %v3092_v25 = vsel %vm191_vm0, %v11122_v33, %v8579_v53  ;;  %v8587_v1 = vpop.permute.xlu0 %8586  ;;  %v8592_v53 = vpop.permute.xlu1 %8591 }
 0x3ec   : >> { %3628 = vmatmul.f32.gmra.mxu3 %v3121_v0  ;;  %v3123_v0 = vsel %vm191_vm0, %v2419_v38, %v8574_v61  ;;  %v8588_v52 = vunpack.i.l.bf16 %v8587_v1  ;;  %v8589_v23 = vunpack.i.h.bf16 %v8587_v1 }
 0x3ee   : >> { %v3338_v40 = vpop.f32.mrf.mxu2  ;;  %v3093_v33 = vsel %vm191_vm0, %v11278_v19, %v8588_v52  ;;  %v2485_v52 = vld [vmem:[#allocation2 + $0xf2] sm:$0xff] }
 0x3ef   : >> { %v3451_v9 = vpop.f32.mrf.mxu3 }
 0x3f0   : >> { %v11533_v18 = vadd.f32 %v3451_v9, %v3338_v40  ;;  %v11535_v24 = vpop.f32.mrf.mxu0  ;;  %v2420_v40 = vld [vmem:[#allocation2 + $0xe0] sm:$0xff]  ;;  %v11550_v9 = vpop.f32.mrf.mxu1 }
 0x3f1   : >> { %v3124_v6 = vsel %vm191_vm0, %v2420_v40, %v8583_v37  ;;  %v3368_v40 = vadd.f32 %v3367_v49, %v11373_v34  ;;  %v3371_v49 = vadd.f32 %v3370_v8, %v11392_v28  ;;  %v3374_v8 = vadd.f32 %v11550_v9, %v11411_v46  ;;  %v2487_v9 = vld [vmem:[#allocation2 + $0x10a] sm:$0xff] }
 0x3f3   : >> { %3518 = vmatmul.f32.gmra.mxu2 %v3090_v14  ;;  %7645 = vmatmul.msk.f32.gmra.mxu0 %vm191_vm0, %v2481_v44 }
 0x3f4   : >> { %3631 = vmatmul.f32.gmra.mxu3 %v3122_v12  ;;  %v2483_v12 = vld [vmem:[#allocation2 + $0xda] sm:$0xff] }
 0x3f6   : >> { %v3341_v10 = vpop.f32.mrf.mxu2 }
 0x3f7   : >> { %v3454_v4 = vpop.f32.mrf.mxu3 }
 0x3f8   : >> { %v11540_v31 = vadd.f32 %v3454_v4, %v3341_v10  ;;  %v11542_v47 = vpop.f32.mrf.mxu0  ;;  %v2421_v10 = vld [vmem:[#allocation2 + $0xf0] sm:$0xff]  ;;  %v11567_v37 = vpop.f32.mrf.mxu1 }
 0x3fb   : >> { %3521 = vmatmul.f32.gmra.mxu2 %v3091_v3  ;;  %7646 = vmatmul.msk.f32.gmra.mxu0 %vm191_vm0, %v2482_v39  ;;  %v2484_v39 = vld [vmem:[#allocation2 + $0xe2] sm:$0xff] }
 0x3fc   : >> { %3634 = vmatmul.f32.gmra.mxu3 %v3123_v0  ;;  %v3125_v0 = vsel %vm191_vm0, %v2421_v10, %v8589_v23 }
 0x3fe   : >> { %v3344_v60 = vpop.f32.mrf.mxu2 }
 0x3ff   : >> { %v3457_v55 = vpop.f32.mrf.mxu3 }
 0x400   : >> { %v11552_v14 = vadd.f32 %v3457_v55, %v3344_v60  ;;  %v11554_v44 = vpop.f32.mrf.mxu0  ;;  %v8593_v60 = vunpack.i.l.bf16 %v8592_v53  ;;  %v8594_v55 = vunpack.i.h.bf16 %v8592_v53 }
 0x402   : >> { %v3094_v19 = vsel %vm191_vm0, %v11175_v50, %v8593_v60 }
 0x403   : >> { %3524 = vmatmul.f32.gmra.mxu2 %v3092_v25  ;;  %7647 = vmatmul.msk.f32.gmra.mxu0 %vm191_vm0, %v2483_v12  ;;  %v2422_v12 = vld [vmem:[#allocation2 + $0xf8] sm:$0xff] }
 0x404   : >> { %3637 = vmatmul.f32.gmra.mxu3 %v3124_v6  ;;  %v3126_v10 = vsel %vm191_vm0, %v2422_v12, %v8594_v55 }
 0x406   : >> { %v3347_v61 = vpop.f32.mrf.mxu2 }
 0x407   : >> { %v3460_v38 = vpop.f32.mrf.mxu3 }
 0x408   : >> { %v11560_v4 = vadd.f32 %v3460_v38, %v3347_v61  ;;  %v11562_v3 = vpop.f32.mrf.mxu0  ;;  %v8597_v38 = vpop.permute.xlu2 %8596 }
 0x409   : >> { %v8598_v34 = vunpack.i.l.bf16 %v8597_v38  ;;  %v8599_v53 = vunpack.i.h.bf16 %v8597_v38 }
 0x40b   : >> { %3527 = vmatmul.f32.gmra.mxu2 %v3093_v33  ;;  %7648 = vmatmul.msk.f32.gmra.mxu0 %vm191_vm0, %v2484_v39  ;;  %v11575_v39 = vpop.f32.mrf.mxu1  ;;  %v3095_v12 = vsel %vm191_vm0, %v11319_v27, %v8598_v34  ;;  %v2424_v34 = vld [vmem:[#allocation2 + $0x110] sm:$0xff] }
 0x40c   : >> { %3640 = vmatmul.f32.gmra.mxu3 %v3125_v0 }
 0x40e   : >> { %v3480_v25 = vpop.f32.mrf.mxu2 }
 0x40f   : >> { %v3481_v6 = vadd.f32 %v3480_v25, %v3368_v40  ;;  %v3593_v1 = vpop.f32.mrf.mxu3  ;;  %v2423_v25 = vld [vmem:[#allocation2 + $0x108] sm:$0xff] }
 0x410   : >> { %v3706_v61 = vpop.f32.mrf.mxu0 }
 0x411   : >> { %v3594_v23 = vadd.f32 %v3593_v1, %v3481_v6  ;;  %v2486_v6 = vld [vmem:[#allocation2 + $0xfa] sm:$0xff] }
 0x413   : >> { %v3707_v33 = vadd.f32 %v3706_v61, %v3594_v23  ;;  %3530 = vmatmul.f32.gmra.mxu2 %v3094_v19  ;;  %7649 = vmatmul.msk.f32.gmra.mxu0 %vm191_vm0, %v2485_v52  ;;  %v3127_v61 = vsel %vm191_vm0, %v2423_v25, %v8599_v53  ;;  %v8602_v19 = vpop.permute.xlu0 %8601  ;;  %v11585_v38 = vpop.f32.mrf.mxu1  ;;  %v11591_v25 = vld [vmem:[#allocation2 + $0x159] sm:$0xff] }
 0x414   : >> { %3643 = vmatmul.f32.gmra.mxu3 %v3126_v10  ;;  %v8603_v28 = vunpack.i.l.bf16 %v8602_v19  ;;  %v8604_v10 = vunpack.i.h.bf16 %v8602_v19 }
 0x415   : >> { %v3875_v0 = vmax.f32 %v3707_v33, 0.0 }
 0x416   : >> { %v3483_v40 = vpop.f32.mrf.mxu2  ;;  %v3096_v46 = vsel %vm191_vm0, %v11335_v20, %v8603_v28  ;;  %v3377_v20 = vadd.f32 %v11567_v37, %v11427_v16  ;;  %v8612_v37 = vpop.permute.xlu2 %8611 }
 0x417   : >> { %3907 = vst.msk [vmem:[#allocation2 + $0x19] sm:$0xff] %vm191_vm0, %v3875_v0  ;;  %v3484_v50 = vadd.f32 %v3483_v40, %v3371_v49  ;;  %v3596_v60 = vpop.f32.mrf.mxu3  ;;  %v11589_v40 = vld [vmem:[#allocation2 + $0x142] sm:$0xff] }
 0x418   : >> { %v3709_v55 = vpop.f32.mrf.mxu0 }
 0x419   : >> { %v3597_v1 = vadd.f32 %v3596_v60, %v3484_v50  ;;  %v8640_v60 = vpack.i.bf16 %v11591_v25, %v11589_v40 }
 0x41b   : >> { %v3710_v52 = vadd.f32 %v3709_v55, %v3597_v1  ;;  %3533 = vmatmul.f32.gmra.mxu2 %v3095_v12  ;;  %7650 = vmatmul.msk.f32.gmra.mxu0 %vm191_vm0, %v2486_v6  ;;  %v3128_v12 = vsel %vm191_vm0, %v2424_v34, %v8604_v10  ;;  %v8607_v6 = vpop.permute.xlu1 %8606  ;;  %v11607_v34 = vpop.f32.mrf.mxu1 }
 0x41c   : >> { %3646 = vmatmul.f32.gmra.mxu3 %v3127_v61  ;;  %8641 = vrot.lane.b32.xlu2 %v8640_v60, %s9289_s10  ;;  %v8608_v1 = vunpack.i.l.bf16 %v8607_v6  ;;  %v11601_v61 = vld [vmem:[#allocation2 + $0x151] sm:$0xff]  ;;  %v3380_v60 = vadd.f32 %v11575_v39, %v11442_v63  ;;  %v2489_v39 = vld [vmem:[#allocation2 + $0x122] sm:$0xff] }
 0x41d   : >> { %v3876_v23 = vmax.f32 %v3710_v52, 0.0  ;;  %v8609_v52 = vunpack.i.h.bf16 %v8607_v6  ;;  %v11616_v6 = vld [vmem:[#allocation2 + $0x15a] sm:$0xff] }
 0x41e   : >> { %v3486_v33 = vpop.f32.mrf.mxu2  ;;  %v3973_v27 = vld [vmem:[#allocation2 + $0x19] sm:$0xff] }
 0x41f   : >> { %3908 = vst.msk [vmem:[#allocation2 + $0x21] sm:$0xff] %vm191_vm0, %v3876_v23  ;;  %v3487_v49 = vadd.f32 %v3486_v33, %v3374_v8  ;;  %v3599_v0 = vpop.f32.mrf.mxu3  ;;  %v8630_v53 = vpack.i.bf16 %v11245_v62, %v3973_v27  ;;  %v2425_v23 = vld [vmem:[#allocation2 + $0x120] sm:$0xff] }
 0x420   : >> { %v3712_v50 = vpop.f32.mrf.mxu0  ;;  %v3129_v16 = vsel %vm191_vm0, %v2425_v23, %v8609_v52 }
 0x421   : >> { %v3600_v55 = vadd.f32 %v3599_v0, %v3487_v49  ;;  %8631 = vrot.lane.b32.xlu0 %v8630_v53, %s9289_s10  ;;  %v3097_v0 = vsel %vm191_vm0, %v11400_v22, %v8608_v1  ;;  %v2488_v53 = vld [vmem:[#allocation2 + $0x112] sm:$0xff] }
 0x422   : >> { %v11618_v22 = vld [vmem:[#allocation2 + $0x171] sm:$0xff] }
 0x423   : >> { %v3713_v62 = vadd.f32 %v3712_v50, %v3600_v55  ;;  %3536 = vmatmul.f32.gmra.mxu2 %v3096_v46  ;;  %7651 = vmatmul.msk.f32.gmra.mxu0 %vm191_vm0, %v2487_v9  ;;  %v8613_v9 = vunpack.i.l.bf16 %v8612_v37 }
 0x424   : >> { %3649 = vmatmul.f32.gmra.mxu3 %v3128_v12  ;;  %v8614_v12 = vunpack.i.h.bf16 %v8612_v37 }
 0x425   : >> { %v3877_v19 = vmax.f32 %v3713_v62, 0.0  ;;  %v3098_v63 = vsel %vm191_vm0, %v11362_v42, %v8613_v9  ;;  %v11635_v42 = vld [vmem:[#allocation2 + $0x169] sm:$0xff] }
 0x426   : >> { %v3489_v28 = vpop.f32.mrf.mxu2  ;;  %v3974_v8 = vld [vmem:[#allocation2 + $0x21] sm:$0xff]  ;;  %v2466_v9 = vld [vmem:[#allocation2 + $0x189] sm:$0xff] }
 0x427   : >> { %3909 = vst.msk [vmem:[#allocation2 + $0x31] sm:$0xff] %vm191_vm0, %v3877_v19  ;;  %v3490_v10 = vadd.f32 %v3489_v28, %v3377_v20  ;;  %v3602_v33 = vpop.f32.mrf.mxu3  ;;  %v8635_v27 = vpack.i.bf16 %v3974_v8, %v11601_v61  ;;  %v2426_v20 = vld [vmem:[#allocation2 + $0x128] sm:$0xff]  ;;  %v8655_v19 = vpack.i.bf16 %v11618_v22, %v11616_v6 }
 0x428   : >> { %v3715_v49 = vpop.f32.mrf.mxu0 }
 0x429   : >> { %v3603_v50 = vadd.f32 %v3602_v33, %v3490_v10  ;;  %8636 = vrot.lane.b32.xlu1 %v8635_v27, %s9289_s10  ;;  %8656 = vrot.lane.b32.xlu2 %v8655_v19, %s9289_s10  ;;  %v3130_v33 = vsel %vm191_vm0, %v2426_v20, %v8614_v12  ;;  %v11629_v27 = vpop.permute.xlu0 %8616  ;;  %v2427_v12 = vld [vmem:[#allocation2 + $0x138] sm:$0xff] }
 0x42b   : >> { %v3716_v46 = vadd.f32 %v3715_v49, %v3603_v50  ;;  %3539 = vmatmul.f32.gmra.mxu2 %v3097_v0  ;;  %7652 = vmatmul.msk.f32.gmra.mxu0 %vm191_vm0, %v2488_v53  ;;  %v3388_v49 = vpop.f32.mrf.mxu1  ;;  %v11631_v0 = vpop.permute.xlu1 %8621  ;;  %v3383_v50 = vadd.f32 %v11585_v38, %v11461_v43  ;;  %v2490_v38 = vld [vmem:[#allocation2 + $0x12a] sm:$0xff] }
 0x42c   : >> { %3652 = vmatmul.f32.gmra.mxu3 %v3129_v16  ;;  %v8623_v37 = vunpack.i.l.bf16 %v11631_v0 }
 0x42d   : >> { %v3878_v55 = vmax.f32 %v3716_v46, 0.0  ;;  %v11640_v46 = vld [vmem:[#allocation2 + $0x172] sm:$0xff] }
 0x42e   : >> { %v3492_v62 = vpop.f32.mrf.mxu2  ;;  %v3975_v1 = vld [vmem:[#allocation2 + $0x31] sm:$0xff] }
 0x42f   : >> { %3910 = vst.msk [vmem:[#allocation2 + $0x39] sm:$0xff] %vm191_vm0, %v3878_v55  ;;  %v3493_v52 = vadd.f32 %v3492_v62, %v3380_v60  ;;  %v3605_v28 = vpop.f32.mrf.mxu3  ;;  %v8645_v8 = vpack.i.bf16 %v11292_v58, %v3975_v1  ;;  %v8619_v58 = vunpack.i.h.bf16 %v11629_v27  ;;  %v8670_v62 = vpack.i.bf16 %v2466_v9, %v11640_v46  ;;  %v2428_v9 = vld [vmem:[#allocation2 + $0x140] sm:$0xff] }
 0x430   : >> { %v3718_v23 = vpop.f32.mrf.mxu0 }
 0x431   : >> { %v3606_v10 = vadd.f32 %v3605_v28, %v3493_v52  ;;  %8646 = vrot.lane.b32.xlu0 %v8645_v8, %s9289_s10  ;;  %v3099_v43 = vsel %vm191_vm0, %v11383_v26, %v8619_v58  ;;  %8671 = vrot.lane.b32.xlu2 %v8670_v62, %s9289_s10  ;;  %v3131_v8 = vsel %vm191_vm0, %v2427_v12, %v8623_v37 }
 0x432   : >> { %v3386_v26 = vadd.f32 %v11607_v34, %v11475_v17 }
 0x433   : >> { %v3719_v53 = vadd.f32 %v3718_v23, %v3606_v10  ;;  %3542 = vmatmul.f32.gmra.mxu2 %v3098_v63  ;;  %7653 = vmatmul.msk.f32.gmra.mxu0 %vm191_vm0, %v2489_v39  ;;  %v8627_v23 = vpop.permute.xlu2 %8626  ;;  %v3391_v39 = vpop.f32.mrf.mxu1 }
 0x434   : >> { %3655 = vmatmul.f32.gmra.mxu3 %v3130_v33  ;;  %v8628_v10 = vunpack.i.l.bf16 %v8627_v23  ;;  %v11651_v33 = vld [vmem:[#allocation2 + $0x16a] sm:$0xff]  ;;  %v8629_v58 = vunpack.i.h.bf16 %v8627_v23 }
 0x435   : >> { %v3879_v16 = vmax.f32 %v3719_v53, 0.0 }
 0x436   : >> { %v3495_v60 = vpop.f32.mrf.mxu2  ;;  %v3976_v55 = vld [vmem:[#allocation2 + $0x39] sm:$0xff]  ;;  %v3100_v62 = vsel %vm191_vm0, %v11452_v7, %v8628_v10  ;;  %v3132_v17 = vsel %vm191_vm0, %v2428_v9, %v8629_v58  ;;  %v7678_v58 = vld [vmem:[%s13722_s2 + $0x4e8] sm:$0xff] }
 0x437   : >> { %3911 = vst.msk [vmem:[#allocation2 + $0x49] sm:$0xff] %vm191_vm0, %v3879_v16  ;;  %v3496_v1 = vadd.f32 %v3495_v60, %v3383_v50  ;;  %v3608_v20 = vpop.f32.mrf.mxu3  ;;  %v8650_v19 = vpack.i.bf16 %v3976_v55, %v11635_v42 }
 0x438   : >> { %v3721_v52 = vpop.f32.mrf.mxu0 }
 0x439   : >> { %v3609_v28 = vadd.f32 %v3608_v20, %v3496_v1  ;;  %8651 = vrot.lane.b32.xlu1 %v8650_v19, %s9289_s10  ;;  %v2491_v1 = vld [vmem:[#allocation2 + $0x13a] sm:$0xff] }
 0x43a   : >> { %v11662_v19 = vld [vmem:[#allocation2 + $0x181] sm:$0xff] }
 0x43b   : >> { %v3722_v63 = vadd.f32 %v3721_v52, %v3609_v28  ;;  %3545 = vmatmul.f32.gmra.mxu2 %v3099_v43  ;;  %7654 = vmatmul.msk.f32.gmra.mxu0 %vm191_vm0, %v2490_v38  ;;  %v3389_v52 = vadd.f32 %v3388_v49, %v11489_v32  ;;  %v3394_v38 = vpop.f32.mrf.mxu1  ;;  %v7679_v32 = vld [vmem:[%s13722_s2 + $0x4f0] sm:$0xff] }
 0x43c   : >> { %3658 = vmatmul.f32.gmra.mxu3 %v3131_v8 }
 0x43d   : >> { %v3880_v53 = vmax.f32 %v3722_v63, 0.0 }
 0x43e   : >> { %v3498_v50 = vpop.f32.mrf.mxu2  ;;  %v3977_v16 = vld [vmem:[#allocation2 + $0x49] sm:$0xff] }
 0x43f   : >> { %3912 = vst.msk [vmem:[#allocation2 + $0x51] sm:$0xff] %vm191_vm0, %v3880_v53  ;;  %v3499_v37 = vadd.f32 %v3498_v50, %v3386_v26  ;;  %v3611_v60 = vpop.f32.mrf.mxu3  ;;  %v8660_v55 = vpack.i.bf16 %v11651_v33, %v3977_v16  ;;  %v7680_v26 = vld [vmem:[%s13722_s2 + $0x4f8] sm:$0xff]  ;;  %v3392_v50 = vadd.f32 %v3391_v39, %v11498_v11 }
 0x440   : >> { %v3724_v12 = vpop.f32.mrf.mxu0  ;;  %4963 = vmatpush.msrb.mxu1 %v7680_v26  ;;  %v7676_v11 = vld [vmem:[%s13722_s2 + $0x4d8] sm:$0xff]  ;;  %v7671_v26 = vld [vmem:[%s13722_s2 + $0x4b0] sm:$0xff] }
 0x441   : >> { %v3612_v20 = vadd.f32 %v3611_v60, %v3499_v37  ;;  %8661 = vrot.lane.b32.xlu0 %v8660_v55, %s9289_s10  ;;  %v7677_v60 = vld [vmem:[%s13722_s2 + $0x4e0] sm:$0xff] }
 0x442   : >> { %4964 = vmatpush.msrb.mxu1 %v7679_v32  ;;  %v7670_v32 = vld [vmem:[%s13722_s2 + $0x4a8] sm:$0xff] }
 0x443   : >> { %v3725_v34 = vadd.f32 %v3724_v12, %v3612_v20  ;;  %3548 = vmatmul.f32.gmra.mxu2 %v3100_v62  ;;  %7655 = vmatmul.msk.f32.gmra.mxu0 %vm191_vm0, %v2491_v1  ;;  %v3397_v12 = vpop.f32.mrf.mxu1  ;;  %v7675_v1 = vld [vmem:[%s13722_s2 + $0x4d0] sm:$0xff] }
 0x444   : >> { %3661 = vmatmul.f32.gmra.mxu3 %v3132_v17  ;;  %4965 = vmatpush.msrb.mxu1 %v7678_v58  ;;  %v7674_v17 = vld [vmem:[%s13722_s2 + $0x4c8] sm:$0xff] }
 0x445   : >> { %v3881_v43 = vmax.f32 %v3725_v34, 0.0  ;;  %v3395_v34 = vadd.f32 %v3394_v38, %v11507_v13  ;;  %v7672_v13 = vld [vmem:[%s13722_s2 + $0x4b8] sm:$0xff] }
 0x446   : >> { %v3501_v28 = vpop.f32.mrf.mxu2  ;;  %v3978_v8 = vld [vmem:[#allocation2 + $0x51] sm:$0xff]  ;;  %4966 = vmatpush.msrb.mxu1 %v7677_v60 }
 0x447   : >> { %3913 = vst.msk [vmem:[#allocation2 + $0x61] sm:$0xff] %vm191_vm0, %v3881_v43  ;;  %v3502_v7 = vadd.f32 %v3501_v28, %v3389_v52  ;;  %v3614_v23 = vpop.f32.mrf.mxu3  ;;  %v8665_v63 = vpack.i.bf16 %v3978_v8, %v11662_v19  ;;  %v7673_v8 = vld [vmem:[%s13722_s2 + $0x4c0] sm:$0xff] }
 0x448   : >> { %v3727_v10 = vpop.f32.mrf.mxu0  ;;  %4967 = vmatpush.msrb.mxu1 %v7676_v11 }
 0x449   : >> { %v3615_v53 = vadd.f32 %v3614_v23, %v3502_v7  ;;  %8666 = vrot.lane.b32.xlu1 %v8665_v63, %s9289_s10 }
 0x44a   : >> { %4968 = vmatpush.msrb.mxu1 %v7675_v1  ;;  %v7666_v1 = vld [vmem:[%s13722_s2 + $0x488] sm:$0xff] }
 0x44b   : >> { %v3728_v49 = vadd.f32 %v3727_v10, %v3615_v53  ;;  %7656 = vmatmul.msk.f32.gmra.mxu0 %vm191_vm0, %v11589_v40  ;;  %v3400_v10 = vpop.f32.mrf.mxu1 }
 0x44c   : >> { %4969 = vmatpush.msrb.mxu1 %v7674_v17 }
 0x44d   : >> { %v3882_v16 = vmax.f32 %v3728_v49, 0.0  ;;  %v3398_v49 = vadd.f32 %v3397_v12, %v11517_v36  ;;  %v7668_v36 = vld [vmem:[%s13722_s2 + $0x498] sm:$0xff]  ;;  %v7667_v12 = vld [vmem:[%s13722_s2 + $0x490] sm:$0xff] }
 0x44e   : >> { %v3504_v9 = vpop.f32.mrf.mxu2  ;;  %v3979_v37 = vld [vmem:[#allocation2 + $0x61] sm:$0xff]  ;;  %4970 = vmatpush.msrb.mxu1 %v7673_v8 }
 0x44f   : >> { %3914 = vst.msk [vmem:[#allocation2 + $0x69] sm:$0xff] %vm191_vm0, %v3882_v16  ;;  %v3505_v55 = vadd.f32 %v3504_v9, %v3392_v50  ;;  %4275 = vrot.lane.b32.xlu0 %v3979_v37, %s9289_s10  ;;  %v3617_v40 = vpop.f32.mrf.mxu3  ;;  %v7669_v9 = vld [vmem:[%s13722_s2 + $0x4a0] sm:$0xff] }
 0x450   : >> { %v3730_v62 = vpop.f32.mrf.mxu0  ;;  %4971 = vmatpush.msrb.mxu1 %v7672_v13 }
 0x451   : >> { %v3618_v39 = vadd.f32 %v3617_v40, %v3505_v55 }
 0x452   : >> { %4972 = vmatpush.msrb.mxu1 %v7671_v26 }
 0x453   : >> { %v3731_v20 = vadd.f32 %v3730_v62, %v3618_v39  ;;  %v8618_v62 = vunpack.i.l.bf16 %v11629_v27  ;;  %v3403_v39 = vpop.f32.mrf.mxu1 }
 0x454   : >> { %4973 = vmatpush.msrb.mxu1 %v7670_v32 }
 0x455   : >> { %v3883_v52 = vmax.f32 %v3731_v20, 0.0  ;;  %v3401_v20 = vadd.f32 %v3400_v10, %v11526_v35 }
 0x456   : >> { %v3507_v43 = vpop.f32.mrf.mxu2  ;;  %v3980_v28 = vld [vmem:[#allocation2 + $0x69] sm:$0xff]  ;;  %4974 = vmatpush.msrb.mxu1 %v7669_v9 }
 0x457   : >> { %3915 = vst.msk [vmem:[#allocation2 + $0x79] sm:$0xff] %vm191_vm0, %v3883_v52  ;;  %v3508_v7 = vadd.f32 %v3507_v43, %v3395_v34  ;;  %4277 = vrot.lane.b32.xlu1 %v3980_v28, %s9289_s10  ;;  %v3620_v23 = vpop.f32.mrf.mxu3  ;;  %v7665_v43 = vld [vmem:[%s13722_s2 + $0x480] sm:$0xff] }
 0x458   : >> { %v3733_v63 = vpop.f32.mrf.mxu0  ;;  %4975 = vmatpush.msrb.mxu1 %v7668_v36  ;;  %v3939_v28 = vld [vmem:[#allocation2] sm:$0xff] }
 0x459   : >> { %v3621_v38 = vadd.f32 %v3620_v23, %v3508_v7  ;;  %v4739_v7 = vsel %vm191_vm0, %v3939_v28, %v8618_v62 }
 0x45a   : >> { %4976 = vmatpush.msrb.mxu1 %v7667_v12 }
 0x45b   : >> { %v3734_v53 = vadd.f32 %v3733_v63, %v3621_v38  ;;  %v8624_v63 = vunpack.i.h.bf16 %v11631_v0  ;;  %v3404_v38 = vadd.f32 %v3403_v39, %v11535_v24  ;;  %v3406_v26 = vpop.f32.mrf.mxu1 }
 0x45c   : >> { %4977 = vmatpush.msrb.mxu1 %v7666_v1 }
 0x45d   : >> { %v3884_v58 = vmax.f32 %v3734_v53, 0.0 }
 0x45e   : >> { %v3510_v50 = vpop.f32.mrf.mxu2  ;;  %v3981_v16 = vld [vmem:[#allocation2 + $0x79] sm:$0xff]  ;;  %4978 = vmatpush.msrb.mxu1 %v7665_v43 }
 0x45f   : >> { %3916 = vst.msk [vmem:[#allocation2 + $0x81] sm:$0xff] %vm191_vm0, %v3884_v58  ;;  %v3511_v37 = vadd.f32 %v3510_v50, %v3398_v49  ;;  %4279 = vrot.lane.b32.xlu2 %v3981_v16, %s9289_s10  ;;  %v3623_v60 = vpop.f32.mrf.mxu3  ;;  %4979 = vmatmul.f32.vlgmr.msrb.gmra.mxu1 %v4739_v7  ;;  %v3940_v49 = vld [vmem:[#allocation2 + $0x8] sm:$0xff] }
 0x460   : >> { %v3736_v55 = vpop.f32.mrf.mxu0  ;;  %v4740_v16 = vsel %vm191_vm0, %v3940_v49, %v8624_v63 }
 0x461   : >> { %v3624_v40 = vadd.f32 %v3623_v60, %v3511_v37  ;;  %v3407_v60 = vadd.f32 %v3406_v26, %v11542_v47 }
 0x463   : >> { %v3737_v11 = vadd.f32 %v3736_v55, %v3624_v40  ;;  %v3409_v62 = vpop.f32.mrf.mxu1 }
 0x465   : >> { %v3885_v17 = vmax.f32 %v3737_v11, 0.0 }
 0x466   : >> { %v3513_v34 = vpop.f32.mrf.mxu2  ;;  %v3982_v52 = vld [vmem:[#allocation2 + $0x81] sm:$0xff] }
 0x467   : >> { %3917 = vst.msk [vmem:[#allocation2 + $0x91] sm:$0xff] %vm191_vm0, %v3885_v17  ;;  %v3514_v27 = vadd.f32 %v3513_v34, %v3401_v20  ;;  %4281 = vrot.lane.b32.xlu0 %v3982_v52, %s9289_s10  ;;  %v3626_v8 = vpop.f32.mrf.mxu3  ;;  %4982 = vmatmul.f32.gmra.mxu1 %v4740_v16  ;;  %v3410_v20 = vadd.f32 %v3409_v62, %v11554_v44 }
 0x468   : >> { %v3739_v23 = vpop.f32.mrf.mxu0 }
 0x469   : >> { %v3627_v35 = vadd.f32 %v3626_v8, %v3514_v27 }
 0x46b   : >> { %v3740_v13 = vadd.f32 %v3739_v23, %v3627_v35  ;;  %v3412_v8 = vpop.f32.mrf.mxu1 }
 0x46c   : >> { %v3413_v23 = vadd.f32 %v3412_v8, %v11562_v3 }
 0x46d   : >> { %v3886_v10 = vmax.f32 %v3740_v13, 0.0 }
 0x46e   : >> { %v3516_v53 = vpop.f32.mrf.mxu2  ;;  %v3983_v32 = vld [vmem:[#allocation2 + $0x91] sm:$0xff] }
 0x46f   : >> { %3918 = vst.msk [vmem:[#allocation2 + $0x99] sm:$0xff] %vm191_vm0, %v3886_v10  ;;  %v3517_v58 = vadd.f32 %v3516_v53, %v3404_v38  ;;  %4283 = vrot.lane.b32.xlu1 %v3983_v32, %s9289_s10  ;;  %v3629_v50 = vpop.f32.mrf.mxu3  ;;  %v2493_v10 = vld [vmem:[#allocation2 + $0x152] sm:$0xff] }
 0x470   : >> { %v3742_v9 = vpop.f32.mrf.mxu0  ;;  %7657 = vmatmul.msk.f32.gmra.mxu0 %vm191_vm0, %v2493_v10 }
 0x471   : >> { %v3630_v37 = vadd.f32 %v3629_v50, %v3517_v58 }
 0x473   : >> { %v3743_v0 = vadd.f32 %v3742_v9, %v3630_v37 }
 0x475   : >> { %v3887_v24 = vmax.f32 %v3743_v0, 0.0 }
 0x476   : >> { %v3519_v55 = vpop.f32.mrf.mxu2  ;;  %v3984_v36 = vld [vmem:[#allocation2 + $0x99] sm:$0xff] }
 0x477   : >> { %3919 = vst.msk [vmem:[#allocation2 + $0xa9] sm:$0xff] %vm191_vm0, %v3887_v24  ;;  %v3520_v40 = vadd.f32 %v3519_v55, %v3407_v60  ;;  %4285 = vrot.lane.b32.xlu2 %v3984_v36, %s9289_s10  ;;  %v3632_v12 = vpop.f32.mrf.mxu3 }
 0x478   : >> { %v3745_v11 = vpop.f32.mrf.mxu0  ;;  %7658 = vmatmul.msk.f32.gmra.mxu0 %vm191_vm0, %v11616_v6 }
 0x479   : >> { %v3633_v39 = vadd.f32 %v3632_v12, %v3520_v40  ;;  %v11752_v40 = vld [vmem:[#allocation2 + $0x18] sm:$0xff]  ;;  %v8642_v12 = vpop.permute.xlu2 %8641 }
 0x47b   : >> { %v3746_v1 = vadd.f32 %v3745_v11, %v3633_v39  ;;  %v8950_v11 = vld [vmem:[#allocation2 + $0x139] sm:$0xff] }
 0x47d   : >> { %v3888_v17 = vmax.f32 %v3746_v1, 0.0 }
 0x47e   : >> { %v3522_v34 = vpop.f32.mrf.mxu2  ;;  %v3985_v52 = vld [vmem:[#allocation2 + $0xa9] sm:$0xff] }
 0x47f   : >> { %3920 = vst.msk [vmem:[#allocation2 + $0xb1] sm:$0xff] %vm191_vm0, %v3888_v17  ;;  %v3523_v47 = vadd.f32 %v3522_v34, %v3410_v20  ;;  %4287 = vrot.lane.b32.xlu0 %v3985_v52, %s9289_s10  ;;  %v3635_v43 = vpop.f32.mrf.mxu3  ;;  %v8643_v34 = vunpack.i.l.bf16 %v8642_v12 }
 0x480   : >> { %v3748_v28 = vpop.f32.mrf.mxu0  ;;  %7659 = vmatmul.msk.f32.gmra.mxu0 %vm191_vm0, %v11651_v33 }
 0x481   : >> { %v3636_v27 = vadd.f32 %v3635_v43, %v3523_v47 }
 0x483   : >> { %v3749_v7 = vadd.f32 %v3748_v28, %v3636_v27  ;;  %v2429_v28 = vld [vmem:[#allocation2 + $0x150] sm:$0xff] }
 0x485   : >> { %v3889_v35 = vmax.f32 %v3749_v7, 0.0  ;;  %v3102_v7 = vsel %vm191_vm0, %v11482_v30, %v8643_v34 }
 0x486   : >> { %v3525_v63 = vpop.f32.mrf.mxu2  ;;  %v3986_v13 = vld [vmem:[#allocation2 + $0xb1] sm:$0xff] }
 0x487   : >> { %3921 = vst.msk [vmem:[#allocation2 + $0xc1] sm:$0xff] %vm191_vm0, %v3889_v35  ;;  %v3526_v44 = vadd.f32 %v3525_v63, %v3413_v23  ;;  %4289 = vrot.lane.b32.xlu1 %v3986_v13, %s9289_s10  ;;  %v3638_v38 = vpop.f32.mrf.mxu3  ;;  %v11764_v23 = vld [vmem:[#allocation2 + $0x20] sm:$0xff] }
 0x488   : >> { %v3751_v26 = vpop.f32.mrf.mxu0  ;;  %7660 = vmatmul.msk.f32.gmra.mxu0 %vm191_vm0, %v11640_v46 }
 0x489   : >> { %v3639_v53 = vadd.f32 %v3638_v38, %v3526_v44 }
 0x48b   : >> { %v3752_v32 = vadd.f32 %v3751_v26, %v3639_v53  ;;  %v8644_v26 = vunpack.i.h.bf16 %v8642_v12 }
 0x48d   : >> { %v3890_v49 = vmax.f32 %v3752_v32, 0.0 }
 0x48e   : >> { %v3528_v58 = vpop.f32.mrf.mxu2  ;;  %v3987_v50 = vld [vmem:[#allocation2 + $0xc1] sm:$0xff] }
 0x48f   : >> { %3922 = vst.msk [vmem:[#allocation2 + $0xc9] sm:$0xff] %vm191_vm0, %v3890_v49  ;;  %v3529_v3 = vadd.f32 %v3528_v58, %v11369_v41  ;;  %4291 = vrot.lane.b32.xlu2 %v3987_v50, %s9289_s10  ;;  %v3641_v16 = vpop.f32.mrf.mxu3  ;;  %v2430_v50 = vld [vmem:[#allocation2 + $0x158] sm:$0xff] }
 0x490   : >> { %v3754_v9 = vpop.f32.mrf.mxu0 }
 0x491   : >> { %v3642_v37 = vadd.f32 %v3641_v16, %v3529_v3  ;;  %v11774_v16 = vld [vmem:[#allocation2 + $0x30] sm:$0xff] }
 0x493   : >> { %v3755_v0 = vadd.f32 %v3754_v9, %v3642_v37  ;;  %v8632_v60 = vpop.permute.xlu0 %8631 }
 0x494   : >> { %v8634_v24 = vunpack.i.h.bf16 %v8632_v60  ;;  %v8633_v55 = vunpack.i.l.bf16 %v8632_v60  ;;  %v3134_v60 = vsel %vm191_vm0, %v2430_v50, %v8644_v26 }
 0x495   : >> { %v3891_v36 = vmax.f32 %v3755_v0, 0.0 }
 0x496   : >> { %v3531_v62 = vpop.f32.mrf.mxu2  ;;  %v3101_v41 = vsel %vm191_vm0, %v8950_v11, %v8634_v24  ;;  %v4741_v39 = vsel %vm191_vm0, %v11752_v40, %v8633_v55  ;;  %v3988_v1 = vld [vmem:[#allocation2 + $0xc9] sm:$0xff]  ;;  %v8657_v55 = vpop.permute.xlu2 %8656 }
 0x497   : >> { %3923 = vst.msk [vmem:[#allocation2 + $0xd9] sm:$0xff] %vm191_vm0, %v3891_v36  ;;  %v3532_v6 = vadd.f32 %v3531_v62, %v11390_v21  ;;  %3551 = vmatmul.f32.gmra.mxu2 %v3101_v41  ;;  %4985 = vmatmul.f32.gmra.mxu1 %v4741_v39  ;;  %v3644_v20 = vpop.f32.mrf.mxu3  ;;  %v11784_v36 = vld [vmem:[#allocation2 + $0x182] sm:$0xff]  ;;  %v8658_v12 = vunpack.i.l.bf16 %v8657_v55 }
 0x498   : >> { %4293 = vrot.lane.b32.xlu0 %v3988_v1, %s9289_s10  ;;  %v3757_v17 = vpop.f32.mrf.mxu0  ;;  %7661 = vmatmul.msk.f32.gmra.mxu0 %vm191_vm0, %v11784_v36 }
 0x499   : >> { %v3645_v52 = vadd.f32 %v3644_v20, %v3532_v6  ;;  %v3104_v6 = vsel %vm191_vm0, %v11591_v25, %v8658_v12 }
 0x49b   : >> { %v3758_v47 = vadd.f32 %v3757_v17, %v3645_v52  ;;  %v8637_v43 = vpop.permute.xlu1 %8636  ;;  %v11790_v17 = vld [vmem:[#allocation2 + $0x38] sm:$0xff] }
 0x49c   : >> { %v8639_v27 = vunpack.i.h.bf16 %v8637_v43  ;;  %v8638_v8 = vunpack.i.l.bf16 %v8637_v43 }
 0x49d   : >> { %v3892_v21 = vmax.f32 %v3758_v47, 0.0 }
 0x49e   : >> { %v3534_v35 = vpop.f32.mrf.mxu2  ;;  %v3989_v63 = vld [vmem:[#allocation2 + $0xd9] sm:$0xff]  ;;  %v3133_v13 = vsel %vm191_vm0, %v2429_v28, %v8638_v8  ;;  %v4742_v44 = vsel %vm191_vm0, %v11764_v23, %v8639_v27  ;;  %v11801_v27 = vld [vmem:[#allocation2 + $0x18a] sm:$0xff] }
 0x49f   : >> { %3924 = vst.msk [vmem:[#allocation2 + $0xe1] sm:$0xff] %vm191_vm0, %v3892_v21  ;;  %v3535_v33 = vadd.f32 %v3534_v35, %v11409_v29  ;;  %4295 = vrot.lane.b32.xlu1 %v3989_v63, %s9289_s10  ;;  %3554 = vmatmul.f32.gmra.mxu2 %v3102_v7  ;;  %v3647_v38 = vpop.f32.mrf.mxu3  ;;  %v8659_v21 = vunpack.i.h.bf16 %v8657_v55  ;;  %v11816_v55 = vld [vmem:[#allocation2 + $0x50] sm:$0xff] }
 0x4a0   : >> { %3664 = vmatmul.f32.gmra.mxu3 %v3133_v13  ;;  %4988 = vmatmul.f32.gmra.mxu1 %v4742_v44  ;;  %v3760_v30 = vpop.f32.mrf.mxu0 }
 0x4a1   : >> { %v3648_v10 = vadd.f32 %v3647_v38, %v3535_v33  ;;  %7662 = vmatmul.msk.f32.gmra.mxu0 %vm191_vm0, %v11801_v27  ;;  %v11805_v38 = vld [vmem:[#allocation2 + $0x48] sm:$0xff] }
 0x4a3   : >> { %v3761_v53 = vadd.f32 %v3760_v30, %v3648_v10  ;;  %v8647_v32 = vpop.permute.xlu0 %8646 }
 0x4a4   : >> { %v8649_v49 = vunpack.i.h.bf16 %v8647_v32  ;;  %v8648_v58 = vunpack.i.l.bf16 %v8647_v32 }
 0x4a5   : >> { %v3893_v3 = vmax.f32 %v3761_v53, 0.0  ;;  %v8672_v53 = vpop.permute.xlu2 %8671 }
 0x4a6   : >> { %v3537_v29 = vpop.f32.mrf.mxu2  ;;  %v3990_v9 = vld [vmem:[#allocation2 + $0xe1] sm:$0xff]  ;;  %v3103_v37 = vsel %vm191_vm0, %v11601_v61, %v8649_v49  ;;  %v4743_v0 = vsel %vm191_vm0, %v11774_v16, %v8648_v58  ;;  %v8673_v50 = vunpack.i.l.bf16 %v8672_v53 }
 0x4a7   : >> { %3925 = vst.msk [vmem:[#allocation2 + $0xf1] sm:$0xff] %vm191_vm0, %v3893_v3  ;;  %v3538_v46 = vadd.f32 %v3537_v29, %v11425_v2  ;;  %4297 = vrot.lane.b32.xlu2 %v3990_v9, %s9289_s10  ;;  %3557 = vmatmul.f32.gmra.mxu2 %v3103_v37  ;;  %v3650_v24 = vpop.f32.mrf.mxu3  ;;  %v2431_v2 = vld [vmem:[#allocation2 + $0x168] sm:$0xff] }
 0x4a8   : >> { %3667 = vmatmul.f32.gmra.mxu3 %v3134_v60  ;;  %4991 = vmatmul.f32.gmra.mxu1 %v4743_v0  ;;  %v3763_v61 = vpop.f32.mrf.mxu0  ;;  %v3106_v60 = vsel %vm191_vm0, %v11618_v22, %v8673_v50  ;;  %v7695_v50 = vld [vmem:[%s13722_s2 + $0x570] sm:$0xff] }
 0x4a9   : >> { %v3651_v62 = vadd.f32 %v3650_v24, %v3538_v46 }
 0x4ab   : >> { %v3764_v11 = vadd.f32 %v3763_v61, %v3651_v62  ;;  %v8652_v41 = vpop.permute.xlu1 %8651 }
 0x4ac   : >> { %v8654_v39 = vunpack.i.h.bf16 %v8652_v41  ;;  %v8653_v1 = vunpack.i.l.bf16 %v8652_v41 }
 0x4ad   : >> { %v3894_v20 = vmax.f32 %v3764_v11, 0.0 }
 0x4ae   : >> { %v3540_v34 = vpop.f32.mrf.mxu2  ;;  %v3135_v52 = vsel %vm191_vm0, %v2431_v2, %v8653_v1  ;;  %v4744_v47 = vsel %vm191_vm0, %v11790_v17, %v8654_v39  ;;  %v11795_v43 = vld [vmem:[#allocation2 + $0xf1] sm:$0xff] }
 0x4af   : >> { %3926 = vst.msk [vmem:[#allocation2 + $0xf9] sm:$0xff] %vm191_vm0, %v3894_v20  ;;  %v3541_v28 = vadd.f32 %v3540_v34, %v11440_v51  ;;  %3560 = vmatmul.f32.gmra.mxu2 %v3104_v6  ;;  %4299 = vrot.lane.b32.xlu0 %v11795_v43, %s9289_s10  ;;  %v3653_v25 = vpop.f32.mrf.mxu3  ;;  %v2432_v51 = vld [vmem:[#allocation2 + $0x170] sm:$0xff]  ;;  %v7696_v1 = vld [vmem:[%s13722_s2 + $0x578] sm:$0xff]  ;;  %v8674_v6 = vunpack.i.h.bf16 %v8672_v53  ;;  %v2434_v34 = vld [vmem:[#allocation2 + $0x188] sm:$0xff] }
 0x4b0   : >> { %3670 = vmatmul.f32.gmra.mxu3 %v3135_v52  ;;  %4994 = vmatmul.f32.gmra.mxu1 %v4744_v47  ;;  %v3766_v8 = vpop.f32.mrf.mxu0  ;;  %v3136_v49 = vsel %vm191_vm0, %v2432_v51, %v8659_v21  ;;  %v7728_v51 = vld [vmem:[%s13722_s2 + $0x678] sm:$0xff]  ;;  %v11849_v53 = vld [vmem:[#allocation2 + $0x68] sm:$0xff] }
 0x4b1   : >> { %v3654_v7 = vadd.f32 %v3653_v25, %v3541_v28  ;;  %5076 = vmatpush.msra.mxu2 %v7696_v1  ;;  %v3138_v25 = vsel %vm191_vm0, %v2434_v34, %v8674_v6  ;;  %5302 = vmatpush.msra.mxu0 %v7728_v51  ;;  %v7726_v6 = vld [vmem:[%s13722_s2 + $0x668] sm:$0xff]  ;;  %v4107_v51 = vld [vmem:[#allocation2 + $0x7a] sm:$0xff] }
 0x4b3   : >> { %v3767_v35 = vadd.f32 %v3766_v8, %v3654_v7  ;;  %v8662_v63 = vpop.permute.xlu0 %8661  ;;  %v11837_v8 = vld [vmem:[#allocation2 + $0x60] sm:$0xff]  ;;  %5077 = vmatpush.msra.mxu2 %v7695_v50 }
 0x4b4   : >> { %v8664_v13 = vunpack.i.h.bf16 %v8662_v63  ;;  %v8663_v44 = vunpack.i.l.bf16 %v8662_v63  ;;  %v3955_v50 = vld [vmem:[#allocation2 + $0xc0] sm:$0xff] }
 0x4b5   : >> { %v3895_v33 = vmax.f32 %v3767_v35, 0.0 }
 0x4b6   : >> { %v3543_v30 = vpop.f32.mrf.mxu2  ;;  %v3105_v10 = vsel %vm191_vm0, %v11635_v42, %v8664_v13  ;;  %v4745_v26 = vsel %vm191_vm0, %v11805_v38, %v8663_v44  ;;  %v2433_v42 = vld [vmem:[#allocation2 + $0x180] sm:$0xff] }
 0x4b7   : >> { %3927 = vst.msk [vmem:[#allocation2 + $0x109] sm:$0xff] %vm191_vm0, %v3895_v33  ;;  %v3544_v32 = vadd.f32 %v3543_v30, %v11459_v48  ;;  %3563 = vmatmul.f32.gmra.mxu2 %v3105_v10  ;;  %v3656_v58 = vpop.f32.mrf.mxu3  ;;  %v11821_v62 = vld [vmem:[#allocation2 + $0xf9] sm:$0xff] }
 0x4b8   : >> { %3673 = vmatmul.f32.gmra.mxu3 %v3136_v49  ;;  %4997 = vmatmul.f32.gmra.mxu1 %v4745_v26  ;;  %v3769_v3 = vpop.f32.mrf.mxu0  ;;  %v7736_v33 = vld [vmem:[%s13722_s2 + $0x6b8] sm:$0xff] }
 0x4b9   : >> { %v3657_v29 = vadd.f32 %v3656_v58, %v3544_v32  ;;  %5423 = vmatpush.msra.mxu1 %v7736_v33  ;;  %v11912_v33 = vld [vmem:[#allocation2 + $0xb0] sm:$0xff] }
 0x4bb   : >> { %v3770_v9 = vadd.f32 %v3769_v3, %v3657_v29  ;;  %v8667_v37 = vpop.permute.xlu1 %8666  ;;  %v2467_v3 = vld [vmem:[#allocation2 + $0x199] sm:$0xff]  ;;  %v7711_v29 = vld [vmem:[%s13722_s2 + $0x5f0] sm:$0xff] }
 0x4bc   : >> { %v8669_v0 = vunpack.i.h.bf16 %v8667_v37  ;;  %v8668_v46 = vunpack.i.l.bf16 %v8667_v37  ;;  %v8695_v37 = vpack.i.bf16 %v2467_v3, %v11784_v36 }
 0x4bd   : >> { %v3896_v24 = vmax.f32 %v3770_v9, 0.0  ;;  %v4280_v9 = vpop.permute.xlu2 %4279 }
 0x4be   : >> { %v3546_v48 = vpop.f32.mrf.mxu2  ;;  %v3137_v12 = vsel %vm191_vm0, %v2433_v42, %v8668_v46  ;;  %v4746_v61 = vsel %vm191_vm0, %v11816_v55, %v8669_v0  ;;  %v11823_v11 = vld [vmem:[#allocation2 + $0x109] sm:$0xff]  ;;  %v3949_v42 = vld [vmem:[#allocation2 + $0x78] sm:$0xff] }
 0x4bf   : >> { %3928 = vst.msk [vmem:[#allocation2 + $0x111] sm:$0xff] %vm191_vm0, %v3896_v24  ;;  %v3547_v41 = vadd.f32 %v3546_v48, %v11473_v5  ;;  %3566 = vmatmul.f32.gmra.mxu2 %v3106_v60  ;;  %v3659_v2 = vpop.f32.mrf.mxu3  ;;  %v8675_v22 = vpack.i.bf16 %v11823_v11, %v11821_v62  ;;  %v7712_v5 = vld [vmem:[%s13722_s2 + $0x5f8] sm:$0xff]  ;;  %v4749_v0 = vsel %vm191_vm0, %v3949_v42, %v4280_v9  ;;  %v7727_v46 = vld [vmem:[%s13722_s2 + $0x670] sm:$0xff]  ;;  %v11873_v48 = vld [vmem:[#allocation2 + $0x80] sm:$0xff] }
 0x4c0   : >> { %3676 = vmatmul.f32.gmra.mxu3 %v3137_v12  ;;  %5000 = vmatmul.f32.gmra.mxu1 %v4746_v61  ;;  %v3772_v39 = vpop.f32.mrf.mxu0  ;;  %v4099_v24 = vld [vmem:[#allocation2 + $0x1a] sm:$0xff]  ;;  %v7694_v61 = vld [vmem:[%s13722_s2 + $0x568] sm:$0xff] }
 0x4c1   : >> { %v3660_v20 = vadd.f32 %v3659_v2, %v3547_v41  ;;  %8676 = vrot.lane.b32.xlu1 %v8675_v22, %s9289_s10  ;;  %5189 = vmatpush.msra.mxu3 %v7712_v5  ;;  %v4276_v47 = vpop.permute.xlu0 %4275  ;;  %v8710_v36 = vpack.i.bf16 %v4099_v24, %v11752_v40  ;;  %v7710_v41 = vld [vmem:[%s13722_s2 + $0x5e8] sm:$0xff]  ;;  %v4101_v22 = vld [vmem:[#allocation2 + $0x32] sm:$0xff] }
 0x4c2   : >> { %v4747_v21 = vsel %vm191_vm0, %v11837_v8, %v4276_v47  ;;  %5303 = vmatpush.msra.mxu0 %v7727_v46  ;;  %5078 = vmatpush.msra.mxu2 %v7694_v61  ;;  %v8725_v40 = vpack.i.bf16 %v4101_v22, %v11774_v16  ;;  %v4103_v5 = vld [vmem:[#allocation2 + $0x4a] sm:$0xff]  ;;  %v4113_v61 = vld [vmem:[#allocation2 + $0xc2] sm:$0xff] }
 0x4c3   : >> { %v3773_v52 = vadd.f32 %v3772_v39, %v3660_v20  ;;  %5190 = vmatpush.msra.mxu3 %v7711_v29  ;;  %v3951_v39 = vld [vmem:[#allocation2 + $0x90] sm:$0xff]  ;;  %v8740_v47 = vpack.i.bf16 %v4103_v5, %v11805_v38  ;;  %v7734_v24 = vld [vmem:[%s13722_s2 + $0x6a8] sm:$0xff]  ;;  %v11947_v5 = vld [vmem:[#allocation2 + $0xe0] sm:$0xff] }
 0x4c4   : >> { %v7735_v20 = vld [vmem:[%s13722_s2 + $0x6b0] sm:$0xff]  ;;  %5304 = vmatpush.msra.mxu0 %v7726_v6 }
 0x4c5   : >> { %v3897_v28 = vmax.f32 %v3773_v52, 0.0  ;;  %5191 = vmatpush.msra.mxu3 %v7710_v41  ;;  %5424 = vmatpush.msra.mxu1 %v7735_v20  ;;  %v11894_v52 = vld [vmem:[#allocation2 + $0x98] sm:$0xff]  ;;  %v7707_v41 = vld [vmem:[%s13722_s2 + $0x5d0] sm:$0xff] }
 0x4c6   : >> { %v3549_v7 = vpop.f32.mrf.mxu2  ;;  %v4115_v20 = vld [vmem:[#allocation2 + $0xda] sm:$0xff] }
 0x4c7   : >> { %3929 = vst.msk [vmem:[#allocation2 + $0x121] sm:$0xff] %vm191_vm0, %v3897_v28  ;;  %v3550_v35 = vadd.f32 %v3549_v7, %v11487_v57  ;;  %v3662_v63 = vpop.f32.mrf.mxu3  ;;  %v11851_v57 = vld [vmem:[#allocation2 + $0x111] sm:$0xff]  ;;  %v7693_v28 = vld [vmem:[%s13722_s2 + $0x560] sm:$0xff]  ;;  %5425 = vmatpush.msra.mxu1 %v7734_v24 }
 0x4c8   : >> { %3679 = vmatmul.f32.gmra.mxu3 %v3138_v25  ;;  %5003 = vmatmul.f32.gmra.mxu1 %v4747_v21  ;;  %v3775_v13 = vpop.f32.mrf.mxu0  ;;  %v7709_v25 = vld [vmem:[%s13722_s2 + $0x5e0] sm:$0xff] }
 0x4c9   : >> { %v3663_v44 = vadd.f32 %v3662_v63, %v3550_v35  ;;  %v4278_v10 = vpop.permute.xlu1 %4277  ;;  %5079 = vmatpush.msra.mxu2 %v7693_v28  ;;  %5192 = vmatpush.msra.mxu3 %v7709_v25  ;;  %v4105_v21 = vld [vmem:[#allocation2 + $0x62] sm:$0xff]  ;;  %v2499_v28 = vld [vmem:[#allocation2 + $0x19a] sm:$0xff] }
 0x4ca   : >> { %v4748_v49 = vsel %vm191_vm0, %v11849_v53, %v4278_v10  ;;  %v3953_v35 = vld [vmem:[#allocation2 + $0xa8] sm:$0xff]  ;;  %v8755_v38 = vpack.i.bf16 %v4105_v21, %v11837_v8  ;;  %v8770_v10 = vpack.i.bf16 %v4107_v51, %v3949_v42  ;;  %v7692_v8 = vld [vmem:[%s13722_s2 + $0x558] sm:$0xff]  ;;  %7663 = vmatmul.msk.f32.gmra.mxu0 %vm191_vm0, %v2499_v28 }
 0x4cb   : >> { %v3776_v30 = vadd.f32 %v3775_v13, %v3663_v44  ;;  %v7725_v13 = vld [vmem:[%s13722_s2 + $0x660] sm:$0xff]  ;;  %5080 = vmatpush.msra.mxu2 %v7692_v8  ;;  %v7724_v42 = vld [vmem:[%s13722_s2 + $0x658] sm:$0xff]  ;;  %v7690_v21 = vld [vmem:[%s13722_s2 + $0x548] sm:$0xff] }
 0x4cc   : >> { %5305 = vmatpush.msra.mxu0 %v7725_v13  ;;  %v7706_v51 = vld [vmem:[%s13722_s2 + $0x5c8] sm:$0xff] }
 0x4cd   : >> { %v3898_v26 = vmax.f32 %v3776_v30, 0.0 }
 0x4ce   : >> { %v11853_v32 = vld [vmem:[#allocation2 + $0x121] sm:$0xff]  ;;  %5306 = vmatpush.msra.mxu0 %v7724_v42 }
 0x4cf   : >> { %3930 = vst.msk [vmem:[#allocation2 + $0x129] sm:$0xff] %vm191_vm0, %v3898_v26  ;;  %v8680_v58 = vpack.i.bf16 %v11853_v32, %v11851_v57 }
 0x4d0   : >> { %5006 = vmatmul.f32.gmra.mxu1 %v4748_v49  ;;  %v4109_v49 = vld [vmem:[#allocation2 + $0x92] sm:$0xff] }
 0x4d1   : >> { %8681 = vrot.lane.b32.xlu2 %v8680_v58, %s9289_s10  ;;  %v4286_v34 = vpop.permute.xlu2 %4285  ;;  %v7708_v58 = vld [vmem:[%s13722_s2 + $0x5d8] sm:$0xff]  ;;  %v8785_v29 = vpack.i.bf16 %v4109_v49, %v3951_v39 }
 0x4d2   : >> { %v4752_v16 = vsel %vm191_vm0, %v11894_v52, %v4286_v34  ;;  %5193 = vmatpush.msra.mxu3 %v7708_v58  ;;  %v7723_v34 = vld [vmem:[%s13722_s2 + $0x650] sm:$0xff] }
 0x4d3   : >> { %5307 = vmatpush.msra.mxu0 %v7723_v34 }
 0x4d4   : >> { %5194 = vmatpush.msra.mxu3 %v7707_v41 }
 0x4d6   : >> { %5195 = vmatpush.msra.mxu3 %v7706_v51 }
 0x4d8   : >> { %5009 = vmatmul.f32.gmra.mxu1 %v4749_v0  ;;  %v11928_v0 = vld [vmem:[#allocation2 + $0xc8] sm:$0xff] }
 0x4d9   : >> { %8696 = vrot.lane.b32.xlu2 %v8695_v37, %s9289_s10  ;;  %v4282_v60 = vpop.permute.xlu0 %4281  ;;  %v4111_v37 = vld [vmem:[#allocation2 + $0xaa] sm:$0xff] }
 0x4da   : >> { %v4750_v12 = vsel %vm191_vm0, %v11873_v48, %v4282_v60  ;;  %v8800_v60 = vpack.i.bf16 %v4111_v37, %v3953_v35  ;;  %v7722_v37 = vld [vmem:[%s13722_s2 + $0x648] sm:$0xff] }
 0x4db   : >> { %5308 = vmatpush.msra.mxu0 %v7722_v37  ;;  %v7704_v37 = vld [vmem:[%s13722_s2 + $0x5b8] sm:$0xff] }
 0x4e0   : >> { %5012 = vmatmul.f32.gmra.mxu1 %v4750_v12  ;;  %v7691_v12 = vld [vmem:[%s13722_s2 + $0x550] sm:$0xff] }
 0x4e1   : >> { %8711 = vrot.lane.b32.xlu2 %v8710_v36, %s9289_s10  ;;  %v4284_v2 = vpop.permute.xlu1 %4283  ;;  %5081 = vmatpush.msra.mxu2 %v7691_v12 }
 0x4e2   : >> { %v4751_v1 = vsel %vm191_vm0, %v3951_v39, %v4284_v2  ;;  %v3957_v2 = vld [vmem:[#allocation2 + $0xd8] sm:$0xff]  ;;  %v8815_v39 = vpack.i.bf16 %v4113_v61, %v3955_v50 }
 0x4e3   : >> { %5082 = vmatpush.msra.mxu2 %v7690_v21  ;;  %v7721_v21 = vld [vmem:[%s13722_s2 + $0x640] sm:$0xff] }
 0x4e4   : >> { %5309 = vmatpush.msra.mxu0 %v7721_v21 }
 0x4e8   : >> { %5015 = vmatmul.f32.gmra.mxu1 %v4751_v1 }
 0x4e9   : >> { %8726 = vrot.lane.b32.xlu2 %v8725_v40, %s9289_s10  ;;  %v4292_v26 = vpop.permute.xlu2 %4291 }
 0x4ea   : >> { %v4755_v3 = vsel %vm191_vm0, %v3955_v50, %v4292_v26 }
 0x4ed   : >> { %v3778_v1 = vpop.f32.mrf.mxu0 }
 0x4f0   : >> { %5018 = vmatmul.f32.gmra.mxu1 %v4752_v16 }
 0x4f1   : >> { %8741 = vrot.lane.b32.xlu2 %v8740_v47, %s9289_s10  ;;  %v4288_v7 = vpop.permute.xlu0 %4287  ;;  %v8830_v47 = vpack.i.bf16 %v4115_v20, %v3957_v2  ;;  %v2435_v20 = vld [vmem:[#allocation2 + $0x198] sm:$0xff] }
 0x4f2   : >> { %v4753_v63 = vsel %vm191_vm0, %v3953_v35, %v4288_v7 }
 0x4f8   : >> { %5021 = vmatmul.f32.gmra.mxu1 %v4753_v63  ;;  %v3781_v63 = vpop.f32.mrf.mxu0 }
 0x4f9   : >> { %8756 = vrot.lane.b32.xlu2 %v8755_v38, %s9289_s10  ;;  %v4290_v44 = vpop.permute.xlu1 %4289 }
 0x4fa   : >> { %v4754_v30 = vsel %vm191_vm0, %v11912_v33, %v4290_v44  ;;  %v4117_v44 = vld [vmem:[#allocation2 + $0xf2] sm:$0xff] }
 0x500   : >> { %5024 = vmatmul.f32.gmra.mxu1 %v4754_v30  ;;  %v3959_v30 = vld [vmem:[#allocation2 + $0xf0] sm:$0xff]  ;;  %v3784_v42 = vpop.f32.mrf.mxu0 }
 0x501   : >> { %8771 = vrot.lane.b32.xlu2 %v8770_v10, %s9289_s10  ;;  %v4298_v6 = vpop.permute.xlu2 %4297  ;;  %v8845_v8 = vpack.i.bf16 %v4117_v44, %v3959_v30  ;;  %v11998_v44 = vld [vmem:[#allocation2 + $0x120] sm:$0xff] }
 0x502   : >> { %v4758_v16 = vsel %vm191_vm0, %v11947_v5, %v4298_v6 }
 0x508   : >> { %5027 = vmatmul.f32.gmra.mxu1 %v4755_v3 }
 0x509   : >> { %8786 = vrot.lane.b32.xlu2 %v8785_v29, %s9289_s10 }
 0x50a   : >> { %v4294_v9 = vpop.permute.xlu0 %4293 }
 0x50b   : >> { %v4756_v46 = vsel %vm191_vm0, %v11928_v0, %v4294_v9  ;;  %v4119_v9 = vld [vmem:[#allocation2 + $0x10a] sm:$0xff] }
 0x510   : >> { %5030 = vmatmul.f32.gmra.mxu1 %v4756_v46 }
 0x511   : >> { %8801 = vrot.lane.b32.xlu2 %v8800_v60, %s9289_s10  ;;  %v4296_v36 = vpop.permute.xlu1 %4295  ;;  %v4055_v60 = vld [vmem:[#allocation2 + $0x108] sm:$0xff] }
 0x512   : >> { %v4757_v22 = vsel %vm191_vm0, %v3957_v2, %v4296_v36  ;;  %v8860_v24 = vpack.i.bf16 %v4119_v9, %v4055_v60  ;;  %v11969_v36 = vpop.f32.mrf.mxu1  ;;  %v7688_v9 = vld [vmem:[%s13722_s2 + $0x538] sm:$0xff] }
 0x518   : >> { %5033 = vmatmul.f32.gmra.mxu1 %v4757_v22 }
 0x519   : >> { %8816 = vrot.lane.b32.xlu2 %v8815_v39, %s9289_s10  ;;  %v7733_v39 = vld [vmem:[%s13722_s2 + $0x6a0] sm:$0xff] }
 0x51a   : >> { %v3552_v40 = vpop.f32.mrf.mxu2  ;;  %5426 = vmatpush.msra.mxu1 %v7733_v39 }
 0x51b   : >> { %v3553_v25 = vadd.f32 %v3552_v40, %v11496_v56  ;;  %v7705_v40 = vld [vmem:[%s13722_s2 + $0x5c0] sm:$0xff] }
 0x51c   : >> { %5196 = vmatpush.msra.mxu3 %v7705_v40 }
 0x51e   : >> { %5197 = vmatpush.msra.mxu3 %v7704_v37  ;;  %v7719_v37 = vld [vmem:[%s13722_s2 + $0x630] sm:$0xff] }
 0x520   : >> { %5036 = vmatmul.f32.gmra.mxu1 %v4758_v16 }
 0x521   : >> { %8831 = vrot.lane.b32.xlu2 %v8830_v47, %s9289_s10  ;;  %v4300_v38 = vpop.permute.xlu0 %4299 }
 0x522   : >> { %v3555_v7 = vpop.f32.mrf.mxu2  ;;  %v4759_v10 = vsel %vm191_vm0, %v3959_v30, %v4300_v38  ;;  %v11995_v38 = vld [vmem:[#allocation2 + $0xf8] sm:$0xff] }
 0x523   : >> { %v3665_v35 = vpop.f32.mrf.mxu3  ;;  %v3556_v49 = vadd.f32 %v3555_v7, %v11505_v54  ;;  %v11972_v54 = vld [vmem:[#allocation2 + $0x129] sm:$0xff] }
 0x524   : >> { %v3666_v13 = vadd.f32 %v3665_v35, %v3553_v25  ;;  %v4121_v25 = vld [vmem:[#allocation2 + $0x122] sm:$0xff] }
 0x525   : >> { %v8875_v30 = vpack.i.bf16 %v4121_v25, %v11998_v44 }
 0x526   : >> { %v3779_v56 = vadd.f32 %v3778_v1, %v3666_v13  ;;  %v7689_v1 = vld [vmem:[%s13722_s2 + $0x540] sm:$0xff] }
 0x527   : >> { %5083 = vmatpush.msra.mxu2 %v7689_v1 }
 0x528   : >> { %v3899_v26 = vmax.f32 %v3779_v56, 0.0  ;;  %5039 = vmatmul.f32.gmra.mxu1 %v4759_v10  ;;  %v3787_v56 = vpop.f32.mrf.mxu0 }
 0x529   : >> { %8846 = vrot.lane.b32.xlu2 %v8845_v8, %s9289_s10  ;;  %v12006_v8 = vpop.f32.mrf.mxu1  ;;  %5084 = vmatpush.msra.mxu2 %v7688_v9 }
 0x52a   : >> { %3931 = vst.msk [vmem:[#allocation2 + $0x139] sm:$0xff] %vm191_vm0, %v3899_v26  ;;  %v3558_v58 = vpop.f32.mrf.mxu2 }
 0x52b   : >> { %v3668_v50 = vpop.f32.mrf.mxu3  ;;  %v11964_v3 = vpop.permute.xlu2 %8681  ;;  %v3559_v41 = vadd.f32 %v3558_v58, %v11515_v59 }
 0x52c   : >> { %v3669_v29 = vadd.f32 %v3668_v50, %v3556_v49 }
 0x52e   : >> { %v3782_v46 = vadd.f32 %v3781_v63, %v3669_v29 }
 0x530   : >> { %v3900_v12 = vmax.f32 %v3782_v46, 0.0 }
 0x531   : >> { %8861 = vrot.lane.b32.xlu2 %v8860_v24, %s9289_s10  ;;  %v11974_v61 = vld [vmem:[#allocation2 + $0x139] sm:$0xff] }
 0x532   : >> { %3932 = vst.msk [vmem:[#allocation2 + $0x141] sm:$0xff] %vm191_vm0, %v3900_v12  ;;  %v3561_v2 = vpop.f32.mrf.mxu2  ;;  %v8685_v22 = vpack.i.bf16 %v11974_v61, %v11972_v54  ;;  %v12014_v46 = vld [vmem:[#allocation2 + $0x138] sm:$0xff] }
 0x533   : >> { %v3671_v6 = vpop.f32.mrf.mxu3  ;;  %v8697_v59 = vpop.permute.xlu2 %8696 }
 0x534   : >> { %v3672_v34 = vadd.f32 %v3671_v6, %v3559_v41  ;;  %v8699_v16 = vunpack.i.h.bf16 %v8697_v59  ;;  %v8698_v47 = vunpack.i.l.bf16 %v8697_v59  ;;  %v8677_v28 = vpop.permute.xlu1 %8676  ;;  %8686 = vrot.lane.b32.xlu0 %v8685_v22, %s9289_s10  ;;  %v3790_v22 = vpop.f32.mrf.mxu0 }
 0x535   : >> { %v8678_v7 = vunpack.i.l.bf16 %v8677_v28  ;;  %v8679_v26 = vunpack.i.h.bf16 %v8677_v28  ;;  %v12029_v59 = vpop.f32.mrf.mxu1 }
 0x536   : >> { %v3785_v35 = vadd.f32 %v3784_v42, %v3672_v34  ;;  %v3107_v63 = vsel %vm191_vm0, %v11662_v19, %v8698_v47  ;;  %v3139_v13 = vsel %vm191_vm0, %v2435_v20, %v8699_v16  ;;  %v3562_v19 = vadd.f32 %v3561_v2, %v11524_v45  ;;  %v7720_v20 = vld [vmem:[%s13722_s2 + $0x638] sm:$0xff]  ;;  %v12034_v16 = vld [vmem:[#allocation2 + $0x110] sm:$0xff] }
 0x537   : >> { %3569 = vmatmul.f32.gmra.mxu2 %v3107_v63  ;;  %v4760_v51 = vsel %vm191_vm0, %v11995_v38, %v8678_v7  ;;  %3682 = vmatmul.f32.gmra.mxu3 %v3139_v13  ;;  %v4761_v45 = vsel %vm191_vm0, %v4055_v60, %v8679_v26  ;;  %v8683_v60 = vunpack.i.l.bf16 %v11964_v3 }
 0x538   : >> { %v3901_v10 = vmax.f32 %v3785_v35, 0.0  ;;  %5042 = vmatmul.f32.gmra.mxu1 %v4760_v51  ;;  %5310 = vmatpush.msra.mxu0 %v7720_v20  ;;  %v8684_v51 = vunpack.i.h.bf16 %v11964_v3  ;;  %v12095_v20 = vld [vmem:[#allocation2 + $0x49] sm:$0xff] }
 0x539   : >> { %8876 = vrot.lane.b32.xlu2 %v8875_v30, %s9289_s10  ;;  %v4123_v50 = vld [vmem:[#allocation2 + $0x13a] sm:$0xff]  ;;  %v4762_v47 = vsel %vm191_vm0, %v12034_v16, %v8683_v60 }
 0x53a   : >> { %3933 = vst.msk [vmem:[#allocation2 + $0x151] sm:$0xff] %vm191_vm0, %v3901_v10  ;;  %v3564_v29 = vpop.f32.mrf.mxu2  ;;  %v8890_v24 = vpack.i.bf16 %v4123_v50, %v12014_v46  ;;  %v12019_v41 = vld [vmem:[#allocation2 + $0x141] sm:$0xff]  ;;  %5311 = vmatpush.msra.mxu0 %v7719_v37 }
 0x53b   : >> { %v3674_v49 = vpop.f32.mrf.mxu3  ;;  %v3565_v39 = vadd.f32 %v3564_v29, %v11533_v18  ;;  %v12154_v37 = vld [vmem:[#allocation2 + $0x81] sm:$0xff] }
 0x53c   : >> { %v3675_v58 = vadd.f32 %v3674_v49, %v3562_v19  ;;  %v7687_v19 = vld [vmem:[%s13722_s2 + $0x530] sm:$0xff]  ;;  %v4763_v49 = vsel %vm191_vm0, %v11998_v44, %v8684_v51  ;;  %v12073_v44 = vld [vmem:[#allocation2 + $0x22] sm:$0xff] }
 0x53d   : >> { %5085 = vmatpush.msra.mxu2 %v7687_v19  ;;  %v12059_v26 = vpop.f32.mrf.mxu1  ;;  %v12137_v19 = vld [vmem:[#allocation2 + $0x69] sm:$0xff] }
 0x53e   : >> { %v3788_v42 = vadd.f32 %v3787_v56, %v3675_v58  ;;  %v3793_v56 = vpop.f32.mrf.mxu0  ;;  %v2468_v58 = vld [vmem:[#allocation2 + $0x1a1] sm:$0xff] }
 0x540   : >> { %v3902_v12 = vmax.f32 %v3788_v42, 0.0  ;;  %5045 = vmatmul.f32.gmra.mxu1 %v4761_v45  ;;  %v12071_v42 = vld [vmem:[#allocation2 + $0x31] sm:$0xff] }
 0x541   : >> { %8891 = vrot.lane.b32.xlu2 %v8890_v24, %s9289_s10  ;;  %v12021_v2 = vld [vmem:[#allocation2 + $0x151] sm:$0xff] }
 0x542   : >> { %3934 = vst.msk [vmem:[#allocation2 + $0x159] sm:$0xff] %vm191_vm0, %v3902_v12  ;;  %v8690_v1 = vpack.i.bf16 %v12021_v2, %v12019_v41  ;;  %v3567_v18 = vpop.f32.mrf.mxu2  ;;  %v12038_v25 = vld [vmem:[#allocation2 + $0x150] sm:$0xff] }
 0x543   : >> { %v3677_v40 = vpop.f32.mrf.mxu3  ;;  %v3568_v35 = vadd.f32 %v3567_v18, %v11540_v31  ;;  %v7732_v31 = vld [vmem:[%s13722_s2 + $0x698] sm:$0xff] }
 0x544   : >> { %v3678_v6 = vadd.f32 %v3677_v40, %v3565_v39  ;;  %8691 = vrot.lane.b32.xlu1 %v8690_v1, %s9289_s10  ;;  %5427 = vmatpush.msra.mxu1 %v7732_v31  ;;  %v8720_v39 = vpack.i.bf16 %v12071_v42, %v12073_v44  ;;  %v7686_v40 = vld [vmem:[%s13722_s2 + $0x528] sm:$0xff]  ;;  %v7701_v31 = vld [vmem:[%s13722_s2 + $0x5a0] sm:$0xff] }
 0x545   : >> { %v12075_v45 = vpop.f32.mrf.mxu1  ;;  %5086 = vmatpush.msra.mxu2 %v7686_v40  ;;  %v12170_v40 = vld [vmem:[#allocation2 + $0xa9] sm:$0xff] }
 0x546   : >> { %v3791_v34 = vadd.f32 %v3790_v22, %v3678_v6  ;;  %v7702_v6 = vld [vmem:[%s13722_s2 + $0x5a8] sm:$0xff] }
 0x548   : >> { %v3903_v28 = vmax.f32 %v3791_v34, 0.0  ;;  %5048 = vmatmul.f32.gmra.mxu1 %v4762_v47  ;;  %v12097_v34 = vld [vmem:[#allocation2 + $0x39] sm:$0xff] }
 0x549   : >> { %v4125_v7 = vld [vmem:[#allocation2 + $0x152] sm:$0xff] }
 0x54a   : >> { %v12040_v21 = vld [vmem:[#allocation2 + $0x159] sm:$0xff]  ;;  %3935 = vst.msk [vmem:[#allocation2 + $0x169] sm:$0xff] %vm191_vm0, %v3903_v28  ;;  %v8905_v63 = vpack.i.bf16 %v4125_v7, %v12038_v25  ;;  %v8730_v28 = vpack.i.bf16 %v11790_v17, %v12097_v34  ;;  %v7718_v7 = vld [vmem:[%s13722_s2 + $0x628] sm:$0xff] }
 0x54b   : >> { %v8700_v13 = vpack.i.bf16 %v11801_v27, %v12040_v21  ;;  %v3680_v30 = vpop.f32.mrf.mxu3  ;;  %v7703_v27 = vld [vmem:[%s13722_s2 + $0x5b0] sm:$0xff]  ;;  %5312 = vmatpush.msra.mxu0 %v7718_v7 }
 0x54c   : >> { %v3681_v10 = vadd.f32 %v3680_v30, %v3568_v35  ;;  %8906 = vrot.lane.b32.xlu2 %v8905_v63, %s9289_s10  ;;  %5198 = vmatpush.msra.mxu3 %v7703_v27  ;;  %v12112_v35 = vld [vmem:[#allocation2 + $0x61] sm:$0xff]  ;;  %v12114_v63 = vld [vmem:[#allocation2 + $0x51] sm:$0xff] }
 0x54d   : >> { %8701 = vrot.lane.b32.xlu0 %v8700_v13, %s9289_s10  ;;  %v12103_v47 = vpop.f32.mrf.mxu1  ;;  %v12116_v13 = vld [vmem:[#allocation2 + $0x52] sm:$0xff]  ;;  %v8745_v17 = vpack.i.bf16 %v11816_v55, %v12114_v63  ;;  %v12139_v27 = vld [vmem:[#allocation2 + $0x6a] sm:$0xff] }
 0x54e   : >> { %v3794_v3 = vadd.f32 %v3793_v56, %v3681_v10  ;;  %5199 = vmatpush.msra.mxu3 %v7702_v6  ;;  %v8750_v51 = vpack.i.bf16 %v12112_v35, %v12116_v13  ;;  %v7731_v56 = vld [vmem:[%s13722_s2 + $0x690] sm:$0xff]  ;;  %v7685_v10 = vld [vmem:[%s13722_s2 + $0x520] sm:$0xff] }
 0x54f   : >> { %5428 = vmatpush.msra.mxu1 %v7731_v56  ;;  %5087 = vmatpush.msra.mxu2 %v7685_v10  ;;  %v12135_v55 = vld [vmem:[#allocation2 + $0x79] sm:$0xff] }
 0x550   : >> { %v3904_v50 = vmax.f32 %v3794_v3, 0.0  ;;  %5051 = vmatmul.f32.gmra.mxu1 %v4763_v49  ;;  %5200 = vmatpush.msra.mxu3 %v7701_v31  ;;  %v8765_v3 = vpack.i.bf16 %v12135_v55, %v12139_v27  ;;  %v8760_v49 = vpack.i.bf16 %v11849_v53, %v12137_v19  ;;  %v12172_v6 = vld [vmem:[#allocation2 + $0x99] sm:$0xff] }
 0x551   : >> { %v12063_v29 = vld [vmem:[#allocation2 + $0x169] sm:$0xff]  ;;  %v8790_v7 = vpack.i.bf16 %v11894_v52, %v12172_v6  ;;  %v12188_v56 = vld [vmem:[#allocation2 + $0xb2] sm:$0xff] }
 0x552   : >> { %3936 = vst.msk [vmem:[#allocation2 + $0x171] sm:$0xff] %vm191_vm0, %v3904_v50  ;;  %v8705_v9 = vpack.i.bf16 %v12063_v29, %v2468_v58  ;;  %v12077_v24 = vld [vmem:[#allocation2 + $0x168] sm:$0xff]  ;;  %v7717_v58 = vld [vmem:[%s13722_s2 + $0x620] sm:$0xff]  ;;  %v7716_v31 = vld [vmem:[%s13722_s2 + $0x618] sm:$0xff] }
 0x553   : >> { %5313 = vmatpush.msra.mxu0 %v7717_v58  ;;  %v12204_v58 = vld [vmem:[#allocation2 + $0xd9] sm:$0xff] }
 0x554   : >> { %8706 = vrot.lane.b32.xlu1 %v8705_v9, %s9289_s10  ;;  %v12152_v9 = vld [vmem:[#allocation2 + $0x91] sm:$0xff] }
 0x555   : >> { %v12123_v30 = vpop.f32.mrf.mxu1  ;;  %5314 = vmatpush.msra.mxu0 %v7716_v31  ;;  %v12226_v31 = vld [vmem:[#allocation2 + $0xe2] sm:$0xff] }
 0x559   : >> { %v4127_v12 = vld [vmem:[#allocation2 + $0x16a] sm:$0xff] }
 0x55a   : >> { %v12079_v22 = vld [vmem:[#allocation2 + $0x171] sm:$0xff]  ;;  %v8920_v1 = vpack.i.bf16 %v4127_v12, %v12077_v24  ;;  %v12156_v12 = vld [vmem:[#allocation2 + $0x82] sm:$0xff] }
 0x55b   : >> { %v8715_v60 = vpack.i.bf16 %v11764_v23, %v12079_v22  ;;  %v12099_v23 = vld [vmem:[#allocation2 + $0x3a] sm:$0xff]  ;;  %v8780_v53 = vpack.i.bf16 %v12152_v9, %v12156_v12 }
 0x55c   : >> { %8721 = vrot.lane.b32.xlu1 %v8720_v39, %s9289_s10  ;;  %8921 = vrot.lane.b32.xlu2 %v8920_v1, %s9289_s10  ;;  %v8735_v18 = vpack.i.bf16 %v12095_v20, %v12099_v23  ;;  %v8775_v39 = vpack.i.bf16 %v11873_v48, %v12154_v37  ;;  %v7684_v1 = vld [vmem:[%s13722_s2 + $0x518] sm:$0xff] }
 0x55d   : >> { %8716 = vrot.lane.b32.xlu0 %v8715_v60, %s9289_s10  ;;  %v12150_v50 = vpop.f32.mrf.mxu1  ;;  %v7700_v60 = vld [vmem:[%s13722_s2 + $0x598] sm:$0xff]  ;;  %5088 = vmatpush.msra.mxu2 %v7684_v1 }
 0x55e   : >> { %5201 = vmatpush.msra.mxu3 %v7700_v60  ;;  %v12176_v48 = vld [vmem:[#allocation2 + $0x9a] sm:$0xff]  ;;  %v7699_v60 = vld [vmem:[%s13722_s2 + $0x590] sm:$0xff] }
 0x560   : >> { %5202 = vmatpush.msra.mxu3 %v7699_v60 }
 0x564   : >> { %8736 = vrot.lane.b32.xlu1 %v8735_v18, %s9289_s10 }
 0x565   : >> { %8731 = vrot.lane.b32.xlu0 %v8730_v28, %s9289_s10  ;;  %v12174_v18 = vpop.f32.mrf.mxu1  ;;  %v8795_v28 = vpack.i.bf16 %v12170_v40, %v12176_v48 }
 0x56c   : >> { %8751 = vrot.lane.b32.xlu1 %v8750_v51, %s9289_s10  ;;  %v12184_v51 = vld [vmem:[#allocation2 + $0xc1] sm:$0xff] }
 0x56d   : >> { %8746 = vrot.lane.b32.xlu0 %v8745_v17, %s9289_s10  ;;  %v12186_v17 = vld [vmem:[#allocation2 + $0xb1] sm:$0xff]  ;;  %v8810_v10 = vpack.i.bf16 %v12184_v51, %v12188_v56 }
 0x56e   : >> { %v8805_v52 = vpack.i.bf16 %v11912_v33, %v12186_v17  ;;  %v7683_v33 = vld [vmem:[%s13722_s2 + $0x510] sm:$0xff] }
 0x56f   : >> { %5089 = vmatpush.msra.mxu2 %v7683_v33  ;;  %v12239_v33 = vld [vmem:[#allocation2 + $0xfa] sm:$0xff] }
 0x570   : >> { %v8855_v60 = vpack.i.bf16 %v11823_v11, %v12239_v33  ;;  %v3964_v11 = vld [vmem:[#allocation2 + $0x128] sm:$0xff] }
 0x574   : >> { %8766 = vrot.lane.b32.xlu1 %v8765_v3, %s9289_s10  ;;  %v12195_v3 = vpop.f32.mrf.mxu1 }
 0x575   : >> { %8761 = vrot.lane.b32.xlu0 %v8760_v49, %s9289_s10  ;;  %v7730_v49 = vld [vmem:[%s13722_s2 + $0x688] sm:$0xff] }
 0x576   : >> { %5429 = vmatpush.msra.mxu1 %v7730_v49 }
 0x57c   : >> { %8781 = vrot.lane.b32.xlu1 %v8780_v53, %s9289_s10  ;;  %v12206_v53 = vld [vmem:[#allocation2 + $0xc9] sm:$0xff] }
 0x57d   : >> { %8776 = vrot.lane.b32.xlu0 %v8775_v39, %s9289_s10  ;;  %v12208_v39 = vld [vmem:[#allocation2 + $0xca] sm:$0xff] }
 0x57e   : >> { %v8825_v1 = vpack.i.bf16 %v12204_v58, %v12208_v39 }
 0x584   : >> { %8796 = vrot.lane.b32.xlu1 %v8795_v28, %s9289_s10  ;;  %v8820_v28 = vpack.i.bf16 %v11928_v0, %v12206_v53  ;;  %v7715_v0 = vld [vmem:[%s13722_s2 + $0x610] sm:$0xff] }
 0x585   : >> { %8791 = vrot.lane.b32.xlu0 %v8790_v7, %s9289_s10  ;;  %v12221_v7 = vpop.f32.mrf.mxu1  ;;  %5315 = vmatpush.msra.mxu0 %v7715_v0 }
 0x586   : >> { %13842 = vst [vmem:[#allocation39_spill] sm:$0xff] %v12221_v7  ;;  %v4062_v7 = vld [vmem:[#allocation2 + $0x158] sm:$0xff] }
 0x58c   : >> { %8811 = vrot.lane.b32.xlu1 %v8810_v10, %s9289_s10  ;;  %v12224_v10 = vld [vmem:[#allocation2 + $0xe1] sm:$0xff] }
 0x58d   : >> { %8806 = vrot.lane.b32.xlu0 %v8805_v52, %s9289_s10  ;;  %v8840_v52 = vpack.i.bf16 %v11795_v43, %v12226_v31  ;;  %v8835_v49 = vpack.i.bf16 %v11947_v5, %v12224_v10  ;;  %v8850_v43 = vpack.i.bf16 %v11995_v38, %v11821_v62  ;;  %v7682_v5 = vld [vmem:[%s13722_s2 + $0x508] sm:$0xff]  ;;  %v7681_v62 = vld [vmem:[%s13722_s2 + $0x500] sm:$0xff] }
 0x58e   : >> { %5090 = vmatpush.msra.mxu2 %v7682_v5  ;;  %v8865_v5 = vpack.i.bf16 %v12034_v16, %v11851_v57  ;;  %v4122_v16 = vld [vmem:[#allocation2 + $0x12a] sm:$0xff] }
 0x590   : >> { %5091 = vmatpush.msra.mxu2 %v7681_v62  ;;  %v7697_v62 = vld [vmem:[%s13722_s2 + $0x580] sm:$0xff] }
 0x594   : >> { %8826 = vrot.lane.b32.xlu1 %v8825_v1, %s9289_s10  ;;  %v12237_v1 = vpop.f32.mrf.mxu1 }
 0x595   : >> { %8821 = vrot.lane.b32.xlu0 %v8820_v28, %s9289_s10  ;;  %13843 = vst [vmem:[#allocation40_spill] sm:$0xff] %v12237_v1  ;;  %v7698_v28 = vld [vmem:[%s13722_s2 + $0x588] sm:$0xff]  ;;  %v12259_v1 = vld [vmem:[#allocation2 + $0x112] sm:$0xff] }
 0x596   : >> { %5203 = vmatpush.msra.mxu3 %v7698_v28  ;;  %v7714_v28 = vld [vmem:[%s13722_s2 + $0x608] sm:$0xff] }
 0x597   : >> { %5316 = vmatpush.msra.mxu0 %v7714_v28  ;;  %v3966_v28 = vld [vmem:[#allocation2 + $0x140] sm:$0xff] }
 0x598   : >> { %5204 = vmatpush.msra.mxu3 %v7697_v62 }
 0x59c   : >> { %8841 = vrot.lane.b32.xlu1 %v8840_v52, %s9289_s10  ;;  %v12256_v38 = vpop.f32.mrf.mxu1 }
 0x59d   : >> { %8836 = vrot.lane.b32.xlu0 %v8835_v49, %s9289_s10  ;;  %13844 = vst [vmem:[#allocation41_spill] sm:$0xff] %v12256_v38 }
 0x5a4   : >> { %8856 = vrot.lane.b32.xlu1 %v8855_v60, %s9289_s10  ;;  %v8870_v60 = vpack.i.bf16 %v11853_v32, %v12259_v1  ;;  %v7729_v32 = vld [vmem:[%s13722_s2 + $0x680] sm:$0xff] }
 0x5a5   : >> { %8851 = vrot.lane.b32.xlu0 %v8850_v43, %s9289_s10  ;;  %v2500_v43 = vld [vmem:[#allocation2 + $0x1a2] sm:$0xff]  ;;  %5430 = vmatpush.msra.mxu1 %v7729_v32 }
 0x5a6   : >> { %v8687_v52 = vpop.permute.xlu0 %8686  ;;  %7664 = vmatmul.msk.f32.gmra.mxu0 %vm191_vm0, %v2500_v43  ;;  %v8880_v43 = vpack.i.bf16 %v3964_v11, %v11972_v54  ;;  %v4124_v32 = vld [vmem:[#allocation2 + $0x142] sm:$0xff]  ;;  %v8895_v54 = vpack.i.bf16 %v3966_v28, %v12019_v41  ;;  %v4126_v41 = vld [vmem:[#allocation2 + $0x15a] sm:$0xff] }
 0x5a7   : >> { %v8688_v49 = vunpack.i.l.bf16 %v8687_v52 }
 0x5a9   : >> { %v4764_v0 = vsel %vm191_vm0, %v3964_v11, %v8688_v49  ;;  %v8689_v49 = vunpack.i.h.bf16 %v8687_v52  ;;  %v8885_v52 = vpack.i.bf16 %v11974_v61, %v4122_v16  ;;  %v8900_v61 = vpack.i.bf16 %v12021_v2, %v4124_v32  ;;  %v3796_v11 = vpop.f32.mrf.mxu0 }
 0x5aa   : >> { %5054 = vmatmul.f32.gmra.mxu1 %v4764_v0  ;;  %v7713_v0 = vld [vmem:[%s13722_s2 + $0x600] sm:$0xff] }
 0x5ab   : >> { %v4765_v57 = vsel %vm191_vm0, %v12014_v46, %v8689_v49  ;;  %5317 = vmatpush.msra.mxu0 %v7713_v0 }
 0x5ac   : >> { %8871 = vrot.lane.b32.xlu1 %v8870_v60, %s9289_s10  ;;  %v12283_v60 = vpop.f32.mrf.mxu1 }
 0x5ad   : >> { %8866 = vrot.lane.b32.xlu0 %v8865_v5, %s9289_s10  ;;  %13845 = vst [vmem:[#allocation42_spill] sm:$0xff] %v12283_v60  ;;  %v2372_v60 = vld [vmem:[#allocation2 + $0x189] sm:$0xff] }
 0x5b2   : >> { %5057 = vmatmul.f32.gmra.mxu1 %v4765_v57 }
 0x5b4   : >> { %8886 = vrot.lane.b32.xlu1 %v8885_v52, %s9289_s10  ;;  %v12293_v0 = vpop.f32.mrf.mxu1 }
 0x5b5   : >> { %8881 = vrot.lane.b32.xlu0 %v8880_v43, %s9289_s10 }
 0x5b6   : >> { %v8692_v46 = vpop.permute.xlu1 %8691 }
 0x5b7   : >> { %v8693_v5 = vunpack.i.l.bf16 %v8692_v46  ;;  %v8694_v52 = vunpack.i.h.bf16 %v8692_v46  ;;  %v8712_v46 = vpop.permute.xlu2 %8711 }
 0x5b9   : >> { %v4766_v49 = vsel %vm191_vm0, %v3966_v28, %v8693_v5  ;;  %v8915_v28 = vpack.i.bf16 %v12063_v29, %v4126_v41 }
 0x5ba   : >> { %5060 = vmatmul.f32.gmra.mxu1 %v4766_v49  ;;  %v3570_v57 = vpop.f32.mrf.mxu2  ;;  %v3683_v16 = vpop.f32.mrf.mxu3 }
 0x5bb   : >> { %v3571_v62 = vadd.f32 %v3570_v57, %v11552_v14  ;;  %v4767_v14 = vsel %vm191_vm0, %v12038_v25, %v8694_v52  ;;  %v8910_v57 = vpack.i.bf16 %v4062_v7, %v12040_v21  ;;  %v4128_v21 = vld [vmem:[#allocation2 + $0x172] sm:$0xff] }
 0x5bc   : >> { %8901 = vrot.lane.b32.xlu1 %v8900_v61, %s9289_s10  ;;  %v12304_v25 = vpop.f32.mrf.mxu1 }
 0x5bd   : >> { %8896 = vrot.lane.b32.xlu0 %v8895_v54, %s9289_s10  ;;  %v3684_v43 = vadd.f32 %v3683_v16, %v3571_v62  ;;  %v2436_v16 = vld [vmem:[#allocation2 + $0x1a0] sm:$0xff] }
 0x5be   : >> { %v4003_v62 = vld [vmem:[#allocation2 + $0x2] sm:$0xff] }
 0x5bf   : >> { %v8702_v5 = vpop.permute.xlu0 %8701  ;;  %v3797_v38 = vadd.f32 %v3796_v11, %v3684_v43  ;;  %v4064_v11 = vld [vmem:[#allocation2 + $0x170] sm:$0xff] }
 0x5c0   : >> { %v8704_v49 = vunpack.i.h.bf16 %v8702_v5  ;;  %v8703_v61 = vunpack.i.l.bf16 %v8702_v5 }
 0x5c1   : >> { %v3905_v2 = vmax.f32 %v3797_v38, 0.0  ;;  %v8713_v38 = vunpack.i.l.bf16 %v8712_v46 }
 0x5c2   : >> { %v3108_v32 = vsel %vm191_vm0, %v2372_v60, %v8704_v49  ;;  %5063 = vmatmul.f32.gmra.mxu1 %v4767_v14  ;;  %v4768_v52 = vsel %vm191_vm0, %v4062_v7, %v8703_v61  ;;  %v8925_v49 = vpack.i.bf16 %v4064_v11, %v12079_v22  ;;  %v4004_v7 = vld [vmem:[#allocation2 + $0xa] sm:$0xff]  ;;  %v4067_v61 = vld [vmem:[#allocation2 + $0x19] sm:$0xff] }
 0x5c3   : >> { %3572 = vmatmul.f32.gmra.mxu2 %v3108_v32  ;;  %3937 = vst.msk [vmem:[#allocation2 + $0x181] sm:$0xff] %vm191_vm0, %v3905_v2  ;;  %v4771_v43 = vsel %vm191_vm0, %v4003_v62, %v8713_v38  ;;  %v8714_v32 = vunpack.i.h.bf16 %v8712_v46  ;;  %v4131_v38 = vld [vmem:[#allocation2 + $0x30] sm:$0xff] }
 0x5c4   : >> { %8916 = vrot.lane.b32.xlu1 %v8915_v28, %s9289_s10 }
 0x5c5   : >> { %8911 = vrot.lane.b32.xlu0 %v8910_v57, %s9289_s10  ;;  %v4803_v62 = vsel %vm191_vm0, %v4067_v61, %v8714_v32  ;;  %v4005_v61 = vld [vmem:[#allocation2 + $0x1a] sm:$0xff] }
 0x5c6   : >> { %v8707_v60 = vpop.permute.xlu1 %8706 }
 0x5c7   : >> { %v8708_v54 = vunpack.i.l.bf16 %v8707_v60  ;;  %v8709_v14 = vunpack.i.h.bf16 %v8707_v60 }
 0x5c9   : >> { %v3140_v29 = vsel %vm191_vm0, %v2436_v16, %v8708_v54  ;;  %v12313_v54 = vpop.f32.mrf.mxu1  ;;  %v4769_v46 = vsel %vm191_vm0, %v12077_v24, %v8709_v14 }
 0x5ca   : >> { %3685 = vmatmul.f32.gmra.mxu3 %v3140_v29  ;;  %5066 = vmatmul.f32.gmra.mxu1 %v4768_v52  ;;  %v4191_v5 = vld [vmem:[#allocation2 + $0x181] sm:$0xff]  ;;  %v8727_v29 = vpop.permute.xlu2 %8726 }
 0x5cb   : >> { %5092 = vmatmul.f32.vlgmr.msra.gmra.mxu2 %v4771_v43  ;;  %v8930_v2 = vpack.i.bf16 %v4191_v5, %v4128_v21  ;;  %v8728_v21 = vunpack.i.l.bf16 %v8727_v29 }
 0x5cd   : >> { %8926 = vrot.lane.b32.xlu0 %v8925_v49, %s9289_s10  ;;  %8931 = vrot.lane.b32.xlu1 %v8930_v2, %s9289_s10  ;;  %v4068_v2 = vld [vmem:[#allocation2 + $0x21] sm:$0xff]  ;;  %v4773_v24 = vsel %vm191_vm0, %v4005_v61, %v8728_v21 }
 0x5ce   : >> { %v8722_v41 = vpop.permute.xlu1 %8721 }
 0x5cf   : >> { %v8724_v28 = vunpack.i.h.bf16 %v8722_v41  ;;  %v8717_v57 = vpop.permute.xlu0 %8716  ;;  %v8723_v52 = vunpack.i.l.bf16 %v8722_v41 }
 0x5d0   : >> { %v8719_v16 = vunpack.i.h.bf16 %v8717_v57  ;;  %v8718_v43 = vunpack.i.l.bf16 %v8717_v57  ;;  %v8729_v57 = vunpack.i.h.bf16 %v8727_v29 }
 0x5d1   : >> { %v4835_v22 = vsel %vm191_vm0, %v4131_v38, %v8724_v28  ;;  %v4804_v28 = vsel %vm191_vm0, %v4068_v2, %v8723_v52  ;;  %v4132_v38 = vld [vmem:[#allocation2 + $0x38] sm:$0xff] }
 0x5d2   : >> { %5069 = vmatmul.f32.gmra.mxu1 %v4769_v46  ;;  %v4772_v60 = vsel %vm191_vm0, %v4004_v7, %v8719_v16  ;;  %5205 = vmatmul.f32.vlgmr.msra.gmra.mxu3 %v4803_v62  ;;  %v4770_v32 = vsel %vm191_vm0, %v4064_v11, %v8718_v43  ;;  %v12323_v7 = vpop.f32.mrf.mxu1  ;;  %v4805_v11 = vsel %vm191_vm0, %v12071_v42, %v8729_v57  ;;  %v4195_v46 = vld [vmem:[#allocation2 + $0x32] sm:$0xff]  ;;  %v8742_v43 = vpop.permute.xlu2 %8741  ;;  %v4135_v57 = vld [vmem:[#allocation2 + $0x60] sm:$0xff] }
 0x5d3   : >> { %5095 = vmatmul.f32.gmra.mxu2 %v4772_v60  ;;  %5318 = vmatmul.f32.vlgmr.msra.gmra.mxu0 %v4835_v22  ;;  %v4133_v22 = vld [vmem:[#allocation2 + $0x48] sm:$0xff] }
 0x5d6   : >> { %v8737_v41 = vpop.permute.xlu1 %8736 }
 0x5d7   : >> { %v8732_v5 = vpop.permute.xlu0 %8731  ;;  %v8739_v16 = vunpack.i.h.bf16 %v8737_v41 }
 0x5d8   : >> { %v8733_v49 = vunpack.i.l.bf16 %v8732_v5  ;;  %v8734_v62 = vunpack.i.h.bf16 %v8732_v5  ;;  %v8738_v5 = vunpack.i.l.bf16 %v8737_v41 }
 0x5d9   : >> { %v4837_v52 = vsel %vm191_vm0, %v4133_v22, %v8739_v16  ;;  %v4197_v16 = vld [vmem:[#allocation2 + $0x4a] sm:$0xff] }
 0x5da   : >> { %5072 = vmatmul.f32.gmra.mxu1 %v4770_v32  ;;  %5208 = vmatmul.f32.gmra.mxu3 %v4804_v28  ;;  %v4836_v14 = vsel %vm191_vm0, %v4132_v38, %v8733_v49  ;;  %v4774_v60 = vsel %vm191_vm0, %v12073_v44, %v8734_v62  ;;  %v12331_v29 = vpop.f32.mrf.mxu1  ;;  %v8743_v49 = vunpack.i.l.bf16 %v8742_v43  ;;  %v4806_v42 = vsel %vm191_vm0, %v12097_v34, %v8738_v5  ;;  %v4134_v32 = vld [vmem:[#allocation2 + $0x50] sm:$0xff]  ;;  %v8757_v22 = vpop.permute.xlu2 %8756  ;;  %v4136_v5 = vld [vmem:[#allocation2 + $0x68] sm:$0xff] }
 0x5db   : >> { %5098 = vmatmul.f32.gmra.mxu2 %v4773_v24  ;;  %5321 = vmatmul.f32.gmra.mxu0 %v4836_v14  ;;  %v8744_v38 = vunpack.i.h.bf16 %v8742_v43 }
 0x5dc   : >> { %v4775_v44 = vsel %vm191_vm0, %v4195_v46, %v8743_v49 }
 0x5dd   : >> { %v4807_v34 = vsel %vm191_vm0, %v12095_v20, %v8744_v38  ;;  %v4199_v38 = vld [vmem:[#allocation2 + $0x62] sm:$0xff] }
 0x5de   : >> { %v8752_v28 = vpop.permute.xlu1 %8751 }
 0x5df   : >> { %v8747_v21 = vpop.permute.xlu0 %8746  ;;  %v8754_v24 = vunpack.i.h.bf16 %v8752_v28 }
 0x5e0   : >> { %v8748_v2 = vunpack.i.l.bf16 %v8747_v21  ;;  %v8749_v14 = vunpack.i.h.bf16 %v8747_v21 }
 0x5e2   : >> { %5211 = vmatmul.f32.gmra.mxu3 %v4805_v11  ;;  %7737 = vmatmul.msk.f32.vlgmr.msra.gmra.mxu1 %vm191_vm0, %v4195_v46  ;;  %v4838_v61 = vsel %vm191_vm0, %v4134_v32, %v8748_v2  ;;  %v12339_v41 = vpop.f32.mrf.mxu1  ;;  %v4776_v62 = vsel %vm191_vm0, %v12099_v23, %v8749_v14  ;;  %v4839_v11 = vsel %vm191_vm0, %v4135_v57, %v8754_v24 }
 0x5e3   : >> { %5101 = vmatmul.f32.gmra.mxu2 %v4774_v60  ;;  %5324 = vmatmul.f32.gmra.mxu0 %v4837_v52  ;;  %v8753_v60 = vunpack.i.l.bf16 %v8752_v28  ;;  %v8758_v52 = vunpack.i.l.bf16 %v8757_v22  ;;  %v4137_v28 = vld [vmem:[#allocation2 + $0x78] sm:$0xff] }
 0x5e5   : >> { %v4808_v20 = vsel %vm191_vm0, %v12114_v63, %v8753_v60 }
 0x5e6   : >> { %v8767_v2 = vpop.permute.xlu1 %8766 }
 0x5e7   : >> { %v8762_v46 = vpop.permute.xlu0 %8761  ;;  %v8769_v32 = vunpack.i.h.bf16 %v8767_v2 }
 0x5e8   : >> { %v8763_v43 = vunpack.i.l.bf16 %v8762_v46 }
 0x5e9   : >> { %v4841_v14 = vsel %vm191_vm0, %v4137_v28, %v8769_v32 }
 0x5ea   : >> { %5214 = vmatmul.f32.gmra.mxu3 %v4806_v42  ;;  %7738 = vmatmul.msk.f32.gmra.mxu1 %vm191_vm0, %v12099_v23  ;;  %v12347_v21 = vpop.f32.mrf.mxu1  ;;  %v4777_v23 = vsel %vm191_vm0, %v4197_v16, %v8758_v52  ;;  %v4840_v49 = vsel %vm191_vm0, %v4136_v5, %v8763_v43  ;;  %v8759_v42 = vunpack.i.h.bf16 %v8757_v22  ;;  %v4138_v22 = vld [vmem:[#allocation2 + $0x80] sm:$0xff] }
 0x5eb   : >> { %5104 = vmatmul.f32.gmra.mxu2 %v4775_v44  ;;  %5327 = vmatmul.f32.gmra.mxu0 %v4838_v61  ;;  %v8764_v44 = vunpack.i.h.bf16 %v8762_v46 }
 0x5ec   : >> { %v4809_v63 = vsel %vm191_vm0, %v12112_v35, %v8759_v42 }
 0x5ed   : >> { %v4778_v24 = vsel %vm191_vm0, %v12116_v13, %v8764_v44 }
 0x5ee   : >> { %v8782_v52 = vpop.permute.xlu1 %8781 }
 0x5ef   : >> { %v8777_v57 = vpop.permute.xlu0 %8776  ;;  %v8783_v28 = vunpack.i.l.bf16 %v8782_v52 }
 0x5f0   : >> { %v8779_v5 = vunpack.i.h.bf16 %v8777_v57 }
 0x5f2   : >> { %5217 = vmatmul.f32.gmra.mxu3 %v4807_v34  ;;  %7739 = vmatmul.msk.f32.gmra.mxu1 %vm191_vm0, %v4197_v16  ;;  %v12355_v61 = vpop.f32.mrf.mxu1  ;;  %v8772_v34 = vpop.permute.xlu2 %8771  ;;  %v8768_v16 = vunpack.i.l.bf16 %v8767_v2  ;;  %v4780_v2 = vsel %vm191_vm0, %v12139_v27, %v8779_v5 }
 0x5f3   : >> { %5107 = vmatmul.f32.gmra.mxu2 %v4776_v62  ;;  %5330 = vmatmul.f32.gmra.mxu0 %v4839_v11  ;;  %v8773_v62 = vunpack.i.l.bf16 %v8772_v34  ;;  %v8778_v11 = vunpack.i.l.bf16 %v8777_v57  ;;  %v8774_v43 = vunpack.i.h.bf16 %v8772_v34 }
 0x5f4   : >> { %v4810_v35 = vsel %vm191_vm0, %v12137_v19, %v8768_v16 }
 0x5f5   : >> { %v4779_v46 = vsel %vm191_vm0, %v4199_v38, %v8773_v62  ;;  %v4811_v19 = vsel %vm191_vm0, %v12135_v55, %v8774_v43  ;;  %v4812_v55 = vsel %vm191_vm0, %v12154_v37, %v8783_v28 }
 0x5f6   : >> { %v8797_v57 = vpop.permute.xlu1 %8796 }
 0x5f7   : >> { %v8792_v44 = vpop.permute.xlu0 %8791  ;;  %v8799_v62 = vunpack.i.h.bf16 %v8797_v57  ;;  %v8798_v5 = vunpack.i.l.bf16 %v8797_v57 }
 0x5fa   : >> { %5220 = vmatmul.f32.gmra.mxu3 %v4808_v20  ;;  %7740 = vmatmul.msk.f32.gmra.mxu1 %vm191_vm0, %v12116_v13  ;;  %v4842_v13 = vsel %vm191_vm0, %v4138_v22, %v8778_v11  ;;  %v12369_v60 = vpop.f32.mrf.mxu1  ;;  %v8784_v20 = vunpack.i.h.bf16 %v8782_v52  ;;  %v8787_v32 = vpop.permute.xlu2 %8786  ;;  %v8794_v11 = vunpack.i.h.bf16 %v8792_v44  ;;  %v4141_v22 = vld [vmem:[#allocation2 + $0xa8] sm:$0xff] }
 0x5fb   : >> { %5110 = vmatmul.f32.gmra.mxu2 %v4777_v23  ;;  %5333 = vmatmul.f32.gmra.mxu0 %v4840_v49  ;;  %v4139_v23 = vld [vmem:[#allocation2 + $0x90] sm:$0xff]  ;;  %v4201_v49 = vld [vmem:[#allocation2 + $0x7a] sm:$0xff]  ;;  %v8789_v16 = vunpack.i.h.bf16 %v8787_v32  ;;  %v4845_v52 = vsel %vm191_vm0, %v4141_v22, %v8799_v62 }
 0x5fc   : >> { %v4843_v42 = vsel %vm191_vm0, %v4139_v23, %v8784_v20 }
 0x5fd   : >> { %v4813_v37 = vsel %vm191_vm0, %v12152_v9, %v8789_v16  ;;  %v4814_v9 = vsel %vm191_vm0, %v12172_v6, %v8798_v5 }
 0x5ff   : >> { %v8807_v20 = vpop.permute.xlu0 %8806 }
 0x600   : >> { %v8808_v23 = vunpack.i.l.bf16 %v8807_v20 }
 0x602   : >> { %5223 = vmatmul.f32.gmra.mxu3 %v4809_v63  ;;  %7741 = vmatmul.msk.f32.gmra.mxu1 %vm191_vm0, %v4199_v38  ;;  %v12377_v63 = vpop.f32.mrf.mxu1  ;;  %v8788_v38 = vunpack.i.l.bf16 %v8787_v32  ;;  %v8802_v43 = vpop.permute.xlu2 %8801 }
 0x603   : >> { %5113 = vmatmul.f32.gmra.mxu2 %v4778_v24  ;;  %5336 = vmatmul.f32.gmra.mxu0 %v4841_v14  ;;  %v8793_v24 = vunpack.i.l.bf16 %v8792_v44  ;;  %v4140_v14 = vld [vmem:[#allocation2 + $0x98] sm:$0xff]  ;;  %v8812_v32 = vpop.permute.xlu1 %8811  ;;  %v8804_v44 = vunpack.i.h.bf16 %v8802_v43 }
 0x604   : >> { %v8814_v28 = vunpack.i.h.bf16 %v8812_v32  ;;  %v8813_v62 = vunpack.i.l.bf16 %v8812_v32 }
 0x605   : >> { %v4844_v34 = vsel %vm191_vm0, %v4140_v14, %v8793_v24  ;;  %v4815_v6 = vsel %vm191_vm0, %v12170_v40, %v8804_v44  ;;  %v4205_v14 = vld [vmem:[#allocation2 + $0xaa] sm:$0xff] }
 0x606   : >> { %v4816_v40 = vsel %vm191_vm0, %v12186_v17, %v8813_v62 }
 0x607   : >> { %v8822_v16 = vpop.permute.xlu0 %8821 }
 0x608   : >> { %v8824_v5 = vunpack.i.h.bf16 %v8822_v16 }
 0x60a   : >> { %5226 = vmatmul.f32.gmra.mxu3 %v4810_v35  ;;  %7742 = vmatmul.msk.f32.gmra.mxu1 %vm191_vm0, %v12139_v27  ;;  %v4781_v27 = vsel %vm191_vm0, %v4201_v49, %v8788_v38  ;;  %v12385_v35 = vpop.f32.mrf.mxu1  ;;  %v8809_v38 = vunpack.i.h.bf16 %v8807_v20  ;;  %v8817_v57 = vpop.permute.xlu2 %8816 }
 0x60b   : >> { %5116 = vmatmul.f32.gmra.mxu2 %v4779_v46  ;;  %5339 = vmatmul.f32.gmra.mxu0 %v4842_v13  ;;  %v4203_v46 = vld [vmem:[#allocation2 + $0x92] sm:$0xff]  ;;  %v4782_v13 = vsel %vm191_vm0, %v12156_v12, %v8794_v11  ;;  %v8818_v11 = vunpack.i.l.bf16 %v8817_v57 }
 0x60f   : >> { %v8837_v32 = vpop.permute.xlu0 %8836 }
 0x612   : >> { %5229 = vmatmul.f32.gmra.mxu3 %v4811_v19  ;;  %7743 = vmatmul.msk.f32.gmra.mxu1 %vm191_vm0, %v4201_v49  ;;  %v8803_v19 = vunpack.i.l.bf16 %v8802_v43  ;;  %v8819_v43 = vunpack.i.h.bf16 %v8817_v57 }
 0x613   : >> { %5119 = vmatmul.f32.gmra.mxu2 %v4780_v2  ;;  %5342 = vmatmul.f32.gmra.mxu0 %v4843_v42  ;;  %v4142_v2 = vld [vmem:[#allocation2 + $0xb0] sm:$0xff] }
 0x614   : >> { %v4846_v42 = vsel %vm191_vm0, %v4142_v2, %v8808_v23  ;;  %v4817_v17 = vsel %vm191_vm0, %v12184_v51, %v8819_v43  ;;  %v4145_v23 = vld [vmem:[#allocation2 + $0xd8] sm:$0xff]  ;;  %v4786_v2 = vsel %vm191_vm0, %v12188_v56, %v8824_v5 }
 0x615   : >> { %v4209_v5 = vld [vmem:[#allocation2 + $0xda] sm:$0xff] }
 0x61a   : >> { %5232 = vmatmul.f32.gmra.mxu3 %v4812_v55  ;;  %7744 = vmatmul.msk.f32.gmra.mxu1 %vm191_vm0, %v12156_v12  ;;  %v4783_v12 = vsel %vm191_vm0, %v4203_v46, %v8803_v19  ;;  %v4143_v55 = vld [vmem:[#allocation2 + $0xc0] sm:$0xff] }
 0x61b   : >> { %5122 = vmatmul.f32.gmra.mxu2 %v4781_v27  ;;  %5345 = vmatmul.f32.gmra.mxu0 %v4844_v34  ;;  %v4784_v27 = vsel %vm191_vm0, %v12176_v48, %v8809_v38  ;;  %v4847_v34 = vsel %vm191_vm0, %v4143_v55, %v8814_v28 }
 0x622   : >> { %5235 = vmatmul.f32.gmra.mxu3 %v4813_v37  ;;  %7745 = vmatmul.msk.f32.gmra.mxu1 %vm191_vm0, %v4203_v46  ;;  %v8823_v37 = vunpack.i.l.bf16 %v8822_v16  ;;  %v4144_v46 = vld [vmem:[#allocation2 + $0xc8] sm:$0xff] }
 0x623   : >> { %5125 = vmatmul.f32.gmra.mxu2 %v4782_v13  ;;  %5348 = vmatmul.f32.gmra.mxu0 %v4845_v52  ;;  %v8827_v52 = vpop.permute.xlu1 %8826  ;;  %v3799_v55 = vpop.f32.mrf.mxu0 }
 0x624   : >> { %v4848_v13 = vsel %vm191_vm0, %v4144_v46, %v8823_v37  ;;  %v8829_v20 = vunpack.i.h.bf16 %v8827_v52  ;;  %v8828_v44 = vunpack.i.l.bf16 %v8827_v52 }
 0x627   : >> { %v12393_v49 = vpop.f32.mrf.mxu1 }
 0x62a   : >> { %5238 = vmatmul.f32.gmra.mxu3 %v4814_v9  ;;  %7746 = vmatmul.msk.f32.gmra.mxu1 %vm191_vm0, %v12176_v48  ;;  %v4785_v48 = vsel %vm191_vm0, %v4205_v14, %v8818_v11  ;;  %v4207_v9 = vld [vmem:[#allocation2 + $0xc2] sm:$0xff] }
 0x62b   : >> { %5128 = vmatmul.f32.gmra.mxu2 %v4783_v12  ;;  %5351 = vmatmul.f32.gmra.mxu0 %v4846_v42  ;;  %v4849_v12 = vsel %vm191_vm0, %v4145_v23, %v8829_v20  ;;  %v8832_v42 = vpop.permute.xlu2 %8831  ;;  %v8842_v57 = vpop.permute.xlu1 %8841  ;;  %v4147_v20 = vld [vmem:[#allocation2 + $0xf0] sm:$0xff] }
 0x62c   : >> { %v8833_v38 = vunpack.i.l.bf16 %v8832_v42  ;;  %v8834_v62 = vunpack.i.h.bf16 %v8832_v42  ;;  %v8844_v37 = vunpack.i.h.bf16 %v8842_v57 }
 0x62e   : >> { %v4819_v43 = vsel %vm191_vm0, %v12204_v58, %v8834_v62 }
 0x62f   : >> { %v12401_v24 = vpop.f32.mrf.mxu1 }
 0x632   : >> { %5241 = vmatmul.f32.gmra.mxu3 %v4815_v6  ;;  %7747 = vmatmul.msk.f32.gmra.mxu1 %vm191_vm0, %v4205_v14  ;;  %v8838_v6 = vunpack.i.l.bf16 %v8837_v32  ;;  %v4818_v14 = vsel %vm191_vm0, %v12206_v53, %v8828_v44 }
 0x633   : >> { %5131 = vmatmul.f32.gmra.mxu2 %v4784_v27  ;;  %5354 = vmatmul.f32.gmra.mxu0 %v4847_v34  ;;  %v4787_v27 = vsel %vm191_vm0, %v4207_v9, %v8833_v38 }
 0x637   : >> { %v12409_v22 = vpop.f32.mrf.mxu1 }
 0x63a   : >> { %5244 = vmatmul.f32.gmra.mxu3 %v4816_v40  ;;  %7748 = vmatmul.msk.f32.gmra.mxu1 %vm191_vm0, %v12188_v56  ;;  %v4146_v56 = vld [vmem:[#allocation2 + $0xe0] sm:$0xff]  ;;  %v8839_v40 = vunpack.i.h.bf16 %v8837_v32 }
 0x63b   : >> { %5134 = vmatmul.f32.gmra.mxu2 %v4785_v48  ;;  %5357 = vmatmul.f32.gmra.mxu0 %v4848_v13  ;;  %v4850_v34 = vsel %vm191_vm0, %v4146_v56, %v8838_v6  ;;  %v8857_v56 = vpop.permute.xlu1 %8856 }
 0x63c   : >> { %v4788_v23 = vsel %vm191_vm0, %v12208_v39, %v8839_v40 }
 0x63f   : >> { %v12417_v19 = vpop.f32.mrf.mxu1 }
 0x642   : >> { %5247 = vmatmul.f32.gmra.mxu3 %v4817_v17  ;;  %7749 = vmatmul.msk.f32.gmra.mxu1 %vm191_vm0, %v4207_v9  ;;  %v8847_v9 = vpop.permute.xlu2 %8846 }
 0x643   : >> { %5137 = vmatmul.f32.gmra.mxu2 %v4786_v2  ;;  %5360 = vmatmul.f32.gmra.mxu0 %v4849_v12  ;;  %v8852_v2 = vpop.permute.xlu0 %8851  ;;  %v8843_v12 = vunpack.i.l.bf16 %v8842_v57  ;;  %v8848_v58 = vunpack.i.l.bf16 %v8847_v9 }
 0x644   : >> { %v8853_v32 = vunpack.i.l.bf16 %v8852_v2 }
 0x645   : >> { %v4820_v6 = vsel %vm191_vm0, %v12224_v10, %v8843_v12 }
 0x646   : >> { %v3573_v28 = vpop.f32.mrf.mxu2 }
 0x647   : >> { %v12425_v51 = vpop.f32.mrf.mxu1  ;;  %v3574_v16 = vadd.f32 %v3573_v28, %v11560_v4  ;;  %v4851_v4 = vsel %vm191_vm0, %v4147_v20, %v8844_v37  ;;  %v8854_v20 = vunpack.i.h.bf16 %v8852_v2  ;;  %v4211_v2 = vld [vmem:[#allocation2 + $0xf2] sm:$0xff] }
 0x64a   : >> { %5250 = vmatmul.f32.gmra.mxu3 %v4818_v14  ;;  %7750 = vmatmul.msk.f32.gmra.mxu1 %vm191_vm0, %v12208_v39  ;;  %v4193_v14 = vld [vmem:[#allocation2 + $0x199] sm:$0xff] }
 0x64b   : >> { %5140 = vmatmul.f32.gmra.mxu2 %v4787_v27  ;;  %5363 = vmatmul.f32.gmra.mxu0 %v4850_v34  ;;  %v4789_v34 = vsel %vm191_vm0, %v4209_v5, %v8848_v58  ;;  %v4149_v58 = vld [vmem:[#allocation2 + $0x108] sm:$0xff] }
 0x64d   : >> { %v3686_v11 = vpop.f32.mrf.mxu3 }
 0x64e   : >> { %v3687_v46 = vadd.f32 %v3686_v11, %v3574_v16  ;;  %v5093_v53 = vpop.f32.mrf.mxu2  ;;  %v12452_v16 = vld [vmem:[#allocation2 + $0x180] sm:$0xff] }
 0x64f   : >> { %v12434_v48 = vpop.f32.mrf.mxu1  ;;  %v5094_v39 = vadd.f32 %v5093_v53, %v11969_v36  ;;  %v8859_v53 = vunpack.i.h.bf16 %v8857_v56 }
 0x650   : >> { %v3800_v13 = vadd.f32 %v3799_v55, %v3687_v46  ;;  %v5319_v52 = vpop.f32.mrf.mxu0  ;;  %v4148_v55 = vld [vmem:[#allocation2 + $0xf8] sm:$0xff]  ;;  %v8849_v46 = vunpack.i.h.bf16 %v8847_v9 }
 0x651   : >> { %v4852_v57 = vsel %vm191_vm0, %v4148_v55, %v8853_v32  ;;  %v4085_v9 = vld [vmem:[#allocation2 + $0xf1] sm:$0xff] }
 0x652   : >> { %v3906_v17 = vmax.f32 %v3800_v13, 0.0  ;;  %5253 = vmatmul.f32.gmra.mxu3 %v4819_v43  ;;  %7751 = vmatmul.msk.f32.gmra.mxu1 %vm191_vm0, %v4209_v5  ;;  %v4821_v32 = vsel %vm191_vm0, %v4085_v9, %v8849_v46 }
 0x653   : >> { %5143 = vmatmul.f32.gmra.mxu2 %v4788_v23  ;;  %5366 = vmatmul.f32.gmra.mxu0 %v4851_v4 }
 0x654   : >> { %3938 = vst.msk [vmem:[#allocation2 + $0x189] sm:$0xff] %vm191_vm0, %v3906_v17 }
 0x655   : >> { %v5206_v42 = vpop.f32.mrf.mxu3 }
 0x656   : >> { %v5096_v44 = vpop.f32.mrf.mxu2  ;;  %v5207_v27 = vadd.f32 %v5206_v42, %v5094_v39  ;;  %v4853_v39 = vsel %vm191_vm0, %v4149_v58, %v8859_v53  ;;  %v13846_v58 = vld [vmem:[#allocation28_spill] sm:$0xff] }
 0x657   : >> { %v12443_v28 = vpop.f32.mrf.mxu1  ;;  %v5097_v4 = vadd.f32 %v5096_v44, %v12006_v8  ;;  %v8867_v8 = vpop.permute.xlu0 %8866 }
 0x658   : >> { %v5322_v38 = vpop.f32.mrf.mxu0  ;;  %v5320_v17 = vadd.f32 %v5319_v52, %v5207_v27  ;;  %v4790_v52 = vsel %vm191_vm0, %v12226_v31, %v8854_v20  ;;  %v8858_v27 = vunpack.i.l.bf16 %v8857_v56 }
 0x65a   : >> { %5256 = vmatmul.f32.gmra.mxu3 %v4820_v6  ;;  %7752 = vmatmul.msk.f32.gmra.mxu1 %vm191_vm0, %v12226_v31  ;;  %v8862_v6 = vpop.permute.xlu2 %8861  ;;  %v4086_v31 = vld [vmem:[#allocation2 + $0xf9] sm:$0xff] }
 0x65b   : >> { %5146 = vmatmul.f32.gmra.mxu2 %v4789_v34  ;;  %5369 = vmatmul.f32.gmra.mxu0 %v4852_v57  ;;  %v12454_v36 = vld [vmem:[#allocation2 + $0x18a] sm:$0xff]  ;;  %v12456_v62 = vld [vmem:[#allocation2 + $0x182] sm:$0xff]  ;;  %v8863_v44 = vunpack.i.l.bf16 %v8862_v6  ;;  %v8868_v57 = vunpack.i.l.bf16 %v8867_v8 }
 0x65c   : >> { %v12458_v10 = vld [vmem:[#allocation2 + $0x188] sm:$0xff]  ;;  %v8945_v11 = vpack.i.bf16 %v4193_v14, %v12454_v36  ;;  %v8935_v37 = vpack.i.bf16 %v12456_v62, %v12452_v16 }
 0x65d   : >> { %v12463_v40 = vld [vmem:[#allocation2 + $0x189] sm:$0xff]  ;;  %v5209_v13 = vpop.f32.mrf.mxu3  ;;  %v4791_v20 = vsel %vm191_vm0, %v4211_v2, %v8863_v44 }
 0x65e   : >> { %v8940_v43 = vpack.i.bf16 %v12458_v10, %v12463_v40  ;;  %v5099_v5 = vpop.f32.mrf.mxu2  ;;  %8946 = vrot.lane.b32.xlu1 %v8945_v11, %s9289_s10  ;;  %8936 = vrot.lane.b32.xlu2 %v8935_v37, %s9289_s10  ;;  %v5210_v55 = vadd.f32 %v5209_v13, %v5097_v4  ;;  %v4194_v4 = vld [vmem:[#allocation2 + $0x1a1] sm:$0xff] }
 0x65f   : >> { %v5432_v23 = vpop.f32.mrf.mxu1  ;;  %v5100_v53 = vadd.f32 %v5099_v5, %v12029_v59  ;;  %v8864_v59 = vunpack.i.h.bf16 %v8862_v6  ;;  %v13847_v6 = vld [vmem:[#allocation29_spill] sm:$0xff] }
 0x660   : >> { %8941 = vrot.lane.b32.xlu0 %v8940_v43, %s9289_s10  ;;  %v5325_v12 = vpop.f32.mrf.mxu0  ;;  %v5433_v42 = vadd.f32 %v5432_v23, %v5320_v17  ;;  %v5323_v37 = vadd.f32 %v5322_v38, %v5210_v55  ;;  %v4822_v17 = vsel %vm191_vm0, %v4086_v31, %v8858_v27  ;;  %v4150_v23 = vld [vmem:[#allocation2 + $0x110] sm:$0xff] }
 0x662   : >> { %v5528_v14 = vadd.f32 %v5433_v42, %v10355_v15  ;;  %5259 = vmatmul.f32.gmra.mxu3 %v4821_v32  ;;  %7753 = vmatmul.msk.f32.gmra.mxu1 %vm191_vm0, %v4211_v2  ;;  %v8872_v42 = vpop.permute.xlu1 %8871  ;;  %v4854_v32 = vsel %vm191_vm0, %v4150_v23, %v8868_v57  ;;  %v4151_v57 = vld [vmem:[#allocation2 + $0x120] sm:$0xff] }
 0x663   : >> { %5149 = vmatmul.f32.gmra.mxu2 %v4790_v52  ;;  %5372 = vmatmul.f32.gmra.mxu0 %v4853_v39  ;;  %v8874_v38 = vunpack.i.h.bf16 %v8872_v42  ;;  %v8869_v39 = vunpack.i.h.bf16 %v8867_v8 }
 0x664   : >> { %5560 = vst.msk [vmem:[#allocation3] sm:$0xff] %vm191_vm0, %v5528_v14 }
 0x665   : >> { %v5212_v34 = vpop.f32.mrf.mxu3  ;;  %v4792_v8 = vsel %vm191_vm0, %v12239_v33, %v8869_v39  ;;  %v4152_v39 = vld [vmem:[#allocation2 + $0x128] sm:$0xff] }
 0x666   : >> { %v5102_v11 = vpop.f32.mrf.mxu2  ;;  %v5213_v9 = vadd.f32 %v5212_v34, %v5100_v53  ;;  %4705 = vrot.lane.b32.xlu2 %v4194_v4, %s9289_s10  ;;  %v4087_v34 = vld [vmem:[#allocation2 + $0x109] sm:$0xff] }
 0x667   : >> { %v5435_v46 = vpop.f32.mrf.mxu1  ;;  %v5103_v52 = vadd.f32 %v5102_v11, %v12059_v26  ;;  %v4213_v53 = vld [vmem:[#allocation2 + $0x10a] sm:$0xff]  ;;  %v8882_v26 = vpop.permute.xlu0 %8881  ;;  %v8873_v11 = vunpack.i.l.bf16 %v8872_v42 }
 0x668   : >> { %v5328_v13 = vpop.f32.mrf.mxu0  ;;  %v5436_v43 = vadd.f32 %v5435_v46, %v5323_v37  ;;  %v5326_v55 = vadd.f32 %v5325_v12, %v5213_v9  ;;  %v4823_v37 = vsel %vm191_vm0, %v4087_v34, %v8864_v59  ;;  %v4855_v46 = vsel %vm191_vm0, %v4151_v57, %v8874_v38 }
 0x669   : >> { %v8883_v23 = vunpack.i.l.bf16 %v8882_v26  ;;  %v8884_v34 = vunpack.i.h.bf16 %v8882_v26 }
 0x66a   : >> { %v5529_v56 = vadd.f32 %v5436_v43, %v13846_v58  ;;  %5262 = vmatmul.f32.gmra.mxu3 %v4822_v17  ;;  %7754 = vmatmul.msk.f32.gmra.mxu1 %vm191_vm0, %v12239_v33  ;;  %v8877_v43 = vpop.permute.xlu2 %8876  ;;  %v4088_v33 = vld [vmem:[#allocation2 + $0x111] sm:$0xff] }
 0x66b   : >> { %5152 = vmatmul.f32.gmra.mxu2 %v4791_v20  ;;  %5375 = vmatmul.f32.gmra.mxu0 %v4854_v32  ;;  %v8878_v12 = vunpack.i.l.bf16 %v8877_v43  ;;  %v4856_v42 = vsel %vm191_vm0, %v4152_v39, %v8883_v23 }
 0x66c   : >> { %5561 = vst.msk [vmem:[#allocation3 + $0x8] sm:$0xff] %vm191_vm0, %v5529_v56 }
 0x66d   : >> { %v5215_v5 = vpop.f32.mrf.mxu3  ;;  %v4793_v38 = vsel %vm191_vm0, %v4213_v53, %v8878_v12  ;;  %v4026_v12 = vld [vmem:[#allocation2 + $0x112] sm:$0xff] }
 0x66e   : >> { %v5105_v2 = vpop.f32.mrf.mxu2  ;;  %v5216_v31 = vadd.f32 %v5215_v5, %v5103_v52  ;;  %v4824_v5 = vsel %vm191_vm0, %v4088_v33, %v8873_v11  ;;  %v13848_v52 = vld [vmem:[#allocation30_spill] sm:$0xff]  ;;  %v4794_v26 = vsel %vm191_vm0, %v4026_v12, %v8884_v34 }
 0x66f   : >> { %v5438_v14 = vpop.f32.mrf.mxu1  ;;  %v5106_v56 = vadd.f32 %v5105_v2, %v12075_v45  ;;  %v8879_v45 = vunpack.i.h.bf16 %v8877_v43 }
 0x670   : >> { %v5331_v44 = vpop.f32.mrf.mxu0  ;;  %v5439_v27 = vadd.f32 %v5438_v14, %v5326_v55  ;;  %v5329_v9 = vadd.f32 %v5328_v13, %v5216_v31  ;;  %v8887_v55 = vpop.permute.xlu1 %8886 }
 0x671   : >> { %v8889_v13 = vunpack.i.h.bf16 %v8887_v55 }
 0x672   : >> { %v5530_v20 = vadd.f32 %v5439_v27, %v13847_v6  ;;  %5265 = vmatmul.f32.gmra.mxu3 %v4823_v37  ;;  %7755 = vmatmul.msk.f32.gmra.mxu1 %vm191_vm0, %v4213_v53  ;;  %v8892_v23 = vpop.permute.xlu2 %8891 }
 0x673   : >> { %5155 = vmatmul.f32.gmra.mxu2 %v4792_v8  ;;  %5378 = vmatmul.f32.gmra.mxu0 %v4855_v46  ;;  %v4153_v8 = vld [vmem:[#allocation2 + $0x138] sm:$0xff] }
 0x674   : >> { %5562 = vst.msk [vmem:[#allocation3 + $0x10] sm:$0xff] %vm191_vm0, %v5530_v20  ;;  %v4089_v20 = vld [vmem:[#allocation2 + $0x121] sm:$0xff]  ;;  %v4857_v11 = vsel %vm191_vm0, %v4153_v8, %v8889_v13 }
 0x675   : >> { %v5218_v17 = vpop.f32.mrf.mxu3  ;;  %v4154_v13 = vld [vmem:[#allocation2 + $0x140] sm:$0xff] }
 0x676   : >> { %v5108_v4 = vpop.f32.mrf.mxu2  ;;  %v5219_v14 = vadd.f32 %v5218_v17, %v5106_v56  ;;  %v4215_v17 = vld [vmem:[#allocation2 + $0x122] sm:$0xff] }
 0x677   : >> { %v5441_v58 = vpop.f32.mrf.mxu1  ;;  %v5109_v53 = vadd.f32 %v5108_v4, %v12103_v47  ;;  %v8897_v47 = vpop.permute.xlu0 %8896  ;;  %v8888_v4 = vunpack.i.l.bf16 %v8887_v55 }
 0x678   : >> { %v5334_v32 = vpop.f32.mrf.mxu0  ;;  %v5442_v59 = vadd.f32 %v5441_v58, %v5329_v9  ;;  %v5332_v37 = vadd.f32 %v5331_v44, %v5219_v14  ;;  %v13849_v9 = vld [vmem:[#allocation31_spill] sm:$0xff]  ;;  %v8893_v44 = vunpack.i.l.bf16 %v8892_v23  ;;  %v8902_v34 = vpop.permute.xlu1 %8901 }
 0x67a   : >> { %v5531_v27 = vadd.f32 %v5442_v59, %v13848_v52  ;;  %5268 = vmatmul.f32.gmra.mxu3 %v4824_v5  ;;  %7756 = vmatmul.msk.f32.gmra.mxu1 %vm191_vm0, %v12259_v1  ;;  %v4825_v1 = vsel %vm191_vm0, %v4089_v20, %v8879_v45  ;;  %v8898_v59 = vunpack.i.l.bf16 %v8897_v47 }
 0x67b   : >> { %5158 = vmatmul.f32.gmra.mxu2 %v4793_v38  ;;  %5381 = vmatmul.f32.gmra.mxu0 %v4856_v42  ;;  %v4795_v42 = vsel %vm191_vm0, %v4215_v17, %v8893_v44  ;;  %v4217_v44 = vld [vmem:[#allocation2 + $0x13a] sm:$0xff] }
 0x67c   : >> { %5563 = vst.msk [vmem:[#allocation3 + $0x18] sm:$0xff] %vm191_vm0, %v5531_v27  ;;  %v4090_v27 = vld [vmem:[#allocation2 + $0x129] sm:$0xff] }
 0x67d   : >> { %v5221_v2 = vpop.f32.mrf.mxu3  ;;  %v4826_v45 = vsel %vm191_vm0, %v4090_v27, %v8888_v4  ;;  %v8907_v4 = vpop.permute.xlu2 %8906 }
 0x67e   : >> { %v5111_v57 = vpop.f32.mrf.mxu2  ;;  %v5222_v43 = vadd.f32 %v5221_v2, %v5109_v53  ;;  %v4216_v2 = vld [vmem:[#allocation2 + $0x12a] sm:$0xff]  ;;  %v4858_v53 = vsel %vm191_vm0, %v4154_v13, %v8898_v59 }
 0x67f   : >> { %v5444_v46 = vpop.f32.mrf.mxu1  ;;  %v5112_v39 = vadd.f32 %v5111_v57, %v12123_v30  ;;  %v8894_v30 = vunpack.i.h.bf16 %v8892_v23  ;;  %v13851_v23 = vld [vmem:[#allocation33_spill] sm:$0xff] }
 0x680   : >> { %v5337_v31 = vpop.f32.mrf.mxu0  ;;  %v5445_v6 = vadd.f32 %v5444_v46, %v5332_v37  ;;  %v5335_v38 = vadd.f32 %v5334_v32, %v5222_v43  ;;  %v13850_v46 = vld [vmem:[#allocation32_spill] sm:$0xff]  ;;  %v8904_v32 = vunpack.i.h.bf16 %v8902_v34  ;;  %v4091_v43 = vld [vmem:[#allocation2 + $0x139] sm:$0xff] }
 0x682   : >> { %v5532_v58 = vadd.f32 %v5445_v6, %v13849_v9  ;;  %5271 = vmatmul.f32.gmra.mxu3 %v4825_v1  ;;  %7757 = vmatmul.msk.f32.gmra.mxu1 %vm191_vm0, %v4215_v17  ;;  %v8899_v6 = vunpack.i.h.bf16 %v8897_v47  ;;  %v4155_v9 = vld [vmem:[#allocation2 + $0x150] sm:$0xff] }
 0x683   : >> { %5161 = vmatmul.f32.gmra.mxu2 %v4794_v26  ;;  %5384 = vmatmul.f32.gmra.mxu0 %v4857_v11  ;;  %v4859_v26 = vsel %vm191_vm0, %v4155_v9, %v8904_v32 }
 0x684   : >> { %5564 = vst.msk [vmem:[#allocation3 + $0x20] sm:$0xff] %vm191_vm0, %v5532_v58  ;;  %v4827_v58 = vsel %vm191_vm0, %v4091_v43, %v8894_v30  ;;  %v4796_v47 = vsel %vm191_vm0, %v4216_v2, %v8899_v6  ;;  %v8917_v30 = vpop.permute.xlu1 %8916 }
 0x685   : >> { %v5224_v56 = vpop.f32.mrf.mxu3 }
 0x686   : >> { %v5114_v33 = vpop.f32.mrf.mxu2  ;;  %v5225_v37 = vadd.f32 %v5224_v56, %v5112_v39 }
 0x687   : >> { %v5447_v5 = vpop.f32.mrf.mxu1  ;;  %v5115_v1 = vadd.f32 %v5114_v33, %v12150_v50  ;;  %v8908_v50 = vunpack.i.l.bf16 %v8907_v4  ;;  %v8903_v33 = vunpack.i.l.bf16 %v8902_v34 }
 0x688   : >> { %v5340_v14 = vpop.f32.mrf.mxu0  ;;  %v5448_v52 = vadd.f32 %v5447_v5, %v5335_v38  ;;  %v5338_v8 = vadd.f32 %v5337_v31, %v5225_v37  ;;  %v8912_v31 = vpop.permute.xlu0 %8911 }
 0x689   : >> { %v8913_v5 = vunpack.i.l.bf16 %v8912_v31  ;;  %v4797_v37 = vsel %vm191_vm0, %v4217_v44, %v8908_v50 }
 0x68a   : >> { %v5533_v55 = vadd.f32 %v5448_v52, %v13850_v46  ;;  %5274 = vmatmul.f32.gmra.mxu3 %v4826_v45  ;;  %7758 = vmatmul.msk.f32.gmra.mxu1 %vm191_vm0, %v4216_v2  ;;  %v4092_v2 = vld [vmem:[#allocation2 + $0x141] sm:$0xff] }
 0x68b   : >> { %5164 = vmatmul.f32.gmra.mxu2 %v4795_v42  ;;  %5387 = vmatmul.f32.gmra.mxu0 %v4858_v53  ;;  %v4828_v46 = vsel %vm191_vm0, %v4092_v2, %v8903_v33  ;;  %v4218_v53 = vld [vmem:[#allocation2 + $0x142] sm:$0xff] }
 0x68c   : >> { %5565 = vst.msk [vmem:[#allocation3 + $0x28] sm:$0xff] %vm191_vm0, %v5533_v55  ;;  %v4156_v55 = vld [vmem:[#allocation2 + $0x158] sm:$0xff] }
 0x68d   : >> { %v5227_v57 = vpop.f32.mrf.mxu3  ;;  %v4860_v6 = vsel %vm191_vm0, %v4156_v55, %v8913_v5  ;;  %v4094_v55 = vld [vmem:[#allocation2 + $0x159] sm:$0xff] }
 0x68e   : >> { %v5117_v20 = vpop.f32.mrf.mxu2  ;;  %v5228_v56 = vadd.f32 %v5227_v57, %v5115_v1  ;;  %v13852_v57 = vld [vmem:[#allocation34_spill] sm:$0xff] }
 0x68f   : >> { %v5450_v12 = vpop.f32.mrf.mxu1  ;;  %v5118_v42 = vadd.f32 %v5117_v20, %v12174_v18  ;;  %v8909_v18 = vunpack.i.h.bf16 %v8907_v4  ;;  %v13853_v4 = vld [vmem:[#allocation35_spill] sm:$0xff] }
 0x690   : >> { %v5343_v11 = vpop.f32.mrf.mxu0  ;;  %v5451_v17 = vadd.f32 %v5450_v12, %v5338_v8  ;;  %v5341_v52 = vadd.f32 %v5340_v14, %v5228_v56  ;;  %v8919_v14 = vunpack.i.h.bf16 %v8917_v30  ;;  %v8914_v8 = vunpack.i.h.bf16 %v8912_v31 }
 0x692   : >> { %v5534_v59 = vadd.f32 %v5451_v17, %v13851_v23  ;;  %5277 = vmatmul.f32.gmra.mxu3 %v4827_v58  ;;  %7759 = vmatmul.msk.f32.gmra.mxu1 %vm191_vm0, %v4217_v44  ;;  %v4157_v44 = vld [vmem:[#allocation2 + $0x168] sm:$0xff]  ;;  %v4798_v31 = vsel %vm191_vm0, %v4218_v53, %v8914_v8 }
 0x693   : >> { %5167 = vmatmul.f32.gmra.mxu2 %v4796_v47  ;;  %5390 = vmatmul.f32.gmra.mxu0 %v4859_v26  ;;  %v4093_v26 = vld [vmem:[#allocation2 + $0x151] sm:$0xff]  ;;  %v4861_v23 = vsel %vm191_vm0, %v4157_v44, %v8919_v14  ;;  %v8922_v47 = vpop.permute.xlu2 %8921 }
 0x694   : >> { %5566 = vst.msk [vmem:[#allocation3 + $0x30] sm:$0xff] %vm191_vm0, %v5534_v59  ;;  %v4829_v56 = vsel %vm191_vm0, %v4093_v26, %v8909_v18  ;;  %v4219_v59 = vld [vmem:[#allocation2 + $0x152] sm:$0xff] }
 0x695   : >> { %v5230_v38 = vpop.f32.mrf.mxu3  ;;  %v13855_v18 = vld [vmem:[#allocation36_spill] sm:$0xff] }
 0x696   : >> { %v5120_v39 = vpop.f32.mrf.mxu2  ;;  %v5231_v32 = vadd.f32 %v5230_v38, %v5118_v42  ;;  %v8918_v38 = vunpack.i.l.bf16 %v8917_v30  ;;  %v13856_v26 = vld [vmem:[#allocation40_spill] sm:$0xff] }
 0x697   : >> { %v5453_v27 = vpop.f32.mrf.mxu1  ;;  %v5121_v43 = vadd.f32 %v5120_v39, %v12195_v3  ;;  %v8923_v3 = vunpack.i.l.bf16 %v8922_v47 }
 0x698   : >> { %v5346_v45 = vpop.f32.mrf.mxu0  ;;  %v5454_v13 = vadd.f32 %v5453_v27, %v5341_v52  ;;  %v5344_v1 = vadd.f32 %v5343_v11, %v5231_v32  ;;  %v8927_v11 = vpop.permute.xlu0 %8926  ;;  %v4830_v32 = vsel %vm191_vm0, %v4094_v55, %v8918_v38  ;;  %v4096_v55 = vld [vmem:[#allocation2 + $0x171] sm:$0xff] }
 0x699   : >> { %v8928_v39 = vunpack.i.l.bf16 %v8927_v11  ;;  %v8929_v8 = vunpack.i.h.bf16 %v8927_v11 }
 0x69a   : >> { %v5535_v34 = vadd.f32 %v5454_v13, %v13852_v57  ;;  %5280 = vmatmul.f32.gmra.mxu3 %v4828_v46  ;;  %7760 = vmatmul.msk.f32.gmra.mxu1 %vm191_vm0, %v4218_v53  ;;  %v13854_v13 = vld [vmem:[#allocation39_spill] sm:$0xff]  ;;  %v4799_v53 = vsel %vm191_vm0, %v4219_v59, %v8923_v3  ;;  %v4158_v57 = vld [vmem:[#allocation2 + $0x170] sm:$0xff]  ;;  %v13857_v3 = vld [vmem:[#allocation37_spill] sm:$0xff] }
 0x69b   : >> { %5170 = vmatmul.f32.gmra.mxu2 %v4797_v37  ;;  %5393 = vmatmul.f32.gmra.mxu0 %v4860_v6  ;;  %v4862_v30 = vsel %vm191_vm0, %v4158_v57, %v8928_v39 }
 0x69c   : >> { %5567 = vst.msk [vmem:[#allocation3 + $0x38] sm:$0xff] %vm191_vm0, %v5535_v34  ;;  %v4220_v34 = vld [vmem:[#allocation2 + $0x15a] sm:$0xff] }
 0x69d   : >> { %v5233_v20 = vpop.f32.mrf.mxu3 }
 0x69e   : >> { %v5123_v12 = vpop.f32.mrf.mxu2  ;;  %v5234_v50 = vadd.f32 %v5233_v20, %v5121_v43  ;;  %v8924_v20 = vunpack.i.h.bf16 %v8922_v47 }
 0x69f   : >> { %v5456_v17 = vpop.f32.mrf.mxu1  ;;  %v5124_v2 = vadd.f32 %v5123_v12, %v13854_v13 }
 0x6a0   : >> { %v5349_v9 = vpop.f32.mrf.mxu0  ;;  %v5457_v58 = vadd.f32 %v5456_v17, %v5344_v1  ;;  %v5347_v27 = vadd.f32 %v5346_v45, %v5234_v50  ;;  %v8932_v45 = vpop.permute.xlu1 %8931  ;;  %v4800_v50 = vsel %vm191_vm0, %v4220_v34, %v8929_v8  ;;  %v13860_v8 = vld [vmem:[#allocation42_spill] sm:$0xff] }
 0x6a1   : >> { %v8934_v1 = vunpack.i.h.bf16 %v8932_v45 }
 0x6a2   : >> { %v5536_v33 = vadd.f32 %v5457_v58, %v13853_v4  ;;  %5283 = vmatmul.f32.gmra.mxu3 %v4829_v56  ;;  %7761 = vmatmul.msk.f32.gmra.mxu1 %vm191_vm0, %v4219_v59  ;;  %v4095_v59 = vld [vmem:[#allocation2 + $0x169] sm:$0xff] }
 0x6a3   : >> { %5173 = vmatmul.f32.gmra.mxu2 %v4798_v31  ;;  %5396 = vmatmul.f32.gmra.mxu0 %v4861_v23  ;;  %v4831_v4 = vsel %vm191_vm0, %v4095_v59, %v8924_v20  ;;  %v4863_v47 = vsel %vm191_vm0, %v12452_v16, %v8934_v1 }
 0x6a4   : >> { %5568 = vst.msk [vmem:[#allocation3 + $0x40] sm:$0xff] %vm191_vm0, %v5536_v33  ;;  %v4221_v33 = vld [vmem:[#allocation2 + $0x16a] sm:$0xff] }
 0x6a5   : >> { %v5236_v5 = vpop.f32.mrf.mxu3 }
 0x6a6   : >> { %v5126_v52 = vpop.f32.mrf.mxu2  ;;  %v5237_v6 = vadd.f32 %v5236_v5, %v5124_v2 }
 0x6a7   : >> { %v5459_v42 = vpop.f32.mrf.mxu1  ;;  %v5127_v44 = vadd.f32 %v5126_v52, %v13856_v26 }
 0x6a8   : >> { %v5352_v37 = vpop.f32.mrf.mxu0  ;;  %v5460_v46 = vadd.f32 %v5459_v42, %v5347_v27  ;;  %v5350_v43 = vadd.f32 %v5349_v9, %v5237_v6  ;;  %v8933_v9 = vunpack.i.l.bf16 %v8932_v45  ;;  %v13858_v27 = vld [vmem:[#allocation41_spill] sm:$0xff] }
 0x6aa   : >> { %v5537_v14 = vadd.f32 %v5460_v46, %v13855_v18  ;;  %5286 = vmatmul.f32.gmra.mxu3 %v4830_v32  ;;  %7762 = vmatmul.msk.f32.gmra.mxu1 %vm191_vm0, %v4220_v34  ;;  %v4832_v16 = vsel %vm191_vm0, %v4096_v55, %v8933_v9  ;;  %v4222_v32 = vld [vmem:[#allocation2 + $0x172] sm:$0xff]  ;;  %v13859_v34 = vld [vmem:[#allocation38_spill] sm:$0xff] }
 0x6ab   : >> { %5176 = vmatmul.f32.gmra.mxu2 %v4799_v53  ;;  %5399 = vmatmul.f32.gmra.mxu0 %v4862_v30 }
 0x6ac   : >> { %5569 = vst.msk [vmem:[#allocation3 + $0x48] sm:$0xff] %vm191_vm0, %v5537_v14 }
 0x6ad   : >> { %v5239_v12 = vpop.f32.mrf.mxu3 }
 0x6ae   : >> { %v5129_v17 = vpop.f32.mrf.mxu2  ;;  %v5240_v31 = vadd.f32 %v5239_v12, %v5127_v44  ;;  %v13861_v44 = vld [vmem:[#allocation7_spill] sm:$0xff] }
 0x6af   : >> { %v5462_v58 = vpop.f32.mrf.mxu1  ;;  %v5130_v42 = vadd.f32 %v5129_v17, %v13858_v27 }
 0x6b0   : >> { %v5355_v56 = vpop.f32.mrf.mxu0  ;;  %v5463_v23 = vadd.f32 %v5462_v58, %v5350_v43  ;;  %v5353_v39 = vadd.f32 %v5352_v37, %v5240_v31  ;;  %v4097_v43 = vld [vmem:[#allocation2 + $0x181] sm:$0xff] }
 0x6b2   : >> { %v5538_v38 = vadd.f32 %v5463_v23, %v13857_v3  ;;  %5289 = vmatmul.f32.gmra.mxu3 %v4831_v4  ;;  %7763 = vmatmul.msk.f32.gmra.mxu1 %vm191_vm0, %v4221_v33 }
 0x6b3   : >> { %5179 = vmatmul.f32.gmra.mxu2 %v4800_v50  ;;  %5402 = vmatmul.f32.gmra.mxu0 %v4863_v47  ;;  %v13862_v47 = vld [vmem:[#allocation18_spill] sm:$0xff] }
 0x6b4   : >> { %5570 = vst.msk [vmem:[#allocation3 + $0x50] sm:$0xff] %vm191_vm0, %v5538_v38 }
 0x6b5   : >> { %v5242_v11 = vpop.f32.mrf.mxu3 }
 0x6b6   : >> { %v5132_v5 = vpop.f32.mrf.mxu2  ;;  %v5243_v57 = vadd.f32 %v5242_v11, %v5130_v42 }
 0x6b7   : >> { %v5465_v52 = vpop.f32.mrf.mxu1  ;;  %v5133_v12 = vadd.f32 %v5132_v5, %v13860_v8 }
 0x6b8   : >> { %v5358_v13 = vpop.f32.mrf.mxu0  ;;  %v5466_v2 = vadd.f32 %v5465_v52, %v5353_v39  ;;  %v8937_v46 = vpop.permute.xlu2 %8936  ;;  %v5356_v45 = vadd.f32 %v5355_v56, %v5243_v57  ;;  %v4225_v52 = vld [vmem:[#allocation2 + $0x19a] sm:$0xff] }
 0x6b9   : >> { %v8938_v53 = vunpack.i.l.bf16 %v8937_v46  ;;  %v8939_v37 = vunpack.i.h.bf16 %v8937_v46 }
 0x6ba   : >> { %v5539_v6 = vadd.f32 %v5466_v2, %v13859_v34  ;;  %5292 = vmatmul.f32.gmra.mxu3 %v4832_v16  ;;  %7764 = vmatmul.msk.f32.gmra.mxu1 %vm191_vm0, %v4222_v32 }
 0x6bb   : >> { %v4801_v18 = vsel %vm191_vm0, %v4221_v33, %v8938_v53  ;;  %v4833_v58 = vsel %vm191_vm0, %v4097_v43, %v8939_v37  ;;  %v13863_v53 = vld [vmem:[#allocation25_spill] sm:$0xff]  ;;  %v13864_v43 = vld [vmem:[#allocation8_spill] sm:$0xff] }
 0x6bc   : >> { %5571 = vst.msk [vmem:[#allocation3 + $0x58] sm:$0xff] %vm191_vm0, %v5539_v6  ;;  %5182 = vmatmul.f32.gmra.mxu2 %v4801_v18 }
 0x6bd   : >> { %v5245_v14 = vpop.f32.mrf.mxu3 }
 0x6be   : >> { %v5135_v30 = vpop.f32.mrf.mxu2  ;;  %v5246_v26 = vadd.f32 %v5245_v14, %v5133_v12 }
 0x6bf   : >> { %v5468_v20 = vpop.f32.mrf.mxu1  ;;  %v5136_v33 = vadd.f32 %v5135_v30, %v12293_v0 }
 0x6c0   : >> { %v5361_v1 = vpop.f32.mrf.mxu0  ;;  %v5469_v17 = vadd.f32 %v5468_v20, %v5356_v45  ;;  %v5359_v56 = vadd.f32 %v5358_v13, %v5246_v26  ;;  %v4226_v45 = vld [vmem:[#allocation2 + $0x1a2] sm:$0xff] }
 0x6c2   : >> { %v5540_v23 = vadd.f32 %v5469_v17, %v13861_v44  ;;  %5295 = vmatmul.f32.gmra.mxu3 %v4833_v58  ;;  %7765 = vmatmul.msk.f32.gmra.mxu1 %vm191_vm0, %v12456_v62 }
 0x6c4   : >> { %5572 = vst.msk [vmem:[#allocation3 + $0x60] sm:$0xff] %vm191_vm0, %v5540_v23 }
 0x6c5   : >> { %v5248_v59 = vpop.f32.mrf.mxu3 }
 0x6c6   : >> { %v5138_v50 = vpop.f32.mrf.mxu2  ;;  %v5249_v38 = vadd.f32 %v5248_v59, %v5136_v33  ;;  %v4162_v59 = vld [vmem:[#allocation2 + $0x1a0] sm:$0xff] }
 0x6c7   : >> { %v5471_v4 = vpop.f32.mrf.mxu1  ;;  %v5139_v27 = vadd.f32 %v5138_v50, %v12304_v25 }
 0x6c8   : >> { %v5364_v31 = vpop.f32.mrf.mxu0  ;;  %v5472_v3 = vadd.f32 %v5471_v4, %v5359_v56  ;;  %v5362_v5 = vadd.f32 %v5361_v1, %v5249_v38  ;;  %v4161_v1 = vld [vmem:[#allocation2 + $0x198] sm:$0xff] }
 0x6ca   : >> { %v5541_v9 = vadd.f32 %v5472_v3, %v13862_v47  ;;  %7766 = vmatmul.msk.f32.gmra.mxu1 %vm191_vm0, %v12454_v36 }
 0x6cc   : >> { %5573 = vst.msk [vmem:[#allocation3 + $0x68] sm:$0xff] %vm191_vm0, %v5541_v9 }
 0x6cd   : >> { %v5251_v11 = vpop.f32.mrf.mxu3 }
 0x6ce   : >> { %v5141_v62 = vpop.f32.mrf.mxu2  ;;  %v5252_v55 = vadd.f32 %v5251_v11, %v5139_v27 }
 0x6cf   : >> { %v5474_v39 = vpop.f32.mrf.mxu1  ;;  %v5142_v20 = vadd.f32 %v5141_v62, %v12313_v54  ;;  %v4706_v54 = vpop.permute.xlu2 %4705 }
 0x6d0   : >> { %v5367_v42 = vpop.f32.mrf.mxu0  ;;  %v5475_v13 = vadd.f32 %v5474_v39, %v5362_v5  ;;  %v8947_v0 = vpop.permute.xlu1 %8946  ;;  %v5365_v14 = vadd.f32 %v5364_v31, %v5252_v55  ;;  %v13865_v31 = vld [vmem:[#allocation21_spill] sm:$0xff]  ;;  %v4866_v38 = vsel %vm191_vm0, %v4162_v59, %v4706_v54 }
 0x6d1   : >> { %v8948_v2 = vunpack.i.l.bf16 %v8947_v0  ;;  %v8949_v8 = vunpack.i.h.bf16 %v8947_v0 }
 0x6d2   : >> { %v8942_v46 = vpop.permute.xlu0 %8941  ;;  %v5542_v16 = vadd.f32 %v5475_v13, %v13863_v53  ;;  %7767 = vmatmul.msk.f32.gmra.mxu1 %vm191_vm0, %v4225_v52 }
 0x6d3   : >> { %v8944_v57 = vunpack.i.h.bf16 %v8942_v46  ;;  %v8943_v34 = vunpack.i.l.bf16 %v8942_v46  ;;  %v4834_v36 = vsel %vm191_vm0, %v12463_v40, %v8948_v2 }
 0x6d4   : >> { %5574 = vst.msk [vmem:[#allocation3 + $0x70] sm:$0xff] %vm191_vm0, %v5542_v16  ;;  %5298 = vmatmul.f32.gmra.mxu3 %v4834_v36 }
 0x6d5   : >> { %v4802_v6 = vsel %vm191_vm0, %v4222_v32, %v8944_v57  ;;  %v4864_v25 = vsel %vm191_vm0, %v12458_v10, %v8943_v34  ;;  %v5254_v18 = vpop.f32.mrf.mxu3  ;;  %v4865_v10 = vsel %vm191_vm0, %v4161_v1, %v8949_v8  ;;  %v13867_v34 = vld [vmem:[#allocation24_spill] sm:$0xff] }
 0x6d6   : >> { %5185 = vmatmul.f32.gmra.mxu2 %v4802_v6  ;;  %5405 = vmatmul.f32.gmra.mxu0 %v4864_v25  ;;  %v5144_v37 = vpop.f32.mrf.mxu2  ;;  %v5255_v17 = vadd.f32 %v5254_v18, %v5142_v20  ;;  %v13868_v20 = vld [vmem:[#allocation27_spill] sm:$0xff] }
 0x6d7   : >> { %v5477_v30 = vpop.f32.mrf.mxu1  ;;  %v5145_v50 = vadd.f32 %v5144_v37, %v12323_v7  ;;  %v13866_v7 = vld [vmem:[#allocation12_spill] sm:$0xff] }
 0x6d8   : >> { %v5370_v12 = vpop.f32.mrf.mxu0  ;;  %v5478_v40 = vadd.f32 %v5477_v30, %v5365_v14  ;;  %v5368_v44 = vadd.f32 %v5367_v42, %v5255_v17 }
 0x6da   : >> { %v5543_v32 = vadd.f32 %v5478_v40, %v13864_v43  ;;  %7768 = vmatmul.msk.f32.gmra.mxu1 %vm191_vm0, %v4226_v45 }
 0x6dc   : >> { %5575 = vst.msk [vmem:[#allocation3 + $0x78] sm:$0xff] %vm191_vm0, %v5543_v32 }
 0x6dd   : >> { %v5257_v58 = vpop.f32.mrf.mxu3 }
 0x6de   : >> { %5408 = vmatmul.f32.gmra.mxu0 %v4865_v10  ;;  %v5147_v26 = vpop.f32.mrf.mxu2  ;;  %v5258_v33 = vadd.f32 %v5257_v58, %v5145_v50  ;;  %v13869_v58 = vld [vmem:[#allocation5_spill] sm:$0xff] }
 0x6df   : >> { %v5480_v23 = vpop.f32.mrf.mxu1  ;;  %v5148_v5 = vadd.f32 %v5147_v26, %v12331_v29 }
 0x6e0   : >> { %v5373_v56 = vpop.f32.mrf.mxu0  ;;  %v5481_v4 = vadd.f32 %v5480_v23, %v5368_v44  ;;  %v5371_v11 = vadd.f32 %v5370_v12, %v5258_v33 }
 0x6e2   : >> { %v5544_v3 = vadd.f32 %v5481_v4, %v13865_v31  ;;  %v13870_v4 = vld [vmem:[#allocation9_spill] sm:$0xff] }
 0x6e4   : >> { %5576 = vst.msk [vmem:[#allocation3 + $0x80] sm:$0xff] %vm191_vm0, %v5544_v3 }
 0x6e5   : >> { %v5260_v47 = vpop.f32.mrf.mxu3 }
 0x6e6   : >> { %5411 = vmatmul.f32.gmra.mxu0 %v4866_v38  ;;  %v5150_v9 = vpop.f32.mrf.mxu2  ;;  %v5261_v27 = vadd.f32 %v5260_v47, %v5148_v5  ;;  %v13871_v5 = vld [vmem:[#allocation11_spill] sm:$0xff] }
 0x6e7   : >> { %v5483_v62 = vpop.f32.mrf.mxu1  ;;  %v5151_v55 = vadd.f32 %v5150_v9, %v12339_v41 }
 0x6e8   : >> { %v5376_v39 = vpop.f32.mrf.mxu0  ;;  %v5484_v52 = vadd.f32 %v5483_v62, %v5371_v11  ;;  %v5374_v2 = vadd.f32 %v5373_v56, %v5261_v27 }
 0x6ea   : >> { %v5545_v42 = vadd.f32 %v5484_v52, %v13866_v7 }
 0x6ec   : >> { %5577 = vst.msk [vmem:[#allocation3 + $0x88] sm:$0xff] %vm191_vm0, %v5545_v42 }
 0x6ed   : >> { %v5263_v13 = vpop.f32.mrf.mxu3 }
 0x6ee   : >> { %v5153_v0 = vpop.f32.mrf.mxu2  ;;  %v5264_v57 = vadd.f32 %v5263_v13, %v5151_v55 }
 0x6ef   : >> { %v5486_v46 = vpop.f32.mrf.mxu1  ;;  %v5154_v37 = vadd.f32 %v5153_v0, %v12347_v21 }
 0x6f0   : >> { %v5379_v53 = vpop.f32.mrf.mxu0  ;;  %v5487_v16 = vadd.f32 %v5486_v46, %v5374_v2  ;;  %v5377_v25 = vadd.f32 %v5376_v39, %v5264_v57  ;;  %v13872_v46 = vld [vmem:[#allocation14_spill] sm:$0xff] }
 0x6f2   : >> { %v5546_v36 = vadd.f32 %v5487_v16, %v13867_v34 }
 0x6f4   : >> { %5578 = vst.msk [vmem:[#allocation3 + $0x90] sm:$0xff] %vm191_vm0, %v5546_v36 }
 0x6f5   : >> { %v5266_v29 = vpop.f32.mrf.mxu3 }
 0x6f6   : >> { %v5156_v6 = vpop.f32.mrf.mxu2  ;;  %v5267_v45 = vadd.f32 %v5266_v29, %v5154_v37 }
 0x6f7   : >> { %v5489_v18 = vpop.f32.mrf.mxu1  ;;  %v5157_v17 = vadd.f32 %v5156_v6, %v12355_v61 }
 0x6f8   : >> { %v5382_v14 = vpop.f32.mrf.mxu0  ;;  %v5490_v30 = vadd.f32 %v5489_v18, %v5377_v25  ;;  %v5380_v40 = vadd.f32 %v5379_v53, %v5267_v45  ;;  %v13873_v25 = vld [vmem:[#allocation16_spill] sm:$0xff] }
 0x6fa   : >> { %v5547_v8 = vadd.f32 %v5490_v30, %v13868_v20 }
 0x6fc   : >> { %5579 = vst.msk [vmem:[#allocation3 + $0x98] sm:$0xff] %vm191_vm0, %v5547_v8 }
 0x6fd   : >> { %v5269_v41 = vpop.f32.mrf.mxu3 }
 0x6fe   : >> { %v5159_v12 = vpop.f32.mrf.mxu2  ;;  %v5270_v10 = vadd.f32 %v5269_v41, %v5157_v17  ;;  %v13874_v41 = vld [vmem:[#allocation19_spill] sm:$0xff] }
 0x6ff   : >> { %v5492_v1 = vpop.f32.mrf.mxu1  ;;  %v5160_v54 = vadd.f32 %v5159_v12, %v12369_v60 }
 0x700   : >> { %v5493_v43 = vadd.f32 %v5492_v1, %v5380_v40  ;;  %v5385_v32 = vpop.f32.mrf.mxu0  ;;  %v5383_v23 = vadd.f32 %v5382_v14, %v5270_v10 }
 0x702   : >> { %v5548_v26 = vadd.f32 %v5493_v43, %v13869_v58  ;;  %v13875_v58 = vld [vmem:[#allocation22_spill] sm:$0xff] }
 0x704   : >> { %5580 = vst.msk [vmem:[#allocation3 + $0xa0] sm:$0xff] %vm191_vm0, %v5548_v26 }
 0x705   : >> { %v5272_v21 = vpop.f32.mrf.mxu3 }
 0x706   : >> { %v5162_v44 = vpop.f32.mrf.mxu2  ;;  %v5273_v56 = vadd.f32 %v5272_v21, %v5160_v54 }
 0x707   : >> { %v5495_v59 = vpop.f32.mrf.mxu1  ;;  %v5163_v9 = vadd.f32 %v5162_v44, %v12377_v63 }
 0x708   : >> { %v5496_v50 = vadd.f32 %v5495_v59, %v5383_v23  ;;  %v5388_v31 = vpop.f32.mrf.mxu0  ;;  %v5386_v38 = vadd.f32 %v5385_v32, %v5273_v56 }
 0x70a   : >> { %v5549_v33 = vadd.f32 %v5496_v50, %v13870_v4  ;;  %v13876_v4 = vld [vmem:[#allocation26_spill] sm:$0xff] }
 0x70c   : >> { %5581 = vst.msk [vmem:[#allocation3 + $0xa8] sm:$0xff] %vm191_vm0, %v5549_v33 }
 0x70d   : >> { %v5275_v61 = vpop.f32.mrf.mxu3 }
 0x70e   : >> { %v5165_v3 = vpop.f32.mrf.mxu2  ;;  %v5276_v62 = vadd.f32 %v5275_v61, %v5163_v9 }
 0x70f   : >> { %v5498_v47 = vpop.f32.mrf.mxu1  ;;  %v5166_v13 = vadd.f32 %v5165_v3, %v12385_v35 }
 0x710   : >> { %v5499_v11 = vadd.f32 %v5498_v47, %v5386_v38  ;;  %v5391_v60 = vpop.f32.mrf.mxu0  ;;  %v5389_v27 = vadd.f32 %v5388_v31, %v5276_v62  ;;  %v13877_v38 = vld [vmem:[#allocation4_spill] sm:$0xff] }
 0x712   : >> { %v5550_v39 = vadd.f32 %v5499_v11, %v13871_v5 }
 0x714   : >> { %5582 = vst.msk [vmem:[#allocation3 + $0xb0] sm:$0xff] %vm191_vm0, %v5550_v39 }
 0x715   : >> { %v5278_v52 = vpop.f32.mrf.mxu3 }
 0x716   : >> { %v5168_v7 = vpop.f32.mrf.mxu2  ;;  %v5279_v2 = vadd.f32 %v5278_v52, %v5166_v13  ;;  %v13878_v13 = vld [vmem:[#allocation6_spill] sm:$0xff] }
 0x717   : >> { %v5501_v42 = vpop.f32.mrf.mxu1  ;;  %v5169_v34 = vadd.f32 %v5168_v7, %v12393_v49 }
 0x718   : >> { %v5502_v0 = vadd.f32 %v5501_v42, %v5389_v27  ;;  %v5392_v53 = vadd.f32 %v5391_v60, %v5279_v2  ;;  %v5394_v16 = vpop.f32.mrf.mxu0 }
 0x71a   : >> { %v5551_v55 = vadd.f32 %v5502_v0, %v13872_v46 }
 0x71c   : >> { %5583 = vst.msk [vmem:[#allocation3 + $0xb8] sm:$0xff] %vm191_vm0, %v5551_v55 }
 0x71d   : >> { %v5281_v63 = vpop.f32.mrf.mxu3 }
 0x71e   : >> { %v5171_v29 = vpop.f32.mrf.mxu2  ;;  %v5282_v6 = vadd.f32 %v5281_v63, %v5169_v34 }
 0x71f   : >> { %v5504_v57 = vpop.f32.mrf.mxu1  ;;  %v5172_v30 = vadd.f32 %v5171_v29, %v12401_v24 }
 0x720   : >> { %v5505_v36 = vadd.f32 %v5504_v57, %v5392_v53  ;;  %v5395_v37 = vadd.f32 %v5394_v16, %v5282_v6  ;;  %v5397_v20 = vpop.f32.mrf.mxu0  ;;  %v13879_v57 = vld [vmem:[#allocation10_spill] sm:$0xff] }
 0x722   : >> { %v5552_v18 = vadd.f32 %v5505_v36, %v13873_v25 }
 0x724   : >> { %5584 = vst.msk [vmem:[#allocation3 + $0xc0] sm:$0xff] %vm191_vm0, %v5552_v18 }
 0x725   : >> { %v5284_v35 = vpop.f32.mrf.mxu3 }
 0x726   : >> { %v5285_v8 = vadd.f32 %v5284_v35, %v5172_v30  ;;  %v5174_v40 = vpop.f32.mrf.mxu2  ;;  %v13880_v35 = vld [vmem:[#allocation13_spill] sm:$0xff]  ;;  %v5615_v30 = vld [vmem:[#allocation3 + $0xb8] sm:$0xff] (%p2040_p4) }
 0x727   : >> { %v5507_v14 = vpop.f32.mrf.mxu1  ;;  %v5175_v43 = vadd.f32 %v5174_v40, %v12409_v22 }
 0x728   : >> { %v5508_v45 = vadd.f32 %v5507_v14, %v5395_v37  ;;  %v5398_v1 = vadd.f32 %v5397_v20, %v5285_v8  ;;  %v5400_v21 = vpop.f32.mrf.mxu0  ;;  %v5614_v14 = vld [vmem:[#allocation3 + $0xb0] sm:$0xff] (%p2040_p4)  ;;  %v5720_v8 = vmax.f32 (%p2040_p4), %v5615_v30, 0.0 }
 0x729   : > { %v5719_v20 = vmax.f32 (%p2040_p4), %v5614_v14, 0.0  ;;  %v5597_v14 = vld [vmem:[#allocation3 + $0x28] sm:$0xff] (%p2040_p4) }
 0x72a   : >> { %v5553_v12 = vadd.f32 %v5508_v45, %v13874_v41  ;;  %v5598_v41 = vld [vmem:[#allocation3 + $0x30] sm:$0xff] (%p2040_p4)  ;;  %5752 = vst.msk [vmem:[#allocation2 + $0x129] sm:$0xff] (%p2040_p4), %vm191_vm0, %v5720_v8  ;;  %v5612_v8 = vld [vmem:[#allocation3 + $0xa0] sm:$0xff] (%p2040_p4) }
 0x72b   : > { %v5703_v40 = vmax.f32 (%p2040_p4), %v5598_v41, 0.0  ;;  %5751 = vst.msk [vmem:[#allocation2 + $0x121] sm:$0xff] (%p2040_p4), %vm191_vm0, %v5719_v20  ;;  %v5603_v20 = vld [vmem:[#allocation3 + $0x58] sm:$0xff] (%p2040_p4) }
 0x72c   : >> { %5585 = vst.msk [vmem:[#allocation3 + $0xc8] sm:$0xff] %vm191_vm0, %v5553_v12  ;;  %v5607_v12 = vld [vmem:[#allocation3 + $0x78] sm:$0xff] (%p2040_p4) }
 0x72d   : >> { %v5287_v49 = vpop.f32.mrf.mxu3  ;;  %5735 = vst.msk [vmem:[#allocation2 + $0x61] sm:$0xff] (%p2040_p4), %vm191_vm0, %v5703_v40  ;;  %v5702_v40 = vmax.f32 (%p2040_p4), %v5597_v14, 0.0 }
 0x72e   : >> { %v5288_v10 = vadd.f32 %v5287_v49, %v5175_v43  ;;  %v5177_v24 = vpop.f32.mrf.mxu2  ;;  %v5599_v49 = vld [vmem:[#allocation3 + $0x38] sm:$0xff] (%p2040_p4)  ;;  %v5592_v43 = vld [vmem:[#allocation3] sm:$0xff] (%p2040_p4) }
 0x72f   : >> { %v5510_v17 = vpop.f32.mrf.mxu1  ;;  %v5178_v54 = vadd.f32 %v5177_v24, %v12417_v19  ;;  %5734 = vst.msk [vmem:[#allocation2 + $0x51] sm:$0xff] (%p2040_p4), %vm191_vm0, %v5702_v40 }
 0x730   : >> { %v5511_v32 = vadd.f32 %v5510_v17, %v5398_v1  ;;  %v5401_v44 = vadd.f32 %v5400_v21, %v5288_v10  ;;  %v5403_v22 = vpop.f32.mrf.mxu0  ;;  %v5608_v1 = vld [vmem:[#allocation3 + $0x80] sm:$0xff] (%p2040_p4)  ;;  %v5712_v17 = vmax.f32 (%p2040_p4), %v5607_v12, 0.0  ;;  %v5610_v21 = vld [vmem:[#allocation3 + $0x90] sm:$0xff] (%p2040_p4) }
 0x731   : > { %v5713_v15 = vmax.f32 (%p2040_p4), %v5608_v1, 0.0 }
 0x732   : >> { %v5554_v26 = vadd.f32 %v5511_v32, %v13875_v58  ;;  %v5704_v32 = vmax.f32 (%p2040_p4), %v5599_v49, 0.0  ;;  %v5601_v58 = vld [vmem:[#allocation3 + $0x48] sm:$0xff] (%p2040_p4)  ;;  %5744 = vst.msk [vmem:[#allocation2 + $0xc9] sm:$0xff] (%p2040_p4), %vm191_vm0, %v5712_v17  ;;  %v5708_v49 = vmax.f32 (%p2040_p4), %v5603_v20, 0.0  ;;  %v7771_v20 = vld [vmem:[%s13722_s2 + $0x6d0] sm:$0xff] (%p2040_p4) }
 0x733   : > { %v5617_v10 = vld [vmem:[#allocation3 + $0xc8] sm:$0xff] (%p2040_p4)  ;;  %5745 = vst.msk [vmem:[#allocation2 + $0xd9] sm:$0xff] (%p2040_p4), %vm191_vm0, %v5713_v15 }
 0x734   : >> { %5586 = vst.msk [vmem:[#allocation3 + $0xd0] sm:$0xff] %vm191_vm0, %v5554_v26  ;;  %v5697_v26 = vmax.f32 (%p2040_p4), %v5592_v43, 0.0  ;;  %v5722_v24 = vmax.f32 (%p2040_p4), %v5617_v10, 0.0  ;;  %v5717_v43 = vmax.f32 (%p2040_p4), %v5612_v8, 0.0 }
 0x735   : >> { %v5290_v23 = vpop.f32.mrf.mxu3  ;;  %5736 = vst.msk [vmem:[#allocation2 + $0x69] sm:$0xff] (%p2040_p4), %vm191_vm0, %v5704_v32 }
 0x736   : >> { %v5291_v56 = vadd.f32 %v5290_v23, %v5178_v54  ;;  %v5180_v9 = vpop.f32.mrf.mxu2  ;;  %v5706_v23 = vmax.f32 (%p2040_p4), %v5601_v58, 0.0  ;;  %v5715_v54 = vmax.f32 (%p2040_p4), %v5610_v21, 0.0  ;;  %5729 = vst.msk [vmem:[#allocation2 + $0x19] sm:$0xff] (%p2040_p4), %vm191_vm0, %v5697_v26  ;;  %v5596_v26 = vld [vmem:[#allocation3 + $0x20] sm:$0xff] (%p2040_p4) }
 0x737   : >> { %v5513_v59 = vpop.f32.mrf.mxu1  ;;  %v5181_v62 = vadd.f32 %v5180_v9, %v12425_v51  ;;  %5754 = vst.msk [vmem:[#allocation2 + $0x141] sm:$0xff] (%p2040_p4), %vm191_vm0, %v5722_v24  ;;  %v5701_v24 = vmax.f32 (%p2040_p4), %v5596_v26, 0.0 }
 0x738   : >> { %v5514_v50 = vadd.f32 %v5513_v59, %v5401_v44  ;;  %v5404_v31 = vadd.f32 %v5403_v22, %v5291_v56  ;;  %v5616_v44 = vld [vmem:[#allocation3 + $0xc0] sm:$0xff] (%p2040_p4)  ;;  %v5602_v59 = vld [vmem:[#allocation3 + $0x50] sm:$0xff] (%p2040_p4)  ;;  %5738 = vst.msk [vmem:[#allocation2 + $0x81] sm:$0xff] (%p2040_p4), %vm191_vm0, %v5706_v23  ;;  %v7784_v23 = vld [vmem:[%s13722_s2 + $0x738] sm:$0xff] (%p2040_p4) }
 0x739   : > { %v5594_v22 = vld [vmem:[#allocation3 + $0x10] sm:$0xff] (%p2040_p4)  ;;  %5747 = vst.msk [vmem:[#allocation2 + $0xf1] sm:$0xff] (%p2040_p4), %vm191_vm0, %v5715_v54  ;;  %7959 = vmatpush.msra.mxu2 (%p2040_p4), %v7784_v23  ;;  %7960 = vmatpush.msra.mxu3 (%p2040_p4), %v7784_v23 }
 0x73a   : >> { %v5555_v33 = vadd.f32 %v5514_v50, %v13876_v4  ;;  %v5611_v50 = vld [vmem:[#allocation3 + $0x98] sm:$0xff] (%p2040_p4)  ;;  %5740 = vst.msk [vmem:[#allocation2 + $0x99] sm:$0xff] (%p2040_p4), %vm191_vm0, %v5708_v49  ;;  %6785 = vmatpush.msra.mxu0 (%p2040_p4), %v7784_v23  ;;  %7958 = vmatpush.msra.mxu1 (%p2040_p4), %v7784_v23 }
 0x73b   : > { %v5793_v4 = vld [vmem:[#allocation2 + $0x1] sm:$0xff] (%p2040_p4)  ;;  %v5716_v9 = vmax.f32 (%p2040_p4), %v5611_v50, 0.0  ;;  %5749 = vst.msk [vmem:[#allocation2 + $0x109] sm:$0xff] (%p2040_p4), %vm191_vm0, %v5717_v43 }
 0x73c   : >> { %5587 = vst.msk [vmem:[#allocation3 + $0xd8] sm:$0xff] %vm191_vm0, %v5555_v33  ;;  %v5721_v33 = vmax.f32 (%p2040_p4), %v5616_v44, 0.0 }
 0x73d   : >> { %v5293_v11 = vpop.f32.mrf.mxu3  ;;  %5748 = vst.msk [vmem:[#allocation2 + $0xf9] sm:$0xff] (%p2040_p4), %vm191_vm0, %v5716_v9  ;;  %v7780_v9 = vld [vmem:[%s13722_s2 + $0x718] sm:$0xff] (%p2040_p4) }
 0x73e   : >> { %v5294_v19 = vadd.f32 %v5293_v11, %v5181_v62  ;;  %v5600_v11 = vld [vmem:[#allocation3 + $0x40] sm:$0xff] (%p2040_p4)  ;;  %5753 = vst.msk [vmem:[#allocation2 + $0x139] sm:$0xff] (%p2040_p4), %vm191_vm0, %v5721_v33  ;;  %v5820_v30 = vld [vmem:[#allocation2 + $0x141] sm:$0xff] (%p2040_p4) }
 0x73f   : >> { %v5516_v61 = vpop.f32.mrf.mxu1  ;;  %v5183_v39 = vpop.f32.mrf.mxu2  ;;  %v12675_v41 = vld [vmem:[#allocation2 + $0x81] sm:$0xff] (%p2040_p4)  ;;  %5733 = vst.msk [vmem:[#allocation2 + $0x49] sm:$0xff] (%p2040_p4), %vm191_vm0, %v5701_v24 }
 0x740   : >> { %v5517_v3 = vadd.f32 %v5516_v61, %v5404_v31  ;;  %v5184_v42 = vadd.f32 %v5183_v39, %v12434_v48  ;;  %v5817_v31 = vld [vmem:[#allocation2 + $0x121] sm:$0xff] (%p2040_p4)  ;;  %v5707_v61 = vmax.f32 (%p2040_p4), %v5602_v59, 0.0  ;;  %v5813_v12 = vld [vmem:[#allocation2 + $0xf1] sm:$0xff] (%p2040_p4) }
 0x741   : > { %v8986_v32 = vpack.i.bf16 (%p2040_p4), %v5813_v12, %v12675_v41 }
 0x742   : >> { %v5556_v47 = vadd.f32 %v5517_v3, %v13877_v38  ;;  %5739 = vst.msk [vmem:[#allocation2 + $0x91] sm:$0xff] (%p2040_p4), %vm191_vm0, %v5707_v61 }
 0x743   : > { %v5619_v3 = vld [vmem:[#allocation3 + $0xd8] sm:$0xff] (%p2040_p4) }
 0x744   : >> { %5588 = vst.msk [vmem:[#allocation3 + $0xe0] sm:$0xff] %vm191_vm0, %v5556_v47  ;;  %v5818_v47 = vld [vmem:[#allocation2 + $0x129] sm:$0xff] (%p2040_p4)  ;;  %v5724_v39 = vmax.f32 (%p2040_p4), %v5619_v3, 0.0  ;;  %v5814_v21 = vld [vmem:[#allocation2 + $0xf9] sm:$0xff] (%p2040_p4) }
 0x745   : >> { %v5296_v7 = vpop.f32.mrf.mxu3  ;;  %v8961_v62 = vpack.i.bf16 (%p2040_p4), %v5818_v47, %v5793_v4  ;;  %v7781_v47 = vld [vmem:[%s13722_s2 + $0x720] sm:$0xff] (%p2040_p4) }
 0x746   : >> { %v5297_v46 = vadd.f32 %v5296_v7, %v5184_v42  ;;  %v5705_v7 = vmax.f32 (%p2040_p4), %v5600_v11, 0.0  ;;  %5756 = vst.msk [vmem:[#allocation2 + $0x159] sm:$0xff] (%p2040_p4), %vm191_vm0, %v5724_v39  ;;  %v7779_v39 = vld [vmem:[%s13722_s2 + $0x710] sm:$0xff] (%p2040_p4) }
 0x747   : >> { %v5519_v5 = vpop.f32.mrf.mxu1  ;;  %8962 = vrot.lane.b32.xlu1 (%p2040_p4), %v8961_v62, %s9288_s24  ;;  %v12811_v24 = vld [vmem:[#allocation2 + $0x50] sm:$0xff] (%p2040_p4) }
 0x748   : > { %5737 = vst.msk [vmem:[#allocation2 + $0x79] sm:$0xff] (%p2040_p4), %vm191_vm0, %v5705_v7  ;;  %v12733_v7 = vld [vmem:[#allocation2 + $0x109] sm:$0xff] (%p2040_p4) }
 0x749   : > { %v12692_v58 = vld [vmem:[#allocation2 + $0x91] sm:$0xff] (%p2040_p4) }
 0x74a   : > { %v8996_v61 = vpack.i.bf16 (%p2040_p4), %v5814_v21, %v12692_v58 }
 0x74b   : > { %v5620_v42 = vld [vmem:[#allocation3 + $0xe0] sm:$0xff] (%p2040_p4) }
 0x74d   : > { %v5822_v54 = vld [vmem:[#allocation2 + $0x159] sm:$0xff] (%p2040_p4) }
 0x74f   : >> { %v5522_v2 = vpop.f32.mrf.mxu1  ;;  %v12680_v17 = vld [vmem:[#allocation2 + $0x79] sm:$0xff] (%p2040_p4) }
 0x753   : >> { %v5406_v60 = vpop.f32.mrf.mxu0 }
 0x754   : >> { %v5407_v52 = vadd.f32 %v5406_v60, %v5294_v19  ;;  %v5609_v19 = vld [vmem:[#allocation3 + $0x88] sm:$0xff] (%p2040_p4)  ;;  %v5595_v60 = vld [vmem:[#allocation3 + $0x18] sm:$0xff] (%p2040_p4) }
 0x756   : >> { %v5520_v27 = vadd.f32 %v5519_v5, %v5407_v52  ;;  %v5699_v5 = vmax.f32 (%p2040_p4), %v5594_v22, 0.0  ;;  %v12652_v52 = vld [vmem:[#allocation2 + $0x61] sm:$0xff] (%p2040_p4)  ;;  %v7783_v22 = vld [vmem:[%s13722_s2 + $0x730] sm:$0xff] (%p2040_p4) }
 0x757   : >> { %v5299_v36 = vpop.f32.mrf.mxu3  ;;  %v5525_v48 = vpop.f32.mrf.mxu1  ;;  %7962 = vmatpush.msra.mxu2 (%p2040_p4), %v7783_v22  ;;  %7963 = vmatpush.msra.mxu3 (%p2040_p4), %v7783_v22 }
 0x758   : >> { %v5557_v0 = vadd.f32 %v5520_v27, %v13878_v13  ;;  %v12654_v27 = vld [vmem:[#allocation2 + $0xc9] sm:$0xff] (%p2040_p4)  ;;  %5731 = vst.msk [vmem:[#allocation2 + $0x31] sm:$0xff] (%p2040_p4), %vm191_vm0, %v5699_v5  ;;  %6786 = vmatpush.msra.mxu0 (%p2040_p4), %v7783_v22  ;;  %7961 = vmatpush.msra.mxu1 (%p2040_p4), %v7783_v22  ;;  %v12839_v22 = vld [vmem:[#allocation2 + $0x7a] sm:$0xff] (%p2040_p4) }
 0x759   : >> { %v5186_v55 = vpop.f32.mrf.mxu2  ;;  %v12657_v13 = vld [vmem:[#allocation2 + $0x69] sm:$0xff] (%p2040_p4) }
 0x75a   : >> { %5589 = vst.msk [vmem:[#allocation3 + $0xe8] sm:$0xff] %vm191_vm0, %v5557_v0  ;;  %v5187_v51 = vadd.f32 %v5186_v55, %v12443_v28  ;;  %v5606_v28 = vld [vmem:[#allocation3 + $0x70] sm:$0xff] (%p2040_p4)  ;;  %v5700_v55 = vmax.f32 (%p2040_p4), %v5595_v60, 0.0  ;;  %v9071_v23 = vpack.i.bf16 (%p2040_p4), %v12811_v24, %v12657_v13 }
 0x75b   : >> { %v5409_v63 = vpop.f32.mrf.mxu0  ;;  %v5711_v45 = vmax.f32 (%p2040_p4), %v5606_v28, 0.0  ;;  %v12659_v0 = vld [vmem:[#allocation2 + $0xd9] sm:$0xff] (%p2040_p4) }
 0x75c   : >> { %v5410_v53 = vadd.f32 %v5409_v63, %v5297_v46  ;;  %v5300_v29 = vadd.f32 %v5299_v36, %v5187_v51  ;;  %v5604_v46 = vld [vmem:[#allocation3 + $0x60] sm:$0xff] (%p2040_p4)  ;;  %v5613_v63 = vld [vmem:[#allocation3 + $0xa8] sm:$0xff] (%p2040_p4)  ;;  %v5725_v51 = vmax.f32 (%p2040_p4), %v5620_v42, 0.0  ;;  %5732 = vst.msk [vmem:[#allocation2 + $0x39] sm:$0xff] (%p2040_p4), %vm191_vm0, %v5700_v55 }
 0x75d   : > { %5743 = vst.msk [vmem:[#allocation2 + $0xc1] sm:$0xff] (%p2040_p4), %vm191_vm0, %v5711_v45  ;;  %v5709_v36 = vmax.f32 (%p2040_p4), %v5604_v46, 0.0  ;;  %v12731_v60 = vld [vmem:[#allocation2 + $0x99] sm:$0xff] (%p2040_p4) }
 0x75e   : >> { %v5523_v16 = vadd.f32 %v5522_v2, %v5410_v53  ;;  %v5714_v2 = vmax.f32 (%p2040_p4), %v5609_v19, 0.0  ;;  %v8956_v53 = vpack.i.bf16 (%p2040_p4), %v12654_v27, %v12652_v52  ;;  %5757 = vst.msk [vmem:[#allocation2 + $0x169] sm:$0xff] (%p2040_p4), %vm191_vm0, %v5725_v51  ;;  %v9006_v55 = vpack.i.bf16 (%p2040_p4), %v12733_v7, %v12731_v60 }
 0x75f   : > { %5741 = vst.msk [vmem:[#allocation2 + $0xa9] sm:$0xff] (%p2040_p4), %vm191_vm0, %v5709_v36  ;;  %v12699_v59 = vld [vmem:[#allocation2 + $0x31] sm:$0xff] (%p2040_p4) }
 0x760   : >> { %v5558_v34 = vadd.f32 %v5523_v16, %v13879_v57  ;;  %v5593_v16 = vld [vmem:[#allocation3 + $0x8] sm:$0xff] (%p2040_p4)  ;;  %v8966_v57 = vpack.i.bf16 (%p2040_p4), %v12659_v0, %v12657_v13  ;;  %5746 = vst.msk [vmem:[#allocation2 + $0xe1] sm:$0xff] (%p2040_p4), %vm191_vm0, %v5714_v2  ;;  %v9001_v3 = vpack.i.bf16 (%p2040_p4), %v5822_v54, %v12699_v59  ;;  %v7778_v2 = vld [vmem:[%s13722_s2 + $0x708] sm:$0xff] (%p2040_p4)  ;;  %v12800_v43 = vld [vmem:[#allocation2 + $0x30] sm:$0xff] (%p2040_p4) }
 0x761   : > { %v5621_v44 = vld [vmem:[#allocation3 + $0xe8] sm:$0xff] (%p2040_p4)  ;;  %v7769_v54 = vld [vmem:[%s13722_s2 + $0x6c0] sm:$0xff] (%p2040_p4) }
 0x762   : >> { %5590 = vst.msk [vmem:[#allocation3 + $0xf0] sm:$0xff] %vm191_vm0, %v5558_v34  ;;  %v5794_v34 = vld [vmem:[#allocation2 + $0x9] sm:$0xff] (%p2040_p4)  ;;  %8967 = vrot.lane.b32.xlu1 (%p2040_p4), %v8966_v57, %s9288_s24  ;;  %v5726_v4 = vmax.f32 (%p2040_p4), %v5621_v44, 0.0  ;;  %v5800_v57 = vld [vmem:[#allocation2 + $0x51] sm:$0xff] (%p2040_p4) }
 0x763   : >> { %v5412_v6 = vpop.f32.mrf.mxu0  ;;  %v12723_v11 = vld [vmem:[#allocation2 + $0x39] sm:$0xff] (%p2040_p4)  ;;  %v12813_v44 = vld [vmem:[#allocation2 + $0x62] sm:$0xff] (%p2040_p4) }
 0x764   : >> { %v5413_v25 = vadd.f32 %v5412_v6, %v5300_v29  ;;  %v12642_v56 = vld [vmem:[#allocation2 + $0xc1] sm:$0xff] (%p2040_p4)  ;;  %v5718_v6 = vmax.f32 (%p2040_p4), %v5613_v63, 0.0  ;;  %5758 = vst.msk [vmem:[#allocation2 + $0x171] sm:$0xff] (%p2040_p4), %vm191_vm0, %v5726_v4  ;;  %v12777_v14 = vld [vmem:[#allocation2 + $0x32] sm:$0xff] (%p2040_p4) }
 0x765   : > { %v8951_v38 = vpack.i.bf16 (%p2040_p4), %v5817_v31, %v12642_v56  ;;  %v5618_v29 = vld [vmem:[#allocation3 + $0xd0] sm:$0xff] (%p2040_p4)  ;;  %v7782_v31 = vld [vmem:[%s13722_s2 + $0x728] sm:$0xff] (%p2040_p4)  ;;  %v12795_v49 = vld [vmem:[#allocation2 + $0x38] sm:$0xff] (%p2040_p4) }
 0x766   : >> { %v5526_v18 = vadd.f32 %v5525_v48, %v5413_v25  ;;  %2042 = sbr.rel (!%p2040_p4) target bundleno = 646 (0x286), region = 77  ;;  %v5605_v48 = vld [vmem:[#allocation3 + $0x68] sm:$0xff] (%p2040_p4)  ;;  %v5723_v28 = vmax.f32 (%p2040_p4), %v5618_v29, 0.0  ;;  %5750 = vst.msk [vmem:[#allocation2 + $0x111] sm:$0xff] (%p2040_p4), %vm191_vm0, %v5718_v6  ;;  %7965 = vmatpush.msra.mxu2 (%p2040_p4), %v7782_v31  ;;  %7966 = vmatpush.msra.mxu3 (%p2040_p4), %v7782_v31  ;;  %v5823_v62 = vld [vmem:[#allocation2 + $0x169] sm:$0xff] (%p2040_p4)  ;;  %v7777_v63 = vld [vmem:[%s13722_s2 + $0x700] sm:$0xff] (%p2040_p4) }
 0x767   : > { %8952 = vrot.lane.b32.xlu0 (%p2040_p4), %v8951_v38, %s9288_s24  ;;  %v5819_v25 = vld [vmem:[#allocation2 + $0x139] sm:$0xff] (%p2040_p4)  ;;  %v5710_v45 = vmax.f32 (%p2040_p4), %v5605_v48, 0.0  ;;  %v12684_v10 = vld [vmem:[#allocation2 + $0xe1] sm:$0xff] (%p2040_p4)  ;;  %6787 = vmatpush.msra.mxu0 (%p2040_p4), %v7782_v31  ;;  %v12725_v5 = vld [vmem:[#allocation2 + $0xa9] sm:$0xff] (%p2040_p4)  ;;  %v9011_v42 = vpack.i.bf16 (%p2040_p4), %v5823_v62, %v12723_v11  ;;  %v9031_v48 = vpack.i.bf16 (%p2040_p4), %v12699_v59, %v5800_v57 }
 0x768   : >> { %v5559_v37 = vadd.f32 %v5526_v18, %v13880_v35  ;;  %v5698_v18 = vmax.f32 (%p2040_p4), %v5593_v16, 0.0  ;;  %v5795_v35 = vld [vmem:[#allocation2 + $0x19] sm:$0xff] (%p2040_p4)  ;;  %5755 = vst.msk [vmem:[#allocation2 + $0x151] sm:$0xff] (%p2040_p4), %vm191_vm0, %v5723_v28  ;;  %v8976_v15 = vpack.i.bf16 (%p2040_p4), %v12684_v10, %v12680_v17  ;;  %7964 = vmatpush.msra.mxu1 (%p2040_p4), %v7782_v31  ;;  %7968 = vmatpush.msra.mxu2 (%p2040_p4), %v7781_v47  ;;  %v7774_v6 = vld [vmem:[%s13722_s2 + $0x6e8] sm:$0xff] (%p2040_p4) }
 0x769   : > { %v8981_v1 = vpack.i.bf16 (%p2040_p4), %v5820_v30, %v5795_v35  ;;  %5742 = vst.msk [vmem:[#allocation2 + $0xb1] sm:$0xff] (%p2040_p4), %vm191_vm0, %v5710_v45  ;;  %7969 = vmatpush.msra.mxu3 (%p2040_p4), %v7781_v47  ;;  %6788 = vmatpush.msra.mxu0 (%p2040_p4), %v7781_v47  ;;  %v7773_v35 = vld [vmem:[%s13722_s2 + $0x6e0] sm:$0xff] (%p2040_p4)  ;;  %v7772_v28 = vld [vmem:[%s13722_s2 + $0x6d8] sm:$0xff] (%p2040_p4)  ;;  %v7770_v59 = vld [vmem:[%s13722_s2 + $0x6c8] sm:$0xff] (%p2040_p4) }
 0x76a   : >> { %5591 = vst.msk [vmem:[#allocation3 + $0xf8] sm:$0xff] %vm191_vm0, %v5559_v37  ;;  %v8971_v37 = vpack.i.bf16 (%p2040_p4), %v5819_v25, %v5794_v34  ;;  %8987 = vrot.lane.b32.xlu1 (%p2040_p4), %v8986_v32, %s9288_s24  ;;  %7971 = vmatpush.msra.mxu2 (%p2040_p4), %v7780_v9  ;;  %v7775_v34 = vld [vmem:[%s13722_s2 + $0x6f0] sm:$0xff] (%p2040_p4)  ;;  %v12780_v30 = vld [vmem:[#allocation2 + $0x18] sm:$0xff] (%p2040_p4)  ;;  %v12841_v31 = vld [vmem:[#allocation2 + $0x48] sm:$0xff] (%p2040_p4) }
 0x76b   : > { %5730 = vst.msk [vmem:[#allocation2 + $0x21] sm:$0xff] %vm191_vm0, %v5698_v18  ;;  %7972 = vmatpush.msra.mxu3 %v7780_v9  ;;  %7967 = vmatpush.msra.mxu1 %v7781_v47  ;;  %v5824_v36 = vld [vmem:[#allocation2 + $0x171] sm:$0xff]  ;;  %v12764_v25 = vld [vmem:[#allocation2 + $0x49] sm:$0xff]  ;;  %v12802_v32 = vld [vmem:[#allocation2 + $0x3a] sm:$0xff]  ;;  %v9091_v47 = vpack.i.bf16 %v12692_v58, %v12839_v22 }
 0x76c   : > { %8972 = vrot.lane.b32.xlu2 %v8971_v37, %s9288_s24  ;;  %7974 = vmatpush.msra.mxu2 %v7779_v39  ;;  %v9021_v18 = vpack.i.bf16 %v5824_v36, %v12764_v25  ;;  %v9046_v12 = vpack.i.bf16 %v12764_v25, %v12777_v14  ;;  %v9051_v21 = vpack.i.bf16 %v12802_v32, %v12800_v43  ;;  %v7816_v13 = vld [vmem:[%s13722_s2 + $0x838] sm:$0xff]  ;;  %v7814_v62 = vld [vmem:[%s13722_s2 + $0x828] sm:$0xff]  ;;  %v12898_v36 = vld [vmem:[#allocation2 + $0x60] sm:$0xff] }
 0x76d   : > { %v5816_v19 = vld [vmem:[#allocation2 + $0x111] sm:$0xff]  ;;  %6789 = vmatpush.msra.mxu0 %v7780_v9  ;;  %7975 = vmatpush.msra.mxu3 %v7779_v39 }
 0x76e   : > { %v9016_v46 = vpack.i.bf16 %v5816_v19, %v12725_v5  ;;  %7970 = vmatpush.msra.mxu1 %v7780_v9  ;;  %7977 = vmatpush.msra.mxu2 %v7778_v2  ;;  %v7830_v19 = vld [vmem:[%s13722_s2 + $0x8a8] sm:$0xff]  ;;  %v7840_v58 = vld [vmem:[%s13722_s2 + $0x8f8] sm:$0xff] }
 0x76f   : > { %8957 = vrot.lane.b32.xlu0 %v8956_v53, %s9288_s24  ;;  %v5821_v33 = vld [vmem:[#allocation2 + $0x151] sm:$0xff]  ;;  %6790 = vmatpush.msra.mxu0 %v7779_v39 }
 0x770   : > { %7978 = vmatpush.msra.mxu3 %v7778_v2  ;;  %v7776_v53 = vld [vmem:[%s13722_s2 + $0x6f8] sm:$0xff]  ;;  %7980 = vmatpush.msra.mxu2 %v7777_v63 }
 0x771   : > { %v12750_v51 = vld [vmem:[#allocation2 + $0xb1] sm:$0xff]  ;;  %7973 = vmatpush.msra.mxu1 %v7779_v39  ;;  %6791 = vmatpush.msra.mxu0 %v7778_v2  ;;  %v7798_v39 = vld [vmem:[%s13722_s2 + $0x7a8] sm:$0xff] }
 0x772   : > { %v12702_v50 = vld [vmem:[#allocation2 + $0x21] sm:$0xff]  ;;  %9002 = vrot.lane.b32.xlu1 %v9001_v3, %s9288_s24  ;;  %7981 = vmatpush.msra.mxu3 %v7777_v63  ;;  %v7800_v3 = vld [vmem:[%s13722_s2 + $0x7b8] sm:$0xff] }
 0x773   : > { %v8991_v38 = vpack.i.bf16 %v5821_v33, %v12702_v50  ;;  %v12752_v16 = vld [vmem:[#allocation2 + $0x1a] sm:$0xff]  ;;  %7983 = vmatpush.msra.mxu2 %v7776_v53  ;;  %7976 = vmatpush.msra.mxu1 %v7778_v2  ;;  %v12782_v45 = vld [vmem:[#allocation2 + $0x22] sm:$0xff] }
 0x774   : > { %8977 = vrot.lane.b32.xlu2 %v8976_v15, %s9288_s24  ;;  %v9026_v29 = vpack.i.bf16 %v12752_v16, %v12750_v51  ;;  %7984 = vmatpush.msra.mxu3 %v7776_v53  ;;  %v12772_v37 = vld [vmem:[#allocation2 + $0x20] sm:$0xff]  ;;  %v9036_v40 = vpack.i.bf16 %v12782_v45, %v12780_v30  ;;  %v9056_v15 = vpack.i.bf16 %v12795_v49, %v5800_v57  ;;  %v7832_v33 = vld [vmem:[%s13722_s2 + $0x8b8] sm:$0xff] }
 0x775   : > { %7986 = vmatpush.msra.mxu2 %v7775_v34  ;;  %6792 = vmatpush.msra.mxu0 %v7777_v63  ;;  %v9041_v8 = vpack.i.bf16 %v12772_v37, %v12723_v11  ;;  %v7799_v11 = vld [vmem:[%s13722_s2 + $0x7b0] sm:$0xff]  ;;  %v7829_v2 = vld [vmem:[%s13722_s2 + $0x8a0] sm:$0xff] }
 0x776   : > { %7987 = vmatpush.msra.mxu3 %v7775_v34  ;;  %7979 = vmatpush.msra.mxu1 %v7777_v63  ;;  %v7828_v63 = vld [vmem:[%s13722_s2 + $0x898] sm:$0xff]  ;;  %v12893_v57 = vld [vmem:[#allocation2 + $0x80] sm:$0xff] }
 0x777   : > { %8982 = vrot.lane.b32.xlu0 %v8981_v1, %s9288_s24  ;;  %7989 = vmatpush.msra.mxu2 %v7774_v6  ;;  %v12797_v1 = vld [vmem:[#allocation2 + $0x4a] sm:$0xff] }
 0x778   : > { %7990 = vmatpush.msra.mxu3 %v7774_v6  ;;  %6793 = vmatpush.msra.mxu0 %v7776_v53  ;;  %v9061_v26 = vpack.i.bf16 %v12652_v52, %v12797_v1  ;;  %v9076_v52 = vpack.i.bf16 %v12680_v17, %v12813_v44  ;;  %v12831_v17 = vld [vmem:[#allocation2 + $0x68] sm:$0xff] }
 0x779   : > { %7992 = vmatpush.msra.mxu2 %v7773_v35  ;;  %7982 = vmatpush.msra.mxu1 %v7776_v53  ;;  %v9086_v4 = vpack.i.bf16 %v12831_v17, %v12675_v41  ;;  %v7815_v41 = vld [vmem:[%s13722_s2 + $0x830] sm:$0xff] }
 0x77a   : > { %9017 = vrot.lane.b32.xlu1 %v9016_v46, %s9288_s24  ;;  %7993 = vmatpush.msra.mxu3 %v7773_v35  ;;  %v7797_v46 = vld [vmem:[%s13722_s2 + $0x7a0] sm:$0xff]  ;;  %v7839_v53 = vld [vmem:[%s13722_s2 + $0x8f0] sm:$0xff] }
 0x77b   : > { %7995 = vmatpush.msra.mxu2 %v7772_v28  ;;  %6794 = vmatpush.msra.mxu0 %v7775_v34 }
 0x77c   : > { %8992 = vrot.lane.b32.xlu2 %v8991_v38, %s9288_s24  ;;  %7996 = vmatpush.msra.mxu3 %v7772_v28  ;;  %v7831_v38 = vld [vmem:[%s13722_s2 + $0x8b0] sm:$0xff] }
 0x77d   : > { %7985 = vmatpush.msra.mxu1 %v7775_v34  ;;  %7998 = vmatpush.msra.mxu2 %v7771_v20  ;;  %v9101_v34 = vpack.i.bf16 %v12893_v57, %v12731_v60  ;;  %v12909_v60 = vld [vmem:[#allocation2 + $0x92] sm:$0xff] }
 0x77e   : > { %7999 = vmatpush.msra.mxu3 %v7771_v20  ;;  %6795 = vmatpush.msra.mxu0 %v7774_v6 }
 0x77f   : > { %8997 = vrot.lane.b32.xlu0 %v8996_v61, %s9288_s24  ;;  %7988 = vmatpush.msra.mxu1 %v7774_v6  ;;  %v12843_v61 = vld [vmem:[#allocation2 + $0x52] sm:$0xff] }
 0x780   : > { %6796 = vmatpush.msra.mxu0 %v7773_v35  ;;  %8001 = vmatpush.msra.mxu2 %v7770_v59  ;;  %v9066_v9 = vpack.i.bf16 %v12843_v61, %v12841_v31  ;;  %v7811_v6 = vld [vmem:[%s13722_s2 + $0x810] sm:$0xff] }
 0x781   : > { %7991 = vmatpush.msra.mxu1 %v7773_v35  ;;  %8002 = vmatpush.msra.mxu3 %v7770_v59  ;;  %v7795_v35 = vld [vmem:[%s13722_s2 + $0x790] sm:$0xff] }
 0x782   : > { %9032 = vrot.lane.b32.xlu1 %v9031_v48, %s9288_s24  ;;  %6797 = vmatpush.msra.mxu0 %v7772_v28  ;;  %v7827_v48 = vld [vmem:[%s13722_s2 + $0x890] sm:$0xff] }
 0x783   : > { %7994 = vmatpush.msra.mxu1 %v7772_v28  ;;  %8004 = vmatpush.msra.mxu2 %v7769_v54  ;;  %v9106_v28 = vpack.i.bf16 %v12725_v5, %v12909_v60  ;;  %v5785_v5 = vld [vmem:[#allocation2 + $0x120] sm:$0xff] }
 0x784   : > { %9007 = vrot.lane.b32.xlu2 %v9006_v55, %s9288_s24  ;;  %6798 = vmatpush.msra.mxu0 %v7771_v20  ;;  %v7812_v55 = vld [vmem:[%s13722_s2 + $0x818] sm:$0xff] }
 0x785   : > { %7997 = vmatpush.msra.mxu1 %v7771_v20  ;;  %8005 = vmatpush.msra.mxu3 %v7769_v54 }
 0x786   : > { %6799 = vmatpush.msra.mxu0 %v7770_v59  ;;  %7011 = vmatpush.msrb.mxu2 %v7816_v13 }
 0x787   : > { %9012 = vrot.lane.b32.xlu0 %v9011_v42, %s9288_s24  ;;  %8000 = vmatpush.msra.mxu1 %v7770_v59  ;;  %v7813_v42 = vld [vmem:[%s13722_s2 + $0x820] sm:$0xff] }
 0x788   : > { %6800 = vmatpush.msra.mxu0 %v7769_v54  ;;  %7124 = vmatpush.msrb.mxu3 %v7832_v33  ;;  %v5761_v59 = vld [vmem:[#allocation2] sm:$0xff] }
 0x789   : > { %8003 = vmatpush.msra.mxu1 %v7769_v54  ;;  %7012 = vmatpush.msrb.mxu2 %v7815_v41  ;;  %v7794_v41 = vld [vmem:[%s13722_s2 + $0x788] sm:$0xff] }
 0x78a   : > { %9047 = vrot.lane.b32.xlu1 %v9046_v12, %s9288_s24  ;;  %7125 = vmatpush.msrb.mxu3 %v7831_v38  ;;  %v7826_v12 = vld [vmem:[%s13722_s2 + $0x888] sm:$0xff]  ;;  %v7809_v38 = vld [vmem:[%s13722_s2 + $0x800] sm:$0xff] }
 0x78b   : > { %6898 = vmatpush.msrb.mxu1 %v7800_v3  ;;  %7013 = vmatpush.msrb.mxu2 %v7814_v62  ;;  %v7808_v62 = vld [vmem:[%s13722_s2 + $0x7f8] sm:$0xff] }
 0x78c   : > { %9022 = vrot.lane.b32.xlu2 %v9021_v18, %s9288_s24  ;;  %7126 = vmatpush.msrb.mxu3 %v7830_v19  ;;  %v12911_v18 = vld [vmem:[#allocation2 + $0x6a] sm:$0xff] }
 0x78d   : > { %6899 = vmatpush.msrb.mxu1 %v7799_v11  ;;  %7245 = vmatpush.msrb.mxu0 %v7840_v58  ;;  %v9081_v20 = vpack.i.bf16 %v12911_v18, %v12898_v36  ;;  %v7793_v11 = vld [vmem:[%s13722_s2 + $0x780] sm:$0xff] }
 0x78e   : > { %7014 = vmatpush.msrb.mxu2 %v7813_v42  ;;  %7127 = vmatpush.msrb.mxu3 %v7829_v2  ;;  %v7837_v42 = vld [vmem:[%s13722_s2 + $0x8e0] sm:$0xff]  ;;  %v12963_v2 = vld [vmem:[#allocation2 + $0x98] sm:$0xff] }
 0x78f   : > { %9027 = vrot.lane.b32.xlu0 %v9026_v29, %s9288_s24  ;;  %6900 = vmatpush.msrb.mxu1 %v7798_v39  ;;  %v7796_v29 = vld [vmem:[%s13722_s2 + $0x798] sm:$0xff] }
 0x790   : > { %7015 = vmatpush.msrb.mxu2 %v7812_v55  ;;  %7128 = vmatpush.msrb.mxu3 %v7828_v63  ;;  %v7824_v39 = vld [vmem:[%s13722_s2 + $0x878] sm:$0xff]  ;;  %v9116_v55 = vpack.i.bf16 %v12963_v2, %v12750_v51 }
 0x791   : > { %6901 = vmatpush.msrb.mxu1 %v7797_v46  ;;  %7246 = vmatpush.msrb.mxu0 %v7839_v53  ;;  %v5762_v46 = vld [vmem:[#allocation2 + $0x8] sm:$0xff]  ;;  %v7792_v63 = vld [vmem:[%s13722_s2 + $0x778] sm:$0xff]  ;;  %v7807_v53 = vld [vmem:[%s13722_s2 + $0x7f0] sm:$0xff] }
 0x792   : > { %9062 = vrot.lane.b32.xlu1 %v9061_v26, %s9288_s24  ;;  %7016 = vmatpush.msrb.mxu2 %v7811_v6  ;;  %v12929_v26 = vld [vmem:[#allocation2 + $0xc0] sm:$0xff] }
 0x793   : > { %6902 = vmatpush.msrb.mxu1 %v7796_v29  ;;  %7129 = vmatpush.msrb.mxu3 %v7827_v48  ;;  %v12973_v29 = vld [vmem:[#allocation2 + $0xc8] sm:$0xff] }
 0x794   : > { %9037 = vrot.lane.b32.xlu2 %v9036_v40, %s9288_s24  ;;  %v7838_v40 = vld [vmem:[%s13722_s2 + $0x8e8] sm:$0xff] }
 0x795   : > { %6903 = vmatpush.msrb.mxu1 %v7795_v35  ;;  %7130 = vmatpush.msrb.mxu3 %v7826_v12  ;;  %v12983_v12 = vld [vmem:[#allocation2 + $0x78] sm:$0xff] }
 0x796   : > { %7247 = vmatpush.msrb.mxu0 %v7838_v40  ;;  %v7823_v40 = vld [vmem:[%s13722_s2 + $0x870] sm:$0xff] }
 0x797   : > { %9042 = vrot.lane.b32.xlu0 %v9041_v8, %s9288_s24  ;;  %v7810_v8 = vld [vmem:[%s13722_s2 + $0x808] sm:$0xff]  ;;  %6904 = vmatpush.msrb.mxu1 %v7794_v41 }
 0x798   : > { %7017 = vmatpush.msrb.mxu2 %v7810_v8  ;;  %7248 = vmatpush.msrb.mxu0 %v7837_v42 }
 0x799   : > { %6905 = vmatpush.msrb.mxu1 %v7793_v11  ;;  %v5787_v11 = vld [vmem:[#allocation2 + $0x138] sm:$0xff] }
 0x79a   : > { %9077 = vrot.lane.b32.xlu1 %v9076_v52, %s9288_s24  ;;  %7018 = vmatpush.msrb.mxu2 %v7809_v38  ;;  %v7822_v38 = vld [vmem:[%s13722_s2 + $0x868] sm:$0xff] }
 0x79b   : > { %6906 = vmatpush.msrb.mxu1 %v7792_v63  ;;  %v7789_v63 = vld [vmem:[%s13722_s2 + $0x760] sm:$0xff] }
 0x79c   : > { %9052 = vrot.lane.b32.xlu2 %v9051_v21, %s9288_s24  ;;  %7019 = vmatpush.msrb.mxu2 %v7808_v62 }
 0x79e   : > { %7020 = vmatpush.msrb.mxu2 %v7807_v53  ;;  %v7804_v53 = vld [vmem:[%s13722_s2 + $0x7d8] sm:$0xff] }
 0x79f   : > { %9057 = vrot.lane.b32.xlu0 %v9056_v15, %s9288_s24 }
 0x7a2   : > { %9092 = vrot.lane.b32.xlu1 %v9091_v47, %s9288_s24  ;;  %v7825_v47 = vld [vmem:[%s13722_s2 + $0x880] sm:$0xff] }
 0x7a3   : > { %7131 = vmatpush.msrb.mxu3 %v7825_v47  ;;  %v7790_v47 = vld [vmem:[%s13722_s2 + $0x768] sm:$0xff] }
 0x7a4   : > { %9067 = vrot.lane.b32.xlu2 %v9066_v9, %s9288_s24  ;;  %v12948_v9 = vld [vmem:[#allocation2 + $0x128] sm:$0xff] }
 0x7a5   : > { %7132 = vmatpush.msrb.mxu3 %v7824_v39 }
 0x7a7   : > { %9072 = vrot.lane.b32.xlu0 %v9071_v23, %s9288_s24  ;;  %7133 = vmatpush.msrb.mxu3 %v7823_v40  ;;  %v13043_v40 = vld [vmem:[#allocation2 + $0xb0] sm:$0xff] }
 0x7a9   : > { %7134 = vmatpush.msrb.mxu3 %v7822_v38  ;;  %v13064_v38 = vld [vmem:[#allocation2 + $0x90] sm:$0xff] }
 0x7aa   : > { %9107 = vrot.lane.b32.xlu1 %v9106_v28, %s9288_s24 }
 0x7ac   : > { %9082 = vrot.lane.b32.xlu2 %v9081_v20, %s9288_s24 }
 0x7af   : > { %9087 = vrot.lane.b32.xlu0 %v9086_v4, %s9288_s24 }
 0x7b7   : > { %9102 = vrot.lane.b32.xlu0 %v9101_v34, %s9288_s24 }
 0x7b9   : > { %v8963_v52 = vpop.permute.xlu1 %8962 }
 0x7ba   : > { %v8964_v54 = vunpack.i.l.bf16 %v8963_v52  ;;  %v8965_v19 = vunpack.i.h.bf16 %v8963_v52  ;;  %v12992_v52 = vld [vmem:[#allocation2 + $0xd8] sm:$0xff] }
 0x7bc   : > { %v6561_v3 = vsel %vm191_vm0, %v5761_v59, %v8964_v54  ;;  %v6586_v51 = vsel %vm191_vm0, %v12948_v9, %v8965_v19 }
 0x7bd   : > { %6801 = vmatmul.f32.vlgmr.msra.gmra.mxu0 %v6561_v3  ;;  %v7806_v3 = vld [vmem:[%s13722_s2 + $0x7e8] sm:$0xff] }
 0x7be   : > { %7021 = vmatpush.msrb.mxu2 %v7806_v3 }
 0x7bf   : > { %9117 = vrot.lane.b32.xlu0 %v9116_v55, %s9288_s24  ;;  %v7821_v55 = vld [vmem:[%s13722_s2 + $0x860] sm:$0xff] }
 0x7c0   : > { %7135 = vmatpush.msrb.mxu3 %v7821_v55 }
 0x7c6   : > { %v12936_v33 = vpop.permute.xlu2 %8972 }
 0x7c7   : > { %v8974_v58 = vunpack.i.l.bf16 %v12936_v33  ;;  %v8975_v41 = vunpack.i.h.bf16 %v12936_v33  ;;  %v7805_v33 = vld [vmem:[%s13722_s2 + $0x7e0] sm:$0xff] }
 0x7c8   : > { %7022 = vmatpush.msrb.mxu2 %v7805_v33 }
 0x7c9   : > { %v6562_v28 = vsel %vm191_vm0, %v5762_v46, %v8974_v58  ;;  %v6587_v42 = vsel %vm191_vm0, %v5787_v11, %v8975_v41 }
 0x7ca   : > { %6804 = vmatmul.f32.gmra.mxu0 %v6562_v28  ;;  %v7835_v28 = vld [vmem:[%s13722_s2 + $0x8d0] sm:$0xff]  ;;  %7023 = vmatpush.msrb.mxu2 %v7804_v53  ;;  %v7834_v53 = vld [vmem:[%s13722_s2 + $0x8c8] sm:$0xff] }
 0x7ce   : > { %v8978_v59 = vpop.permute.xlu2 %8977 }
 0x7d4   : > { %v8968_v35 = vpop.permute.xlu1 %8967 }
 0x7d9   : > { %v8953_v15 = vpop.permute.xlu0 %8952 }
 0x7da   : > { %v8955_v21 = vunpack.i.h.bf16 %v8953_v15  ;;  %v8954_v23 = vunpack.i.l.bf16 %v8953_v15  ;;  %v12988_v15 = vld [vmem:[#allocation2 + $0xaa] sm:$0xff] }
 0x7db   : > { %v9121_v54 = vpack.i.bf16 %v12642_v56, %v12988_v15  ;;  %v7836_v56 = vld [vmem:[%s13722_s2 + $0x8d8] sm:$0xff] }
 0x7dc   : > { %v6577_v13 = vsel %vm191_vm0, %v12929_v26, %v8954_v23  ;;  %v6585_v4 = vsel %vm191_vm0, %v5785_v5, %v8955_v21  ;;  %v12990_v5 = vld [vmem:[#allocation2 + $0x82] sm:$0xff]  ;;  %v8970_v21 = vunpack.i.h.bf16 %v8968_v35  ;;  %v8969_v23 = vunpack.i.l.bf16 %v8968_v35  ;;  %7249 = vmatpush.msrb.mxu0 %v7836_v56  ;;  %v7820_v35 = vld [vmem:[%s13722_s2 + $0x858] sm:$0xff] }
 0x7dd   : > { %6849 = vmatmul.f32.vlgmr.msra.gmra.mxu2 %v6577_v13  ;;  %6873 = vmatmul.f32.vlgmr.msra.gmra.mxu3 %v6585_v4  ;;  %v9096_v13 = vpack.i.bf16 %v12990_v5, %v12983_v12  ;;  %v7791_v4 = vld [vmem:[%s13722_s2 + $0x770] sm:$0xff]  ;;  %v13069_v56 = vld [vmem:[#allocation2 + $0xc2] sm:$0xff] }
 0x7de   : > { %6907 = vmatpush.msrb.mxu1 %v7791_v4  ;;  %9122 = vrot.lane.b32.xlu1 %v9121_v54, %s9288_s24  ;;  %v6570_v19 = vsel %vm191_vm0, %v12831_v17, %v8969_v23  ;;  %v6579_v58 = vsel %vm191_vm0, %v12992_v52, %v8970_v21  ;;  %v7788_v21 = vld [vmem:[%s13722_s2 + $0x758] sm:$0xff]  ;;  %v7803_v23 = vld [vmem:[%s13722_s2 + $0x7d0] sm:$0xff]  ;;  %v9131_v54 = vpack.i.bf16 %v13043_v40, %v12654_v27 }
 0x7df   : > { %9097 = vrot.lane.b32.xlu2 %v9096_v13, %s9288_s24  ;;  %7250 = vmatpush.msrb.mxu0 %v7835_v28  ;;  %v7819_v27 = vld [vmem:[%s13722_s2 + $0x850] sm:$0xff] }
 0x7e0   : > { %6908 = vmatpush.msrb.mxu1 %v7790_v47  ;;  %7136 = vmatpush.msrb.mxu3 %v7820_v35  ;;  %v13071_v47 = vld [vmem:[#allocation2 + $0x9a] sm:$0xff] }
 0x7e1   : > { %v8958_v34 = vpop.permute.xlu0 %8957  ;;  %9132 = vrot.lane.b32.xlu0 %v9131_v54, %s9288_s24  ;;  %7024 = vmatpush.msrb.mxu2 %v7803_v23 }
 0x7e2   : > { %v8960_v6 = vunpack.i.h.bf16 %v8958_v34  ;;  %v8959_v48 = vunpack.i.l.bf16 %v8958_v34  ;;  %v8980_v34 = vunpack.i.h.bf16 %v8978_v59  ;;  %6909 = vmatpush.msrb.mxu1 %v7789_v63  ;;  %7137 = vmatpush.msrb.mxu3 %v7819_v27 }
 0x7e3   : > { %7251 = vmatpush.msrb.mxu0 %v7834_v53 }
 0x7e4   : > { %v6569_v20 = vsel %vm191_vm0, %v12898_v36, %v8959_v48  ;;  %v6578_v8 = vsel %vm191_vm0, %v12973_v29, %v8960_v6  ;;  %v8979_v6 = vunpack.i.l.bf16 %v8978_v59  ;;  %v13035_v48 = vld [vmem:[#allocation2 + $0xe0] sm:$0xff]  ;;  %6910 = vmatpush.msrb.mxu1 %v7788_v21 }
 0x7e5   : > { %6825 = vmatmul.f32.vlgmr.msra.gmra.mxu1 %v6569_v20  ;;  %6852 = vmatmul.f32.gmra.mxu2 %v6578_v8  ;;  %v13051_v59 = vld [vmem:[#allocation2 + $0x140] sm:$0xff]  ;;  %v6580_v4 = vsel %vm191_vm0, %v13035_v48, %v8980_v34  ;;  %v13091_v34 = vld [vmem:[#allocation2 + $0x150] sm:$0xff] }
 0x7e6   : > { %6876 = vmatmul.f32.gmra.mxu3 %v6586_v51  ;;  %v8993_v51 = vpop.permute.xlu2 %8992  ;;  %v6571_v13 = vsel %vm191_vm0, %v12983_v12, %v8979_v6  ;;  %v7801_v6 = vld [vmem:[%s13722_s2 + $0x7c0] sm:$0xff] }
 0x7e7   : > { %v8994_v8 = vunpack.i.l.bf16 %v8993_v51  ;;  %v8995_v55 = vunpack.i.h.bf16 %v8993_v51  ;;  %v7785_v21 = vld [vmem:[%s13722_s2 + $0x740] sm:$0xff] }
 0x7e9   : > { %v8983_v62 = vpop.permute.xlu0 %8982  ;;  %v6564_v41 = vsel %vm191_vm0, %v12772_v37, %v8994_v8  ;;  %v9136_v37 = vpack.i.bf16 %v12659_v0, %v13069_v56  ;;  %v7818_v0 = vld [vmem:[%s13722_s2 + $0x848] sm:$0xff]  ;;  %v6589_v28 = vsel %vm191_vm0, %v13091_v34, %v8995_v55  ;;  %v7817_v8 = vld [vmem:[%s13722_s2 + $0x840] sm:$0xff]  ;;  %v13139_v55 = vld [vmem:[#allocation2 + $0xb2] sm:$0xff] }
 0x7ea   : > { %v8984_v39 = vunpack.i.l.bf16 %v8983_v62  ;;  %v8985_v20 = vunpack.i.h.bf16 %v8983_v62  ;;  %7138 = vmatpush.msrb.mxu3 %v7818_v0 }
 0x7eb   : > { %9137 = vrot.lane.b32.xlu1 %v9136_v37, %s9288_s24  ;;  %v13122_v37 = vld [vmem:[#allocation2 + $0x158] sm:$0xff] }
 0x7ec   : > { %v6563_v46 = vsel %vm191_vm0, %v12780_v30, %v8984_v39  ;;  %v8988_v30 = vpop.permute.xlu1 %8987  ;;  %v6588_v3 = vsel %vm191_vm0, %v13051_v59, %v8985_v20  ;;  %v7787_v39 = vld [vmem:[%s13722_s2 + $0x750] sm:$0xff]  ;;  %7139 = vmatpush.msrb.mxu3 %v7817_v8  ;;  %v13147_v8 = vld [vmem:[#allocation2 + $0x168] sm:$0xff] }
 0x7ed   : > { %6828 = vmatmul.f32.gmra.mxu1 %v6570_v19  ;;  %6855 = vmatmul.f32.gmra.mxu2 %v6579_v58  ;;  %v8990_v11 = vunpack.i.h.bf16 %v8988_v30  ;;  %v8989_v33 = vunpack.i.l.bf16 %v8988_v30  ;;  %v9111_v58 = vpack.i.bf16 %v13071_v47, %v13064_v38  ;;  %v7786_v30 = vld [vmem:[%s13722_s2 + $0x748] sm:$0xff] }
 0x7ee   : > { %6879 = vmatmul.f32.gmra.mxu3 %v6587_v42  ;;  %6807 = vmatmul.f32.gmra.mxu0 %v6563_v46  ;;  %v7802_v42 = vld [vmem:[%s13722_s2 + $0x7c8] sm:$0xff]  ;;  %v13083_v46 = vld [vmem:[#allocation2 + $0xf0] sm:$0xff] }
 0x7ef   : > { %6911 = vmatpush.msrb.mxu1 %v7787_v39  ;;  %9112 = vrot.lane.b32.xlu2 %v9111_v58, %s9288_s24  ;;  %v6572_v51 = vsel %vm191_vm0, %v12893_v57, %v8989_v33  ;;  %v6581_v35 = vsel %vm191_vm0, %v13083_v46, %v8990_v11  ;;  %v13120_v11 = vld [vmem:[#allocation2 + $0xf8] sm:$0xff] }
 0x7f0   : > { %7025 = vmatpush.msrb.mxu2 %v7802_v42  ;;  %v13135_v39 = vld [vmem:[#allocation2 + $0xda] sm:$0xff]  ;;  %v13137_v42 = vld [vmem:[#allocation2 + $0xf1] sm:$0xff] }
 0x7f1   : > { %v8998_v62 = vpop.permute.xlu0 %8997  ;;  %6912 = vmatpush.msrb.mxu1 %v7786_v30  ;;  %v9151_v30 = vpack.i.bf16 %v13137_v42, %v13135_v39 }
 0x7f2   : > { %7026 = vmatpush.msrb.mxu2 %v7801_v6  ;;  %v9000_v23 = vunpack.i.h.bf16 %v8998_v62  ;;  %v8999_v54 = vunpack.i.l.bf16 %v8998_v62 }
 0x7f3   : > { %6913 = vmatpush.msrb.mxu1 %v7785_v21  ;;  %9152 = vrot.lane.b32.xlu1 %v9151_v30, %s9288_s24 }
 0x7f4   : > { %v9003_v19 = vpop.permute.xlu1 %9002  ;;  %v6573_v62 = vsel %vm191_vm0, %v13064_v38, %v8999_v54  ;;  %v6582_v58 = vsel %vm191_vm0, %v13120_v11, %v9000_v23 }
 0x7f5   : > { %6831 = vmatmul.f32.gmra.mxu1 %v6571_v13  ;;  %6858 = vmatmul.f32.gmra.mxu2 %v6580_v4  ;;  %v9004_v63 = vunpack.i.l.bf16 %v9003_v19  ;;  %v9008_v13 = vpop.permute.xlu2 %9007  ;;  %v9005_v27 = vunpack.i.h.bf16 %v9003_v19  ;;  %v13133_v19 = vld [vmem:[#allocation2 + $0xa8] sm:$0xff] }
 0x7f6   : > { %6882 = vmatmul.f32.gmra.mxu3 %v6588_v3  ;;  %6810 = vmatmul.f32.gmra.mxu0 %v6564_v41  ;;  %v7833_v3 = vld [vmem:[%s13722_s2 + $0x8c0] sm:$0xff]  ;;  %v9146_v41 = vpack.i.bf16 %v12973_v29, %v12684_v10  ;;  %v9009_v0 = vunpack.i.l.bf16 %v9008_v13 }
 0x7f7   : > { %v6565_v20 = vsel %vm191_vm0, %v12800_v43, %v9004_v63  ;;  %7252 = vmatpush.msrb.mxu0 %v7833_v3  ;;  %v6590_v10 = vsel %vm191_vm0, %v13122_v37, %v9005_v27  ;;  %v9010_v63 = vunpack.i.h.bf16 %v9008_v13  ;;  %v13159_v27 = vld [vmem:[#allocation2 + $0xf9] sm:$0xff] }
 0x7f8   : > { %9147 = vrot.lane.b32.xlu0 %v9146_v41, %s9288_s24  ;;  %v6574_v21 = vsel %vm191_vm0, %v12963_v2, %v9009_v0 }
 0x7f9   : > { %v9013_v4 = vpop.permute.xlu0 %9012 }
 0x7fa   : > { %v9014_v33 = vunpack.i.l.bf16 %v9013_v4 }
 0x7fc   : > { %v6566_v29 = vsel %vm191_vm0, %v12795_v49, %v9014_v33  ;;  %v9018_v53 = vpop.permute.xlu1 %9017 }
 0x7fd   : > { %6834 = vmatmul.f32.gmra.mxu1 %v6572_v51  ;;  %6861 = vmatmul.f32.gmra.mxu2 %v6581_v35  ;;  %v9023_v6 = vpop.permute.xlu2 %9022  ;;  %v9126_v51 = vpack.i.bf16 %v13139_v55, %v13133_v19  ;;  %v9015_v35 = vunpack.i.h.bf16 %v9013_v4  ;;  %v9020_v4 = vunpack.i.h.bf16 %v9018_v53  ;;  %v9019_v3 = vunpack.i.l.bf16 %v9018_v53 }
 0x7fe   : > { %6885 = vmatmul.f32.gmra.mxu3 %v6589_v28  ;;  %6813 = vmatmul.f32.gmra.mxu0 %v6565_v20  ;;  %v13145_v28 = vld [vmem:[#allocation2 + $0x108] sm:$0xff]  ;;  %v9024_v20 = vunpack.i.l.bf16 %v9023_v6  ;;  %v9025_v33 = vunpack.i.h.bf16 %v9023_v6 }
 0x7ff   : > { %9127 = vrot.lane.b32.xlu2 %v9126_v51, %s9288_s24  ;;  %v6583_v23 = vsel %vm191_vm0, %v13145_v28, %v9010_v63  ;;  %v6591_v54 = vsel %vm191_vm0, %v13147_v8, %v9015_v35  ;;  %v6575_v63 = vsel %vm191_vm0, %v13133_v19, %v9019_v3  ;;  %v13178_v51 = vld [vmem:[#allocation2 + $0xca] sm:$0xff] }
 0x800   : > { %v6567_v13 = vsel %vm191_vm0, %v12841_v31, %v9024_v20 }
 0x801   : > { %v9028_v53 = vpop.permute.xlu0 %9027 }
 0x802   : > { %v9030_v35 = vunpack.i.h.bf16 %v9028_v53  ;;  %v9029_v20 = vunpack.i.l.bf16 %v9028_v53 }
 0x804   : > { %v9033_v41 = vpop.permute.xlu1 %9032 }
 0x805   : > { %6837 = vmatmul.f32.gmra.mxu1 %v6573_v62  ;;  %6864 = vmatmul.f32.gmra.mxu2 %v6582_v58  ;;  %v13161_v62 = vld [vmem:[#allocation2 + $0x110] sm:$0xff]  ;;  %v9034_v58 = vunpack.i.l.bf16 %v9033_v41 }
 0x806   : > { %6888 = vmatmul.f32.gmra.mxu3 %v6590_v10  ;;  %6816 = vmatmul.f32.gmra.mxu0 %v6566_v29  ;;  %v9161_v10 = vpack.i.bf16 %v13035_v48, %v13159_v27  ;;  %v13165_v29 = vld [vmem:[#allocation2 + $0x170] sm:$0xff]  ;;  %v6584_v0 = vsel %vm191_vm0, %v13161_v62, %v9020_v4  ;;  %v6576_v4 = vsel %vm191_vm0, %v13043_v40, %v9029_v20  ;;  %v13205_v20 = vld [vmem:[#allocation2 + $0x121] sm:$0xff] }
 0x807   : > { %v6592_v6 = vsel %vm191_vm0, %v13165_v29, %v9025_v33  ;;  %v6568_v30 = vsel %vm191_vm0, %v12811_v24, %v9034_v58  ;;  %v13176_v48 = vld [vmem:[#allocation2 + $0xf2] sm:$0xff]  ;;  %v9038_v33 = vpop.permute.xlu2 %9037 }
 0x808   : > { %9162 = vrot.lane.b32.xlu0 %v9161_v10, %s9288_s24 }
 0x809   : > { %v9043_v10 = vpop.permute.xlu0 %9042 }
 0x80d   : > { %6840 = vmatmul.f32.gmra.mxu1 %v6574_v21  ;;  %6867 = vmatmul.f32.gmra.mxu2 %v6583_v23  ;;  %v9166_v21 = vpack.i.bf16 %v12733_v7, %v13176_v48  ;;  %v9141_v23 = vpack.i.bf16 %v13178_v51, %v12929_v26  ;;  %v9040_v7 = vunpack.i.h.bf16 %v9038_v33  ;;  %v9039_v26 = vunpack.i.l.bf16 %v9038_v33 }
 0x80e   : > { %6891 = vmatmul.f32.gmra.mxu3 %v6591_v54  ;;  %6819 = vmatmul.f32.gmra.mxu0 %v6567_v13  ;;  %v9035_v54 = vunpack.i.h.bf16 %v9033_v41  ;;  %v5889_v13 = vld [vmem:[#allocation2 + $0x19] sm:$0xff]  ;;  %v13193_v41 = vld [vmem:[#allocation2 + $0x111] sm:$0xff] }
 0x80f   : > { %9167 = vrot.lane.b32.xlu1 %v9166_v21, %s9288_s24  ;;  %9142 = vrot.lane.b32.xlu2 %v9141_v23, %s9288_s24  ;;  %v6625_v3 = vsel %vm191_vm0, %v5889_v13, %v9030_v35  ;;  %v9176_v53 = vpack.i.bf16 %v13120_v11, %v13193_v41  ;;  %v13207_v21 = vld [vmem:[#allocation2 + $0xe2] sm:$0xff]  ;;  %v9045_v13 = vunpack.i.h.bf16 %v9043_v10  ;;  %v9053_v33 = vpop.permute.xlu2 %9052 }
 0x810   : > { %v6657_v58 = vsel %vm191_vm0, %v12800_v43, %v9035_v54  ;;  %v5891_v54 = vld [vmem:[#allocation2 + $0x31] sm:$0xff] }
 0x811   : > { %9177 = vrot.lane.b32.xlu0 %v9176_v53, %s9288_s24  ;;  %v5892_v53 = vld [vmem:[#allocation2 + $0x39] sm:$0xff] }
 0x815   : > { %6843 = vmatmul.f32.gmra.mxu1 %v6575_v63  ;;  %6870 = vmatmul.f32.gmra.mxu2 %v6584_v0  ;;  %v9044_v63 = vunpack.i.l.bf16 %v9043_v10  ;;  %v5825_v0 = vld [vmem:[#allocation2 + $0x2] sm:$0xff] }
 0x816   : > { %6894 = vmatmul.f32.gmra.mxu3 %v6592_v6  ;;  %6822 = vmatmul.f32.gmra.mxu0 %v6568_v30  ;;  %v6593_v43 = vsel %vm191_vm0, %v5825_v0, %v9039_v26  ;;  %v6626_v6 = vsel %vm191_vm0, %v12702_v50, %v9040_v7  ;;  %v9048_v30 = vpop.permute.xlu1 %9047  ;;  %v9058_v26 = vpop.permute.xlu0 %9057  ;;  %v9054_v0 = vunpack.i.l.bf16 %v9053_v33 }
 0x817   : > { %v6658_v35 = vsel %vm191_vm0, %v12795_v49, %v9044_v63  ;;  %v9049_v11 = vunpack.i.l.bf16 %v9048_v30  ;;  %v9050_v23 = vunpack.i.h.bf16 %v9048_v30  ;;  %v9156_v49 = vpack.i.bf16 %v13207_v21, %v12992_v52  ;;  %v13223_v52 = vld [vmem:[#allocation2 + $0x129] sm:$0xff] }
 0x818   : > { %v9055_v63 = vunpack.i.h.bf16 %v9053_v33  ;;  %v9059_v10 = vunpack.i.l.bf16 %v9058_v26 }
 0x819   : > { %9157 = vrot.lane.b32.xlu2 %v9156_v49, %s9288_s24 }
 0x81d   : > { %6846 = vmatmul.f32.gmra.mxu1 %v6576_v4  ;;  %7027 = vmatmul.f32.vlgmr.msrb.gmra.mxu2 %v6625_v3  ;;  %v5826_v4 = vld [vmem:[#allocation2 + $0xa] sm:$0xff]  ;;  %v6627_v3 = vsel %vm191_vm0, %v5891_v54, %v9049_v11  ;;  %v13235_v11 = vld [vmem:[#allocation2 + $0x139] sm:$0xff]  ;;  %v9060_v54 = vunpack.i.h.bf16 %v9058_v26 }
 0x81e   : > { %7140 = vmatmul.f32.vlgmr.msrb.gmra.mxu3 %v6657_v58  ;;  %7841 = vmatmul.msk.f32.vlgmr.msrb.gmra.mxu0 %vm191_vm0, %v12777_v14  ;;  %v13203_v14 = vld [vmem:[#allocation2 + $0x10a] sm:$0xff]  ;;  %v6659_v58 = vsel %vm191_vm0, %v12841_v31, %v9050_v23  ;;  %v6594_v7 = vsel %vm191_vm0, %v5826_v4, %v9045_v13  ;;  %v6595_v31 = vsel %vm191_vm0, %v12752_v16, %v9054_v0  ;;  %v9063_v30 = vpop.permute.xlu1 %9062  ;;  %v9068_v13 = vpop.permute.xlu2 %9067  ;;  %v5829_v26 = vld [vmem:[#allocation2 + $0x32] sm:$0xff] }
 0x81f   : > { %v9181_v50 = vpack.i.bf16 %v13205_v20, %v13203_v14  ;;  %v9065_v16 = vunpack.i.h.bf16 %v9063_v30  ;;  %v9073_v33 = vpop.permute.xlu0 %9072 }
 0x821   : > { %9182 = vrot.lane.b32.xlu1 %v9181_v50, %s9288_s24  ;;  %v13237_v50 = vld [vmem:[#allocation2 + $0xfa] sm:$0xff]  ;;  %v6661_v4 = vsel %vm191_vm0, %v12898_v36, %v9065_v16 }
 0x825   : > { %6914 = vmatmul.f32.vlgmr.msrb.gmra.mxu1 %v6593_v43  ;;  %7030 = vmatmul.f32.gmra.mxu2 %v6626_v6  ;;  %v9191_v43 = vpack.i.bf16 %v13161_v62, %v13223_v52  ;;  %v6628_v6 = vsel %vm191_vm0, %v5892_v53, %v9055_v63  ;;  %v9064_v62 = vunpack.i.l.bf16 %v9063_v30  ;;  %v5894_v63 = vld [vmem:[#allocation2 + $0x51] sm:$0xff] }
 0x826   : > { %7143 = vmatmul.f32.gmra.mxu3 %v6658_v35  ;;  %7842 = vmatmul.msk.f32.gmra.mxu0 %vm191_vm0, %v12802_v32  ;;  %v6660_v35 = vsel %vm191_vm0, %v12811_v24, %v9059_v10  ;;  %v9171_v24 = vpack.i.bf16 %v13237_v50, %v13083_v46  ;;  %v9069_v46 = vunpack.i.l.bf16 %v9068_v13  ;;  %v9078_v10 = vpop.permute.xlu1 %9077 }
 0x827   : > { %9192 = vrot.lane.b32.xlu0 %v9191_v43, %s9288_s24  ;;  %v6629_v49 = vsel %vm191_vm0, %v12764_v25, %v9064_v62  ;;  %v13255_v25 = vld [vmem:[#allocation2 + $0x141] sm:$0xff]  ;;  %v13266_v43 = vld [vmem:[#allocation2 + $0x151] sm:$0xff]  ;;  %v9080_v30 = vunpack.i.h.bf16 %v9078_v10  ;;  %v9075_v62 = vunpack.i.h.bf16 %v9073_v33 }
 0x828   : > { %9172 = vrot.lane.b32.xlu2 %v9171_v24, %s9288_s24  ;;  %v6597_v0 = vsel %vm191_vm0, %v5829_v26, %v9069_v46 }
 0x829   : > { %v6663_v24 = vsel %vm191_vm0, %v12983_v12, %v9080_v30 }
 0x82d   : > { %6917 = vmatmul.f32.gmra.mxu1 %v6594_v7  ;;  %7033 = vmatmul.f32.gmra.mxu2 %v6627_v3  ;;  %v6596_v3 = vsel %vm191_vm0, %v12782_v45, %v9060_v54  ;;  %v9074_v7 = vunpack.i.l.bf16 %v9073_v33  ;;  %v9206_v45 = vpack.i.bf16 %v12948_v9, %v13255_v25  ;;  %v6598_v54 = vsel %vm191_vm0, %v12802_v32, %v9075_v62  ;;  %v5896_v33 = vld [vmem:[#allocation2 + $0x69] sm:$0xff] }
 0x82e   : > { %7146 = vmatmul.f32.gmra.mxu3 %v6659_v58  ;;  %7843 = vmatmul.msk.f32.gmra.mxu0 %vm191_vm0, %v12797_v1  ;;  %v13233_v1 = vld [vmem:[#allocation2 + $0x122] sm:$0xff]  ;;  %v9070_v58 = vunpack.i.h.bf16 %v9068_v13 }
 0x82f   : > { %v9196_v23 = vpack.i.bf16 %v13235_v11, %v13233_v1  ;;  %v6662_v53 = vsel %vm191_vm0, %v12831_v17, %v9074_v7  ;;  %9207 = vrot.lane.b32.xlu0 %v9206_v45, %s9288_s24  ;;  %v9093_v7 = vpop.permute.xlu1 %9092 }
 0x830   : > { %v6630_v36 = vsel %vm191_vm0, %v5894_v63, %v9070_v58  ;;  %v13285_v58 = vld [vmem:[#allocation2 + $0x159] sm:$0xff]  ;;  %v9094_v45 = vunpack.i.l.bf16 %v9093_v7 }
 0x831   : > { %9197 = vrot.lane.b32.xlu1 %v9196_v23, %s9288_s24  ;;  %v9083_v23 = vpop.permute.xlu2 %9082  ;;  %v9221_v32 = vpack.i.bf16 %v13051_v59, %v13285_v58  ;;  %v13294_v63 = vld [vmem:[#allocation2 + $0x152] sm:$0xff] }
 0x832   : > { %v9084_v13 = vunpack.i.l.bf16 %v9083_v23 }
 0x835   : > { %6920 = vmatmul.f32.gmra.mxu1 %v6595_v31  ;;  %7036 = vmatmul.f32.gmra.mxu2 %v6628_v6  ;;  %v13268_v31 = vld [vmem:[#allocation2 + $0x112] sm:$0xff]  ;;  %v9079_v6 = vunpack.i.l.bf16 %v9078_v10  ;;  %v13304_v10 = vld [vmem:[#allocation2 + $0x12a] sm:$0xff] }
 0x836   : > { %7149 = vmatmul.f32.gmra.mxu3 %v6660_v35  ;;  %7844 = vmatmul.msk.f32.gmra.mxu0 %vm191_vm0, %v12843_v61  ;;  %v9186_v17 = vpack.i.bf16 %v13268_v31, %v13145_v28  ;;  %v5895_v35 = vld [vmem:[#allocation2 + $0x61] sm:$0xff]  ;;  %v9085_v28 = vunpack.i.h.bf16 %v9083_v23 }
 0x837   : > { %v6631_v16 = vsel %vm191_vm0, %v5895_v35, %v9079_v6  ;;  %9222 = vrot.lane.b32.xlu0 %v9221_v32, %s9288_s24 }
 0x838   : > { %9187 = vrot.lane.b32.xlu2 %v9186_v17, %s9288_s24  ;;  %v6632_v12 = vsel %vm191_vm0, %v5896_v33, %v9085_v28 }
 0x839   : > { %v9098_v30 = vpop.permute.xlu2 %9097 }
 0x83a   : > { %v13313_v62 = vpop.f32.mrf.mxu0  ;;  %v9099_v28 = vunpack.i.l.bf16 %v9098_v30 }
 0x83d   : > { %6923 = vmatmul.f32.gmra.mxu1 %v6596_v3  ;;  %7039 = vmatmul.f32.gmra.mxu2 %v6629_v49  ;;  %v9088_v49 = vpop.permute.xlu0 %9087  ;;  %v5831_v3 = vld [vmem:[#allocation2 + $0x4a] sm:$0xff] }
 0x83e   : > { %7152 = vmatmul.f32.gmra.mxu3 %v6661_v4  ;;  %7845 = vmatmul.msk.f32.gmra.mxu0 %vm191_vm0, %v12813_v44  ;;  %v13264_v44 = vld [vmem:[#allocation2 + $0x13a] sm:$0xff]  ;;  %v9089_v4 = vunpack.i.l.bf16 %v9088_v49  ;;  %v6599_v46 = vsel %vm191_vm0, %v5831_v3, %v9084_v13 }
 0x83f   : > { %v9211_v9 = vpack.i.bf16 %v13266_v43, %v13264_v44 }
 0x840   : > { %v6664_v26 = vsel %vm191_vm0, %v12893_v57, %v9089_v4  ;;  %v9095_v57 = vunpack.i.h.bf16 %v9093_v7  ;;  %v5898_v4 = vld [vmem:[#allocation2 + $0x81] sm:$0xff] }
 0x841   : > { %9212 = vrot.lane.b32.xlu1 %v9211_v9, %s9288_s24  ;;  %v9090_v9 = vunpack.i.h.bf16 %v9088_v49  ;;  %v9100_v49 = vunpack.i.h.bf16 %v9098_v30  ;;  %v5899_v30 = vld [vmem:[#allocation2 + $0x91] sm:$0xff] }
 0x842   : > { %v6665_v35 = vsel %vm191_vm0, %v13064_v38, %v9095_v57  ;;  %v5833_v38 = vld [vmem:[#allocation2 + $0x62] sm:$0xff]  ;;  %v13337_v57 = vld [vmem:[#allocation2 + $0x16a] sm:$0xff] }
 0x843   : > { %v6600_v23 = vsel %vm191_vm0, %v12843_v61, %v9090_v9  ;;  %v13324_v61 = vld [vmem:[#allocation2 + $0x171] sm:$0xff]  ;;  %v6634_v32 = vsel %vm191_vm0, %v5898_v4, %v9100_v49 }
 0x844   : > { %v9236_v7 = vpack.i.bf16 %v13122_v37, %v13324_v61  ;;  %v13347_v37 = vld [vmem:[#allocation2 + $0x142] sm:$0xff] }
 0x845   : > { %6926 = vmatmul.f32.gmra.mxu1 %v6597_v0  ;;  %7042 = vmatmul.f32.gmra.mxu2 %v6630_v36  ;;  %v13296_v0 = vld [vmem:[#allocation2 + $0x169] sm:$0xff]  ;;  %v13298_v36 = vld [vmem:[#allocation2 + $0x120] sm:$0xff] }
 0x846   : > { %7155 = vmatmul.f32.gmra.mxu3 %v6662_v53  ;;  %7846 = vmatmul.msk.f32.gmra.mxu0 %vm191_vm0, %v12911_v18  ;;  %v9226_v59 = vpack.i.bf16 %v13296_v0, %v13294_v63  ;;  %v5897_v53 = vld [vmem:[#allocation2 + $0x79] sm:$0xff]  ;;  %v9201_v6 = vpack.i.bf16 %v13304_v10, %v13298_v36 }
 0x847   : > { %v6633_v17 = vsel %vm191_vm0, %v5897_v53, %v9094_v45  ;;  %9237 = vrot.lane.b32.xlu0 %v9236_v7, %s9288_s24 }
 0x848   : > { %9202 = vrot.lane.b32.xlu2 %v9201_v6, %s9288_s24  ;;  %v13341_v6 = vld [vmem:[#allocation2 + $0x138] sm:$0xff] }
 0x849   : > { %9227 = vrot.lane.b32.xlu1 %v9226_v59, %s9288_s24  ;;  %v13334_v59 = vpop.f32.mrf.mxu0  ;;  %v9113_v4 = vpop.permute.xlu2 %9112 }
 0x84d   : > { %6929 = vmatmul.f32.gmra.mxu1 %v6598_v54  ;;  %7045 = vmatmul.f32.gmra.mxu2 %v6631_v16  ;;  %v5622_v16 = vld [vmem:[#allocation3 + $0xf0] sm:$0xff] }
 0x84e   : > { %7158 = vmatmul.f32.gmra.mxu3 %v6663_v24  ;;  %7847 = vmatmul.msk.f32.gmra.mxu0 %vm191_vm0, %v12839_v22  ;;  %v9103_v24 = vpop.permute.xlu0 %9102  ;;  %v5727_v54 = vmax.f32 %v5622_v16, 0.0  ;;  %v5623_v16 = vld [vmem:[#allocation3 + $0xf8] sm:$0xff] }
 0x84f   : > { %v9104_v13 = vunpack.i.l.bf16 %v9103_v24  ;;  %v5728_v49 = vmax.f32 %v5623_v16, 0.0 }
 0x850   : > { %5759 = vst.msk [vmem:[#allocation2 + $0x181] sm:$0xff] %vm191_vm0, %v5727_v54 }
 0x851   : > { %v6666_v45 = vsel %vm191_vm0, %v12963_v2, %v9104_v13  ;;  %5760 = vst.msk [vmem:[#allocation2 + $0x189] sm:$0xff] %vm191_vm0, %v5728_v49 }
 0x855   : > { %6932 = vmatmul.f32.gmra.mxu1 %v6599_v46  ;;  %7048 = vmatmul.f32.gmra.mxu2 %v6632_v12  ;;  %v6601_v12 = vsel %vm191_vm0, %v5833_v38, %v9099_v28 }
 0x856   : > { %7161 = vmatmul.f32.gmra.mxu3 %v6664_v26  ;;  %7848 = vmatmul.msk.f32.gmra.mxu0 %vm191_vm0, %v12990_v5  ;;  %v9108_v26 = vpop.permute.xlu1 %9107  ;;  %v9118_v7 = vpop.permute.xlu0 %9117 }
 0x857   : > { %v13339_v53 = vld [vmem:[#allocation2 + $0x181] sm:$0xff]  ;;  %v9109_v9 = vunpack.i.l.bf16 %v9108_v26 }
 0x858   : > { %13883 = vst [vmem:[#allocation20_spill] sm:$0xff] %v13339_v53  ;;  %v9241_v2 = vpack.i.bf16 %v13339_v53, %v13337_v57 }
 0x859   : > { %v6635_v38 = vsel %vm191_vm0, %v5899_v30, %v9109_v9  ;;  %v9119_v9 = vunpack.i.l.bf16 %v9118_v7 }
 0x85a   : > { %9242 = vrot.lane.b32.xlu1 %v9241_v2, %s9288_s24  ;;  %v5900_v2 = vld [vmem:[#allocation2 + $0x99] sm:$0xff] }
 0x85d   : > { %6935 = vmatmul.f32.gmra.mxu1 %v6600_v23  ;;  %7051 = vmatmul.f32.gmra.mxu2 %v6633_v17  ;;  %v9110_v17 = vunpack.i.h.bf16 %v9108_v26  ;;  %v9105_v23 = vunpack.i.h.bf16 %v9103_v24  ;;  %v9115_v26 = vunpack.i.h.bf16 %v9113_v4 }
 0x85e   : > { %7164 = vmatmul.f32.gmra.mxu3 %v6665_v35  ;;  %7849 = vmatmul.msk.f32.gmra.mxu0 %vm191_vm0, %v12909_v60  ;;  %v9216_v35 = vpack.i.bf16 %v13347_v37, %v13341_v6  ;;  %v9123_v49 = vpop.permute.xlu1 %9122 }
 0x85f   : > { %v6636_v16 = vsel %vm191_vm0, %v5900_v2, %v9115_v26  ;;  %v9125_v26 = vunpack.i.h.bf16 %v9123_v49 }
 0x860   : > { %v13320_v3 = vpop.f32.mrf.mxu2  ;;  %v13322_v33 = vpop.f32.mrf.mxu3  ;;  %9217 = vrot.lane.b32.xlu2 %v9216_v35, %s9288_s24 }
 0x861   : > { %13881 = vst [vmem:[#allocation15_spill] sm:$0xff] %v13320_v3 }
 0x862   : > { %13882 = vst [vmem:[#allocation17_spill] sm:$0xff] %v13322_v33  ;;  %v13326_v46 = vpop.f32.mrf.mxu1 }
 0x865   : > { %6938 = vmatmul.f32.gmra.mxu1 %v6601_v12  ;;  %7054 = vmatmul.f32.gmra.mxu2 %v6634_v32  ;;  %v6667_v12 = vsel %vm191_vm0, %v13133_v19, %v9110_v17  ;;  %v6602_v32 = vsel %vm191_vm0, %v12911_v18, %v9105_v23  ;;  %v13373_v19 = vld [vmem:[#allocation2 + $0x189] sm:$0xff] }
 0x866   : > { %7167 = vmatmul.f32.gmra.mxu3 %v6666_v45  ;;  %7850 = vmatmul.msk.f32.gmra.mxu0 %vm191_vm0, %v13071_v47  ;;  %v9114_v45 = vunpack.i.l.bf16 %v9113_v4  ;;  %13888 = vst [vmem:[#allocation7_spill] sm:$0xff] %v13373_v19  ;;  %v9251_v23 = vpack.i.bf16 %v13165_v29, %v13373_v19 }
 0x868   : > { %v13351_v54 = vpop.f32.mrf.mxu2  ;;  %v6603_v18 = vsel %vm191_vm0, %v12839_v22, %v9114_v45  ;;  %9252 = vrot.lane.b32.xlu0 %v9251_v23, %s9288_s24  ;;  %v9124_v22 = vunpack.i.l.bf16 %v9123_v49  ;;  %v5901_v45 = vld [vmem:[#allocation2 + $0xa9] sm:$0xff]  ;;  %v9133_v49 = vpop.permute.xlu0 %9132 }
 0x869   : > { %13884 = vst [vmem:[#allocation23_spill] sm:$0xff] %v13351_v54  ;;  %v13354_v28 = vpop.f32.mrf.mxu3 }
 0x86a   : > { %13885 = vst [vmem:[#allocation4_spill] sm:$0xff] %v13354_v28  ;;  %v13357_v13 = vpop.f32.mrf.mxu1 }
 0x86b   : > { %v13363_v24 = vpop.f32.mrf.mxu0 }
 0x86d   : > { %6941 = vmatmul.f32.gmra.mxu1 %v6602_v32  ;;  %7057 = vmatmul.f32.gmra.mxu2 %v6635_v38  ;;  %v6668_v38 = vsel %vm191_vm0, %v13043_v40, %v9119_v9  ;;  %v6015_v32 = vld [vmem:[#allocation2 + $0x199] sm:$0xff]  ;;  %v9120_v9 = vunpack.i.h.bf16 %v9118_v7 }
 0x86e   : > { %7170 = vmatmul.f32.gmra.mxu3 %v6667_v12  ;;  %7851 = vmatmul.msk.f32.gmra.mxu0 %vm191_vm0, %v12988_v15  ;;  %v13387_v12 = vld [vmem:[#allocation2 + $0x182] sm:$0xff] }
 0x86f   : > { %v9256_v29 = vpack.i.bf16 %v6015_v32, %v13387_v12  ;;  %v9128_v32 = vpop.permute.xlu2 %9127  ;;  %v6604_v7 = vsel %vm191_vm0, %v12990_v5, %v9120_v9 }
 0x870   : > { %v13369_v30 = vpop.f32.mrf.mxu2  ;;  %v9129_v33 = vunpack.i.l.bf16 %v9128_v32 }
 0x871   : > { %13886 = vst [vmem:[#allocation5_spill] sm:$0xff] %v13369_v30  ;;  %v13371_v35 = vpop.f32.mrf.mxu3  ;;  %9257 = vrot.lane.b32.xlu1 %v9256_v29, %s9288_s24  ;;  %v9130_v29 = vunpack.i.h.bf16 %v9128_v32 }
 0x872   : > { %13887 = vst [vmem:[#allocation6_spill] sm:$0xff] %v13371_v35  ;;  %v13375_v17 = vpop.f32.mrf.mxu1  ;;  %v13389_v35 = vld [vmem:[#allocation2 + $0x15a] sm:$0xff]  ;;  %v6605_v5 = vsel %vm191_vm0, %v12909_v60, %v9129_v33 }
 0x873   : > { %v13384_v4 = vpop.f32.mrf.mxu0  ;;  %v9231_v40 = vpack.i.bf16 %v13389_v35, %v13091_v34 }
 0x875   : > { %6944 = vmatmul.f32.gmra.mxu1 %v6603_v18  ;;  %7060 = vmatmul.f32.gmra.mxu2 %v6636_v16  ;;  %v5965_v18 = vld [vmem:[#allocation2 + $0xc0] sm:$0xff] }
 0x876   : > { %7173 = vmatmul.f32.gmra.mxu3 %v6668_v38  ;;  %7852 = vmatmul.msk.f32.gmra.mxu0 %vm191_vm0, %v13139_v55  ;;  %v6637_v38 = vsel %vm191_vm0, %v5901_v45, %v9124_v22  ;;  %v6669_v28 = vsel %vm191_vm0, %v5965_v18, %v9125_v26  ;;  %v5966_v45 = vld [vmem:[#allocation2 + $0xc8] sm:$0xff] }
 0x877   : > { %9232 = vrot.lane.b32.xlu2 %v9231_v40, %s9288_s24  ;;  %v9134_v40 = vunpack.i.l.bf16 %v9133_v49 }
 0x878   : > { %v13396_v2 = vpop.f32.mrf.mxu2 }
 0x879   : > { %13889 = vst [vmem:[#allocation8_spill] sm:$0xff] %v13396_v2  ;;  %v13400_v16 = vpop.f32.mrf.mxu3  ;;  %v6016_v2 = vld [vmem:[#allocation2 + $0x1a1] sm:$0xff] }
 0x87a   : > { %13890 = vst [vmem:[#allocation9_spill] sm:$0xff] %v13400_v16  ;;  %v13402_v23 = vpop.f32.mrf.mxu1  ;;  %v5902_v16 = vld [vmem:[#allocation2 + $0xb1] sm:$0xff] }
 0x87b   : > { %v13406_v34 = vpop.f32.mrf.mxu0  ;;  %v6638_v9 = vsel %vm191_vm0, %v5902_v16, %v9130_v29  ;;  %v5903_v16 = vld [vmem:[#allocation2 + $0xc1] sm:$0xff]  ;;  %v9135_v29 = vunpack.i.h.bf16 %v9133_v49  ;;  %v9148_v49 = vpop.permute.xlu0 %9147 }
 0x87d   : > { %6947 = vmatmul.f32.gmra.mxu1 %v6604_v7  ;;  %7063 = vmatmul.f32.gmra.mxu2 %v6637_v38  ;;  %v9138_v38 = vpop.permute.xlu1 %9137  ;;  %v13424_v7 = vld [vmem:[#allocation2 + $0x188] sm:$0xff] }
 0x87e   : > { %7176 = vmatmul.f32.gmra.mxu3 %v6669_v28  ;;  %7853 = vmatmul.msk.f32.gmra.mxu0 %vm191_vm0, %v13069_v56  ;;  %v6670_v28 = vsel %vm191_vm0, %v5966_v45, %v9134_v40  ;;  %13894 = vst [vmem:[#allocation13_spill] sm:$0xff] %v13424_v7  ;;  %v9139_v30 = vunpack.i.l.bf16 %v9138_v38  ;;  %v9140_v33 = vunpack.i.h.bf16 %v9138_v38 }
 0x880   : > { %v13412_v22 = vpop.f32.mrf.mxu2 }
 0x881   : > { %13891 = vst [vmem:[#allocation10_spill] sm:$0xff] %v13412_v22  ;;  %v13414_v26 = vpop.f32.mrf.mxu3  ;;  %v9266_v22 = vpack.i.bf16 %v13424_v7, %v6016_v2  ;;  %v5967_v2 = vld [vmem:[#allocation2 + $0xd8] sm:$0xff] }
 0x882   : > { %13892 = vst [vmem:[#allocation11_spill] sm:$0xff] %v13414_v26  ;;  %v13416_v18 = vpop.f32.mrf.mxu1  ;;  %v13427_v26 = vld [vmem:[#allocation2 + $0x172] sm:$0xff]  ;;  %v6671_v54 = vsel %vm191_vm0, %v5967_v2, %v9140_v33 }
 0x883   : > { %13893 = vst [vmem:[#allocation12_spill] sm:$0xff] %v13416_v18  ;;  %v13422_v32 = vpop.f32.mrf.mxu0  ;;  %v9246_v60 = vpack.i.bf16 %v13427_v26, %v13147_v8  ;;  %9267 = vrot.lane.b32.xlu0 %v9266_v22, %s9288_s24  ;;  %v6606_v22 = vsel %vm191_vm0, %v13071_v47, %v9135_v29 }
 0x885   : > { %6950 = vmatmul.f32.gmra.mxu1 %v6605_v5  ;;  %7066 = vmatmul.f32.gmra.mxu2 %v6638_v9  ;;  %v6639_v9 = vsel %vm191_vm0, %v5903_v16, %v9139_v30  ;;  %v5968_v16 = vld [vmem:[#allocation2 + $0xe0] sm:$0xff] }
 0x886   : > { %7179 = vmatmul.f32.gmra.mxu3 %v6670_v28  ;;  %7854 = vmatmul.msk.f32.gmra.mxu0 %vm191_vm0, %v13178_v51  ;;  %v9143_v28 = vpop.permute.xlu2 %9142 }
 0x887   : > { %9247 = vrot.lane.b32.xlu2 %v9246_v60, %s9288_s24  ;;  %v9145_v38 = vunpack.i.h.bf16 %v9143_v28  ;;  %v9149_v60 = vunpack.i.l.bf16 %v9148_v49 }
 0x888   : > { %v13434_v40 = vpop.f32.mrf.mxu2 }
 0x889   : > { %13895 = vst [vmem:[#allocation14_spill] sm:$0xff] %v13434_v40  ;;  %v13437_v45 = vpop.f32.mrf.mxu3  ;;  %v9144_v40 = vunpack.i.l.bf16 %v9143_v28 }
 0x88a   : > { %13896 = vst [vmem:[#allocation16_spill] sm:$0xff] %v13437_v45  ;;  %v13439_v5 = vpop.f32.mrf.mxu1  ;;  %v5904_v45 = vld [vmem:[#allocation2 + $0xc9] sm:$0xff] }
 0x88b   : > { %13897 = vst [vmem:[#allocation18_spill] sm:$0xff] %v13439_v5  ;;  %v13443_v8 = vpop.f32.mrf.mxu0  ;;  %v6607_v47 = vsel %vm191_vm0, %v12988_v15, %v9144_v40  ;;  %v6640_v29 = vsel %vm191_vm0, %v5904_v45, %v9145_v38  ;;  %v5905_v45 = vld [vmem:[#allocation2 + $0xd9] sm:$0xff]  ;;  %v9150_v38 = vunpack.i.h.bf16 %v9148_v49  ;;  %v9163_v5 = vpop.permute.xlu0 %9162 }
 0x88d   : > { %6953 = vmatmul.f32.gmra.mxu1 %v6606_v22  ;;  %7069 = vmatmul.f32.gmra.mxu2 %v6639_v9  ;;  %v9153_v9 = vpop.permute.xlu1 %9152  ;;  %v13461_v22 = vld [vmem:[#allocation2 + $0x180] sm:$0xff] }
 0x88e   : > { %7182 = vmatmul.f32.gmra.mxu3 %v6671_v54  ;;  %7855 = vmatmul.msk.f32.gmra.mxu0 %vm191_vm0, %v13135_v39  ;;  %v6672_v54 = vsel %vm191_vm0, %v5968_v16, %v9149_v60  ;;  %v9154_v3 = vunpack.i.l.bf16 %v9153_v9  ;;  %v9155_v40 = vunpack.i.h.bf16 %v9153_v9  ;;  %v5969_v16 = vld [vmem:[#allocation2 + $0xf0] sm:$0xff]  ;;  %v6608_v9 = vsel %vm191_vm0, %v13139_v55, %v9150_v38 }
 0x890   : > { %v13449_v30 = vpop.f32.mrf.mxu2 }
 0x891   : > { %13898 = vst [vmem:[#allocation19_spill] sm:$0xff] %v13449_v30  ;;  %v13451_v33 = vpop.f32.mrf.mxu3  ;;  %v13463_v30 = vld [vmem:[#allocation2 + $0x18a] sm:$0xff] }
 0x892   : > { %13899 = vst [vmem:[#allocation21_spill] sm:$0xff] %v13451_v33  ;;  %v13453_v2 = vpop.f32.mrf.mxu1  ;;  %v9261_v15 = vpack.i.bf16 %v13463_v30, %v13461_v22  ;;  %v9158_v33 = vpop.permute.xlu2 %9157 }
 0x893   : > { %13900 = vst [vmem:[#allocation22_spill] sm:$0xff] %v13453_v2  ;;  %v13459_v28 = vpop.f32.mrf.mxu0  ;;  %v6673_v2 = vsel %vm191_vm0, %v5969_v16, %v9155_v40  ;;  %v9160_v49 = vunpack.i.h.bf16 %v9158_v33 }
 0x894   : > { %13901 = vst [vmem:[#allocation24_spill] sm:$0xff] %v13463_v30  ;;  %9262 = vrot.lane.b32.xlu2 %v9261_v15, %s9288_s24  ;;  %v9164_v15 = vunpack.i.l.bf16 %v9163_v5 }
 0x895   : > { %6956 = vmatmul.f32.gmra.mxu1 %v6607_v47  ;;  %7072 = vmatmul.f32.gmra.mxu2 %v6640_v29  ;;  %v9168_v16 = vpop.permute.xlu1 %9167 }
 0x896   : > { %7185 = vmatmul.f32.gmra.mxu3 %v6672_v54  ;;  %7856 = vmatmul.msk.f32.gmra.mxu0 %vm191_vm0, %v13207_v21  ;;  %v6641_v54 = vsel %vm191_vm0, %v5905_v45, %v9154_v3  ;;  %v5970_v3 = vld [vmem:[#allocation2 + $0xf8] sm:$0xff]  ;;  %v9170_v7 = vunpack.i.h.bf16 %v9168_v16 }
 0x898   : > { %v13469_v60 = vpop.f32.mrf.mxu2 }
 0x899   : > { %13902 = vst [vmem:[#allocation25_spill] sm:$0xff] %v13469_v60  ;;  %v13472_v47 = vpop.f32.mrf.mxu3  ;;  %v9159_v60 = vunpack.i.l.bf16 %v9158_v33  ;;  %v6674_v33 = vsel %vm191_vm0, %v5970_v3, %v9164_v15 }
 0x89a   : > { %13903 = vst [vmem:[#allocation26_spill] sm:$0xff] %v13472_v47  ;;  %v13474_v29 = vpop.f32.mrf.mxu1  ;;  %v5906_v47 = vld [vmem:[#allocation2 + $0xe1] sm:$0xff] }
 0x89b   : > { %13904 = vst [vmem:[#allocation27_spill] sm:$0xff] %v13474_v29  ;;  %v7254_v19 = vpop.f32.mrf.mxu0  ;;  %v6609_v40 = vsel %vm191_vm0, %v13069_v56, %v9159_v60  ;;  %v6642_v55 = vsel %vm191_vm0, %v5906_v47, %v9160_v49  ;;  %v9165_v56 = vunpack.i.h.bf16 %v9163_v5  ;;  %v7350_v47 = vld [vmem:[%s9334_s20] sm:$0xff]  ;;  %v5971_v49 = vld [vmem:[#allocation2 + $0x108] sm:$0xff] }
 0x89d   : > { %6959 = vmatmul.f32.gmra.mxu1 %v6608_v9  ;;  %7075 = vmatmul.f32.gmra.mxu2 %v6641_v54  ;;  %v9169_v9 = vunpack.i.l.bf16 %v9168_v16  ;;  %v6610_v5 = vsel %vm191_vm0, %v13178_v51, %v9165_v56 }
 0x89e   : > { %7188 = vmatmul.f32.gmra.mxu3 %v6673_v2  ;;  %7857 = vmatmul.msk.f32.gmra.mxu0 %vm191_vm0, %v13176_v48 }
 0x8a0   : > { %v7028_v29 = vpop.f32.mrf.mxu2 }
 0x8a1   : > { %v7141_v45 = vpop.f32.mrf.mxu3 }
 0x8a2   : > { %v6915_v53 = vpop.f32.mrf.mxu1 }
 0x8a3   : > { %v6916_v38 = vadd.f32 %v6915_v53, %v13313_v62  ;;  %v7257_v2 = vpop.f32.mrf.mxu0 }
 0x8a5   : > { %v7029_v54 = vadd.f32 %v7028_v29, %v6916_v38  ;;  %6962 = vmatmul.f32.gmra.mxu1 %v6609_v40  ;;  %7078 = vmatmul.f32.gmra.mxu2 %v6642_v55  ;;  %v6643_v29 = vsel %vm191_vm0, %v13137_v42, %v9169_v9  ;;  %v9173_v40 = vpop.permute.xlu2 %9172  ;;  %v6675_v55 = vsel %vm191_vm0, %v5971_v49, %v9170_v7  ;;  %v9178_v38 = vpop.permute.xlu0 %9177  ;;  %v7351_v7 = vld [vmem:[%s9334_s20 + $0x8] sm:$0xff] }
 0x8a6   : > { %7191 = vmatmul.f32.gmra.mxu3 %v6674_v33  ;;  %7858 = vmatmul.msk.f32.gmra.mxu0 %vm191_vm0, %v13237_v50  ;;  %v9174_v16 = vunpack.i.l.bf16 %v9173_v40  ;;  %v5972_v33 = vld [vmem:[#allocation2 + $0x110] sm:$0xff] }
 0x8a7   : > { %v7142_v30 = vadd.f32 %v7141_v45, %v7029_v54 }
 0x8a8   : > { %v7031_v60 = vpop.f32.mrf.mxu2  ;;  %v6611_v56 = vsel %vm191_vm0, %v13135_v39, %v9174_v16 }
 0x8a9   : > { %v7255_v62 = vadd.f32 %v7254_v19, %v7142_v30  ;;  %v7144_v53 = vpop.f32.mrf.mxu3  ;;  %v9175_v30 = vunpack.i.h.bf16 %v9173_v40 }
 0x8aa   : > { %v6918_v18 = vpop.f32.mrf.mxu1 }
 0x8ab   : > { %v7382_v15 = vadd.f32 %v7350_v47, %v7255_v62  ;;  %v6919_v3 = vadd.f32 %v6918_v18, %v13334_v59  ;;  %v7260_v45 = vpop.f32.mrf.mxu0  ;;  %v9179_v59 = vunpack.i.l.bf16 %v9178_v38  ;;  %v9183_v62 = vpop.permute.xlu1 %9182 }
 0x8ad   : > { %7414 = vst.msk [vmem:[%s9341_s23] sm:$0xff] %vm191_vm0, %v7382_v15  ;;  %v7032_v19 = vadd.f32 %v7031_v60, %v6919_v3  ;;  %6965 = vmatmul.f32.gmra.mxu1 %v6610_v5  ;;  %7081 = vmatmul.f32.gmra.mxu2 %v6643_v29  ;;  %v6644_v60 = vsel %vm191_vm0, %v13159_v27, %v9175_v30  ;;  %v9185_v27 = vunpack.i.h.bf16 %v9183_v62  ;;  %v5909_v3 = vld [vmem:[#allocation2 + $0x109] sm:$0xff] }
 0x8ae   : > { %7194 = vmatmul.f32.gmra.mxu3 %v6675_v55  ;;  %7859 = vmatmul.msk.f32.gmra.mxu0 %vm191_vm0, %v13203_v14  ;;  %v7352_v55 = vld [vmem:[%s9334_s20 + $0x10] sm:$0xff] }
 0x8af   : > { %v7145_v42 = vadd.f32 %v7144_v53, %v7032_v19  ;;  %v6676_v53 = vsel %vm191_vm0, %v5972_v33, %v9179_v59 }
 0x8b0   : > { %v7034_v18 = vpop.f32.mrf.mxu2 }
 0x8b1   : > { %v7258_v54 = vadd.f32 %v7257_v2, %v7145_v42  ;;  %v7147_v51 = vpop.f32.mrf.mxu3  ;;  %v9184_v2 = vunpack.i.l.bf16 %v9183_v62 }
 0x8b2   : > { %v6921_v9 = vpop.f32.mrf.mxu1 }
 0x8b3   : > { %v7383_v47 = vadd.f32 %v7351_v7, %v7258_v54  ;;  %v6922_v49 = vadd.f32 %v6921_v9, %v13363_v24  ;;  %v7263_v29 = vpop.f32.mrf.mxu0  ;;  %v9180_v24 = vunpack.i.h.bf16 %v9178_v38  ;;  %v6645_v16 = vsel %vm191_vm0, %v5909_v3, %v9184_v2  ;;  %v9193_v38 = vpop.permute.xlu0 %9192 }
 0x8b4   : > { %v6677_v7 = vsel %vm191_vm0, %v13298_v36, %v9185_v27  ;;  %v9198_v27 = vpop.permute.xlu1 %9197 }
 0x8b5   : > { %7415 = vst.msk [vmem:[%s9341_s23 + $0x8] sm:$0xff] %vm191_vm0, %v7383_v47  ;;  %v7035_v15 = vadd.f32 %v7034_v18, %v6922_v49  ;;  %6968 = vmatmul.f32.gmra.mxu1 %v6611_v56  ;;  %7084 = vmatmul.f32.gmra.mxu2 %v6644_v60  ;;  %v9188_v18 = vpop.permute.xlu2 %9187  ;;  %v6612_v54 = vsel %vm191_vm0, %v13207_v21, %v9180_v24  ;;  %v9194_v56 = vunpack.i.l.bf16 %v9193_v38  ;;  %v7353_v60 = vld [vmem:[%s9334_s20 + $0x18] sm:$0xff]  ;;  %v5974_v47 = vld [vmem:[#allocation2 + $0x128] sm:$0xff] }
 0x8b6   : > { %7197 = vmatmul.f32.gmra.mxu3 %v6676_v53  ;;  %7860 = vmatmul.msk.f32.gmra.mxu0 %vm191_vm0, %v13268_v31  ;;  %v9189_v9 = vunpack.i.l.bf16 %v9188_v18 }
 0x8b7   : > { %v7148_v39 = vadd.f32 %v7147_v51, %v7035_v15  ;;  %v9190_v51 = vunpack.i.h.bf16 %v9188_v18  ;;  %v6678_v3 = vsel %vm191_vm0, %v5974_v47, %v9194_v56  ;;  %v7355_v56 = vld [vmem:[%s9334_s20 + $0x28] sm:$0xff] }
 0x8b8   : > { %v7037_v40 = vpop.f32.mrf.mxu2  ;;  %v6613_v53 = vsel %vm191_vm0, %v13176_v48, %v9189_v9 }
 0x8b9   : > { %v7261_v5 = vadd.f32 %v7260_v45, %v7148_v39  ;;  %v7150_v19 = vpop.f32.mrf.mxu3  ;;  %v6646_v15 = vsel %vm191_vm0, %v13193_v41, %v9190_v51  ;;  %v9200_v41 = vunpack.i.h.bf16 %v9198_v27 }
 0x8ba   : > { %v6924_v30 = vpop.f32.mrf.mxu1 }
 0x8bb   : > { %v7384_v42 = vadd.f32 %v7352_v55, %v7261_v5  ;;  %v6925_v59 = vadd.f32 %v6924_v30, %v13384_v4  ;;  %v7266_v33 = vpop.f32.mrf.mxu0  ;;  %v9195_v55 = vunpack.i.h.bf16 %v9193_v38  ;;  %v9208_v51 = vpop.permute.xlu0 %9207 }
 0x8bd   : > { %7416 = vst.msk [vmem:[%s9341_s23 + $0x10] sm:$0xff] %vm191_vm0, %v7384_v42  ;;  %v7038_v45 = vadd.f32 %v7037_v40, %v6925_v59  ;;  %6971 = vmatmul.f32.gmra.mxu1 %v6612_v54  ;;  %7087 = vmatmul.f32.gmra.mxu2 %v6645_v16  ;;  %v6679_v54 = vsel %vm191_vm0, %v13341_v6, %v9200_v41 }
 0x8be   : > { %7200 = vmatmul.f32.gmra.mxu3 %v6677_v7  ;;  %7861 = vmatmul.msk.f32.gmra.mxu0 %vm191_vm0, %v13233_v1  ;;  %v9203_v7 = vpop.permute.xlu2 %9202  ;;  %v6614_v38 = vsel %vm191_vm0, %v13237_v50, %v9195_v55 }
 0x8bf   : > { %v7151_v4 = vadd.f32 %v7150_v19, %v7038_v45  ;;  %v9205_v9 = vunpack.i.h.bf16 %v9203_v7 }
 0x8c0   : > { %v7040_v36 = vpop.f32.mrf.mxu2 }
 0x8c1   : > { %v7264_v49 = vadd.f32 %v7263_v29, %v7151_v4  ;;  %v7153_v21 = vpop.f32.mrf.mxu3  ;;  %v9199_v29 = vunpack.i.l.bf16 %v9198_v27  ;;  %v9209_v4 = vunpack.i.l.bf16 %v9208_v51 }
 0x8c2   : > { %v6927_v62 = vpop.f32.mrf.mxu1 }
 0x8c3   : > { %v7385_v2 = vadd.f32 %v7353_v60, %v7264_v49  ;;  %v6928_v39 = vadd.f32 %v6927_v62, %v13406_v34  ;;  %v7269_v24 = vpop.f32.mrf.mxu0  ;;  %v7354_v34 = vld [vmem:[%s9334_s20 + $0x20] sm:$0xff]  ;;  %v6647_v42 = vsel %vm191_vm0, %v13205_v20, %v9199_v29  ;;  %v9204_v20 = vunpack.i.l.bf16 %v9203_v7  ;;  %v5977_v29 = vld [vmem:[#allocation2 + $0x150] sm:$0xff] }
 0x8c5   : > { %7417 = vst.msk [vmem:[%s9341_s23 + $0x18] sm:$0xff] %vm191_vm0, %v7385_v2  ;;  %v7041_v40 = vadd.f32 %v7040_v36, %v6928_v39  ;;  %6974 = vmatmul.f32.gmra.mxu1 %v6613_v53  ;;  %7090 = vmatmul.f32.gmra.mxu2 %v6646_v15  ;;  %v5976_v36 = vld [vmem:[#allocation2 + $0x140] sm:$0xff]  ;;  %v6615_v49 = vsel %vm191_vm0, %v13203_v14, %v9204_v20  ;;  %v9213_v15 = vpop.permute.xlu1 %9212 }
 0x8c6   : > { %7203 = vmatmul.f32.gmra.mxu3 %v6678_v3  ;;  %7862 = vmatmul.msk.f32.gmra.mxu0 %vm191_vm0, %v13304_v10  ;;  %v6680_v2 = vsel %vm191_vm0, %v5976_v36, %v9209_v4  ;;  %v9214_v3 = vunpack.i.l.bf16 %v9213_v15 }
 0x8c7   : > { %v7154_v48 = vadd.f32 %v7153_v21, %v7041_v40  ;;  %v6648_v21 = vsel %vm191_vm0, %v13223_v52, %v9205_v9  ;;  %v9215_v52 = vunpack.i.h.bf16 %v9213_v15 }
 0x8c8   : > { %v7043_v5 = vpop.f32.mrf.mxu2 }
 0x8c9   : > { %v7267_v19 = vadd.f32 %v7266_v33, %v7154_v48  ;;  %v7156_v30 = vpop.f32.mrf.mxu3 }
 0x8ca   : > { %v6930_v16 = vpop.f32.mrf.mxu1 }
 0x8cb   : > { %v7386_v59 = vadd.f32 %v7354_v34, %v7267_v19  ;;  %v6931_v18 = vadd.f32 %v6930_v16, %v13422_v32  ;;  %v7272_v45 = vpop.f32.mrf.mxu0  ;;  %v6681_v16 = vsel %vm191_vm0, %v5977_v29, %v9215_v52 }
 0x8cd   : > { %7418 = vst.msk [vmem:[%s9341_s23 + $0x20] sm:$0xff] %vm191_vm0, %v7386_v59  ;;  %v7044_v33 = vadd.f32 %v7043_v5, %v6931_v18  ;;  %6977 = vmatmul.f32.gmra.mxu1 %v6614_v38  ;;  %7093 = vmatmul.f32.gmra.mxu2 %v6647_v42  ;;  %v6649_v5 = vsel %vm191_vm0, %v13235_v11, %v9214_v3  ;;  %v9223_v18 = vpop.permute.xlu0 %9222  ;;  %v9228_v36 = vpop.permute.xlu1 %9227 }
 0x8ce   : > { %7206 = vmatmul.f32.gmra.mxu3 %v6679_v54  ;;  %7863 = vmatmul.msk.f32.gmra.mxu0 %vm191_vm0, %v13264_v44 }
 0x8cf   : > { %v7157_v32 = vadd.f32 %v7156_v30, %v7044_v33  ;;  %v9218_v30 = vpop.permute.xlu2 %9217  ;;  %v5978_v33 = vld [vmem:[#allocation2 + $0x158] sm:$0xff] }
 0x8d0   : > { %v7046_v6 = vpop.f32.mrf.mxu2  ;;  %v9220_v54 = vunpack.i.h.bf16 %v9218_v30 }
 0x8d1   : > { %v7270_v60 = vadd.f32 %v7269_v24, %v7157_v32  ;;  %v7159_v50 = vpop.f32.mrf.mxu3  ;;  %v9210_v24 = vunpack.i.h.bf16 %v9208_v51  ;;  %v7357_v51 = vld [vmem:[%s9334_s20 + $0x38] sm:$0xff] }
 0x8d2   : > { %v6933_v47 = vpop.f32.mrf.mxu1  ;;  %v6650_v4 = vsel %vm191_vm0, %v13255_v25, %v9220_v54  ;;  %v9230_v25 = vunpack.i.h.bf16 %v9228_v36 }
 0x8d3   : > { %v7387_v62 = vadd.f32 %v7355_v56, %v7270_v60  ;;  %v6934_v53 = vadd.f32 %v6933_v47, %v13443_v8  ;;  %v7275_v39 = vpop.f32.mrf.mxu0  ;;  %v7356_v8 = vld [vmem:[%s9334_s20 + $0x30] sm:$0xff]  ;;  %v6616_v59 = vsel %vm191_vm0, %v13268_v31, %v9210_v24 }
 0x8d5   : > { %7419 = vst.msk [vmem:[%s9341_s23 + $0x28] sm:$0xff] %vm191_vm0, %v7387_v62  ;;  %v7047_v27 = vadd.f32 %v7046_v6, %v6934_v53  ;;  %6980 = vmatmul.f32.gmra.mxu1 %v6615_v49  ;;  %7096 = vmatmul.f32.gmra.mxu2 %v6648_v21  ;;  %v9229_v49 = vunpack.i.l.bf16 %v9228_v36  ;;  %v9225_v21 = vunpack.i.h.bf16 %v9223_v18  ;;  %v5979_v53 = vld [vmem:[#allocation2 + $0x168] sm:$0xff]  ;;  %v9238_v29 = vpop.permute.xlu0 %9237  ;;  %v9243_v54 = vpop.permute.xlu1 %9242 }
 0x8d6   : > { %7209 = vmatmul.f32.gmra.mxu3 %v6680_v2  ;;  %7864 = vmatmul.msk.f32.gmra.mxu0 %vm191_vm0, %v13347_v37  ;;  %v6683_v24 = vsel %vm191_vm0, %v5979_v53, %v9230_v25 }
 0x8d7   : > { %v7160_v14 = vadd.f32 %v7159_v50, %v7047_v27  ;;  %v6651_v27 = vsel %vm191_vm0, %v13266_v43, %v9229_v49  ;;  %v9233_v52 = vpop.permute.xlu2 %9232 }
 0x8d8   : > { %v7049_v40 = vpop.f32.mrf.mxu2 }
 0x8d9   : > { %v7273_v48 = vadd.f32 %v7272_v45, %v7160_v14  ;;  %v7162_v41 = vpop.f32.mrf.mxu3  ;;  %v9219_v45 = vunpack.i.l.bf16 %v9218_v30 }
 0x8da   : > { %v6936_v55 = vpop.f32.mrf.mxu1 }
 0x8db   : > { %v7388_v34 = vadd.f32 %v7356_v8, %v7273_v48  ;;  %v6937_v19 = vadd.f32 %v6936_v55, %v13459_v28  ;;  %v7278_v42 = vpop.f32.mrf.mxu0  ;;  %v9224_v28 = vunpack.i.l.bf16 %v9223_v18  ;;  %v6617_v32 = vsel %vm191_vm0, %v13233_v1, %v9219_v45 }
 0x8dc   : > { %v6618_v8 = vsel %vm191_vm0, %v13304_v10, %v9225_v21  ;;  %v9234_v55 = vunpack.i.l.bf16 %v9233_v52  ;;  %v7361_v21 = vld [vmem:[%s9334_s20 + $0x58] sm:$0xff] }
 0x8dd   : > { %7420 = vst.msk [vmem:[%s9341_s23 + $0x30] sm:$0xff] %vm191_vm0, %v7388_v34  ;;  %v7050_v7 = vadd.f32 %v7049_v40, %v6937_v19  ;;  %6983 = vmatmul.f32.gmra.mxu1 %v6616_v59  ;;  %7099 = vmatmul.f32.gmra.mxu2 %v6649_v5  ;;  %v6682_v60 = vsel %vm191_vm0, %v5978_v33, %v9224_v28  ;;  %v7359_v34 = vld [vmem:[%s9334_s20 + $0x48] sm:$0xff]  ;;  %v5980_v19 = vld [vmem:[#allocation2 + $0x170] sm:$0xff] }
 0x8de   : > { %7212 = vmatmul.f32.gmra.mxu3 %v6681_v16  ;;  %7865 = vmatmul.msk.f32.gmra.mxu0 %vm191_vm0, %v13294_v63 }
 0x8df   : > { %v7163_v11 = vadd.f32 %v7162_v41, %v7050_v7  ;;  %v9235_v41 = vunpack.i.h.bf16 %v9233_v52 }
 0x8e0   : > { %v7052_v38 = vpop.f32.mrf.mxu2 }
 0x8e1   : > { %v7276_v9 = vadd.f32 %v7275_v39, %v7163_v11  ;;  %v7165_v31 = vpop.f32.mrf.mxu3  ;;  %v6652_v59 = vsel %vm191_vm0, %v13285_v58, %v9235_v41  ;;  %v9245_v58 = vunpack.i.h.bf16 %v9243_v54  ;;  %v7362_v41 = vld [vmem:[%s9334_s20 + $0x60] sm:$0xff] }
 0x8e2   : > { %v6939_v20 = vpop.f32.mrf.mxu1 }
 0x8e3   : > { %v7389_v6 = vadd.f32 %v7357_v51, %v7276_v9  ;;  %v6940_v56 = vadd.f32 %v6939_v20, %v13326_v46  ;;  %v7281_v50 = vpop.f32.mrf.mxu0  ;;  %v7358_v46 = vld [vmem:[%s9334_s20 + $0x40] sm:$0xff]  ;;  %v9240_v51 = vunpack.i.h.bf16 %v9238_v29  ;;  %v6685_v36 = vsel %vm191_vm0, %v13461_v22, %v9245_v58 }
 0x8e5   : > { %7421 = vst.msk [vmem:[%s9341_s23 + $0x38] sm:$0xff] %vm191_vm0, %v7389_v6  ;;  %v7053_v47 = vadd.f32 %v7052_v38, %v6940_v56  ;;  %6986 = vmatmul.f32.gmra.mxu1 %v6617_v32  ;;  %7102 = vmatmul.f32.gmra.mxu2 %v6650_v4  ;;  %v9244_v38 = vunpack.i.l.bf16 %v9243_v54  ;;  %v9248_v56 = vpop.permute.xlu2 %9247 }
 0x8e6   : > { %7215 = vmatmul.f32.gmra.mxu3 %v6682_v60  ;;  %7866 = vmatmul.msk.f32.gmra.mxu0 %vm191_vm0, %v13389_v35 }
 0x8e7   : > { %v7166_v1 = vadd.f32 %v7165_v31, %v7053_v47  ;;  %v6653_v32 = vsel %vm191_vm0, %v13296_v0, %v9244_v38  ;;  %v9253_v47 = vpop.permute.xlu0 %9252  ;;  %v9249_v0 = vunpack.i.l.bf16 %v9248_v56 }
 0x8e8   : > { %v7055_v62 = vpop.f32.mrf.mxu2  ;;  %v9254_v25 = vunpack.i.l.bf16 %v9253_v47 }
 0x8e9   : > { %v7279_v15 = vadd.f32 %v7278_v42, %v7166_v1  ;;  %v7168_v2 = vpop.f32.mrf.mxu3  ;;  %v6619_v42 = vsel %vm191_vm0, %v13264_v44, %v9234_v55  ;;  %v9250_v1 = vunpack.i.h.bf16 %v9248_v56  ;;  %v6621_v53 = vsel %vm191_vm0, %v13294_v63, %v9249_v0  ;;  %v13907_v63 = vld [vmem:[#allocation24_spill] sm:$0xff]  ;;  %v5983_v55 = vld [vmem:[#allocation2 + $0x198] sm:$0xff]  ;;  %v13911_v56 = vld [vmem:[#allocation22_spill] sm:$0xff] }
 0x8ea   : > { %v6942_v39 = vpop.f32.mrf.mxu1 }
 0x8eb   : > { %v7390_v3 = vadd.f32 %v7358_v46, %v7279_v15  ;;  %v6943_v14 = vadd.f32 %v6942_v39, %v13357_v13  ;;  %v7284_v40 = vpop.f32.mrf.mxu0  ;;  %v9239_v13 = vunpack.i.l.bf16 %v9238_v29  ;;  %v6654_v15 = vsel %vm191_vm0, %v13324_v61, %v9250_v1  ;;  %v13905_v39 = vld [vmem:[#allocation12_spill] sm:$0xff] }
 0x8ec   : > { %v9255_v29 = vunpack.i.h.bf16 %v9253_v47  ;;  %v6048_v47 = vld [vmem:[#allocation2 + $0x1a2] sm:$0xff] }
 0x8ed   : > { %7422 = vst.msk [vmem:[%s9341_s23 + $0x40] sm:$0xff] %vm191_vm0, %v7390_v3  ;;  %v7056_v48 = vadd.f32 %v7055_v62, %v6943_v14  ;;  %6989 = vmatmul.f32.gmra.mxu1 %v6618_v8  ;;  %7105 = vmatmul.f32.gmra.mxu2 %v6651_v27  ;;  %v6684_v45 = vsel %vm191_vm0, %v5980_v19, %v9239_v13  ;;  %v9258_v3 = vpop.permute.xlu1 %9257  ;;  %v13906_v14 = vld [vmem:[#allocation13_spill] sm:$0xff] }
 0x8ee   : > { %7218 = vmatmul.f32.gmra.mxu3 %v6683_v24  ;;  %7867 = vmatmul.msk.f32.gmra.mxu0 %vm191_vm0, %v13337_v57  ;;  %v9260_v8 = vunpack.i.h.bf16 %v9258_v3  ;;  %v6622_v54 = vsel %vm191_vm0, %v13389_v35, %v9255_v29 }
 0x8ef   : > { %v7169_v43 = vadd.f32 %v7168_v2, %v7056_v48 }
 0x8f0   : > { %v7058_v5 = vpop.f32.mrf.mxu2 }
 0x8f1   : > { %v7282_v30 = vadd.f32 %v7281_v50, %v7169_v43  ;;  %v7171_v10 = vpop.f32.mrf.mxu3  ;;  %v6620_v50 = vsel %vm191_vm0, %v13347_v37, %v9240_v51 }
 0x8f2   : > { %v6945_v16 = vpop.f32.mrf.mxu1 }
 0x8f3   : > { %v7391_v18 = vadd.f32 %v7359_v34, %v7282_v30  ;;  %v6946_v7 = vadd.f32 %v6945_v16, %v13375_v17  ;;  %v7287_v11 = vpop.f32.mrf.mxu0  ;;  %v7360_v17 = vld [vmem:[%s9334_s20 + $0x50] sm:$0xff] }
 0x8f4   : > { %v13908_v34 = vld [vmem:[#allocation20_spill] sm:$0xff] }
 0x8f5   : > { %7423 = vst.msk [vmem:[%s9341_s23 + $0x48] sm:$0xff] %vm191_vm0, %v7391_v18  ;;  %v7059_v28 = vadd.f32 %v7058_v5, %v6946_v7  ;;  %6992 = vmatmul.f32.gmra.mxu1 %v6619_v42  ;;  %7108 = vmatmul.f32.gmra.mxu2 %v6652_v59  ;;  %v9263_v42 = vpop.permute.xlu2 %9262  ;;  %v6687_v59 = vsel %vm191_vm0, %v5983_v55, %v9260_v8  ;;  %v6047_v7 = vld [vmem:[#allocation2 + $0x19a] sm:$0xff] }
 0x8f6   : > { %7221 = vmatmul.f32.gmra.mxu3 %v6684_v45  ;;  %7868 = vmatmul.msk.f32.gmra.mxu0 %vm191_vm0, %v13427_v26  ;;  %v9268_v45 = vpop.permute.xlu0 %9267  ;;  %v9264_v38 = vunpack.i.l.bf16 %v9263_v42 }
 0x8f7   : > { %v7172_v44 = vadd.f32 %v7171_v10, %v7059_v28  ;;  %v13909_v10 = vld [vmem:[#allocation18_spill] sm:$0xff]  ;;  %v9265_v28 = vunpack.i.h.bf16 %v9263_v42  ;;  %v9269_v58 = vunpack.i.l.bf16 %v9268_v45  ;;  %v9270_v1 = vunpack.i.h.bf16 %v9268_v45  ;;  %v7367_v42 = vld [vmem:[%s9334_s20 + $0x88] sm:$0xff]  ;;  %v13915_v45 = vld [vmem:[#allocation5_spill] sm:$0xff] }
 0x8f8   : > { %v7061_v33 = vpop.f32.mrf.mxu2 }
 0x8f9   : > { %v7285_v9 = vadd.f32 %v7284_v40, %v7172_v44  ;;  %v7174_v31 = vpop.f32.mrf.mxu3  ;;  %v9259_v40 = vunpack.i.l.bf16 %v9258_v3  ;;  %v7365_v3 = vld [vmem:[%s9334_s20 + $0x78] sm:$0xff] }
 0x8fa   : > { %v6948_v20 = vpop.f32.mrf.mxu1 }
 0x8fb   : > { %v7392_v4 = vadd.f32 %v7360_v17, %v7285_v9  ;;  %v6949_v6 = vadd.f32 %v6948_v20, %v13402_v23  ;;  %v7290_v60 = vpop.f32.mrf.mxu0  ;;  %v6655_v19 = vsel %vm191_vm0, %v13908_v34, %v9259_v40  ;;  %v5984_v17 = vld [vmem:[#allocation2 + $0x1a0] sm:$0xff]  ;;  %v6623_v20 = vsel %vm191_vm0, %v13337_v57, %v9264_v38  ;;  %v13913_v40 = vld [vmem:[#allocation15_spill] sm:$0xff] }
 0x8fd   : > { %7424 = vst.msk [vmem:[%s9341_s23 + $0x50] sm:$0xff] %vm191_vm0, %v7392_v4  ;;  %v7062_v49 = vadd.f32 %v7061_v33, %v6949_v6  ;;  %6995 = vmatmul.f32.gmra.mxu1 %v6620_v50  ;;  %7111 = vmatmul.f32.gmra.mxu2 %v6653_v32  ;;  %v7363_v33 = vld [vmem:[%s9334_s20 + $0x68] sm:$0xff] }
 0x8fe   : > { %7224 = vmatmul.f32.gmra.mxu3 %v6685_v36  ;;  %7869 = vmatmul.msk.f32.gmra.mxu0 %vm191_vm0, %v13387_v12  ;;  %v6686_v12 = vsel %vm191_vm0, %v13906_v14, %v9254_v25  ;;  %v13910_v32 = vld [vmem:[#allocation7_spill] sm:$0xff] }
 0x8ff   : > { %v7175_v23 = vadd.f32 %v7174_v31, %v7062_v49  ;;  %v6656_v4 = vsel %vm191_vm0, %v13910_v32, %v9265_v28 }
 0x900   : > { %v7064_v22 = vpop.f32.mrf.mxu2 }
 0x901   : > { %v7288_v62 = vadd.f32 %v7287_v11, %v7175_v23  ;;  %v7177_v46 = vpop.f32.mrf.mxu3  ;;  %v7364_v23 = vld [vmem:[%s9334_s20 + $0x70] sm:$0xff] }
 0x902   : > { %v6951_v37 = vpop.f32.mrf.mxu1 }
 0x903   : > { %v7393_v2 = vadd.f32 %v7361_v21, %v7288_v62  ;;  %v6952_v27 = vadd.f32 %v6951_v37, %v13905_v39  ;;  %v7293_v52 = vpop.f32.mrf.mxu0 }
 0x905   : > { %7425 = vst.msk [vmem:[%s9341_s23 + $0x58] sm:$0xff] %vm191_vm0, %v7393_v2  ;;  %v7065_v24 = vadd.f32 %v7064_v22, %v6952_v27  ;;  %6998 = vmatmul.f32.gmra.mxu1 %v6621_v53  ;;  %7114 = vmatmul.f32.gmra.mxu2 %v6654_v15  ;;  %v6624_v15 = vsel %vm191_vm0, %v13427_v26, %v9270_v1 }
 0x906   : > { %7227 = vmatmul.f32.gmra.mxu3 %v6686_v12  ;;  %7870 = vmatmul.msk.f32.gmra.mxu0 %vm191_vm0, %v13907_v63 }
 0x907   : > { %v7178_v61 = vadd.f32 %v7177_v46, %v7065_v24  ;;  %v13912_v46 = vld [vmem:[#allocation27_spill] sm:$0xff] }
 0x908   : > { %v7067_v48 = vpop.f32.mrf.mxu2 }
 0x909   : > { %v7291_v43 = vadd.f32 %v7290_v60, %v7178_v61  ;;  %v7180_v13 = vpop.f32.mrf.mxu3  ;;  %v6688_v60 = vsel %vm191_vm0, %v5984_v17, %v9269_v58 }
 0x90a   : > { %v6954_v5 = vpop.f32.mrf.mxu1 }
 0x90b   : > { %v7394_v30 = vadd.f32 %v7362_v41, %v7291_v43  ;;  %v6955_v16 = vadd.f32 %v6954_v5, %v13909_v10  ;;  %v7296_v18 = vpop.f32.mrf.mxu0  ;;  %v13914_v5 = vld [vmem:[#allocation23_spill] sm:$0xff] }
 0x90d   : > { %7426 = vst.msk [vmem:[%s9341_s23 + $0x60] sm:$0xff] %vm191_vm0, %v7394_v30  ;;  %v7068_v11 = vadd.f32 %v7067_v48, %v6955_v16  ;;  %7001 = vmatmul.f32.gmra.mxu1 %v6622_v54  ;;  %7117 = vmatmul.f32.gmra.mxu2 %v6655_v19  ;;  %v7366_v48 = vld [vmem:[%s9334_s20 + $0x80] sm:$0xff] }
 0x90e   : > { %7230 = vmatmul.f32.gmra.mxu3 %v6687_v59  ;;  %7871 = vmatmul.msk.f32.gmra.mxu0 %vm191_vm0, %v6047_v7 }
 0x90f   : > { %v7181_v44 = vadd.f32 %v7180_v13, %v7068_v11 }
 0x910   : > { %v7070_v51 = vpop.f32.mrf.mxu2 }
 0x911   : > { %v7294_v9 = vadd.f32 %v7293_v52, %v7181_v44  ;;  %v7183_v31 = vpop.f32.mrf.mxu3 }
 0x912   : > { %v6957_v35 = vpop.f32.mrf.mxu1 }
 0x913   : > { %v7395_v6 = vadd.f32 %v7363_v33, %v7294_v9  ;;  %v6958_v36 = vadd.f32 %v6957_v35, %v13911_v56  ;;  %v7299_v50 = vpop.f32.mrf.mxu0  ;;  %v13916_v35 = vld [vmem:[#allocation8_spill] sm:$0xff] }
 0x915   : > { %7427 = vst.msk [vmem:[%s9341_s23 + $0x68] sm:$0xff] %vm191_vm0, %v7395_v6  ;;  %v7071_v49 = vadd.f32 %v7070_v51, %v6958_v36  ;;  %7004 = vmatmul.f32.gmra.mxu1 %v6623_v20  ;;  %7120 = vmatmul.f32.gmra.mxu2 %v6656_v4  ;;  %v7368_v51 = vld [vmem:[%s9334_s20 + $0x90] sm:$0xff]  ;;  %v7369_v36 = vld [vmem:[%s9334_s20 + $0x98] sm:$0xff] }
 0x916   : > { %7233 = vmatmul.f32.gmra.mxu3 %v6688_v60  ;;  %7872 = vmatmul.msk.f32.gmra.mxu0 %vm191_vm0, %v6048_v47 }
 0x917   : > { %v7184_v57 = vadd.f32 %v7183_v31, %v7071_v49 }
 0x918   : > { %v7073_v0 = vpop.f32.mrf.mxu2 }
 0x919   : > { %v7297_v25 = vadd.f32 %v7296_v18, %v7184_v57  ;;  %v7186_v22 = vpop.f32.mrf.mxu3  ;;  %v13917_v57 = vld [vmem:[#allocation10_spill] sm:$0xff] }
 0x91a   : > { %v6960_v21 = vpop.f32.mrf.mxu1 }
 0x91b   : > { %v7396_v62 = vadd.f32 %v7364_v23, %v7297_v25  ;;  %v6961_v37 = vadd.f32 %v6960_v21, %v13912_v46  ;;  %v7302_v53 = vpop.f32.mrf.mxu0  ;;  %v7370_v21 = vld [vmem:[%s9334_s20 + $0xa0] sm:$0xff] }
 0x91d   : > { %7428 = vst.msk [vmem:[%s9341_s23 + $0x70] sm:$0xff] %vm191_vm0, %v7396_v62  ;;  %v7074_v2 = vadd.f32 %v7073_v0, %v6961_v37  ;;  %7007 = vmatmul.f32.gmra.mxu1 %v6624_v15  ;;  %v13918_v15 = vld [vmem:[#allocation14_spill] sm:$0xff] }
 0x91f   : > { %v7187_v39 = vadd.f32 %v7186_v22, %v7074_v2 }
 0x920   : > { %v7076_v27 = vpop.f32.mrf.mxu2 }
 0x921   : > { %v7300_v14 = vadd.f32 %v7299_v50, %v7187_v39  ;;  %v7189_v12 = vpop.f32.mrf.mxu3 }
 0x922   : > { %v6963_v52 = vpop.f32.mrf.mxu1 }
 0x923   : > { %v7397_v24 = vadd.f32 %v7365_v3, %v7300_v14  ;;  %v6964_v63 = vadd.f32 %v6963_v52, %v13913_v40  ;;  %v7305_v61 = vpop.f32.mrf.mxu0 }
 0x925   : > { %7429 = vst.msk [vmem:[%s9341_s23 + $0x78] sm:$0xff] %vm191_vm0, %v7397_v24  ;;  %v7077_v26 = vadd.f32 %v7076_v27, %v6964_v63 }
 0x927   : > { %v7190_v8 = vadd.f32 %v7189_v12, %v7077_v26  ;;  %v7371_v12 = vld [vmem:[%s9334_s20 + $0xa8] sm:$0xff] }
 0x928   : > { %v7079_v29 = vpop.f32.mrf.mxu2 }
 0x929   : > { %v7303_v41 = vadd.f32 %v7302_v53, %v7190_v8  ;;  %v7192_v55 = vpop.f32.mrf.mxu3 }
 0x92a   : > { %v6966_v43 = vpop.f32.mrf.mxu1 }
 0x92b   : > { %v7398_v13 = vadd.f32 %v7366_v48, %v7303_v41  ;;  %v6967_v34 = vadd.f32 %v6966_v43, %v13914_v5  ;;  %v7308_v19 = vpop.f32.mrf.mxu0 }
 0x92d   : > { %7430 = vst.msk [vmem:[%s9341_s23 + $0x80] sm:$0xff] %vm191_vm0, %v7398_v13  ;;  %v7080_v30 = vadd.f32 %v7079_v29, %v6967_v34 }
 0x92f   : > { %v7193_v10 = vadd.f32 %v7192_v55, %v7080_v30  ;;  %v7372_v55 = vld [vmem:[%s9334_s20 + $0xb0] sm:$0xff] }
 0x930   : > { %v7082_v16 = vpop.f32.mrf.mxu2 }
 0x931   : > { %v7306_v59 = vadd.f32 %v7305_v61, %v7193_v10  ;;  %v7195_v18 = vpop.f32.mrf.mxu3  ;;  %v13919_v61 = vld [vmem:[#allocation19_spill] sm:$0xff] }
 0x932   : > { %v6969_v7 = vpop.f32.mrf.mxu1 }
 0x933   : > { %v7399_v54 = vadd.f32 %v7367_v42, %v7306_v59  ;;  %v6970_v11 = vadd.f32 %v6969_v7, %v13915_v45  ;;  %v7311_v28 = vpop.f32.mrf.mxu0 }
 0x935   : > { %7431 = vst.msk [vmem:[%s9341_s23 + $0x88] sm:$0xff] %vm191_vm0, %v7399_v54  ;;  %v7083_v38 = vadd.f32 %v7082_v16, %v6970_v11 }
 0x937   : > { %v7196_v44 = vadd.f32 %v7195_v18, %v7083_v38  ;;  %v7373_v18 = vld [vmem:[%s9334_s20 + $0xb8] sm:$0xff] }
 0x938   : > { %v7085_v58 = vpop.f32.mrf.mxu2 }
 0x939   : > { %v7309_v33 = vadd.f32 %v7308_v19, %v7196_v44  ;;  %v7198_v17 = vpop.f32.mrf.mxu3  ;;  %v13920_v19 = vld [vmem:[#allocation25_spill] sm:$0xff] }
 0x93a   : > { %v6972_v9 = vpop.f32.mrf.mxu1 }
 0x93b   : > { %v7400_v31 = vadd.f32 %v7368_v51, %v7309_v33  ;;  %v6973_v20 = vadd.f32 %v6972_v9, %v13916_v35  ;;  %v7314_v32 = vpop.f32.mrf.mxu0 }
 0x93d   : > { %7432 = vst.msk [vmem:[%s9341_s23 + $0x90] sm:$0xff] %vm191_vm0, %v7400_v31  ;;  %v7086_v4 = vadd.f32 %v7085_v58, %v6973_v20 }
 0x93f   : > { %v7199_v6 = vadd.f32 %v7198_v17, %v7086_v4  ;;  %v7374_v17 = vld [vmem:[%s9334_s20 + $0xc0] sm:$0xff] }
 0x940   : > { %v7088_v56 = vpop.f32.mrf.mxu2 }
 0x941   : > { %v7312_v60 = vadd.f32 %v7311_v28, %v7199_v6  ;;  %v7201_v50 = vpop.f32.mrf.mxu3  ;;  %v13921_v28 = vld [vmem:[#allocation17_spill] sm:$0xff] }
 0x942   : > { %v6975_v47 = vpop.f32.mrf.mxu1 }
 0x943   : > { %v7401_v49 = vadd.f32 %v7369_v36, %v7312_v60  ;;  %v6976_v1 = vadd.f32 %v6975_v47, %v13917_v57  ;;  %v7317_v0 = vpop.f32.mrf.mxu0 }
 0x945   : > { %7433 = vst.msk [vmem:[%s9341_s23 + $0x98] sm:$0xff] %vm191_vm0, %v7401_v49  ;;  %v7089_v23 = vadd.f32 %v7088_v56, %v6976_v1 }
 0x947   : > { %v7202_v25 = vadd.f32 %v7201_v50, %v7089_v23  ;;  %v7375_v50 = vld [vmem:[%s9334_s20 + $0xc8] sm:$0xff] }
 0x948   : > { %v7091_v22 = vpop.f32.mrf.mxu2 }
 0x949   : > { %v7315_v62 = vadd.f32 %v7314_v32, %v7202_v25  ;;  %v7204_v46 = vpop.f32.mrf.mxu3  ;;  %v13922_v32 = vld [vmem:[#allocation4_spill] sm:$0xff] }
 0x94a   : > { %v6978_v37 = vpop.f32.mrf.mxu1 }
 0x94b   : > { %v7402_v53 = vadd.f32 %v7370_v21, %v7315_v62  ;;  %v6979_v2 = vadd.f32 %v6978_v37, %v13918_v15  ;;  %v7320_v39 = vpop.f32.mrf.mxu0 }
 0x94d   : > { %7434 = vst.msk [vmem:[%s9341_s23 + $0xa0] sm:$0xff] %vm191_vm0, %v7402_v53  ;;  %v7092_v27 = vadd.f32 %v7091_v22, %v6979_v2 }
 0x94f   : > { %v7205_v3 = vadd.f32 %v7204_v46, %v7092_v27  ;;  %v7376_v46 = vld [vmem:[%s9334_s20 + $0xd0] sm:$0xff] }
 0x950   : > { %v7094_v14 = vpop.f32.mrf.mxu2 }
 0x951   : > { %v7318_v52 = vadd.f32 %v7317_v0, %v7205_v3  ;;  %v7207_v24 = vpop.f32.mrf.mxu3  ;;  %v13923_v0 = vld [vmem:[#allocation6_spill] sm:$0xff] }
 0x952   : > { %v6981_v40 = vpop.f32.mrf.mxu1 }
 0x953   : > { %v7403_v63 = vadd.f32 %v7371_v12, %v7318_v52  ;;  %v6982_v26 = vadd.f32 %v6981_v40, %v13919_v61  ;;  %v7323_v8 = vpop.f32.mrf.mxu0 }
 0x955   : > { %7435 = vst.msk [vmem:[%s9341_s23 + $0xa8] sm:$0xff] %vm191_vm0, %v7403_v63  ;;  %v7095_v29 = vadd.f32 %v7094_v14, %v6982_v26 }
 0x957   : > { %v7208_v48 = vadd.f32 %v7207_v24, %v7095_v29  ;;  %v7377_v24 = vld [vmem:[%s9334_s20 + $0xd8] sm:$0xff] }
 0x958   : > { %v7097_v41 = vpop.f32.mrf.mxu2 }
 0x959   : > { %v7321_v43 = vadd.f32 %v7320_v39, %v7208_v48  ;;  %v7210_v13 = vpop.f32.mrf.mxu3  ;;  %v13924_v39 = vld [vmem:[#allocation9_spill] sm:$0xff] }
 0x95a   : > { %v6984_v5 = vpop.f32.mrf.mxu1 }
 0x95b   : > { %v7404_v34 = vadd.f32 %v7372_v55, %v7321_v43  ;;  %v6985_v30 = vadd.f32 %v6984_v5, %v13920_v19  ;;  %v7326_v10 = vpop.f32.mrf.mxu0  ;;  %v7378_v43 = vld [vmem:[%s9334_s20 + $0xe0] sm:$0xff] }
 0x95d   : > { %7436 = vst.msk [vmem:[%s9341_s23 + $0xb0] sm:$0xff] %vm191_vm0, %v7404_v34  ;;  %v7098_v16 = vadd.f32 %v7097_v41, %v6985_v30 }
 0x95f   : > { %v7211_v42 = vadd.f32 %v7210_v13, %v7098_v16 }
 0x960   : > { %v7100_v59 = vpop.f32.mrf.mxu2 }
 0x961   : > { %v7324_v7 = vadd.f32 %v7323_v8, %v7211_v42  ;;  %v7213_v54 = vpop.f32.mrf.mxu3  ;;  %v13925_v8 = vld [vmem:[#allocation11_spill] sm:$0xff] }
 0x962   : > { %v6987_v45 = vpop.f32.mrf.mxu1 }
 0x963   : > { %v7405_v11 = vadd.f32 %v7373_v18, %v7324_v7  ;;  %v6988_v38 = vadd.f32 %v6987_v45, %v13921_v28  ;;  %v7329_v44 = vpop.f32.mrf.mxu0  ;;  %v7379_v18 = vld [vmem:[%s9334_s20 + $0xe8] sm:$0xff]  ;;  %v13927_v28 = vld [vmem:[#allocation21_spill] sm:$0xff] }
 0x965   : > { %7437 = vst.msk [vmem:[%s9341_s23 + $0xb8] sm:$0xff] %vm191_vm0, %v7405_v11  ;;  %v7101_v58 = vadd.f32 %v7100_v59, %v6988_v38 }
 0x967   : > { %v7214_v51 = vadd.f32 %v7213_v54, %v7101_v58 }
 0x968   : > { %v7103_v33 = vpop.f32.mrf.mxu2 }
 0x969   : > { %v7327_v9 = vadd.f32 %v7326_v10, %v7214_v51  ;;  %v7216_v31 = vpop.f32.mrf.mxu3  ;;  %v13926_v10 = vld [vmem:[#allocation16_spill] sm:$0xff] }
 0x96a   : > { %v6990_v35 = vpop.f32.mrf.mxu1 }
 0x96b   : > { %v7406_v20 = vadd.f32 %v7374_v17, %v7327_v9  ;;  %v6991_v4 = vadd.f32 %v6990_v35, %v13922_v32  ;;  %v7332_v6 = vpop.f32.mrf.mxu0  ;;  %v7380_v17 = vld [vmem:[%s9334_s20 + $0xf0] sm:$0xff] }
 0x96d   : > { %7438 = vst.msk [vmem:[%s9341_s23 + $0xc0] sm:$0xff] %vm191_vm0, %v7406_v20  ;;  %v7104_v56 = vadd.f32 %v7103_v33, %v6991_v4  ;;  %v13928_v20 = vld [vmem:[#allocation26_spill] sm:$0xff] }
 0x96f   : > { %v7217_v36 = vadd.f32 %v7216_v31, %v7104_v56 }
 0x970   : > { %v7106_v60 = vpop.f32.mrf.mxu2 }
 0x971   : > { %v7330_v47 = vadd.f32 %v7329_v44, %v7217_v36  ;;  %v7219_v49 = vpop.f32.mrf.mxu3 }
 0x972   : > { %v6993_v57 = vpop.f32.mrf.mxu1 }
 0x973   : > { %v7407_v1 = vadd.f32 %v7375_v50, %v7330_v47  ;;  %v6994_v23 = vadd.f32 %v6993_v57, %v13923_v0  ;;  %v7335_v22 = vpop.f32.mrf.mxu0  ;;  %v7381_v50 = vld [vmem:[%s9334_s20 + $0xf8] sm:$0xff] }
 0x975   : > { %7439 = vst.msk [vmem:[%s9341_s23 + $0xc8] sm:$0xff] %vm191_vm0, %v7407_v1  ;;  %v7107_v25 = vadd.f32 %v7106_v60, %v6994_v23 }
 0x977   : > { %v7220_v21 = vadd.f32 %v7219_v49, %v7107_v25 }
 0x978   : > { %v7109_v62 = vpop.f32.mrf.mxu2 }
 0x979   : > { %v7333_v37 = vadd.f32 %v7332_v6, %v7220_v21  ;;  %v7222_v53 = vpop.f32.mrf.mxu3 }
 0x97a   : > { %v6996_v15 = vpop.f32.mrf.mxu1 }
 0x97b   : > { %v7408_v2 = vadd.f32 %v7376_v46, %v7333_v37  ;;  %v6997_v27 = vadd.f32 %v6996_v15, %v13924_v39  ;;  %v7338_v12 = vpop.f32.mrf.mxu0 }
 0x97d   : > { %7440 = vst.msk [vmem:[%s9341_s23 + $0xd0] sm:$0xff] %vm191_vm0, %v7408_v2  ;;  %v7110_v3 = vadd.f32 %v7109_v62, %v6997_v27 }
 0x97f   : > { %v7223_v14 = vadd.f32 %v7222_v53, %v7110_v3 }
 0x980   : > { %v7112_v52 = vpop.f32.mrf.mxu2 }
 0x981   : > { %v7336_v40 = vadd.f32 %v7335_v22, %v7223_v14  ;;  %v7225_v63 = vpop.f32.mrf.mxu3 }
 0x982   : > { %v6999_v61 = vpop.f32.mrf.mxu1 }
 0x983   : > { %v7409_v26 = vadd.f32 %v7377_v24, %v7336_v40  ;;  %v7000_v29 = vadd.f32 %v6999_v61, %v13925_v8  ;;  %v7341_v5 = vpop.f32.mrf.mxu0 }
 0x985   : > { %7441 = vst.msk [vmem:[%s9341_s23 + $0xd8] sm:$0xff] %vm191_vm0, %v7409_v26  ;;  %v7113_v48 = vadd.f32 %v7112_v52, %v7000_v29 }
 0x987   : > { %v7226_v41 = vadd.f32 %v7225_v63, %v7113_v48 }
 0x988   : > { %v7115_v55 = vpop.f32.mrf.mxu2 }
 0x989   : > { %v7339_v13 = vadd.f32 %v7338_v12, %v7226_v41  ;;  %v7228_v19 = vpop.f32.mrf.mxu3 }
 0x98a   : > { %v7002_v34 = vpop.f32.mrf.mxu1 }
 0x98b   : > { %v7410_v30 = vadd.f32 %v7378_v43, %v7339_v13  ;;  %v7003_v16 = vadd.f32 %v7002_v34, %v13926_v10  ;;  %v7344_v58 = vpop.f32.mrf.mxu0 }
 0x98d   : > { %7442 = vst.msk [vmem:[%s9341_s23 + $0xe0] sm:$0xff] %vm191_vm0, %v7410_v30  ;;  %v7116_v42 = vadd.f32 %v7115_v55, %v7003_v16 }
 0x98f   : > { %v7229_v59 = vadd.f32 %v7228_v19, %v7116_v42 }
 0x990   : > { %v7118_v54 = vpop.f32.mrf.mxu2 }
 0x991   : > { %v7342_v7 = vadd.f32 %v7341_v5, %v7229_v59  ;;  %v7231_v44 = vpop.f32.mrf.mxu3 }
 0x992   : > { %v7005_v45 = vpop.f32.mrf.mxu1 }
 0x993   : > { %v7411_v11 = vadd.f32 %v7379_v18, %v7342_v7  ;;  %v7006_v38 = vadd.f32 %v7005_v45, %v13927_v28  ;;  %v7347_v36 = vpop.f32.mrf.mxu0 }
 0x995   : > { %7443 = vst.msk [vmem:[%s9341_s23 + $0xe8] sm:$0xff] %vm191_vm0, %v7411_v11  ;;  %v7119_v51 = vadd.f32 %v7118_v54, %v7006_v38 }
 0x997   : > { %v7232_v33 = vadd.f32 %v7231_v44, %v7119_v51 }
 0x998   : > { %v7121_v4 = vpop.f32.mrf.mxu2 }
 0x999   : > { %v7345_v9 = vadd.f32 %v7344_v58, %v7232_v33  ;;  %v7234_v6 = vpop.f32.mrf.mxu3 }
 0x99a   : > { %v7008_v31 = vpop.f32.mrf.mxu1 }
 0x99b   : > { %v7412_v35 = vadd.f32 %v7380_v17, %v7345_v9  ;;  %v7009_v32 = vadd.f32 %v7008_v31, %v13928_v20 }
 0x99d   : > { %7444 = vst.msk [vmem:[%s9341_s23 + $0xf0] sm:$0xff] %vm191_vm0, %v7412_v35  ;;  %v7122_v56 = vadd.f32 %v7121_v4, %v7009_v32 }
 0x99f   : > { %v7235_v60 = vadd.f32 %v7234_v6, %v7122_v56 }
 0x9a1   : > { %v7348_v47 = vadd.f32 %v7347_v36, %v7235_v60 }
 0x9a3   : > { %v7413_v49 = vadd.f32 %v7381_v50, %v7348_v47 }
 0x9a5   : > { %7445 = vst.msk [vmem:[%s9341_s23 + $0xf8] sm:$0xff] %vm191_vm0, %v7413_v49 }
 0x9a6 PF: > { %s13_s12 = sadd.s32 1, %s9281_s12  }
 0x9a7   : > { %p10_p5 = scmp.ge.s32.totalorder %s13_s12, 4  }
 0x9a9   :  { %12 = sbr.rel (!%p10_p5) target bundleno = 1 (0x1), region = 88 }

</bundles_post_ra>
